<compile_context>
chip_gen: v7x
topology: tpu7x:2x2x1
jax: 0.10.0
libtpu: 0.0.40
codegen_flags: <defaults>
</compile_context>

<pallas_src>
import jax
import jax.numpy as jnp
import numpy as np
from jax.experimental import pallas as pl
from jax.experimental.pallas import tpu as pltpu

C = 2048          # backbone output channels (hard-coded in the PyTorch module)
R = 16            # Mask reduction ratio
CR = C // R       # 128
C_CHUNK = 512     # chunk width over the 2048-channel axis inside the kernels
IN_EPS = 1e-5     # nn.InstanceNorm2d default eps
GEM_EPS = 1e-6
GEM_P = 3.0
NUM_CLASSES = 16
LANE = 128

# Weights / stats have constant index_maps (resident across grid steps);
# request a single VMEM buffer for them to halve their footprint (v7x headroom).
_RESIDENT = {"pipeline_mode": pl.Buffered(1)}


# ------------------------------ in-kernel helpers ----------------------------

def _spatial_mean(y3, bb, hw):
    """Per-sample spatial mean of a (bb*hw, cc) slab -> (bb, cc)."""
    if hw % 8 == 0:
        # tile-aligned: one grouped sublane reduction (XLU), no pool matmul
        return jnp.sum(y3.reshape(bb, hw, y3.shape[-1]), axis=1) * (1.0 / hw)
    # fallback for unaligned hw: per-sample reductions (static unroll)
    parts = [jnp.sum(y3[s * hw:(s + 1) * hw], axis=0, keepdims=True)
             for s in range(bb)]
    return jnp.concatenate(parts, axis=0) * (1.0 / hw)


# ----------------------------- Pallas kernels --------------------------------

def _teacher_head_kernel(x_ref, scale_ref, shift_ref, w1e_ref, b1_ref,
                         w2t_ref, wct_ref, out_ref, g_ref):
    """RGB_Teacher head for bb samples.

    x_ref   : (bb*HW, C) bf16   feature slab (bb samples flattened over HW)
    scale/shift : (1, C) f32    folded InstanceNorm (eval / running stats)
    w1e_ref : (C, CR) bf16      mask squeeze conv with IN scale folded in
    b1_ref  : (1, CR) f32       shift @ w1 (bias after the squeeze matmul)
    w2t_ref : (CR, C) bf16      mask excite conv
    wct_ref : (C, NCP) bf16     classifier, lane-padded to 128
    out_ref : (bb, NCP) f32
    g_ref   : (bb, C) f32       GeM pooled accumulator (scratch)
    """
    bb = out_ref.shape[0]
    rows = x_ref.shape[0]
    hw = rows // bb

    # Squeeze matmul: IN scale folded into w1e, IN shift folded into b1, so the
    # bf16 slab feeds the MXU directly (no full-slab f32 affine pass).
    a = jnp.dot(x_ref[...], w1e_ref[...],
                preferred_element_type=jnp.float32) + b1_ref[...]      # (rows, CR)
    a = jnp.maximum(a, 0.0).astype(jnp.bfloat16)

    # Excite matmul + sigmoid + x_IN*m + GeM cube + spatial pooling, chunked
    # over the C output axis so only ~rows x C_CHUNK f32 temporaries are live.
    # n_chunks is a static Python int, so static ref slices are used.
    for j in range(C // C_CHUNK):
        c0 = j * C_CHUNK
        m_j = jnp.dot(a, w2t_ref[:, c0:c0 + C_CHUNK],
                      preferred_element_type=jnp.float32)              # (rows, CC)
        # sigmoid via EUP exp + approx reciprocal (keeps the VALU slot free)
        m_j = pl.reciprocal(1.0 + jnp.exp(-m_j), approx=True)
        # x_IN recomputed only for this column chunk
        x_j = x_ref[:, c0:c0 + C_CHUNK].astype(jnp.float32)
        xin_j = x_j * scale_ref[:, c0:c0 + C_CHUNK] + shift_ref[:, c0:c0 + C_CHUNK]
        y_j = jnp.maximum(xin_j * m_j, GEM_EPS)                        # gem clamp
        y3_j = y_j * y_j * y_j
        g_ref[:, c0:c0 + C_CHUNK] = _spatial_mean(y3_j, bb, hw)

    g = jnp.exp(jnp.log(g_ref[...]) * (1.0 / GEM_P))     # safe: g >= eps**3 > 0
    out_ref[...] = jnp.dot(g.astype(jnp.bfloat16), wct_ref[...],
                           preferred_element_type=jnp.float32)


def _student_head_kernel(x_ref, wct_ref, out_ref, g_ref):
    """CrossModality_Student head for bb samples: GeM pooling + Linear."""
    bb = out_ref.shape[0]
    rows = x_ref.shape[0]
    hw = rows // bb

    for j in range(C // C_CHUNK):
        c0 = j * C_CHUNK
        x_j = jnp.maximum(x_ref[:, c0:c0 + C_CHUNK].astype(jnp.float32), GEM_EPS)
        x3_j = x_j * x_j * x_j
        g_ref[:, c0:c0 + C_CHUNK] = _spatial_mean(x3_j, bb, hw)

    g = jnp.exp(jnp.log(g_ref[...]) * (1.0 / GEM_P))
    out_ref[...] = jnp.dot(g.astype(jnp.bfloat16), wct_ref[...],
                           preferred_element_type=jnp.float32)


# ------------------------------ Pallas wrappers ------------------------------

def _device_kind():
    try:
        return jax.devices()[0].device_kind.lower()
    except Exception:  # pragma: no cover
        return ""


def _choose_tiling(B, HW):
    """Samples per grid step (bb), padded batch, grid size, rows per step."""
    kind = _device_kind()
    two_tc = any(s in kind for s in ("v7", "7x", "v4", "v5p"))
    # MXU-M target per step: bigger on 1-TC / 128 MiB chips (v5e/v6e),
    # smaller on v7x (64 MiB VMEM, 2 TCs) and when the chip is unknown.
    target_rows = 512 if (not two_tc and kind) else 256
    bb = max(1, min(B, max(1, target_rows // max(HW, 1))))
    if two_tc and B >= 2:
        bb = min(bb, max(1, B // 2))   # keep >= 2 grid steps only on 2-TC chips
    Bp = -(-B // bb) * bb
    G = Bp // bb
    rows = bb * HW
    # bf16 slab tiles need the sublane block (rows) to be a multiple of 16
    # unless the block spans the whole (padded) batch.
    if G > 1 and rows % 16 != 0:
        bb, Bp, G, rows = B, B, 1, B * HW
    return bb, Bp, G, rows, kind


def _compiler_params(rows, weight_bytes, kind):
    est = (2 * rows * C * 2              # double-buffered bf16 feature slab
           + 2 * weight_bytes            # resident weights (conservative x2)
           + rows * CR * 6               # mask activations (f32 + bf16 copy)
           + 8 * rows * C_CHUNK * 4      # per-chunk f32 temporaries (+slack)
           + (4 << 20))                  # outputs, scratch, misc
    kw = dict(dimension_semantics=("parallel",))
    if est > (32 << 20):                 # only override the default when needed
        cap = (96 << 20) if any(s in kind for s in ("v5e", "v5 lite", "v6")) \
            else (56 << 20)              # v7x (64 MiB) / unknown: stay safe
        kw["vmem_limit_bytes"] = int(min(est, cap))
    return pltpu.CompilerParams(**kw)


def _pad_classifier(wct):
    nc = wct.shape[1]
    ncp = -(-nc // LANE) * LANE
    wp = jnp.zeros((C, ncp), jnp.bfloat16).at[:, :nc].set(wct.astype(jnp.bfloat16))
    return wp, nc, ncp


def _pad_batch(feat, Bp):
    B, HW, _ = feat.shape
    if Bp != B:
        feat = jnp.concatenate(
            [feat, jnp.zeros((Bp - B, HW, C), feat.dtype)], axis=0)
    return feat.reshape(Bp * HW, C)      # already bf16; reshape is free


def teacher_head(feat, scale, shift, w1t, w2t, wct):
    """feat: (B, HW, C) bf16 -> logits (B, num_classes) f32."""
    B, HW, _ = feat.shape
    bb, Bp, G, rows, kind = _choose_tiling(B, HW)
    x2d = _pad_batch(feat, Bp)

    # Fold the IN scale into the squeeze conv; the shift becomes a bias.
    w1e = (scale.reshape(C, 1) * w1t).astype(jnp.bfloat16)             # (C, CR)
    b1 = jnp.dot(shift, w1t)                                           # (1, CR) f32
    wct_p, nc, ncp = _pad_classifier(wct)
    weight_bytes = (w1e.size + w2t.size + wct_p.size) * 2 + 3 * C * 4

    out = pl.pallas_call(
        _teacher_head_kernel,
        out_shape=jax.ShapeDtypeStruct((G, bb, ncp), jnp.float32),
        grid_spec=pltpu.PrefetchScalarGridSpec(
            num_scalar_prefetch=0,
            grid=(G,),
            in_specs=[
                pl.BlockSpec((rows, C), lambda g: (g, 0)),                # bf16 slab
                pl.BlockSpec((1, C), lambda g: (0, 0), **_RESIDENT),      # IN scale
                pl.BlockSpec((1, C), lambda g: (0, 0), **_RESIDENT),      # IN shift
                pl.BlockSpec((C, CR), lambda g: (0, 0), **_RESIDENT),     # folded conv1
                pl.BlockSpec((1, CR), lambda g: (0, 0), **_RESIDENT),     # folded bias
                pl.BlockSpec((CR, C), lambda g: (0, 0), **_RESIDENT),     # conv2
                pl.BlockSpec((C, ncp), lambda g: (0, 0), **_RESIDENT),    # classifier
            ],
            out_specs=pl.BlockSpec((None, bb, ncp), lambda g: (g, 0, 0)),
            scratch_shapes=[pltpu.VMEM((bb, C), jnp.float32)],
        ),
        compiler_params=_compiler_params(rows, weight_bytes, kind),
    )(x2d, scale, shift, w1e, b1, w2t.astype(jnp.bfloat16), wct_p)
    return out.reshape(Bp, ncp)[:B, :nc]


def student_head(feat, wct):
    """feat: (B, HW, C) bf16 -> logits (B, num_classes) f32."""
    B, HW, _ = feat.shape
    bb, Bp, G, rows, kind = _choose_tiling(B, HW)
    x2d = _pad_batch(feat, Bp)
    wct_p, nc, ncp = _pad_classifier(wct)

    out = pl.pallas_call(
        _student_head_kernel,
        out_shape=jax.ShapeDtypeStruct((G, bb, ncp), jnp.float32),
        grid_spec=pltpu.PrefetchScalarGridSpec(
            num_scalar_prefetch=0,
            grid=(G,),
            in_specs=[
                pl.BlockSpec((rows, C), lambda g: (g, 0)),
                pl.BlockSpec((C, ncp), lambda g: (0, 0), **_RESIDENT),
            ],
            out_specs=pl.BlockSpec((None, bb, ncp), lambda g: (g, 0, 0)),
            scratch_shapes=[pltpu.VMEM((bb, C), jnp.float32)],
        ),
        compiler_params=_compiler_params(rows, wct_p.size * 2, kind),
    )(x2d, wct_p)
    return out.reshape(Bp, ncp)[:B, :nc]


# ------------------------------- glue (plain JAX) ----------------------------

def stub_backbone(x_nchw, w_proj):
    # TODO(synk): the real module uses pretrained resnet50 / resnet50_ibn_a
    # backbones (external code + checkpoints, not reproducible here).  Stand-in:
    # 4x4 spatial average pool (for the /32 strided stack) + 1x1 conv 3->2048
    # + ReLU, emitted channel-last and DIRECTLY in bf16 so the feature slab is
    # written to HBM exactly once in the dtype the Pallas kernels consume.
    B, Cin, H, W = x_nchw.shape
    x = x_nchw.reshape(B, Cin, 4, H // 4, 4, W // 4).mean(axis=(3, 5))   # (B,Cin,4,4)
    x = jnp.transpose(x, (0, 2, 3, 1)).reshape(B, 16, Cin)               # (B,HW,Cin)
    feat = jnp.maximum(jnp.einsum('bpc,cd->bpd', x, w_proj), 0.0)
    return feat.astype(jnp.bfloat16)                                     # (B,HW,C)


@jax.jit
def net_forward_eval(total_input, rgb_input, ir_input, params):
    """Net.forward eval path with rgb_test=True:
       returns (logit_student, logit_rgb_query, logit_rgb_gallery)."""
    # CrossModality_Student: backbone -> GeM -> Linear(2048, num_classes)
    feat_s = stub_backbone(total_input, params['student_proj'])
    logit_student = student_head(feat_s, params['student_wct'])

    # RGB_Teacher on query (rgb_input) and gallery (ir_input): concatenate the
    # *small* NCHW inputs (never the (B,HW,2048) feature slab) so one backbone
    # call + ONE fused pallas_call cover both with no extra HBM slab pass.
    feat_qg = stub_backbone(jnp.concatenate([rgb_input, ir_input], axis=0),
                            params['rgb_proj'])

    # Fold InstanceNorm (eval / running stats) into one scale/shift pair.
    # TODO(synk): assumes track_running_stats=True; PyTorch's InstanceNorm2d
    # default recomputes per-instance spatial stats even at eval.
    scale = params['rgb_gamma'] * jax.lax.rsqrt(params['rgb_rv'] + IN_EPS)
    shift = params['rgb_beta'] - params['rgb_rm'] * scale

    logits_qg = teacher_head(feat_qg, scale, shift,
                             params['rgb_w1t'], params['rgb_w2t'],
                             params['rgb_wct'])
    B = rgb_input.shape[0]
    return logit_student, logits_qg[:B], logits_qg[B:]


# ----------------------------- pure-JAX reference ----------------------------
# Mirrors the kernel's mixed-precision recipe (bf16 MXU operands, f32 accum,
# f32 elementwise, folded IN affine) so the assertion is tight; the pure-f32
# PyTorch math differs only by the documented bf16 rounding of matmul operands.

def _ref_teacher_head(feat_bf16, rm, rv, gamma, beta, w1t, w2t, wct):
    scale = gamma * jax.lax.rsqrt(rv + IN_EPS)
    shift = beta - rm * scale
    w1e = (scale.reshape(C, 1) * w1t).astype(jnp.bfloat16)
    b1 = jnp.dot(shift, w1t)
    a = jnp.einsum('bpc,cr->bpr', feat_bf16, w1e,
                   preferred_element_type=jnp.float32) + b1
    a = jnp.maximum(a, 0.0).astype(jnp.bfloat16)
    m = jnp.einsum('bpr,rc->bpc', a, w2t.astype(jnp.bfloat16),
                   preferred_element_type=jnp.float32)
    m = jax.nn.sigmoid(m)
    x_in = feat_bf16.astype(jnp.float32) * scale + shift
    y = jnp.maximum(x_in * m, GEM_EPS)
    g = jnp.mean(y * y * y, axis=1)
    g = jnp.exp(jnp.log(g) * (1.0 / GEM_P))
    return jnp.dot(g.astype(jnp.bfloat16), wct.astype(jnp.bfloat16),
                   preferred_element_type=jnp.float32)


def _ref_student_head(feat_bf16, wct):
    x = jnp.maximum(feat_bf16.astype(jnp.float32), GEM_EPS)
    g = jnp.mean(x * x * x, axis=1)
    g = jnp.exp(jnp.log(g) * (1.0 / GEM_P))
    return jnp.dot(g.astype(jnp.bfloat16), wct.astype(jnp.bfloat16),
                   preferred_element_type=jnp.float32)


# ------------------------------------ main -----------------------------------

if __name__ == "__main__":
    key = jax.random.PRNGKey(0)
    ks = jax.random.split(key, 13)

    B, Cin, H, W = 2, 3, 16, 16
    total_input = jax.random.normal(ks[0], (B, Cin, H, W), jnp.float32)
    rgb_input = jax.random.normal(ks[1], (B, Cin, H, W), jnp.float32)
    ir_input = jax.random.normal(ks[2], (B, Cin, H, W), jnp.float32)

    params = {
        # stub backbones (1x1 projection weights, channel-last: (Cin, C))
        'student_proj': 0.05 * jax.random.normal(ks[3], (Cin, C), jnp.float32),
        'rgb_proj':     0.05 * jax.random.normal(ks[4], (Cin, C), jnp.float32),
        # CrossModality_Student.classifier: Linear(2048, num_classes, bias=False), transposed
        'student_wct':  0.02 * jax.random.normal(ks[5], (C, NUM_CLASSES), jnp.float32),
        # RGB_Teacher.IN (InstanceNorm2d(2048), eval -> running stats + affine)
        'rgb_rm':    0.01 * jax.random.normal(ks[6], (1, C), jnp.float32),
        'rgb_rv':    1.0 + 0.1 * jnp.abs(jax.random.normal(ks[7], (1, C), jnp.float32)),
        'rgb_gamma': 1.0 + 0.01 * jax.random.normal(ks[8], (1, C), jnp.float32),
        'rgb_beta':  0.01 * jax.random.normal(ks[9], (1, C), jnp.float32),
        # RGB_Teacher.mask: Conv2d(2048,128,1,bias=False) and Conv2d(128,2048,1,bias=False),
        # stored transposed for channel-last matmul.
        'rgb_w1t':   0.02 * jax.random.normal(ks[10], (C, CR), jnp.float32),
        'rgb_w2t':   0.02 * jax.random.normal(ks[11], (CR, C), jnp.float32),
        # RGB_Teacher.classifier: Linear(2048, num_classes, bias=False), transposed
        'rgb_wct':   0.02 * jax.random.normal(ks[12], (C, NUM_CLASSES), jnp.float32),
    }

    logit_student, logit_q, logit_g = jax.block_until_ready(
        net_forward_eval(total_input, rgb_input, ir_input, params))

    # correctness check vs pure-JAX reference (same mixed-precision recipe)
    feat_s = stub_backbone(total_input, params['student_proj'])
    feat_q = stub_backbone(rgb_input, params['rgb_proj'])
    feat_g = stub_backbone(ir_input, params['rgb_proj'])
    ref_s = _ref_student_head(feat_s, params['student_wct'])
    ref_q = _ref_teacher_head(feat_q, params['rgb_rm'], params['rgb_rv'],
                              params['rgb_gamma'], params['rgb_beta'],
                              params['rgb_w1t'], params['rgb_w2t'], params['rgb_wct'])
    ref_g = _ref_teacher_head(feat_g, params['rgb_rm'], params['rgb_rv'],
                              params['rgb_gamma'], params['rgb_beta'],
                              params['rgb_w1t'], params['rgb_w2t'], params['rgb_wct'])

    np.testing.assert_allclose(np.asarray(logit_student), np.asarray(ref_s),
                               rtol=2e-2, atol=5e-3)
    np.testing.assert_allclose(np.asarray(logit_q), np.asarray(ref_q),
                               rtol=2e-2, atol=5e-3)
    np.testing.assert_allclose(np.asarray(logit_g), np.asarray(ref_g),
                               rtol=2e-2, atol=5e-3)

    assert logit_student.shape == (B, NUM_CLASSES)
    assert logit_q.shape == (B, NUM_CLASSES)
    assert logit_g.shape == (B, NUM_CLASSES)
    print("KERNEL_OK")
</pallas_src>

<mosaic_0001>
module attributes {stable_mosaic.version = 11 : i64} {
  func.func @_student_head_kernel(%arg0: i32, %arg1: memref<32x2048xbf16, #tpu.memory_space<vmem>>, %arg2: memref<2048x128xbf16, #tpu.memory_space<vmem>>, %arg3: memref<1x2x128xf32, #tpu.memory_space<vmem>>, %arg4: memref<2x2048xf32, #tpu.memory_space<vmem>>) attributes {dimension_semantics = [#tpu.dimension_semantics<parallel>], iteration_bounds = array<i64: 1>, scalar_prefetch = 0 : i64, scratch_operands = 1 : i64, tpu.core_type = #tpu.core_type<tc>, window_params = [{transform_indices = @transform_0, window_bounds = array<i64: 32, 2048>}, {pipeline_mode = #tpu.pipeline_mode<synchronous>, transform_indices = @transform_1, window_bounds = array<i64: 2048, 128>}, {transform_indices = @transform_2, window_bounds = array<i64: 1, 2, 128>}]} {
    %c0 = arith.constant 0 : index
    %c0_0 = arith.constant 0 : index
    %0 = vector.load %arg1[%c0, %c0_0] : memref<32x2048xbf16, #tpu.memory_space<vmem>>, vector<32x512xbf16>
    %1 = arith.extf %0 : vector<32x512xbf16> to vector<32x512xf32>
    %cst = arith.constant 9.99999997E-7 : f32
    %2 = vector.broadcast %cst : f32 to vector<32x512xf32>
    %3 = arith.maximumf %1, %2 : vector<32x512xf32>
    %4 = arith.mulf %3, %3 : vector<32x512xf32>
    %5 = arith.mulf %4, %3 : vector<32x512xf32>
    %6 = vector.shape_cast %5 : vector<32x512xf32> to vector<2x16x512xf32>
    %cst_1 = arith.constant dense<0.000000e+00> : vector<2x512xf32>
    %7 = vector.multi_reduction <add>, %6, %cst_1 [1] : vector<2x16x512xf32> to vector<2x512xf32>
    %cst_2 = arith.constant 6.250000e-02 : f32
    %8 = vector.broadcast %cst_2 : f32 to vector<2x512xf32>
    %9 = arith.mulf %7, %8 : vector<2x512xf32>
    %c0_3 = arith.constant 0 : index
    %c0_4 = arith.constant 0 : index
    %10 = vector.load %arg4[%c0_3, %c0_4] : memref<2x2048xf32, #tpu.memory_space<vmem>>, vector<2x512xf32>
    tpu.vector_store %arg4[%c0_3, %c0_4], %9 {strides = array<i32>} : memref<2x2048xf32, #tpu.memory_space<vmem>>, vector<2x512xf32>,
    %c0_5 = arith.constant 0 : index
    %c512 = arith.constant 512 : index
    %11 = vector.load %arg1[%c0_5, %c512] : memref<32x2048xbf16, #tpu.memory_space<vmem>>, vector<32x512xbf16>
    %12 = arith.extf %11 : vector<32x512xbf16> to vector<32x512xf32>
    %cst_6 = arith.constant 9.99999997E-7 : f32
    %13 = vector.broadcast %cst_6 : f32 to vector<32x512xf32>
    %14 = arith.maximumf %12, %13 : vector<32x512xf32>
    %15 = arith.mulf %14, %14 : vector<32x512xf32>
    %16 = arith.mulf %15, %14 : vector<32x512xf32>
    %17 = vector.shape_cast %16 : vector<32x512xf32> to vector<2x16x512xf32>
    %cst_7 = arith.constant dense<0.000000e+00> : vector<2x512xf32>
    %18 = vector.multi_reduction <add>, %17, %cst_7 [1] : vector<2x16x512xf32> to vector<2x512xf32>
    %cst_8 = arith.constant 6.250000e-02 : f32
    %19 = vector.broadcast %cst_8 : f32 to vector<2x512xf32>
    %20 = arith.mulf %18, %19 : vector<2x512xf32>
    %c0_9 = arith.constant 0 : index
    %c512_10 = arith.constant 512 : index
    %21 = vector.load %arg4[%c0_9, %c512_10] : memref<2x2048xf32, #tpu.memory_space<vmem>>, vector<2x512xf32>
    tpu.vector_store %arg4[%c0_9, %c512_10], %20 {strides = array<i32>} : memref<2x2048xf32, #tpu.memory_space<vmem>>, vector<2x512xf32>,
    %c0_11 = arith.constant 0 : index
    %c1024 = arith.constant 1024 : index
    %22 = vector.load %arg1[%c0_11, %c1024] : memref<32x2048xbf16, #tpu.memory_space<vmem>>, vector<32x512xbf16>
    %23 = arith.extf %22 : vector<32x512xbf16> to vector<32x512xf32>
    %cst_12 = arith.constant 9.99999997E-7 : f32
    %24 = vector.broadcast %cst_12 : f32 to vector<32x512xf32>
    %25 = arith.maximumf %23, %24 : vector<32x512xf32>
    %26 = arith.mulf %25, %25 : vector<32x512xf32>
    %27 = arith.mulf %26, %25 : vector<32x512xf32>
    %28 = vector.shape_cast %27 : vector<32x512xf32> to vector<2x16x512xf32>
    %cst_13 = arith.constant dense<0.000000e+00> : vector<2x512xf32>
    %29 = vector.multi_reduction <add>, %28, %cst_13 [1] : vector<2x16x512xf32> to vector<2x512xf32>
    %cst_14 = arith.constant 6.250000e-02 : f32
    %30 = vector.broadcast %cst_14 : f32 to vector<2x512xf32>
    %31 = arith.mulf %29, %30 : vector<2x512xf32>
    %c0_15 = arith.constant 0 : index
    %c1024_16 = arith.constant 1024 : index
    %32 = vector.load %arg4[%c0_15, %c1024_16] : memref<2x2048xf32, #tpu.memory_space<vmem>>, vector<2x512xf32>
    tpu.vector_store %arg4[%c0_15, %c1024_16], %31 {strides = array<i32>} : memref<2x2048xf32, #tpu.memory_space<vmem>>, vector<2x512xf32>,
    %c0_17 = arith.constant 0 : index
    %c1536 = arith.constant 1536 : index
    %33 = vector.load %arg1[%c0_17, %c1536] : memref<32x2048xbf16, #tpu.memory_space<vmem>>, vector<32x512xbf16>
    %34 = arith.extf %33 : vector<32x512xbf16> to vector<32x512xf32>
    %cst_18 = arith.constant 9.99999997E-7 : f32
    %35 = vector.broadcast %cst_18 : f32 to vector<32x512xf32>
    %36 = arith.maximumf %34, %35 : vector<32x512xf32>
    %37 = arith.mulf %36, %36 : vector<32x512xf32>
    %38 = arith.mulf %37, %36 : vector<32x512xf32>
    %39 = vector.shape_cast %38 : vector<32x512xf32> to vector<2x16x512xf32>
    %cst_19 = arith.constant dense<0.000000e+00> : vector<2x512xf32>
    %40 = vector.multi_reduction <add>, %39, %cst_19 [1] : vector<2x16x512xf32> to vector<2x512xf32>
    %cst_20 = arith.constant 6.250000e-02 : f32
    %41 = vector.broadcast %cst_20 : f32 to vector<2x512xf32>
    %42 = arith.mulf %40, %41 : vector<2x512xf32>
    %c0_21 = arith.constant 0 : index
    %c1536_22 = arith.constant 1536 : index
    %43 = vector.load %arg4[%c0_21, %c1536_22] : memref<2x2048xf32, #tpu.memory_space<vmem>>, vector<2x512xf32>
    tpu.vector_store %arg4[%c0_21, %c1536_22], %42 {strides = array<i32>} : memref<2x2048xf32, #tpu.memory_space<vmem>>, vector<2x512xf32>,
    %c0_23 = arith.constant 0 : index
    %c0_24 = arith.constant 0 : index
    %44 = vector.load %arg4[%c0_23, %c0_24] : memref<2x2048xf32, #tpu.memory_space<vmem>>, vector<2x2048xf32>
    %45 = math.log %44 : vector<2x2048xf32>
    %cst_25 = arith.constant 0.333333343 : f32
    %46 = vector.broadcast %cst_25 : f32 to vector<2x2048xf32>
    %47 = arith.mulf %45, %46 : vector<2x2048xf32>
    %48 = math.exp %47 : vector<2x2048xf32>
    %49 = arith.truncf %48 : vector<2x2048xf32> to vector<2x2048xbf16>
    %c0_26 = arith.constant 0 : index
    %c0_27 = arith.constant 0 : index
    %50 = vector.load %arg2[%c0_26, %c0_27] : memref<2048x128xbf16, #tpu.memory_space<vmem>>, vector<2048x128xbf16>
    %cst_28 = arith.constant dense<0.000000e+00> : vector<2x128xf32>
    %51 = tpu.matmul %49, %50, %cst_28 {dimension_numbers = #tpu.dot_dimension_numbers<[1], [0], [0], [1], [0, 0, 1, 1], [], []>} : vector<2x2048xbf16>, vector<2048x128xbf16>, vector<2x128xf32> -> vector<2x128xf32>
    %c0_29 = arith.constant 0 : index
    %c0_30 = arith.constant 0 : index
    %c0_31 = arith.constant 0 : index
    %52 = vector.load %arg3[%c0_29, %c0_30, %c0_31] : memref<1x2x128xf32, #tpu.memory_space<vmem>>, vector<1x2x128xf32>
    %53 = vector.shape_cast %52 : vector<1x2x128xf32> to vector<2x128xf32>
    %54 = vector.shape_cast %51 : vector<2x128xf32> to vector<1x2x128xf32>
    tpu.vector_store %arg3[%c0_29, %c0_30, %c0_31], %54 {strides = array<i32>} : memref<1x2x128xf32, #tpu.memory_space<vmem>>, vector<1x2x128xf32>,
    return
  }
  func.func @transform_0(%arg0: i32) -> (i32, i32) {
    %c0_i32 = arith.constant 0 : i32
    %c0_i32_0 = arith.constant 0 : i32
    return %arg0, %c0_i32 : i32, i32
  }
  func.func @transform_1(%arg0: i32) -> (i32, i32) {
    %c0_i32 = arith.constant 0 : i32
    %c0_i32_0 = arith.constant 0 : i32
    %c0_i32_1 = arith.constant 0 : i32
    return %c0_i32, %c0_i32_0 : i32, i32
  }
  func.func @transform_2(%arg0: i32) -> (i32, i32, i32) {
    %c0_i32 = arith.constant 0 : i32
    %c0_i32_0 = arith.constant 0 : i32
    %c0_i32_1 = arith.constant 0 : i32
    return %arg0, %c0_i32, %c0_i32_0 : i32, i32, i32
  }
}

module attributes {stable_mosaic.version = 11 : i64} {
  func.func @_teacher_head_kernel(%arg0: i32, %arg1: memref<64x2048xbf16, #tpu.memory_space<vmem>>, %arg2: memref<1x2048xf32, #tpu.memory_space<vmem>>, %arg3: memref<1x2048xf32, #tpu.memory_space<vmem>>, %arg4: memref<2048x128xbf16, #tpu.memory_space<vmem>>, %arg5: memref<1x128xf32, #tpu.memory_space<vmem>>, %arg6: memref<128x2048xbf16, #tpu.memory_space<vmem>>, %arg7: memref<2048x128xbf16, #tpu.memory_space<vmem>>, %arg8: memref<1x4x128xf32, #tpu.memory_space<vmem>>, %arg9: memref<4x2048xf32, #tpu.memory_space<vmem>>) attributes {dimension_semantics = [#tpu.dimension_semantics<parallel>], iteration_bounds = array<i64: 1>, scalar_prefetch = 0 : i64, scratch_operands = 1 : i64, tpu.core_type = #tpu.core_type<tc>, window_params = [{transform_indices = @transform_0, window_bounds = array<i64: 64, 2048>}, {pipeline_mode = #tpu.pipeline_mode<synchronous>, transform_indices = @transform_1, window_bounds = array<i64: 1, 2048>}, {pipeline_mode = #tpu.pipeline_mode<synchronous>, transform_indices = @transform_2, window_bounds = array<i64: 1, 2048>}, {pipeline_mode = #tpu.pipeline_mode<synchronous>, transform_indices = @transform_3, window_bounds = array<i64: 2048, 128>}, {pipeline_mode = #tpu.pipeline_mode<synchronous>, transform_indices = @transform_4, window_bounds = array<i64: 1, 128>}, {pipeline_mode = #tpu.pipeline_mode<synchronous>, transform_indices = @transform_5, window_bounds = array<i64: 128, 2048>}, {pipeline_mode = #tpu.pipeline_mode<synchronous>, transform_indices = @transform_6, window_bounds = array<i64: 2048, 128>}, {transform_indices = @transform_7, window_bounds = array<i64: 1, 4, 128>}]} {
    %c0 = arith.constant 0 : index
    %c0_0 = arith.constant 0 : index
    %0 = vector.load %arg1[%c0, %c0_0] : memref<64x2048xbf16, #tpu.memory_space<vmem>>, vector<64x2048xbf16>
    %c0_1 = arith.constant 0 : index
    %c0_2 = arith.constant 0 : index
    %1 = vector.load %arg4[%c0_1, %c0_2] : memref<2048x128xbf16, #tpu.memory_space<vmem>>, vector<2048x128xbf16>
    %cst = arith.constant dense<0.000000e+00> : vector<64x128xf32>
    %2 = tpu.matmul %0, %1, %cst {dimension_numbers = #tpu.dot_dimension_numbers<[1], [0], [0], [1], [0, 0, 1, 1], [], []>} : vector<64x2048xbf16>, vector<2048x128xbf16>, vector<64x128xf32> -> vector<64x128xf32>
    %c0_3 = arith.constant 0 : index
    %c0_4 = arith.constant 0 : index
    %3 = vector.load %arg5[%c0_3, %c0_4] : memref<1x128xf32, #tpu.memory_space<vmem>>, vector<1x128xf32>
    %4 = vector.broadcast %3 : vector<1x128xf32> to vector<64x128xf32>
    %5 = arith.addf %2, %4 : vector<64x128xf32>
    %cst_5 = arith.constant 0.000000e+00 : f32
    %6 = vector.broadcast %cst_5 : f32 to vector<64x128xf32>
    %7 = arith.maximumf %5, %6 : vector<64x128xf32>
    %8 = arith.truncf %7 : vector<64x128xf32> to vector<64x128xbf16>
    %c0_6 = arith.constant 0 : index
    %c0_7 = arith.constant 0 : index
    %9 = vector.load %arg6[%c0_6, %c0_7] : memref<128x2048xbf16, #tpu.memory_space<vmem>>, vector<128x512xbf16>
    %cst_8 = arith.constant dense<0.000000e+00> : vector<64x512xf32>
    %10 = tpu.matmul %8, %9, %cst_8 {dimension_numbers = #tpu.dot_dimension_numbers<[1], [0], [0], [1], [0, 0, 1, 1], [], []>} : vector<64x128xbf16>, vector<128x512xbf16>, vector<64x512xf32> -> vector<64x512xf32>
    %cst_9 = arith.constant 0.000000e+00 : f32
    %11 = vector.broadcast %cst_9 : f32 to vector<64x512xf32>
    %12 = arith.subf %11, %10 : vector<64x512xf32>
    %13 = math.exp %12 : vector<64x512xf32>
    %cst_10 = arith.constant 1.000000e+00 : f32
    %14 = vector.broadcast %cst_10 : f32 to vector<64x512xf32>
    %15 = arith.addf %14, %13 : vector<64x512xf32>
    %16 = tpu.reciprocal %15 {approx = true} : vector<64x512xf32> -> vector<64x512xf32>
    %c0_11 = arith.constant 0 : index
    %c0_12 = arith.constant 0 : index
    %17 = vector.load %arg1[%c0_11, %c0_12] : memref<64x2048xbf16, #tpu.memory_space<vmem>>, vector<64x512xbf16>
    %18 = arith.extf %17 : vector<64x512xbf16> to vector<64x512xf32>
    %c0_13 = arith.constant 0 : index
    %c0_14 = arith.constant 0 : index
    %19 = vector.load %arg2[%c0_13, %c0_14] : memref<1x2048xf32, #tpu.memory_space<vmem>>, vector<1x512xf32>
    %20 = vector.broadcast %19 : vector<1x512xf32> to vector<64x512xf32>
    %21 = arith.mulf %18, %20 : vector<64x512xf32>
    %c0_15 = arith.constant 0 : index
    %c0_16 = arith.constant 0 : index
    %22 = vector.load %arg3[%c0_15, %c0_16] : memref<1x2048xf32, #tpu.memory_space<vmem>>, vector<1x512xf32>
    %23 = vector.broadcast %22 : vector<1x512xf32> to vector<64x512xf32>
    %24 = arith.addf %21, %23 : vector<64x512xf32>
    %25 = arith.mulf %24, %16 : vector<64x512xf32>
    %cst_17 = arith.constant 9.99999997E-7 : f32
    %26 = vector.broadcast %cst_17 : f32 to vector<64x512xf32>
    %27 = arith.maximumf %25, %26 : vector<64x512xf32>
    %28 = arith.mulf %27, %27 : vector<64x512xf32>
    %29 = arith.mulf %28, %27 : vector<64x512xf32>
    %30 = vector.shape_cast %29 : vector<64x512xf32> to vector<4x16x512xf32>
    %cst_18 = arith.constant dense<0.000000e+00> : vector<4x512xf32>
    %31 = vector.multi_reduction <add>, %30, %cst_18 [1] : vector<4x16x512xf32> to vector<4x512xf32>
    %cst_19 = arith.constant 6.250000e-02 : f32
    %32 = vector.broadcast %cst_19 : f32 to vector<4x512xf32>
    %33 = arith.mulf %31, %32 : vector<4x512xf32>
    %c0_20 = arith.constant 0 : index
    %c0_21 = arith.constant 0 : index
    %34 = vector.load %arg9[%c0_20, %c0_21] : memref<4x2048xf32, #tpu.memory_space<vmem>>, vector<4x512xf32>
    tpu.vector_store %arg9[%c0_20, %c0_21], %33 {strides = array<i32>} : memref<4x2048xf32, #tpu.memory_space<vmem>>, vector<4x512xf32>,
    %c0_22 = arith.constant 0 : index
    %c512 = arith.constant 512 : index
    %35 = vector.load %arg6[%c0_22, %c512] : memref<128x2048xbf16, #tpu.memory_space<vmem>>, vector<128x512xbf16>
    %cst_23 = arith.constant dense<0.000000e+00> : vector<64x512xf32>
    %36 = tpu.matmul %8, %35, %cst_23 {dimension_numbers = #tpu.dot_dimension_numbers<[1], [0], [0], [1], [0, 0, 1, 1], [], []>} : vector<64x128xbf16>, vector<128x512xbf16>, vector<64x512xf32> -> vector<64x512xf32>
    %cst_24 = arith.constant 0.000000e+00 : f32
    %37 = vector.broadcast %cst_24 : f32 to vector<64x512xf32>
    %38 = arith.subf %37, %36 : vector<64x512xf32>
    %39 = math.exp %38 : vector<64x512xf32>
    %cst_25 = arith.constant 1.000000e+00 : f32
    %40 = vector.broadcast %cst_25 : f32 to vector<64x512xf32>
    %41 = arith.addf %40, %39 : vector<64x512xf32>
    %42 = tpu.reciprocal %41 {approx = true} : vector<64x512xf32> -> vector<64x512xf32>
    %c0_26 = arith.constant 0 : index
    %c512_27 = arith.constant 512 : index
    %43 = vector.load %arg1[%c0_26, %c512_27] : memref<64x2048xbf16, #tpu.memory_space<vmem>>, vector<64x512xbf16>
    %44 = arith.extf %43 : vector<64x512xbf16> to vector<64x512xf32>
    %c0_28 = arith.constant 0 : index
    %c512_29 = arith.constant 512 : index
    %45 = vector.load %arg2[%c0_28, %c512_29] : memref<1x2048xf32, #tpu.memory_space<vmem>>, vector<1x512xf32>
    %46 = vector.broadcast %45 : vector<1x512xf32> to vector<64x512xf32>
    %47 = arith.mulf %44, %46 : vector<64x512xf32>
    %c0_30 = arith.constant 0 : index
    %c512_31 = arith.constant 512 : index
    %48 = vector.load %arg3[%c0_30, %c512_31] : memref<1x2048xf32, #tpu.memory_space<vmem>>, vector<1x512xf32>
    %49 = vector.broadcast %48 : vector<1x512xf32> to vector<64x512xf32>
    %50 = arith.addf %47, %49 : vector<64x512xf32>
    %51 = arith.mulf %50, %42 : vector<64x512xf32>
    %cst_32 = arith.constant 9.99999997E-7 : f32
    %52 = vector.broadcast %cst_32 : f32 to vector<64x512xf32>
    %53 = arith.maximumf %51, %52 : vector<64x512xf32>
    %54 = arith.mulf %53, %53 : vector<64x512xf32>
    %55 = arith.mulf %54, %53 : vector<64x512xf32>
    %56 = vector.shape_cast %55 : vector<64x512xf32> to vector<4x16x512xf32>
    %cst_33 = arith.constant dense<0.000000e+00> : vector<4x512xf32>
    %57 = vector.multi_reduction <add>, %56, %cst_33 [1] : vector<4x16x512xf32> to vector<4x512xf32>
    %cst_34 = arith.constant 6.250000e-02 : f32
    %58 = vector.broadcast %cst_34 : f32 to vector<4x512xf32>
    %59 = arith.mulf %57, %58 : vector<4x512xf32>
    %c0_35 = arith.constant 0 : index
    %c512_36 = arith.constant 512 : index
    %60 = vector.load %arg9[%c0_35, %c512_36] : memref<4x2048xf32, #tpu.memory_space<vmem>>, vector<4x512xf32>
    tpu.vector_store %arg9[%c0_35, %c512_36], %59 {strides = array<i32>} : memref<4x2048xf32, #tpu.memory_space<vmem>>, vector<4x512xf32>,
    %c0_37 = arith.constant 0 : index
    %c1024 = arith.constant 1024 : index
    %61 = vector.load %arg6[%c0_37, %c1024] : memref<128x2048xbf16, #tpu.memory_space<vmem>>, vector<128x512xbf16>
    %cst_38 = arith.constant dense<0.000000e+00> : vector<64x512xf32>
    %62 = tpu.matmul %8, %61, %cst_38 {dimension_numbers = #tpu.dot_dimension_numbers<[1], [0], [0], [1], [0, 0, 1, 1], [], []>} : vector<64x128xbf16>, vector<128x512xbf16>, vector<64x512xf32> -> vector<64x512xf32>
    %cst_39 = arith.constant 0.000000e+00 : f32
    %63 = vector.broadcast %cst_39 : f32 to vector<64x512xf32>
    %64 = arith.subf %63, %62 : vector<64x512xf32>
    %65 = math.exp %64 : vector<64x512xf32>
    %cst_40 = arith.constant 1.000000e+00 : f32
    %66 = vector.broadcast %cst_40 : f32 to vector<64x512xf32>
    %67 = arith.addf %66, %65 : vector<64x512xf32>
    %68 = tpu.reciprocal %67 {approx = true} : vector<64x512xf32> -> vector<64x512xf32>
    %c0_41 = arith.constant 0 : index
    %c1024_42 = arith.constant 1024 : index
    %69 = vector.load %arg1[%c0_41, %c1024_42] : memref<64x2048xbf16, #tpu.memory_space<vmem>>, vector<64x512xbf16>
    %70 = arith.extf %69 : vector<64x512xbf16> to vector<64x512xf32>
    %c0_43 = arith.constant 0 : index
    %c1024_44 = arith.constant 1024 : index
    %71 = vector.load %arg2[%c0_43, %c1024_44] : memref<1x2048xf32, #tpu.memory_space<vmem>>, vector<1x512xf32>
    %72 = vector.broadcast %71 : vector<1x512xf32> to vector<64x512xf32>
    %73 = arith.mulf %70, %72 : vector<64x512xf32>
    %c0_45 = arith.constant 0 : index
    %c1024_46 = arith.constant 1024 : index
    %74 = vector.load %arg3[%c0_45, %c1024_46] : memref<1x2048xf32, #tpu.memory_space<vmem>>, vector<1x512xf32>
    %75 = vector.broadcast %74 : vector<1x512xf32> to vector<64x512xf32>
    %76 = arith.addf %73, %75 : vector<64x512xf32>
    %77 = arith.mulf %76, %68 : vector<64x512xf32>
    %cst_47 = arith.constant 9.99999997E-7 : f32
    %78 = vector.broadcast %cst_47 : f32 to vector<64x512xf32>
    %79 = arith.maximumf %77, %78 : vector<64x512xf32>
    %80 = arith.mulf %79, %79 : vector<64x512xf32>
    %81 = arith.mulf %80, %79 : vector<64x512xf32>
    %82 = vector.shape_cast %81 : vector<64x512xf32> to vector<4x16x512xf32>
    %cst_48 = arith.constant dense<0.000000e+00> : vector<4x512xf32>
    %83 = vector.multi_reduction <add>, %82, %cst_48 [1] : vector<4x16x512xf32> to vector<4x512xf32>
    %cst_49 = arith.constant 6.250000e-02 : f32
    %84 = vector.broadcast %cst_49 : f32 to vector<4x512xf32>
    %85 = arith.mulf %83, %84 : vector<4x512xf32>
    %c0_50 = arith.constant 0 : index
    %c1024_51 = arith.constant 1024 : index
    %86 = vector.load %arg9[%c0_50, %c1024_51] : memref<4x2048xf32, #tpu.memory_space<vmem>>, vector<4x512xf32>
    tpu.vector_store %arg9[%c0_50, %c1024_51], %85 {strides = array<i32>} : memref<4x2048xf32, #tpu.memory_space<vmem>>, vector<4x512xf32>,
    %c0_52 = arith.constant 0 : index
    %c1536 = arith.constant 1536 : index
    %87 = vector.load %arg6[%c0_52, %c1536] : memref<128x2048xbf16, #tpu.memory_space<vmem>>, vector<128x512xbf16>
    %cst_53 = arith.constant dense<0.000000e+00> : vector<64x512xf32>
    %88 = tpu.matmul %8, %87, %cst_53 {dimension_numbers = #tpu.dot_dimension_numbers<[1], [0], [0], [1], [0, 0, 1, 1], [], []>} : vector<64x128xbf16>, vector<128x512xbf16>, vector<64x512xf32> -> vector<64x512xf32>
    %cst_54 = arith.constant 0.000000e+00 : f32
    %89 = vector.broadcast %cst_54 : f32 to vector<64x512xf32>
    %90 = arith.subf %89, %88 : vector<64x512xf32>
    %91 = math.exp %90 : vector<64x512xf32>
    %cst_55 = arith.constant 1.000000e+00 : f32
    %92 = vector.broadcast %cst_55 : f32 to vector<64x512xf32>
    %93 = arith.addf %92, %91 : vector<64x512xf32>
    %94 = tpu.reciprocal %93 {approx = true} : vector<64x512xf32> -> vector<64x512xf32>
    %c0_56 = arith.constant 0 : index
    %c1536_57 = arith.constant 1536 : index
    %95 = vector.load %arg1[%c0_56, %c1536_57] : memref<64x2048xbf16, #tpu.memory_space<vmem>>, vector<64x512xbf16>
    %96 = arith.extf %95 : vector<64x512xbf16> to vector<64x512xf32>
    %c0_58 = arith.constant 0 : index
    %c1536_59 = arith.constant 1536 : index
    %97 = vector.load %arg2[%c0_58, %c1536_59] : memref<1x2048xf32, #tpu.memory_space<vmem>>, vector<1x512xf32>
    %98 = vector.broadcast %97 : vector<1x512xf32> to vector<64x512xf32>
    %99 = arith.mulf %96, %98 : vector<64x512xf32>
    %c0_60 = arith.constant 0 : index
    %c1536_61 = arith.constant 1536 : index
    %100 = vector.load %arg3[%c0_60, %c1536_61] : memref<1x2048xf32, #tpu.memory_space<vmem>>, vector<1x512xf32>
    %101 = vector.broadcast %100 : vector<1x512xf32> to vector<64x512xf32>
    %102 = arith.addf %99, %101 : vector<64x512xf32>
    %103 = arith.mulf %102, %94 : vector<64x512xf32>
    %cst_62 = arith.constant 9.99999997E-7 : f32
    %104 = vector.broadcast %cst_62 : f32 to vector<64x512xf32>
    %105 = arith.maximumf %103, %104 : vector<64x512xf32>
    %106 = arith.mulf %105, %105 : vector<64x512xf32>
    %107 = arith.mulf %106, %105 : vector<64x512xf32>
    %108 = vector.shape_cast %107 : vector<64x512xf32> to vector<4x16x512xf32>
    %cst_63 = arith.constant dense<0.000000e+00> : vector<4x512xf32>
    %109 = vector.multi_reduction <add>, %108, %cst_63 [1] : vector<4x16x512xf32> to vector<4x512xf32>
    %cst_64 = arith.constant 6.250000e-02 : f32
    %110 = vector.broadcast %cst_64 : f32 to vector<4x512xf32>
    %111 = arith.mulf %109, %110 : vector<4x512xf32>
    %c0_65 = arith.constant 0 : index
    %c1536_66 = arith.constant 1536 : index
    %112 = vector.load %arg9[%c0_65, %c1536_66] : memref<4x2048xf32, #tpu.memory_space<vmem>>, vector<4x512xf32>
    tpu.vector_store %arg9[%c0_65, %c1536_66], %111 {strides = array<i32>} : memref<4x2048xf32, #tpu.memory_space<vmem>>, vector<4x512xf32>,
    %c0_67 = arith.constant 0 : index
    %c0_68 = arith.constant 0 : index
    %113 = vector.load %arg9[%c0_67, %c0_68] : memref<4x2048xf32, #tpu.memory_space<vmem>>, vector<4x2048xf32>
    %114 = math.log %113 : vector<4x2048xf32>
    %cst_69 = arith.constant 0.333333343 : f32
    %115 = vector.broadcast %cst_69 : f32 to vector<4x2048xf32>
    %116 = arith.mulf %114, %115 : vector<4x2048xf32>
    %117 = math.exp %116 : vector<4x2048xf32>
    %118 = arith.truncf %117 : vector<4x2048xf32> to vector<4x2048xbf16>
    %c0_70 = arith.constant 0 : index
    %c0_71 = arith.constant 0 : index
    %119 = vector.load %arg7[%c0_70, %c0_71] : memref<2048x128xbf16, #tpu.memory_space<vmem>>, vector<2048x128xbf16>
    %cst_72 = arith.constant dense<0.000000e+00> : vector<4x128xf32>
    %120 = tpu.matmul %118, %119, %cst_72 {dimension_numbers = #tpu.dot_dimension_numbers<[1], [0], [0], [1], [0, 0, 1, 1], [], []>} : vector<4x2048xbf16>, vector<2048x128xbf16>, vector<4x128xf32> -> vector<4x128xf32>
    %c0_73 = arith.constant 0 : index
    %c0_74 = arith.constant 0 : index
    %c0_75 = arith.constant 0 : index
    %121 = vector.load %arg8[%c0_73, %c0_74, %c0_75] : memref<1x4x128xf32, #tpu.memory_space<vmem>>, vector<1x4x128xf32>
    %122 = vector.shape_cast %121 : vector<1x4x128xf32> to vector<4x128xf32>
    %123 = vector.shape_cast %120 : vector<4x128xf32> to vector<1x4x128xf32>
    tpu.vector_store %arg8[%c0_73, %c0_74, %c0_75], %123 {strides = array<i32>} : memref<1x4x128xf32, #tpu.memory_space<vmem>>, vector<1x4x128xf32>,
    return
  }
  func.func @transform_0(%arg0: i32) -> (i32, i32) {
    %c0_i32 = arith.constant 0 : i32
    %c0_i32_0 = arith.constant 0 : i32
    return %arg0, %c0_i32 : i32, i32
  }
  func.func @transform_1(%arg0: i32) -> (i32, i32) {
    %c0_i32 = arith.constant 0 : i32
    %c0_i32_0 = arith.constant 0 : i32
    %c0_i32_1 = arith.constant 0 : i32
    return %c0_i32, %c0_i32_0 : i32, i32
  }
  func.func @transform_2(%arg0: i32) -> (i32, i32) {
    %c0_i32 = arith.constant 0 : i32
    %c0_i32_0 = arith.constant 0 : i32
    %c0_i32_1 = arith.constant 0 : i32
    return %c0_i32, %c0_i32_0 : i32, i32
  }
  func.func @transform_3(%arg0: i32) -> (i32, i32) {
    %c0_i32 = arith.constant 0 : i32
    %c0_i32_0 = arith.constant 0 : i32
    %c0_i32_1 = arith.constant 0 : i32
    return %c0_i32, %c0_i32_0 : i32, i32
  }
  func.func @transform_4(%arg0: i32) -> (i32, i32) {
    %c0_i32 = arith.constant 0 : i32
    %c0_i32_0 = arith.constant 0 : i32
    %c0_i32_1 = arith.constant 0 : i32
    return %c0_i32, %c0_i32_0 : i32, i32
  }
  func.func @transform_5(%arg0: i32) -> (i32, i32) {
    %c0_i32 = arith.constant 0 : i32
    %c0_i32_0 = arith.constant 0 : i32
    %c0_i32_1 = arith.constant 0 : i32
    return %c0_i32, %c0_i32_0 : i32, i32
  }
  func.func @transform_6(%arg0: i32) -> (i32, i32) {
    %c0_i32 = arith.constant 0 : i32
    %c0_i32_0 = arith.constant 0 : i32
    %c0_i32_1 = arith.constant 0 : i32
    return %c0_i32, %c0_i32_0 : i32, i32
  }
  func.func @transform_7(%arg0: i32) -> (i32, i32, i32) {
    %c0_i32 = arith.constant 0 : i32
    %c0_i32_0 = arith.constant 0 : i32
    %c0_i32_1 = arith.constant 0 : i32
    return %arg0, %c0_i32, %c0_i32_0 : i32, i32, i32
  }
}

</mosaic_0001>

<bundles_post_ra>
// kernel: net_forward_eval.2
= control target key start
LH: loop header
LB: loop body
LE: loop exit
PB: predicated region body
PF: predicated region fallthrough
CT: control target
= control target key end

     0   :  { %v162_v29 = vlaneseq  ;;  %vm196_vm0 = vcmask 1041409   ;;  %vm198_vm1 = vcmask 1043459   ;;  %vm200_vm2 = vcmask 1045509   ;;  %s3298_s0 = inlined_call_operand.vmem [shape: bf16[32,2048], index: 0, kind: input, shape index: {}]   ;;  %s3299_s1 = inlined_call_operand.vmem [shape: bf16[2048,128], index: 1, kind: input, shape index: {}]   ;;  %s3300_s2 = inlined_call_operand.hbm [shape: f32[1,2,128], index: 2, kind: output, shape index: {}]  }
   0x1   :  { %v2560_v0 = vld [vmem:[%s3299_s1 + $0x40] sm:$0xff]   ;;  %v2564_v4 = vld [vmem:[%s3299_s1 + $0x48] sm:$0xff]   ;;  %v2568_v8 = vld [vmem:[%s3299_s1 + $0x50] sm:$0xff]   ;;  %vm202_vm3 = vcmask 1047559  }
   0x2   :  { %v2561_v1 = vld [vmem:[%s3299_s1] sm:$0xff]   ;;  %2382 = vmatprep.subr.bf16.mxu0 %v2560_v0  ;;  %v2565_v5 = vld [vmem:[%s3299_s1 + $0x8] sm:$0xff]   ;;  %v2569_v9 = vld [vmem:[%s3299_s1 + $0x10] sm:$0xff]   ;;  %v2850_v36 = vshrl.u32 %v162_v29, 7 }
   0x3   :  { %v2562_v2 = vld [vmem:[%s3299_s1 + $0xc0] sm:$0xff]   ;;  %2383 = vmatpush3.bf16.msra.mxu0 %v2561_v1  ;;  %v2566_v6 = vld [vmem:[%s3299_s1 + $0xc8] sm:$0xff]   ;;  %v2570_v10 = vld [vmem:[%s3299_s1 + $0xd0] sm:$0xff]   ;;  %v2728_v1 = vmov 1983009808  }
   0x4   :  { %v2563_v3 = vld [vmem:[%s3299_s1 + $0x80] sm:$0xff]   ;;  %2404 = vmatprep.subr.bf16.mxu1 %v2562_v2  ;;  %2384 = vmatprep.subr.bf16.mxu0 %v2564_v4  ;;  %v2567_v7 = vld [vmem:[%s3299_s1 + $0x88] sm:$0xff]   ;;  %v2571_v11 = vld [vmem:[%s3299_s1 + $0x90] sm:$0xff]   ;;  %v2870_v2 = vunpack.c.l.s4 %v2728_v1 }
   0x5   :  { %2405 = vmatpush3.bf16.msra.mxu1 %v2563_v3  ;;  %v2572_v12 = vld [vmem:[%s3299_s1 + $0x58] sm:$0xff]   ;;  %v2576_v16 = vld [vmem:[%s3299_s1 + $0x60] sm:$0xff]   ;;  %v2580_v20 = vld [vmem:[%s3299_s1 + $0x68] sm:$0xff]  }
   0x6   :  { %2406 = vmatprep.subr.bf16.mxu1 %v2566_v6  ;;  %v2573_v13 = vld [vmem:[%s3299_s1 + $0x18] sm:$0xff]   ;;  %v2577_v17 = vld [vmem:[%s3299_s1 + $0x20] sm:$0xff]   ;;  %v2581_v21 = vld [vmem:[%s3299_s1 + $0x28] sm:$0xff]  }
   0x7   :  { %2385 = vmatpush3.bf16.msra.mxu0 %v2565_v5  ;;  %v2574_v14 = vld [vmem:[%s3299_s1 + $0xd8] sm:$0xff]   ;;  %v2578_v18 = vld [vmem:[%s3299_s1 + $0xe0] sm:$0xff]   ;;  %v2582_v22 = vld [vmem:[%s3299_s1 + $0xe8] sm:$0xff]  }
   0x8   :  { %2386 = vmatprep.subr.bf16.mxu0 %v2568_v8  ;;  %v2575_v15 = vld [vmem:[%s3299_s1 + $0x98] sm:$0xff]   ;;  %v2579_v19 = vld [vmem:[%s3299_s1 + $0xa0] sm:$0xff]   ;;  %v2583_v23 = vld [vmem:[%s3299_s1 + $0xa8] sm:$0xff]  }
   0x9   :  { %2407 = vmatpush3.bf16.msra.mxu1 %v2567_v7  ;;  %v2584_v24 = vld [vmem:[%s3299_s1 + $0x70] sm:$0xff]   ;;  %v2588_v28 = vld [vmem:[%s3299_s1 + $0x78] sm:$0xff]   ;;  %v13_v33 = vld [vmem:[%s3298_s0] sm:$0xff] }
   0xa   :  { %2408 = vmatprep.subr.bf16.mxu1 %v2570_v10  ;;  %v2585_v25 = vld [vmem:[%s3299_s1 + $0x30] sm:$0xff]   ;;  %v2589_v30 = vld [vmem:[%s3299_s1 + $0x38] sm:$0xff]   ;;  %v14_v34 = vld [vmem:[%s3298_s0 + $0x8] sm:$0xff]  ;;  %v21_v40 = vunpack.c.l.bf16 %v13_v33  ;;  %v22_v41 = vunpack.c.h.bf16 %v13_v33 }
   0xb   :  { %2387 = vmatpush3.bf16.msra.mxu0 %v2569_v9  ;;  %v2586_v26 = vld [vmem:[%s3299_s1 + $0xf0] sm:$0xff]   ;;  %v2590_v31 = vld [vmem:[%s3299_s1 + $0xf8] sm:$0xff]   ;;  %v15_v35 = vld [vmem:[%s3298_s0 + $0x40] sm:$0xff]  ;;  %v23_v42 = vunpack.c.l.bf16 %v14_v34  ;;  %v24_v45 = vunpack.c.h.bf16 %v14_v34 }
   0xc   :  { %2388 = vmatprep.subr.bf16.mxu0 %v2572_v12  ;;  %v2587_v27 = vld [vmem:[%s3299_s1 + $0xb0] sm:$0xff]   ;;  %v2591_v32 = vld [vmem:[%s3299_s1 + $0xb8] sm:$0xff]   ;;  %v16_v37 = vld [vmem:[%s3298_s0 + $0x48] sm:$0xff]  ;;  %v25_v46 = vunpack.c.l.bf16 %v15_v35  ;;  %v26_v47 = vunpack.c.h.bf16 %v15_v35  ;;  %v37_v59 = vmax.f32 %v21_v40, 1e-06 }
   0xd   :  { %2409 = vmatpush3.bf16.msra.mxu1 %v2571_v11  ;;  %v17_v38 = vld [vmem:[%s3298_s0 + $0x80] sm:$0xff]  ;;  %v18_v39 = vld [vmem:[%s3298_s0 + $0x88] sm:$0xff]  ;;  %v27_v48 = vunpack.c.l.bf16 %v16_v37  ;;  %v28_v49 = vunpack.c.h.bf16 %v16_v37  ;;  %v38_v60 = vmax.f32 %v22_v41, 1e-06  ;;  %v39_v61 = vmax.f32 %v23_v42, 1e-06 }
   0xe   :  { %2410 = vmatprep.subr.bf16.mxu1 %v2574_v14  ;;  %v19_v43 = vld [vmem:[%s3298_s0 + $0xc0] sm:$0xff]  ;;  %v20_v44 = vld [vmem:[%s3298_s0 + $0xc8] sm:$0xff]  ;;  %v29_v50 = vunpack.c.l.bf16 %v17_v38  ;;  %v30_v51 = vunpack.c.h.bf16 %v17_v38  ;;  %v31_v52 = vunpack.c.l.bf16 %v18_v39  ;;  %v32_v54 = vunpack.c.h.bf16 %v18_v39 }
   0xf   :  { %2389 = vmatpush3.bf16.msra.mxu0 %v2573_v13  ;;  %v2592_v53 = vld [vmem:[%s3299_s1 + $0x140] sm:$0xff]   ;;  %v33_v55 = vunpack.c.l.bf16 %v19_v43  ;;  %v34_v56 = vunpack.c.h.bf16 %v19_v43  ;;  %v35_v57 = vunpack.c.l.bf16 %v20_v44  ;;  %v36_v58 = vunpack.c.h.bf16 %v20_v44 }
  0x10   :  { %2390 = vmatprep.subr.bf16.mxu0 %v2576_v16  ;;  %v40_v62 = vmax.f32 %v24_v45, 1e-06  ;;  %v41_v63 = vmax.f32 %v25_v46, 1e-06  ;;  %v42_v0 = vmax.f32 %v26_v47, 1e-06  ;;  %v53_v6 = vmul.f32 %v37_v59, %v37_v59 }
  0x11   :  { %2411 = vmatpush3.bf16.msra.mxu1 %v2575_v15  ;;  %v43_v3 = vmax.f32 %v27_v48, 1e-06  ;;  %v44_v4 = vmax.f32 %v28_v49, 1e-06  ;;  %v45_v5 = vmax.f32 %v29_v50, 1e-06  ;;  %v54_v10 = vmul.f32 %v38_v60, %v38_v60 }
  0x12   :  { %2412 = vmatprep.subr.bf16.mxu1 %v2578_v18  ;;  %v46_v7 = vmax.f32 %v30_v51, 1e-06  ;;  %v47_v8 = vmax.f32 %v31_v52, 1e-06  ;;  %v48_v9 = vmax.f32 %v32_v54, 1e-06  ;;  %v55_v14 = vmul.f32 %v39_v61, %v39_v61 }
  0x13   :  { %2391 = vmatpush3.bf16.msra.mxu0 %v2577_v17  ;;  %v49_v11 = vmax.f32 %v33_v55, 1e-06  ;;  %v50_v12 = vmax.f32 %v34_v56, 1e-06  ;;  %v51_v13 = vmax.f32 %v35_v57, 1e-06  ;;  %v56_v16 = vmul.f32 %v40_v62, %v40_v62 }
  0x14   :  { %2392 = vmatprep.subr.bf16.mxu0 %v2580_v20  ;;  %v52_v15 = vmax.f32 %v36_v58, 1e-06  ;;  %v57_v17 = vmul.f32 %v41_v63, %v41_v63  ;;  %v58_v18 = vmul.f32 %v42_v0, %v42_v0  ;;  %v59_v20 = vmul.f32 %v43_v3, %v43_v3 }
  0x15   :  { %2413 = vmatpush3.bf16.msra.mxu1 %v2579_v19  ;;  %v2594_v19 = vld [vmem:[%s3299_s1 + $0x1c0] sm:$0xff]   ;;  %v72_v33 = vmul.f32 %v56_v16, %v40_v62 }
  0x16   :  { %2414 = vmatprep.subr.bf16.mxu1 %v2582_v22  ;;  %v61_v22 = vmul.f32 %v45_v5, %v45_v5  ;;  %v68_v29 = vmul.f32 %v52_v15, %v52_v15  ;;  %v73_v34 = vmul.f32 %v57_v17, %v41_v63  ;;  %v74_v35 = vmul.f32 %v58_v18, %v42_v0 }
  0x17   :  { %2393 = vmatpush3.bf16.msra.mxu0 %v2581_v21  ;;  %v60_v21 = vmul.f32 %v44_v4, %v44_v4  ;;  %v75_v37 = vmul.f32 %v59_v20, %v43_v3 }
  0x18   :  { %2394 = vmatprep.subr.bf16.mxu0 %v2584_v24  ;;  %v63_v24 = vmul.f32 %v47_v8, %v47_v8  ;;  %v77_v39 = vmul.f32 %v61_v22, %v45_v5  ;;  %v84_v46 = vmul.f32 %v68_v29, %v52_v15 }
  0x19   :  { %2415 = vmatpush3.bf16.msra.mxu1 %v2583_v23  ;;  %v62_v23 = vmul.f32 %v46_v7, %v46_v7  ;;  %v76_v38 = vmul.f32 %v60_v21, %v44_v4 }
  0x1a   :  { %2416 = vmatprep.subr.bf16.mxu1 %v2586_v26  ;;  %v65_v26 = vmul.f32 %v49_v11, %v49_v11  ;;  %v79_v41 = vmul.f32 %v63_v24, %v47_v8 }
  0x1b   :  { %2395 = vmatpush3.bf16.msra.mxu0 %v2585_v25  ;;  %v64_v25 = vmul.f32 %v48_v9, %v48_v9  ;;  %v78_v40 = vmul.f32 %v62_v23, %v46_v7  ;;  %v106_v50 = vadd.f32 %v76_v38, %v72_v33 }
  0x1c   :  { %2396 = vmatprep.subr.bf16.mxu0 %v2588_v28  ;;  %v67_v28 = vmul.f32 %v51_v13, %v51_v13  ;;  %v81_v43 = vmul.f32 %v65_v26, %v49_v11 }
  0x1d   :  { %2417 = vmatpush3.bf16.msra.mxu1 %v2587_v27  ;;  %v66_v27 = vmul.f32 %v50_v12, %v50_v12  ;;  %v80_v42 = vmul.f32 %v64_v25, %v48_v9  ;;  %v107_v58 = vrot.slane %v106_v50, 4 }
  0x1e   :  { %2418 = vmatprep.subr.bf16.mxu1 %v2590_v31  ;;  %v70_v31 = vmul.f32 %v54_v10, %v38_v60  ;;  %v83_v45 = vmul.f32 %v67_v28, %v51_v13  ;;  %v113_v51 = vadd.f32 %v81_v43, %v77_v39 }
  0x1f   :  { %2397 = vmatpush3.bf16.msra.mxu0 %v2589_v30  ;;  %v69_v30 = vmul.f32 %v53_v6, %v37_v59  ;;  %v82_v44 = vmul.f32 %v66_v27, %v50_v12  ;;  %v134_v56 = vadd.f32 %v84_v46, %v80_v42  ;;  %v108_v3 = vadd.f32 %v107_v58, %v106_v50 }
  0x20   :  { %2426 = vmatprep.subr.bf16.mxu0 %v2592_v53  ;;  %v92_v48 = vadd.f32 %v74_v35, %v70_v31  ;;  %v127_v55 = vadd.f32 %v83_v45, %v79_v41  ;;  %v114_v59 = vrot.slane %v113_v51, 4  ;;  %v161_v50 = vunpack.c.0.s8 %v2870_v2 }
  0x21   :  { %2419 = vmatpush3.bf16.msra.mxu1 %v2591_v32  ;;  %v71_v32 = vmul.f32 %v55_v14, %v39_v61  ;;  %v85_v47 = vadd.f32 %v73_v34, %v69_v30  ;;  %v120_v52 = vadd.f32 %v82_v44, %v78_v40  ;;  %v135_v0 = vrot.slane %v134_v56, 4 }
  0x22   :  { %2448 = vmatprep.subr.bf16.mxu1 %v2594_v19  ;;  %v93_v54 = vrot.slane %v92_v48, 4  ;;  %v128_v63 = vrot.slane %v127_v55, 4  ;;  %v115_v4 = vadd.f32 %v114_v59, %v113_v51  ;;  %v109_v11 = vrot.slane %v108_v3, 2 }
  0x23   :  { %v99_v49 = vadd.f32 %v75_v37, %v71_v32  ;;  %v86_v53 = vrot.slane %v85_v47, 4  ;;  %v121_v60 = vrot.slane %v120_v52, 4  ;;  %v136_v9 = vadd.f32 %v135_v0, %v134_v56  ;;  %v209_v0 = vld [vmem:[%s3298_s0 + $0x58] sm:$0xff] }
  0x24   :  { %v94_v62 = vadd.f32 %v93_v54, %v92_v48  ;;  %v129_v8 = vadd.f32 %v128_v63, %v127_v55  ;;  %v116_v12 = vrot.slane %v115_v4, 2  ;;  %v110_v19 = vadd.f32 %v109_v11, %v108_v3  ;;  %v208_v63 = vld [vmem:[%s3298_s0 + $0x50] sm:$0xff]  ;;  %v213_v11 = vld [vmem:[%s3298_s0 + $0xd8] sm:$0xff] }
  0x25   :  { %v100_v57 = vrot.slane %v99_v49, 4  ;;  %v87_v61 = vadd.f32 %v86_v53, %v85_v47  ;;  %v122_v5 = vadd.f32 %v121_v60, %v120_v52  ;;  %v137_v17 = vrot.slane %v136_v9, 2 }
  0x26   :  { %v95_v7 = vrot.slane %v94_v62, 2  ;;  %v130_v16 = vrot.slane %v129_v8, 2  ;;  %v117_v20 = vadd.f32 %v116_v12, %v115_v4  ;;  %v111_v27 = vrot.slane %v110_v19, 1  ;;  %v210_v4 = vld [vmem:[%s3298_s0 + $0x90] sm:$0xff] }
  0x27   :  { %v101_v1 = vadd.f32 %v100_v57, %v99_v49  ;;  %v88_v6 = vrot.slane %v87_v61, 2  ;;  %v123_v13 = vrot.slane %v122_v5, 2  ;;  %v138_v25 = vadd.f32 %v137_v17, %v136_v9 }
  0x28   :  { %v96_v15 = vadd.f32 %v95_v7, %v94_v62  ;;  %v131_v24 = vadd.f32 %v130_v16, %v129_v8  ;;  %v118_v28 = vrot.slane %v117_v20, 1  ;;  %v112_v35 = vadd.f32 %v111_v27, %v110_v19  ;;  %v207_v62 = vld [vmem:[%s3298_s0 + $0x18] sm:$0xff] }
  0x29   :  { %v102_v10 = vrot.slane %v101_v1, 2  ;;  %v89_v14 = vadd.f32 %v88_v6, %v87_v61  ;;  %v124_v21 = vadd.f32 %v123_v13, %v122_v5  ;;  %v139_v33 = vrot.slane %v138_v25, 1  ;;  %v211_v5 = vld [vmem:[%s3298_s0 + $0x98] sm:$0xff]  ;;  %v212_v6 = vld [vmem:[%s3298_s0 + $0xd0] sm:$0xff] }
  0x2a   :  { %v97_v23 = vrot.slane %v96_v15, 1  ;;  %v132_v32 = vrot.slane %v131_v24, 1  ;;  %v119_v37 = vadd.f32 %v118_v28, %v117_v20  ;;  %v144_v44 = vmul.f32 0.0625, %v112_v35 }
  0x2b   :  { %v103_v18 = vadd.f32 %v102_v10, %v101_v1  ;;  %v90_v22 = vrot.slane %v89_v14, 1  ;;  %v125_v29 = vrot.slane %v124_v21, 1  ;;  %v140_v40 = vadd.f32 %v139_v33, %v138_v25 }
  0x2c   :  { %v98_v31 = vadd.f32 %v97_v23, %v96_v15  ;;  %v133_v39 = vadd.f32 %v132_v32, %v131_v24  ;;  %v145_v45 = vmul.f32 0.0625, %v119_v37  ;;  %v2877_v53 = vsub.s32 %v161_v50, %v2850_v36  ;;  %v206_v36 = vld [vmem:[%s3298_s0 + $0x10] sm:$0xff] }
  0x2d   :  { %v104_v26 = vrot.slane %v103_v18, 1  ;;  %v91_v30 = vadd.f32 %v90_v22, %v89_v14  ;;  %v126_v38 = vadd.f32 %v125_v29, %v124_v21  ;;  %v148_v48 = vmul.f32 0.0625, %v140_v40 }
  0x2e   :  { %v142_v42 = vmul.f32 0.0625, %v98_v31  ;;  %v147_v47 = vmul.f32 0.0625, %v133_v39  ;;  %v214_v1 = vunpack.c.l.bf16 %v206_v36  ;;  %v215_v7 = vunpack.c.h.bf16 %v206_v36 }
  0x2f   :  { %v105_v34 = vadd.f32 %v104_v26, %v103_v18  ;;  %v141_v41 = vmul.f32 0.0625, %v91_v30  ;;  %v146_v46 = vmul.f32 0.0625, %v126_v38  ;;  %v216_v8 = vunpack.c.l.bf16 %v207_v62 }
  0x30   :  { %v175_v54 = vcombine.low %v147_v47, %v148_v48  ;;  %v217_v9 = vunpack.c.h.bf16 %v207_v62  ;;  %v218_v12 = vunpack.c.l.bf16 %v208_v63  ;;  %v219_v13 = vunpack.c.h.bf16 %v208_v63 }
  0x31   :  { %v143_v43 = vmul.f32 0.0625, %v105_v34  ;;  %v157_v49 = vcombine.low %v141_v41, %v142_v42  ;;  %v174_v52 = vcombine.low %v145_v45, %v146_v46  ;;  %v220_v14 = vunpack.c.l.bf16 %v209_v0 }
  0x32   :  { %v189_v58 = vrot.slane %v175_v54, %v2877_v53  ;;  %v221_v16 = vunpack.c.h.bf16 %v209_v0  ;;  %v222_v17 = vunpack.c.l.bf16 %v210_v4  ;;  %v223_v18 = vunpack.c.h.bf16 %v210_v4 }
  0x33   :  { %v158_v51 = vcombine.low %v143_v43, %v144_v44  ;;  %v165_v55 = vrot.slane %v157_v49, %v2877_v53  ;;  %v182_v57 = vrot.slane %v174_v52, %v2877_v53  ;;  %v224_v19 = vunpack.c.l.bf16 %v211_v5 }
  0x34   :  { %v225_v20 = vunpack.c.h.bf16 %v211_v5  ;;  %v226_v21 = vunpack.c.l.bf16 %v212_v6  ;;  %v227_v22 = vunpack.c.h.bf16 %v212_v6  ;;  %v228_v23 = vunpack.c.l.bf16 %v213_v11 }
  0x35   :  { %v172_v56 = vrot.slane %v158_v51, %v2877_v53  ;;  %v190_v60 = vcombine.low %v182_v57, %v189_v58  ;;  %v230_v24 = vmax.f32 %v214_v1, 1e-06  ;;  %v231_v25 = vmax.f32 %v215_v7, 1e-06 }
  0x36   :  { %v229_v26 = vunpack.c.h.bf16 %v213_v11  ;;  %v232_v27 = vmax.f32 %v216_v8, 1e-06  ;;  %v233_v28 = vmax.f32 %v217_v9, 1e-06  ;;  %v234_v29 = vmax.f32 %v218_v12, 1e-06 }
  0x37   :  { %v173_v59 = vcombine.low %v165_v55, %v172_v56  ;;  %v195_v61 = vrot.slane %v190_v60, 7  ;;  %v235_v30 = vmax.f32 %v219_v13, 1e-06  ;;  %v236_v31 = vmax.f32 %v220_v14, 1e-06 }
  0x38   :  { %v237_v32 = vmax.f32 %v221_v16, 1e-06  ;;  %v246_v33 = vmul.f32 %v230_v24, %v230_v24  ;;  %v238_v34 = vmax.f32 %v222_v17, 1e-06  ;;  %v239_v35 = vmax.f32 %v223_v18, 1e-06 }
  0x39   :  { %v197_v2 = vsel %vm196_vm0, %v195_v61, %v173_v59  ;;  %v240_v37 = vmax.f32 %v224_v19, 1e-06  ;;  %v247_v38 = vmul.f32 %v231_v25, %v231_v25  ;;  %v241_v39 = vmax.f32 %v225_v20, 1e-06 }
  0x3a   :  { %v199_v3 = vsel %vm198_vm1, %v195_v61, %v197_v2  ;;  %v242_v40 = vmax.f32 %v226_v21, 1e-06  ;;  %v243_v41 = vmax.f32 %v227_v22, 1e-06  ;;  %v248_v42 = vmul.f32 %v232_v27, %v232_v27 }
  0x3b   :  { %v201_v10 = vsel %vm200_vm2, %v195_v61, %v199_v3  ;;  %v244_v43 = vmax.f32 %v228_v23, 1e-06  ;;  %v245_v44 = vmax.f32 %v229_v26, 1e-06  ;;  %v249_v45 = vmul.f32 %v233_v28, %v233_v28 }
  0x3c   :  { %v203_v15 = vsel %vm202_vm3, %v195_v61, %v201_v10  ;;  %v250_v46 = vmul.f32 %v234_v29, %v234_v29  ;;  %v251_v47 = vmul.f32 %v235_v30, %v235_v30  ;;  %v252_v48 = vmul.f32 %v236_v31, %v236_v31 }
  0x3d   :  { %2688 = vlog2.f32 %v203_v15  ;;  %v253_v49 = vmul.f32 %v237_v32, %v237_v32  ;;  %v254_v50 = vmul.f32 %v238_v34, %v238_v34  ;;  %v255_v51 = vmul.f32 %v239_v35, %v239_v35 }
  0x3e   :  { %v256_v52 = vmul.f32 %v240_v37, %v240_v37  ;;  %v257_v54 = vmul.f32 %v241_v39, %v241_v39  ;;  %v258_v55 = vmul.f32 %v242_v40, %v242_v40  ;;  %v259_v56 = vmul.f32 %v243_v41, %v243_v41 }
  0x3f   :  { %v260_v57 = vmul.f32 %v244_v43, %v244_v43  ;;  %v261_v58 = vmul.f32 %v245_v44, %v245_v44  ;;  %v262_v59 = vmul.f32 %v246_v33, %v230_v24  ;;  %v263_v61 = vmul.f32 %v247_v38, %v231_v25 }
  0x40   :  { %v264_v36 = vmul.f32 %v248_v42, %v232_v27  ;;  %v265_v2 = vmul.f32 %v249_v45, %v233_v28  ;;  %v266_v62 = vmul.f32 %v250_v46, %v234_v29  ;;  %v267_v0 = vmul.f32 %v251_v47, %v235_v30 }
  0x41   :  { %v268_v1 = vmul.f32 %v252_v48, %v236_v31  ;;  %v269_v3 = vmul.f32 %v253_v49, %v237_v32  ;;  %v270_v4 = vmul.f32 %v254_v50, %v238_v34  ;;  %v271_v5 = vmul.f32 %v255_v51, %v239_v35 }
  0x42   :  { %v272_v6 = vmul.f32 %v256_v52, %v240_v37  ;;  %v273_v7 = vmul.f32 %v257_v54, %v241_v39  ;;  %v274_v9 = vmul.f32 %v258_v55, %v242_v40  ;;  %v275_v10 = vmul.f32 %v259_v56, %v243_v41 }
  0x43   :  { %v276_v11 = vmul.f32 %v260_v57, %v244_v43  ;;  %v277_v12 = vmul.f32 %v261_v58, %v245_v44  ;;  %v278_v13 = vadd.f32 %v266_v62, %v262_v59  ;;  %v285_v14 = vadd.f32 %v267_v0, %v263_v61 }
  0x44   :  { %v292_v15 = vadd.f32 %v268_v1, %v264_v36  ;;  %v299_v17 = vadd.f32 %v269_v3, %v265_v2  ;;  %v306_v18 = vadd.f32 %v274_v9, %v270_v4  ;;  %v313_v19 = vadd.f32 %v275_v10, %v271_v5 }
  0x45   :  { %v279_v20 = vrot.slane %v278_v13, 4  ;;  %v286_v21 = vrot.slane %v285_v14, 4  ;;  %v320_v23 = vadd.f32 %v276_v11, %v272_v6  ;;  %v327_v34 = vadd.f32 %v277_v12, %v273_v7 }
  0x46   :  { %v293_v22 = vrot.slane %v292_v15, 4  ;;  %v300_v24 = vrot.slane %v299_v17, 4  ;;  %v307_v25 = vrot.slane %v306_v18, 4  ;;  %v314_v26 = vrot.slane %v313_v19, 4 }
  0x47   :  { %v2689_v60 = vpop.eup %2688  ;;  %v280_v27 = vadd.f32 %v279_v20, %v278_v13  ;;  %v287_v28 = vadd.f32 %v286_v21, %v285_v14  ;;  %v321_v30 = vrot.slane %v320_v23, 4  ;;  %v328_v43 = vrot.slane %v327_v34, 4 }
  0x48   :  { %v772_v63 = vmul.f32 0.6931472, %v2689_v60  ;;  %v294_v29 = vadd.f32 %v293_v22, %v292_v15  ;;  %v301_v31 = vadd.f32 %v300_v24, %v299_v17  ;;  %v308_v32 = vadd.f32 %v307_v25, %v306_v18  ;;  %v2593_v17 = vld [vmem:[%s3299_s1 + $0x100] sm:$0xff]  }
  0x49   :  { %v315_v33 = vadd.f32 %v314_v26, %v313_v19  ;;  %v281_v35 = vrot.slane %v280_v27, 2  ;;  %v288_v37 = vrot.slane %v287_v28, 2  ;;  %v322_v39 = vadd.f32 %v321_v30, %v320_v23  ;;  %v2595_v24 = vld [vmem:[%s3299_s1 + $0x180] sm:$0xff]  }
  0x4a   :  { %v779_v8 = vmul.f32 0.33333334, %v772_v63  ;;  %v295_v38 = vrot.slane %v294_v29, 2  ;;  %v302_v40 = vrot.slane %v301_v31, 2  ;;  %v309_v41 = vrot.slane %v308_v32, 2 }
  0x4b   :  { %v316_v42 = vrot.slane %v315_v33, 2  ;;  %v282_v44 = vadd.f32 %v281_v35, %v280_v27  ;;  %v289_v45 = vadd.f32 %v288_v37, %v287_v28  ;;  %v323_v47 = vrot.slane %v322_v39, 2  ;;  %v2596_v27 = vld [vmem:[%s3299_s1 + $0x148] sm:$0xff]  }
  0x4c   :  { %v783_v16 = vmul.f32 1.442695, %v779_v8  ;;  %v296_v46 = vadd.f32 %v295_v38, %v294_v29  ;;  %v303_v48 = vadd.f32 %v302_v40, %v301_v31  ;;  %v310_v49 = vadd.f32 %v309_v41, %v308_v32  ;;  %v2597_v31 = vld [vmem:[%s3299_s1 + $0x108] sm:$0xff]   ;;  %v2601_v41 = vld [vmem:[%s3299_s1 + $0x110] sm:$0xff]  }
  0x4d   :  { %v317_v50 = vadd.f32 %v316_v42, %v315_v33  ;;  %v329_v51 = vadd.f32 %v328_v43, %v327_v34  ;;  %v283_v52 = vrot.slane %v282_v44, 1  ;;  %v290_v54 = vrot.slane %v289_v45, 1  ;;  %v2598_v32 = vld [vmem:[%s3299_s1 + $0x1c8] sm:$0xff]   ;;  %v2602_v42 = vld [vmem:[%s3299_s1 + $0x1d0] sm:$0xff]   ;;  %v393_v43 = vld [vmem:[%s3298_s0 + $0x20] sm:$0xff] }
  0x4e   :  { %2690 = vpow2.f32 %v783_v16  ;;  %v297_v55 = vrot.slane %v296_v46, 1  ;;  %v324_v56 = vadd.f32 %v323_v47, %v322_v39  ;;  %v304_v57 = vrot.slane %v303_v48, 1  ;;  %v2599_v38 = vld [vmem:[%s3299_s1 + $0x188] sm:$0xff]   ;;  %v2600_v39 = vld [vmem:[%s3299_s1 + $0x150] sm:$0xff]  }
  0x4f   :  { %v311_v58 = vrot.slane %v310_v49, 1  ;;  %v318_v59 = vrot.slane %v317_v50, 1  ;;  %v330_v60 = vrot.slane %v329_v51, 2  ;;  %v284_v61 = vadd.f32 %v283_v52, %v282_v44  ;;  %v2604_v44 = vld [vmem:[%s3299_s1 + $0x158] sm:$0xff]   ;;  %v394_v47 = vld [vmem:[%s3298_s0 + $0x28] sm:$0xff]  ;;  %v2603_v52 = vld [vmem:[%s3299_s1 + $0x190] sm:$0xff]  }
  0x50   :  { %v291_v36 = vadd.f32 %v290_v54, %v289_v45  ;;  %v298_v2 = vadd.f32 %v297_v55, %v296_v46  ;;  %v325_v62 = vrot.slane %v324_v56, 1  ;;  %v305_v0 = vadd.f32 %v304_v57, %v303_v48  ;;  %v395_v48 = vld [vmem:[%s3298_s0 + $0x60] sm:$0xff]  ;;  %v398_v55 = vld [vmem:[%s3298_s0 + $0xa8] sm:$0xff] }
  0x51   :  { %v312_v1 = vadd.f32 %v311_v58, %v310_v49  ;;  %v319_v3 = vadd.f32 %v318_v59, %v317_v50  ;;  %v331_v4 = vadd.f32 %v330_v60, %v329_v51  ;;  %v334_v8 = vmul.f32 0.0625, %v284_v61  ;;  %v396_v49 = vld [vmem:[%s3298_s0 + $0x68] sm:$0xff]  ;;  %v397_v54 = vld [vmem:[%s3298_s0 + $0xa0] sm:$0xff] }
  0x52   :  { %v326_v7 = vadd.f32 %v325_v62, %v324_v56  ;;  %v335_v10 = vmul.f32 0.0625, %v291_v36  ;;  %v336_v11 = vmul.f32 0.0625, %v298_v2  ;;  %v337_v12 = vmul.f32 0.0625, %v305_v0  ;;  %v399_v56 = vld [vmem:[%s3298_s0 + $0xe0] sm:$0xff]  ;;  %v400_v36 = vld [vmem:[%s3298_s0 + $0xe8] sm:$0xff]  ;;  %v2605_v0 = vld [vmem:[%s3299_s1 + $0x118] sm:$0xff]  }
  0x53   :  { %v332_v9 = vrot.slane %v331_v4, 1  ;;  %v338_v16 = vmul.f32 0.0625, %v312_v1  ;;  %v339_v19 = vmul.f32 0.0625, %v319_v3  ;;  %v401_v50 = vunpack.c.l.bf16 %v393_v43  ;;  %v2606_v1 = vld [vmem:[%s3299_s1 + $0x1d8] sm:$0xff]  }
  0x54   :  { %v340_v20 = vmul.f32 0.0625, %v326_v7  ;;  %v350_v21 = vcombine.low %v334_v8, %v335_v10  ;;  %v351_v25 = vcombine.low %v336_v11, %v337_v12  ;;  %v402_v51 = vunpack.c.h.bf16 %v393_v43  ;;  %v2608_v7 = vld [vmem:[%s3299_s1 + $0x160] sm:$0xff]   ;;  %v2607_v12 = vld [vmem:[%s3299_s1 + $0x198] sm:$0xff]  }
  0x55   :  { %v333_v18 = vadd.f32 %v332_v9, %v331_v4  ;;  %v367_v29 = vcombine.low %v338_v16, %v339_v19  ;;  %v403_v57 = vunpack.c.l.bf16 %v394_v47  ;;  %v404_v58 = vunpack.c.h.bf16 %v394_v47 }
  0x56   :  { %v358_v33 = vrot.slane %v350_v21, %v2877_v53  ;;  %v365_v34 = vrot.slane %v351_v25, %v2877_v53  ;;  %v405_v59 = vunpack.c.l.bf16 %v395_v48  ;;  %v406_v60 = vunpack.c.h.bf16 %v395_v48 }
  0x57   :  { %v341_v28 = vmul.f32 0.0625, %v333_v18  ;;  %v375_v37 = vrot.slane %v367_v29, %v2877_v53  ;;  %v407_v2 = vunpack.c.l.bf16 %v396_v49  ;;  %v408_v62 = vunpack.c.h.bf16 %v396_v49 }
  0x58   :  { %v2691_v63 = vpop.eup %2690  ;;  %v366_v45 = vcombine.low %v358_v33, %v365_v34  ;;  %v410_v3 = vunpack.c.h.bf16 %v397_v54  ;;  %v411_v4 = vunpack.c.l.bf16 %v398_v55  ;;  %v414_v9 = vunpack.c.h.bf16 %v399_v56  ;;  %v2611_v34 = vld [vmem:[%s3299_s1 + $0x1a0] sm:$0xff]  }
  0x59   :  { %v802_v5 = vrot.slane %v2691_v63, %v2877_v53  ;;  %v795_v6 = vcombine.high %v2691_v63, %v2691_v63  ;;  %v368_v35 = vcombine.low %v340_v20, %v341_v28  ;;  %v409_v63 = vunpack.c.l.bf16 %v397_v54 }
  0x5a   :  { %v415_v10 = vunpack.c.l.bf16 %v400_v36  ;;  %v416_v11 = vunpack.c.h.bf16 %v400_v36  ;;  %v419_v16 = vmax.f32 %v403_v57, 1e-06  ;;  %v420_v19 = vmax.f32 %v404_v58, 1e-06  ;;  %v2616_v57 = vld [vmem:[%s3299_s1 + $0x170] sm:$0xff]  }
  0x5b   :  { %v810_v13 = vcombine.high %v802_v5, %v802_v5  ;;  %v879_v14 = vpack.c.bf16 %v802_v5, %v802_v5  ;;  %v809_v15 = vrot.slane %v795_v6, %v2877_v53  ;;  %v382_v40 = vrot.slane %v368_v35, %v2877_v53  ;;  %v2612_v35 = vld [vmem:[%s3299_s1 + $0x168] sm:$0xff]   ;;  %v2617_v36 = vld [vmem:[%s3299_s1 + $0x130] sm:$0xff]  }
  0x5c   :  { %v412_v5 = vunpack.c.h.bf16 %v398_v55  ;;  %v413_v6 = vunpack.c.l.bf16 %v399_v56  ;;  %v421_v20 = vmax.f32 %v405_v59, 1e-06  ;;  %v422_v21 = vmax.f32 %v406_v60, 1e-06 }
  0x5d   :  { %v880_v22 = vpack.c.bf16 %v810_v13, %v810_v13  ;;  %v811_v23 = vcombine.high %v809_v15, %v809_v15  ;;  %v881_v26 = vpack.c.bf16 %v809_v15, %v809_v15  ;;  %v383_v46 = vcombine.low %v375_v37, %v382_v40 }
  0x5e   :  { %v418_v15 = vmax.f32 %v402_v51, 1e-06  ;;  %v424_v25 = vmax.f32 %v408_v62, 1e-06  ;;  %v427_v28 = vmax.f32 %v411_v4, 1e-06  ;;  %v436_v40 = vmul.f32 %v420_v19, %v420_v19 }
  0x5f   :  { %1951 = vmatprep.mubr.bf16.mxu0 %v880_v22  ;;  %v882_v30 = vpack.c.bf16 %v811_v23, %v811_v23  ;;  %v386_v61 = vrot.slane %v383_v46, 7  ;;  %v2609_v22 = vld [vmem:[%s3299_s1 + $0x120] sm:$0xff]   ;;  %v428_v29 = vmax.f32 %v412_v5, 1e-06  ;;  %v432_v37 = vmax.f32 %v416_v11, 1e-06 }
  0x60   :  { %1952 = vmatmul.mubr.bf16.vlgmr.msra.gmra.mrb[0].mxu0 %v879_v14  ;;  %v417_v14 = vmax.f32 %v401_v50, 1e-06  ;;  %v438_v43 = vmul.f32 %v422_v21, %v422_v21  ;;  %v2614_v46 = vld [vmem:[%s3299_s1 + $0x1e8] sm:$0xff]   ;;  %v443_v49 = vmul.f32 %v427_v28, %v427_v28 }
  0x61   :  { %2427 = vmatpush3.bf16.msra.mxu0 %v2593_v17  ;;  %1991 = vmatprep.mubr.bf16.mxu1 %v882_v30  ;;  %v387_v8 = vsel %vm196_vm0, %v386_v61, %v366_v45  ;;  %v2610_v17 = vld [vmem:[%s3299_s1 + $0x1e0] sm:$0xff]   ;;  %v429_v30 = vmax.f32 %v413_v6, 1e-06  ;;  %v440_v45 = vmul.f32 %v424_v25, %v424_v25  ;;  %v444_v50 = vmul.f32 %v428_v29, %v428_v29  ;;  %v2615_v51 = vld [vmem:[%s3299_s1 + $0x1a8] sm:$0xff]  }
  0x62   :  { %1992 = vmatmul.mubr.bf16.vlgmr.msra.gmra.mrb[0].mxu1 %v881_v26  ;;  %2428 = vmatprep.subr.bf16.mxu0 %v2596_v27  ;;  %v388_v13 = vsel %vm198_vm1, %v386_v61, %v387_v8  ;;  %v425_v26 = vmax.f32 %v409_v63, 1e-06  ;;  %v426_v27 = vmax.f32 %v410_v3, 1e-06  ;;  %v433_v33 = vmul.f32 %v417_v14, %v417_v14 }
  0x63   :  { %2449 = vmatpush3.bf16.msra.mxu1 %v2595_v24  ;;  %v389_v18 = vsel %vm200_vm2, %v386_v61, %v388_v13  ;;  %v423_v24 = vmax.f32 %v407_v2, 1e-06  ;;  %v448_v56 = vmul.f32 %v432_v37, %v432_v37  ;;  %v454_v62 = vmul.f32 %v438_v43, %v422_v21  ;;  %v2620_v13 = vld [vmem:[%s3299_s1 + $0x178] sm:$0xff]  }
  0x64   :  { %2450 = vmatprep.subr.bf16.mxu1 %v2598_v32  ;;  %v390_v23 = vsel %vm202_vm3, %v386_v61, %v389_v18  ;;  %v431_v32 = vmax.f32 %v415_v10, 1e-06  ;;  %v441_v47 = vmul.f32 %v425_v26, %v425_v26  ;;  %v442_v48 = vmul.f32 %v426_v27, %v426_v27  ;;  %v2621_v18 = vld [vmem:[%s3299_s1 + $0x138] sm:$0xff]  }
  0x65   :  { %2429 = vmatpush3.bf16.msra.mxu0 %v2597_v31  ;;  %2692 = vlog2.f32 %v390_v23  ;;  %v430_v31 = vmax.f32 %v414_v9, 1e-06  ;;  %v449_v58 = vmul.f32 %v433_v33, %v417_v14  ;;  %v452_v61 = vmul.f32 %v436_v40, %v420_v19  ;;  %v2622_v19 = vld [vmem:[%s3299_s1 + $0x1f8] sm:$0xff]   ;;  %v2626_v40 = vld [vmem:[%s3299_s1 + $0x2c0] sm:$0xff]  }
  0x66   :  { %2430 = vmatprep.subr.bf16.mxu0 %v2600_v39  ;;  %v435_v39 = vmul.f32 %v419_v16, %v419_v16  ;;  %v447_v55 = vmul.f32 %v431_v32, %v431_v32  ;;  %v457_v3 = vmul.f32 %v441_v47, %v425_v26  ;;  %v458_v4 = vmul.f32 %v442_v48, %v426_v27 }
  0x67   :  { %2451 = vmatpush3.bf16.msra.mxu1 %v2599_v38  ;;  %v434_v38 = vmul.f32 %v418_v15, %v418_v15  ;;  %v446_v54 = vmul.f32 %v430_v31, %v430_v31  ;;  %v459_v5 = vmul.f32 %v443_v49, %v427_v28  ;;  %v3020_v6 = vmul.f32 %v444_v50, %v428_v29  ;;  %v2624_v29 = vld [vmem:[%s3299_s1 + $0x240] sm:$0xff]  }
  0x68   :  { %2452 = vmatprep.subr.bf16.mxu1 %v2602_v42  ;;  %v437_v42 = vmul.f32 %v421_v20, %v421_v20  ;;  %v451_v60 = vmul.f32 %v435_v39, %v419_v16  ;;  %v463_v10 = vmul.f32 %v447_v55, %v431_v32  ;;  %v464_v11 = vmul.f32 %v448_v56, %v432_v37  ;;  %v2623_v39 = vld [vmem:[%s3299_s1 + $0x1b8] sm:$0xff]  }
  0x69   :  { %2431 = vmatpush3.bf16.msra.mxu0 %v2601_v41  ;;  %v2613_v41 = vld [vmem:[%s3299_s1 + $0x128] sm:$0xff]   ;;  %v450_v59 = vmul.f32 %v434_v38, %v418_v15  ;;  %v462_v9 = vmul.f32 %v446_v54, %v430_v31 }
  0x6a   :  { %2432 = vmatprep.subr.bf16.mxu0 %v2604_v44  ;;  %v439_v44 = vmul.f32 %v423_v24, %v423_v24  ;;  %v453_v2 = vmul.f32 %v437_v42, %v421_v20  ;;  %v507_v23 = vadd.f32 %v463_v10, %v459_v5 }
  0x6b   :  { %2453 = vmatpush3.bf16.msra.mxu1 %v2603_v52  ;;  %v445_v52 = vmul.f32 %v429_v30, %v429_v30  ;;  %v472_v15 = vadd.f32 %v454_v62, %v450_v59  ;;  %v514_v59 = vadd.f32 %v464_v11, %v3020_v6 }
  0x6c   :  { %2454 = vmatprep.subr.bf16.mxu1 %v2606_v1  ;;  %v455_v63 = vmul.f32 %v439_v44, %v423_v24  ;;  %v2618_v1 = vld [vmem:[%s3299_s1 + $0x1f0] sm:$0xff]   ;;  %v465_v14 = vadd.f32 %v453_v2, %v449_v58  ;;  %v508_v32 = vrot.slane %v507_v23, 4 }
  0x6d   :  { %2433 = vmatpush3.bf16.msra.mxu0 %v2605_v0  ;;  %v456_v0 = vmul.f32 %v440_v45, %v424_v25  ;;  %v461_v8 = vmul.f32 %v445_v52, %v429_v30  ;;  %v473_v25 = vrot.slane %v472_v15, 4 }
  0x6e   :  { %2434 = vmatprep.subr.bf16.mxu0 %v2608_v7  ;;  %v2619_v7 = vld [vmem:[%s3299_s1 + $0x1b0] sm:$0xff]   ;;  %v479_v16 = vadd.f32 %v455_v63, %v451_v60  ;;  %v466_v24 = vrot.slane %v465_v14, 4  ;;  %v509_v43 = vadd.f32 %v508_v32, %v507_v23 }
  0x6f   :  { %2455 = vmatpush3.bf16.msra.mxu1 %v2607_v12  ;;  %v2693_v12 = vpop.eup %2692  ;;  %v493_v21 = vadd.f32 %v461_v8, %v457_v3 }
  0x70   :  { %2456 = vmatprep.subr.bf16.mxu1 %v2610_v17  ;;  %v486_v17 = vadd.f32 %v456_v0, %v452_v61  ;;  %v774_v20 = vmul.f32 0.6931472, %v2693_v12  ;;  %v480_v26 = vrot.slane %v479_v16, 4  ;;  %v467_v33 = vadd.f32 %v466_v24, %v465_v14 }
  0x71   :  { %2435 = vmatpush3.bf16.msra.mxu0 %v2609_v22  ;;  %v500_v22 = vadd.f32 %v462_v9, %v458_v4  ;;  %v494_v30 = vrot.slane %v493_v21, 4  ;;  %v510_v50 = vrot.slane %v509_v43, 2  ;;  %v515_v0 = vrot.slane %v514_v59, 4 }
  0x72   :  { %2436 = vmatprep.subr.bf16.mxu0 %v2612_v35  ;;  %v487_v27 = vrot.slane %v486_v17, 4  ;;  %v780_v28 = vmul.f32 0.33333334, %v774_v20  ;;  %v481_v35 = vadd.f32 %v480_v26, %v479_v16  ;;  %v468_v44 = vrot.slane %v467_v33, 2 }
  0x73   :  { %2457 = vmatpush3.bf16.msra.mxu1 %v2611_v34  ;;  %v501_v31 = vrot.slane %v500_v22, 4  ;;  %v474_v34 = vadd.f32 %v473_v25, %v472_v15  ;;  %v511_v58 = vadd.f32 %v510_v50, %v509_v43  ;;  %v516_v10 = vadd.f32 %v515_v0, %v514_v59  ;;  %v2630_v43 = vld [vmem:[%s3299_s1 + $0x2c8] sm:$0xff]   ;;  %v581_v50 = vld [vmem:[%s3298_s0 + $0x38] sm:$0xff]  ;;  %v2634_v0 = vld [vmem:[%s3299_s1 + $0x2d0] sm:$0xff]  }
  0x74   :  { %2458 = vmatprep.subr.bf16.mxu1 %v2614_v46  ;;  %v488_v37 = vadd.f32 %v487_v27, %v486_v17  ;;  %v785_v38 = vmul.f32 1.442695, %v780_v28  ;;  %v482_v46 = vrot.slane %v481_v35, 2  ;;  %v2625_v28 = vld [vmem:[%s3299_s1 + $0x200] sm:$0xff]  }
  0x75   :  { %2437 = vmatpush3.bf16.msra.mxu0 %v2613_v41  ;;  %v495_v41 = vadd.f32 %v494_v30, %v493_v21  ;;  %v502_v42 = vadd.f32 %v501_v31, %v500_v22  ;;  %v475_v45 = vrot.slane %v474_v34, 2  ;;  %v512_v9 = vrot.slane %v511_v58, 1 }
  0x76   :  { %2438 = vmatprep.subr.bf16.mxu0 %v2616_v57  ;;  %v489_v47 = vrot.slane %v488_v37, 2  ;;  %2694 = vpow2.f32 %v785_v38  ;;  %v483_v54 = vadd.f32 %v482_v46, %v481_v35  ;;  %v517_v11 = vrot.slane %v516_v10, 2 }
  0x77   :  { %2459 = vmatpush3.bf16.msra.mxu1 %v2615_v51  ;;  %v496_v48 = vrot.slane %v495_v41, 2  ;;  %v503_v49 = vrot.slane %v502_v42, 2  ;;  %v469_v51 = vadd.f32 %v468_v44, %v467_v33  ;;  %v476_v52 = vadd.f32 %v475_v45, %v474_v34  ;;  %v2627_v34 = vld [vmem:[%s3299_s1 + $0x280] sm:$0xff]   ;;  %v2632_v44 = vld [vmem:[%s3299_s1 + $0x250] sm:$0xff]  }
  0x78   :  { %2460 = vmatprep.subr.bf16.mxu1 %v2618_v1  ;;  %v490_v55 = vadd.f32 %v489_v47, %v488_v37  ;;  %v513_v16 = vadd.f32 %v512_v9, %v511_v58  ;;  %v518_v17 = vadd.f32 %v517_v11, %v516_v10  ;;  %v580_v47 = vld [vmem:[%s3298_s0 + $0x30] sm:$0xff] }
  0x79   :  { %2439 = vmatpush3.bf16.msra.mxu0 %v2617_v36  ;;  %v497_v56 = vadd.f32 %v496_v48, %v495_v41  ;;  %v504_v57 = vadd.f32 %v503_v49, %v502_v42  ;;  %v470_v60 = vrot.slane %v469_v51, 1  ;;  %v477_v61 = vrot.slane %v476_v52, 1  ;;  %v2629_v42 = vld [vmem:[%s3299_s1 + $0x208] sm:$0xff]  }
  0x7a   :  { %2440 = vmatprep.subr.bf16.mxu0 %v2620_v13  ;;  %v484_v36 = vrot.slane %v483_v54, 1  ;;  %v491_v2 = vrot.slane %v490_v55, 1  ;;  %v519_v24 = vrot.slane %v518_v17, 1  ;;  %v527_v30 = vmul.f32 0.0625, %v513_v16  ;;  %v2631_v48 = vld [vmem:[%s3299_s1 + $0x288] sm:$0xff]  }
  0x7b   :  { %2461 = vmatpush3.bf16.msra.mxu1 %v2619_v7  ;;  %v498_v62 = vrot.slane %v497_v56, 1  ;;  %v505_v63 = vrot.slane %v504_v57, 1  ;;  %v471_v1 = vadd.f32 %v470_v60, %v469_v51  ;;  %v478_v3 = vadd.f32 %v477_v61, %v476_v52  ;;  %v582_v51 = vld [vmem:[%s3298_s0 + $0x70] sm:$0xff]  ;;  %v583_v52 = vld [vmem:[%s3298_s0 + $0x78] sm:$0xff] }
  0x7c   :  { %2462 = vmatprep.subr.bf16.mxu1 %v2622_v19  ;;  %v485_v4 = vadd.f32 %v484_v36, %v483_v54  ;;  %v492_v5 = vadd.f32 %v491_v2, %v490_v55  ;;  %v584_v55 = vld [vmem:[%s3298_s0 + $0xb0] sm:$0xff]  ;;  %v588_v58 = vunpack.c.l.bf16 %v580_v47  ;;  %v589_v59 = vunpack.c.h.bf16 %v580_v47  ;;  %v587_v61 = vld [vmem:[%s3298_s0 + $0xf8] sm:$0xff] }
  0x7d   :  { %2441 = vmatpush3.bf16.msra.mxu0 %v2621_v18  ;;  %v499_v7 = vadd.f32 %v498_v62, %v497_v56  ;;  %v506_v8 = vadd.f32 %v505_v63, %v504_v57  ;;  %v521_v12 = vmul.f32 0.0625, %v471_v1  ;;  %v522_v13 = vmul.f32 0.0625, %v478_v3  ;;  %v585_v56 = vld [vmem:[%s3298_s0 + $0xb8] sm:$0xff]  ;;  %v586_v57 = vld [vmem:[%s3298_s0 + $0xf0] sm:$0xff] }
  0x7e   :  { %2470 = vmatprep.subr.bf16.mxu0 %v2624_v29  ;;  %v523_v14 = vmul.f32 0.0625, %v485_v4  ;;  %v524_v6 = vmul.f32 0.0625, %v492_v5  ;;  %v520_v29 = vadd.f32 %v519_v24, %v518_v17  ;;  %v590_v60 = vunpack.c.l.bf16 %v581_v50 }
  0x7f   :  { %2463 = vmatpush3.bf16.msra.mxu1 %v2623_v39  ;;  %v525_v18 = vmul.f32 0.0625, %v499_v7  ;;  %v526_v19 = vmul.f32 0.0625, %v506_v8  ;;  %v537_v22 = vcombine.low %v521_v12, %v522_v13  ;;  %v2628_v39 = vld [vmem:[%s3299_s1 + $0x248] sm:$0xff]   ;;  %v591_v36 = vunpack.c.h.bf16 %v581_v50 }
  0x80   :  { %2492 = vmatprep.subr.bf16.mxu1 %v2626_v40  ;;  %v2695_v15 = vpop.eup %2694  ;;  %v538_v23 = vcombine.low %v523_v14, %v524_v6  ;;  %v528_v40 = vmul.f32 0.0625, %v520_v29  ;;  %v592_v2 = vunpack.c.l.bf16 %v582_v51  ;;  %v593_v62 = vunpack.c.h.bf16 %v582_v51 }
  0x81   :  { %v819_v20 = vrot.slane %v2695_v15, %v2877_v53  ;;  %v812_v21 = vcombine.high %v2695_v15, %v2695_v15  ;;  %v554_v31 = vcombine.low %v525_v18, %v526_v19  ;;  %v3053_v35 = vrot.slane %v537_v22, %v2877_v53 }
  0x82   :  { %v3056_v37 = vrot.slane %v538_v23, %v2877_v53  ;;  %v555_v45 = vcombine.low %v527_v30, %v528_v40  ;;  %v594_v63 = vunpack.c.l.bf16 %v583_v52  ;;  %v595_v3 = vunpack.c.h.bf16 %v583_v52 }
  0x83   :  { %v827_v25 = vcombine.high %v819_v20, %v819_v20  ;;  %v826_v26 = vrot.slane %v812_v21, %v2877_v53  ;;  %v883_v27 = vpack.c.bf16 %v819_v20, %v819_v20  ;;  %v562_v46 = vrot.slane %v554_v31, %v2877_v53 }
  0x84   :  { %v553_v49 = vcombine.low %v3053_v35, %v3056_v37  ;;  %v569_v54 = vrot.slane %v555_v45, %v2877_v53  ;;  %v596_v4 = vunpack.c.l.bf16 %v584_v55  ;;  %v597_v5 = vunpack.c.h.bf16 %v584_v55 }
  0x85   :  { %v884_v32 = vpack.c.bf16 %v827_v25, %v827_v25  ;;  %v828_v33 = vcombine.high %v826_v26, %v826_v26  ;;  %v885_v38 = vpack.c.bf16 %v826_v26, %v826_v26 }
  0x86   :  { %v570_v1 = vcombine.low %v562_v46, %v569_v54 }
  0x87   :  { %2031 = vmatprep.mubr.bf16.mxu0 %v884_v32  ;;  %v886_v41 = vpack.c.bf16 %v828_v33, %v828_v33 }
  0x88   :  { %2032 = vmatmul.mubr.bf16.vlgmr.msra.gmra.mrb[4].mxu0 %v883_v27 }
  0x89   :  { %2071 = vmatprep.mubr.bf16.mxu1 %v886_v41  ;;  %2471 = vmatpush3.bf16.msra.mxu0 %v2625_v28 }
  0x8a   :  { %2072 = vmatmul.mubr.bf16.vlgmr.msra.gmra.mrb[4].mxu1 %v885_v38  ;;  %2472 = vmatprep.subr.bf16.mxu0 %v2628_v39 }
  0x8b   :  { %2493 = vmatpush3.bf16.msra.mxu1 %v2627_v34 }
  0x8c   :  { %2494 = vmatprep.subr.bf16.mxu1 %v2630_v43 }
  0x8d   :  { %7 = vsyncpa [#allocation4], 0  ;;  %2473 = vmatpush3.bf16.msra.mxu0 %v2629_v42  ;;  %v2633_v7 = vld [vmem:[%s3299_s1 + $0x210] sm:$0xff]   ;;  %v2636_v9 = vld [vmem:[%s3299_s1 + $0x258] sm:$0xff]   ;;  %v598_v10 = vunpack.c.l.bf16 %v585_v56  ;;  %v599_v12 = vunpack.c.h.bf16 %v585_v56  ;;  %v600_v13 = vunpack.c.l.bf16 %v586_v57  ;;  %v601_v14 = vunpack.c.h.bf16 %v586_v57 }
  0x8e   :  { %v2635_v8 = vld [vmem:[%s3299_s1 + $0x290] sm:$0xff]   ;;  %2474 = vmatprep.subr.bf16.mxu0 %v2632_v44  ;;  %v2638_v6 = vld [vmem:[%s3299_s1 + $0x2d8] sm:$0xff]   ;;  %v573_v11 = vrot.slane %v570_v1, 7  ;;  %v602_v15 = vunpack.c.l.bf16 %v587_v61  ;;  %v604_v16 = vmax.f32 %v588_v58, 1e-06  ;;  %v603_v19 = vunpack.c.h.bf16 %v587_v61  ;;  %v2640_v23 = vld [vmem:[%s3299_s1 + $0x260] sm:$0xff]  }
  0x8f   :  { %v605_v17 = vmax.f32 %v589_v59, 1e-06  ;;  %2495 = vmatpush3.bf16.msra.mxu1 %v2631_v48  ;;  %v2637_v18 = vld [vmem:[%s3299_s1 + $0x218] sm:$0xff]   ;;  %v606_v20 = vmax.f32 %v590_v60, 1e-06  ;;  %v2642_v42 = vld [vmem:[%s3299_s1 + $0x2e0] sm:$0xff]  }
  0x90   :  { %v607_v21 = vmax.f32 %v591_v36, 1e-06  ;;  %v608_v22 = vmax.f32 %v592_v2, 1e-06  ;;  %2496 = vmatprep.subr.bf16.mxu1 %v2634_v0  ;;  %v574_v24 = vsel %vm196_vm0, %v573_v11, %v553_v49  ;;  %v609_v25 = vmax.f32 %v593_v62, 1e-06 }
  0x91   :  { %v610_v26 = vmax.f32 %v594_v63, 1e-06  ;;  %v611_v27 = vmax.f32 %v595_v3, 1e-06  ;;  %2475 = vmatpush3.bf16.msra.mxu0 %v2633_v7  ;;  %v575_v28 = vsel %vm198_vm1, %v573_v11, %v574_v24  ;;  %v612_v29 = vmax.f32 %v596_v4, 1e-06 }
  0x92   :  { %v613_v30 = vmax.f32 %v597_v5, 1e-06  ;;  %v614_v31 = vmax.f32 %v598_v10, 1e-06  ;;  %2476 = vmatprep.subr.bf16.mxu0 %v2636_v9  ;;  %v576_v32 = vsel %vm200_vm2, %v573_v11, %v575_v28  ;;  %v615_v33 = vmax.f32 %v599_v12, 1e-06 }
  0x93   :  { %v616_v34 = vmax.f32 %v600_v13, 1e-06  ;;  %v617_v35 = vmax.f32 %v601_v14, 1e-06  ;;  %2497 = vmatpush3.bf16.msra.mxu1 %v2635_v8  ;;  %v2639_v37 = vld [vmem:[%s3299_s1 + $0x298] sm:$0xff]   ;;  %v577_v38 = vsel %vm202_vm3, %v573_v11, %v576_v32  ;;  %v620_v41 = vmul.f32 %v604_v16, %v604_v16  ;;  %v2641_v46 = vld [vmem:[%s3299_s1 + $0x220] sm:$0xff]  }
  0x94   :  { %v618_v39 = vmax.f32 %v602_v15, 1e-06  ;;  %v619_v40 = vmax.f32 %v603_v19, 1e-06  ;;  %2498 = vmatprep.subr.bf16.mxu1 %v2638_v6  ;;  %2696 = vlog2.f32 %v577_v38  ;;  %v621_v43 = vmul.f32 %v605_v17, %v605_v17  ;;  %v2644_v51 = vld [vmem:[%s3299_s1 + $0x268] sm:$0xff]   ;;  %v2643_v57 = vld [vmem:[%s3299_s1 + $0x2a0] sm:$0xff]  }
  0x95   :  { %v622_v44 = vmul.f32 %v606_v20, %v606_v20  ;;  %v623_v45 = vmul.f32 %v607_v21, %v607_v21  ;;  %2477 = vmatpush3.bf16.msra.mxu0 %v2637_v18  ;;  %v624_v47 = vmul.f32 %v608_v22, %v608_v22  ;;  %v625_v48 = vmul.f32 %v609_v25, %v609_v25  ;;  %v2646_v36 = vld [vmem:[%s3299_s1 + $0x2e8] sm:$0xff]   ;;  %v2648_v8 = vld [vmem:[%s3299_s1 + $0x270] sm:$0xff]   ;;  %v2652_v28 = vld [vmem:[%s3299_s1 + $0x278] sm:$0xff]  }
  0x96   :  { %v626_v49 = vmul.f32 %v610_v26, %v610_v26  ;;  %v627_v50 = vmul.f32 %v611_v27, %v611_v27  ;;  %2478 = vmatprep.subr.bf16.mxu0 %v2640_v23  ;;  %v628_v52 = vmul.f32 %v612_v29, %v612_v29  ;;  %v629_v54 = vmul.f32 %v613_v30, %v613_v30  ;;  %v2645_v1 = vld [vmem:[%s3299_s1 + $0x228] sm:$0xff]  }
  0x97   :  { %v630_v55 = vmul.f32 %v614_v31, %v614_v31  ;;  %v631_v56 = vmul.f32 %v615_v33, %v615_v33  ;;  %2499 = vmatpush3.bf16.msra.mxu1 %v2639_v37  ;;  %v632_v58 = vmul.f32 %v616_v34, %v616_v34  ;;  %v633_v59 = vmul.f32 %v617_v35, %v617_v35  ;;  %v2647_v14 = vld [vmem:[%s3299_s1 + $0x2a8] sm:$0xff]  }
  0x98   :  { %v634_v60 = vmul.f32 %v618_v39, %v618_v39  ;;  %v635_v61 = vmul.f32 %v619_v40, %v619_v40  ;;  %2500 = vmatprep.subr.bf16.mxu1 %v2642_v42  ;;  %v636_v2 = vmul.f32 %v620_v41, %v604_v16  ;;  %v637_v62 = vmul.f32 %v621_v43, %v605_v17  ;;  %v2650_v17 = vld [vmem:[%s3299_s1 + $0x2f0] sm:$0xff]  }
  0x99   :  { %v638_v63 = vmul.f32 %v622_v44, %v606_v20  ;;  %v639_v0 = vmul.f32 %v623_v45, %v607_v21  ;;  %2479 = vmatpush3.bf16.msra.mxu0 %v2641_v46  ;;  %v640_v3 = vmul.f32 %v624_v47, %v608_v22  ;;  %v641_v4 = vmul.f32 %v625_v48, %v609_v25  ;;  %v2649_v22 = vld [vmem:[%s3299_s1 + $0x230] sm:$0xff]   ;;  %v2653_v44 = vld [vmem:[%s3299_s1 + $0x238] sm:$0xff]  }
  0x9a   :  { %v642_v5 = vmul.f32 %v626_v49, %v610_v26  ;;  %v643_v7 = vmul.f32 %v627_v50, %v611_v27  ;;  %2480 = vmatprep.subr.bf16.mxu0 %v2644_v51  ;;  %v644_v9 = vmul.f32 %v628_v52, %v612_v29  ;;  %v645_v10 = vmul.f32 %v629_v54, %v613_v30  ;;  %v2656_v49 = vld [vmem:[%s3299_s1 + $0x340] sm:$0xff]  }
  0x9b   :  { %v646_v12 = vmul.f32 %v630_v55, %v614_v31  ;;  %v647_v13 = vmul.f32 %v631_v56, %v615_v33  ;;  %2501 = vmatpush3.bf16.msra.mxu1 %v2643_v57  ;;  %v648_v6 = vmul.f32 %v632_v58, %v616_v34  ;;  %v649_v11 = vmul.f32 %v633_v59, %v617_v35  ;;  %v2651_v33 = vld [vmem:[%s3299_s1 + $0x2b0] sm:$0xff]   ;;  %v2655_v56 = vld [vmem:[%s3299_s1 + $0x2b8] sm:$0xff]  }
  0x9c   :  { %v650_v15 = vmul.f32 %v634_v60, %v618_v39  ;;  %v651_v16 = vmul.f32 %v635_v61, %v619_v40  ;;  %2502 = vmatprep.subr.bf16.mxu1 %v2646_v36  ;;  %v652_v18 = vadd.f32 %v640_v3, %v636_v2  ;;  %v659_v19 = vadd.f32 %v641_v4, %v637_v62  ;;  %v2654_v39 = vld [vmem:[%s3299_s1 + $0x2f8] sm:$0xff]   ;;  %v2658_v60 = vld [vmem:[%s3299_s1 + $0x3c0] sm:$0xff]  }
  0x9d   :  { %v666_v20 = vadd.f32 %v642_v5, %v638_v63  ;;  %v673_v21 = vadd.f32 %v643_v7, %v639_v0  ;;  %2481 = vmatpush3.bf16.msra.mxu0 %v2645_v1  ;;  %v680_v23 = vadd.f32 %v648_v6, %v644_v9  ;;  %v687_v24 = vadd.f32 %v649_v11, %v645_v10 }
  0x9e   :  { %v694_v25 = vadd.f32 %v650_v15, %v646_v12  ;;  %v3159_v26 = vadd.f32 %v651_v16, %v647_v13  ;;  %v2697_v27 = vpop.eup %2696  ;;  %2482 = vmatprep.subr.bf16.mxu0 %v2648_v8  ;;  %v653_v29 = vrot.slane %v652_v18, 4  ;;  %v660_v30 = vrot.slane %v659_v19, 4 }
  0x9f   :  { %v667_v31 = vrot.slane %v666_v20, 4  ;;  %v674_v32 = vrot.slane %v673_v21, 4  ;;  %2503 = vmatpush3.bf16.msra.mxu1 %v2647_v14  ;;  %v776_v34 = vmul.f32 0.6931472, %v2697_v27  ;;  %v681_v35 = vrot.slane %v680_v23, 4 }
  0xa0   :  { %v688_v37 = vrot.slane %v687_v24, 4  ;;  %v695_v38 = vrot.slane %v694_v25, 4  ;;  %2504 = vmatprep.subr.bf16.mxu1 %v2650_v17  ;;  %v654_v40 = vadd.f32 %v653_v29, %v652_v18  ;;  %v661_v41 = vadd.f32 %v660_v30, %v659_v19 }
  0xa1   :  { %v668_v42 = vadd.f32 %v667_v31, %v666_v20  ;;  %v675_v43 = vadd.f32 %v674_v32, %v673_v21  ;;  %2483 = vmatpush3.bf16.msra.mxu0 %v2649_v22  ;;  %v781_v45 = vmul.f32 0.33333334, %v776_v34  ;;  %v682_v46 = vadd.f32 %v681_v35, %v680_v23 }
  0xa2   :  { %v689_v47 = vadd.f32 %v688_v37, %v687_v24  ;;  %v696_v48 = vadd.f32 %v695_v38, %v694_v25  ;;  %2484 = vmatprep.subr.bf16.mxu0 %v2652_v28  ;;  %v655_v50 = vrot.slane %v654_v40, 2  ;;  %v662_v51 = vrot.slane %v661_v41, 2 }
  0xa3   :  { %v669_v52 = vrot.slane %v668_v42, 2  ;;  %v676_v54 = vrot.slane %v675_v43, 2  ;;  %2505 = vmatpush3.bf16.msra.mxu1 %v2651_v33  ;;  %v787_v55 = vmul.f32 1.442695, %v781_v45  ;;  %v683_v57 = vrot.slane %v682_v46, 2 }
  0xa4   :  { %v690_v58 = vrot.slane %v689_v47, 2  ;;  %v697_v59 = vrot.slane %v696_v48, 2  ;;  %2506 = vmatprep.subr.bf16.mxu1 %v2654_v39  ;;  %v656_v61 = vadd.f32 %v655_v50, %v654_v40  ;;  %v663_v36 = vadd.f32 %v662_v51, %v661_v41  ;;  %v2659_v51 = vld [vmem:[%s3299_s1 + $0x380] sm:$0xff]  }
  0xa5   :  { %v670_v2 = vadd.f32 %v669_v52, %v668_v42  ;;  %v677_v62 = vadd.f32 %v676_v54, %v675_v43  ;;  %2485 = vmatpush3.bf16.msra.mxu0 %v2653_v44  ;;  %2698 = vpow2.f32 %v787_v55  ;;  %v684_v63 = vadd.f32 %v683_v57, %v682_v46  ;;  %v2657_v43 = vld [vmem:[%s3299_s1 + $0x300] sm:$0xff]   ;;  %v2660_v46 = vld [vmem:[%s3299_s1 + $0x348] sm:$0xff]  }
  0xa6   :  { %v691_v0 = vadd.f32 %v690_v58, %v689_v47  ;;  %v698_v1 = vadd.f32 %v697_v59, %v696_v48  ;;  %2514 = vmatprep.subr.bf16.mxu0 %v2656_v49  ;;  %v657_v3 = vrot.slane %v656_v61, 1  ;;  %v664_v4 = vrot.slane %v663_v36, 1  ;;  %v2662_v52 = vld [vmem:[%s3299_s1 + $0x3c8] sm:$0xff]  }
  0xa7   :  { %v671_v5 = vrot.slane %v670_v2, 1  ;;  %v678_v7 = vrot.slane %v677_v62, 1  ;;  %2507 = vmatpush3.bf16.msra.mxu1 %v2655_v56  ;;  %v685_v8 = vrot.slane %v684_v63, 1  ;;  %v702_v10 = vrot.slane %v3159_v26, 4  ;;  %v2661_v55 = vld [vmem:[%s3299_s1 + $0x308] sm:$0xff]   ;;  %v2664_v56 = vld [vmem:[%s3299_s1 + $0x350] sm:$0xff]  }
  0xa8   :  { %v692_v9 = vrot.slane %v691_v0, 1  ;;  %2536 = vmatprep.subr.bf16.mxu1 %v2658_v60  ;;  %v658_v12 = vadd.f32 %v657_v3, %v656_v61  ;;  %v665_v13 = vadd.f32 %v664_v4, %v663_v36  ;;  %v699_v6 = vrot.slane %v698_v1, 1  ;;  %v2663_v59 = vld [vmem:[%s3299_s1 + $0x388] sm:$0xff]   ;;  %v2666_v60 = vld [vmem:[%s3299_s1 + $0x3d0] sm:$0xff]   ;;  %v2669_v4 = vld [vmem:[%s3299_s1 + $0x318] sm:$0xff]  }
  0xa9   :  { %v672_v14 = vadd.f32 %v671_v5, %v670_v2  ;;  %v679_v11 = vadd.f32 %v678_v7, %v677_v62  ;;  %v686_v15 = vadd.f32 %v685_v8, %v684_v63  ;;  %v703_v17 = vadd.f32 %v702_v10, %v3159_v26  ;;  %v2665_v36 = vld [vmem:[%s3299_s1 + $0x310] sm:$0xff]   ;;  %v2668_v2 = vld [vmem:[%s3299_s1 + $0x358] sm:$0xff]   ;;  %v2672_v7 = vld [vmem:[%s3299_s1 + $0x360] sm:$0xff]  }
  0xaa   :  { %v693_v16 = vadd.f32 %v692_v9, %v691_v0  ;;  %v700_v19 = vadd.f32 %v699_v6, %v698_v1  ;;  %v708_v20 = vmul.f32 0.0625, %v658_v12  ;;  %v709_v21 = vmul.f32 0.0625, %v665_v13  ;;  %v2667_v63 = vld [vmem:[%s3299_s1 + $0x390] sm:$0xff]   ;;  %v2670_v1 = vld [vmem:[%s3299_s1 + $0x3d8] sm:$0xff]   ;;  %v2674_v9 = vld [vmem:[%s3299_s1 + $0x3e0] sm:$0xff]  }
  0xab   :  { %v704_v18 = vrot.slane %v703_v17, 2  ;;  %v710_v22 = vmul.f32 0.0625, %v672_v14  ;;  %v711_v24 = vmul.f32 0.0625, %v679_v11  ;;  %v712_v25 = vmul.f32 0.0625, %v686_v15  ;;  %v2671_v8 = vld [vmem:[%s3299_s1 + $0x398] sm:$0xff]   ;;  %v2673_v10 = vld [vmem:[%s3299_s1 + $0x320] sm:$0xff]  }
  0xac   :  { %v713_v27 = vmul.f32 0.0625, %v693_v16  ;;  %v724_v32 = vcombine.low %v708_v20, %v709_v21  ;;  %v714_v34 = vmul.f32 0.0625, %v700_v19  ;;  %v2676_v12 = vld [vmem:[%s3299_s1 + $0x368] sm:$0xff]   ;;  %v2675_v13 = vld [vmem:[%s3299_s1 + $0x3a0] sm:$0xff]   ;;  %v2680_v11 = vld [vmem:[%s3299_s1 + $0x370] sm:$0xff]  }
  0xad   :  { %v705_v23 = vadd.f32 %v704_v18, %v703_v17  ;;  %v725_v35 = vcombine.low %v710_v22, %v711_v24  ;;  %v2678_v14 = vld [vmem:[%s3299_s1 + $0x3e8] sm:$0xff]   ;;  %v2682_v17 = vld [vmem:[%s3299_s1 + $0x3f0] sm:$0xff]   ;;  %v2684_v20 = vld [vmem:[%s3299_s1 + $0x378] sm:$0xff]  }
  0xae   :  { %v741_v37 = vcombine.low %v712_v25, %v713_v27  ;;  %v732_v44 = vrot.slane %v724_v32, %v2877_v53  ;;  %v2677_v6 = vld [vmem:[%s3299_s1 + $0x328] sm:$0xff]   ;;  %v2681_v18 = vld [vmem:[%s3299_s1 + $0x330] sm:$0xff]   ;;  %v2685_v24 = vld [vmem:[%s3299_s1 + $0x338] sm:$0xff]  }
  0xaf   :  { %v2699_v28 = vpop.eup %2698  ;;  %v706_v29 = vrot.slane %v705_v23, 1  ;;  %v739_v47 = vrot.slane %v725_v35, %v2877_v53  ;;  %v2679_v15 = vld [vmem:[%s3299_s1 + $0x3a8] sm:$0xff]   ;;  %v2683_v21 = vld [vmem:[%s3299_s1 + $0x3b0] sm:$0xff]   ;;  %v2687_v27 = vld [vmem:[%s3299_s1 + $0x3b8] sm:$0xff]  }
  0xb0   :  { %v836_v30 = vrot.slane %v2699_v28, %v2877_v53  ;;  %v829_v31 = vcombine.high %v2699_v28, %v2699_v28  ;;  %v749_v49 = vrot.slane %v741_v37, %v2877_v53 }
  0xb1   :  { %v707_v33 = vadd.f32 %v706_v29, %v705_v23  ;;  %v740_v57 = vcombine.low %v732_v44, %v739_v47  ;;  %v2686_v23 = vld [vmem:[%s3299_s1 + $0x3f8] sm:$0xff]   ;;  %s2729_s1 = smov [#allocation3]  }
  0xb2   :  { %v844_v26 = vcombine.high %v836_v30, %v836_v30  ;;  %v843_v38 = vrot.slane %v829_v31, %v2877_v53  ;;  %v887_v39 = vpack.c.bf16 %v836_v30, %v836_v30  ;;  %s2246_s17 = sshll.u32 %s2729_s1, 4  ;;  %s2247_s17 = int_to_ptr.vmem [resolvable:$true] %s2246_s17 }
  0xb3   :  { %v715_v40 = vmul.f32 0.0625, %v707_v33  ;;  %s2704_s18 = scalar_lea.vmem %s2247_s17, 32  ;;  %p2709_p1 = scmp.lt.s32.totalorder %s2247_s17, %s2247_s17 }
  0xb4   :  { %v888_v41 = vpack.c.bf16 %v844_v26, %v844_v26  ;;  %v845_v42 = vcombine.high %v843_v38, %v843_v38  ;;  %v889_v45 = vpack.c.bf16 %v843_v38, %v843_v38  ;;  %p2705_p0 = scmp.ne.s32.totalorder %s2247_s17, %s2704_s18  ;;  %p2710_p2 = scmp.lt.s32.totalorder %s2704_s18, %s2704_s18 }
  0xb5   :  { %v742_v48 = vcombine.low %v714_v34, %v715_v40 }
  0xb6   :  { %2111 = vmatprep.mubr.bf16.mxu0 %v888_v41  ;;  %v890_v50 = vpack.c.bf16 %v845_v42, %v845_v42  ;;  %p2711_p3 = por %p2710_p2, %p2709_p1 }
  0xb7   :  { %2112 = vmatmul.mubr.bf16.vlgmr.msra.gmra.mrb[8].mxu0 %v887_v39  ;;  %v756_v54 = vrot.slane %v742_v48, %v2877_v53 }
  0xb8   :  { %2151 = vmatprep.mubr.bf16.mxu1 %v890_v50  ;;  %2515 = vmatpush3.bf16.msra.mxu0 %v2657_v43  ;;  %p2712_p4 = pnand %p2711_p3, %p2705_p0 }
  0xb9   :  { %2152 = vmatmul.mubr.bf16.vlgmr.msra.gmra.mrb[8].mxu1 %v889_v45  ;;  %2516 = vmatprep.subr.bf16.mxu0 %v2660_v46  ;;  %v757_v58 = vcombine.low %v749_v49, %v756_v54 }
  0xba   :  { %2537 = vmatpush3.bf16.msra.mxu1 %v2659_v51 }
  0xbb   :  { %2538 = vmatprep.subr.bf16.mxu1 %v2662_v52  ;;  %v760_v61 = vrot.slane %v757_v58, 7 }
  0xbc   :  { %2517 = vmatpush3.bf16.msra.mxu0 %v2661_v55 }
  0xbd   :  { %2518 = vmatprep.subr.bf16.mxu0 %v2664_v56  ;;  %v761_v62 = vsel %vm196_vm0, %v760_v61, %v740_v57 }
  0xbe   :  { %2539 = vmatpush3.bf16.msra.mxu1 %v2663_v59  ;;  %v762_v0 = vsel %vm198_vm1, %v760_v61, %v761_v62 }
  0xbf   :  { %2540 = vmatprep.subr.bf16.mxu1 %v2666_v60  ;;  %v763_v3 = vsel %vm200_vm2, %v760_v61, %v762_v0 }
  0xc0   :  { %2519 = vmatpush3.bf16.msra.mxu0 %v2665_v36  ;;  %v764_v5 = vsel %vm202_vm3, %v760_v61, %v763_v3 }
  0xc1   :  { %2520 = vmatprep.subr.bf16.mxu0 %v2668_v2  ;;  %2700 = vlog2.f32 %v764_v5 }
  0xc2   :  { %2541 = vmatpush3.bf16.msra.mxu1 %v2667_v63 }
  0xc3   :  { %2542 = vmatprep.subr.bf16.mxu1 %v2670_v1 }
  0xc4   :  { %2521 = vmatpush3.bf16.msra.mxu0 %v2669_v4 }
  0xc5   :  { %2522 = vmatprep.subr.bf16.mxu0 %v2672_v7 }
  0xc6   :  { %2543 = vmatpush3.bf16.msra.mxu1 %v2671_v8 }
  0xc7   :  { %2544 = vmatprep.subr.bf16.mxu1 %v2674_v9 }
  0xc8   :  { %2523 = vmatpush3.bf16.msra.mxu0 %v2673_v10 }
  0xc9   :  { %2524 = vmatprep.subr.bf16.mxu0 %v2676_v12 }
  0xca   :  { %2545 = vmatpush3.bf16.msra.mxu1 %v2675_v13 }
  0xcb   :  { %v2701_v16 = vpop.eup %2700  ;;  %2546 = vmatprep.subr.bf16.mxu1 %v2678_v14 }
  0xcc   :  { %2525 = vmatpush3.bf16.msra.mxu0 %v2677_v6  ;;  %v778_v19 = vmul.f32 0.6931472, %v2701_v16 }
  0xcd   :  { %2526 = vmatprep.subr.bf16.mxu0 %v2680_v11 }
  0xce   :  { %2547 = vmatpush3.bf16.msra.mxu1 %v2679_v15  ;;  %v782_v22 = vmul.f32 0.33333334, %v778_v19 }
  0xcf   :  { %2548 = vmatprep.subr.bf16.mxu1 %v2682_v17 }
  0xd0   :  { %2527 = vmatpush3.bf16.msra.mxu0 %v2681_v18  ;;  %v789_v25 = vmul.f32 1.442695, %v782_v22 }
  0xd1   :  { %2528 = vmatprep.subr.bf16.mxu0 %v2684_v20 }
  0xd2   :  { %2549 = vmatpush3.bf16.msra.mxu1 %v2683_v21  ;;  %2702 = vpow2.f32 %v789_v25 }
  0xd3   :  { %2550 = vmatprep.subr.bf16.mxu1 %v2686_v23 }
  0xd4   :  { %2529 = vmatpush3.bf16.msra.mxu0 %v2685_v24 }
  0xd6   :  { %2551 = vmatpush3.bf16.msra.mxu1 %v2687_v27 }
  0xdc   :  { %v2703_v28 = vpop.eup %2702 }
  0xdd   :  { %v853_v29 = vrot.slane %v2703_v28, %v2877_v53  ;;  %v846_v30 = vcombine.high %v2703_v28, %v2703_v28 }
  0xdf   :  { %v861_v31 = vcombine.high %v853_v29, %v853_v29  ;;  %v860_v32 = vrot.slane %v846_v30, %v2877_v53  ;;  %v891_v33 = vpack.c.bf16 %v853_v29, %v853_v29 }
  0xe1   :  { %v892_v34 = vpack.c.bf16 %v861_v31, %v861_v31  ;;  %v862_v35 = vcombine.high %v860_v32, %v860_v32  ;;  %v893_v37 = vpack.c.bf16 %v860_v32, %v860_v32 }
  0xe3   :  { %2191 = vmatprep.mubr.bf16.mxu0 %v892_v34  ;;  %v894_v26 = vpack.c.bf16 %v862_v35, %v862_v35 }
  0xe4   :  { %2192 = vmatmul.mubr.bf16.vlgmr.msra.gmra.mrb[12].mxu0 %v891_v33 }
  0xe5   :  { %2231 = vmatprep.mubr.bf16.mxu1 %v894_v26 }
  0xe6   :  { %2232 = vmatmul.mubr.bf16.vlgmr.msra.gmra.mrb[12].mxu1 %v893_v37 }
 0x133   :  { %v2398_v38 = vpop.f32.mrb[0].mxu0 }
 0x134   :  { %v2399_v39 = vpop.f32.mrb[1].mxu0 }
 0x135   :  { %v2400_v40 = vadd.f32 %v2399_v39, %v2398_v38  ;;  %v2401_v41 = vpop.f32.mrb[2].mxu0  ;;  %v2420_v42 = vpop.f32.mrb[0].mxu1 }
 0x136   :  { %v2402_v43 = vpop.f32.mrb[3].mxu0  ;;  %v2421_v44 = vpop.f32.mrb[1].mxu1 }
 0x137   :  { %v2422_v45 = vadd.f32 %v2421_v44, %v2420_v42  ;;  %v2423_v46 = vpop.f32.mrb[2].mxu1 }
 0x138   :  { %v2424_v47 = vpop.f32.mrb[3].mxu1 }
 0x139   :  { %v1994_v53 = vadd.f32 %v2422_v45, %v2400_v40 }
 0x15b   :  { %v2442_v48 = vpop.f32.mrb[4].mxu0 }
 0x15c   :  { %v2443_v49 = vpop.f32.mrb[5].mxu0 }
 0x15d   :  { %v2444_v50 = vadd.f32 %v2443_v49, %v2442_v48  ;;  %v2445_v51 = vpop.f32.mrb[6].mxu0  ;;  %v2464_v52 = vpop.f32.mrb[4].mxu1 }
 0x15e   :  { %v2446_v54 = vpop.f32.mrb[7].mxu0  ;;  %v2465_v55 = vpop.f32.mrb[5].mxu1 }
 0x15f   :  { %v2034_v56 = vadd.f32 %v2444_v50, %v1994_v53  ;;  %v2466_v57 = vadd.f32 %v2465_v55, %v2464_v52  ;;  %v2467_v58 = vpop.f32.mrb[6].mxu1 }
 0x160   :  { %v2468_v59 = vpop.f32.mrb[7].mxu1 }
 0x161   :  { %v2074_v60 = vadd.f32 %v2466_v57, %v2034_v56 }
 0x18a   :  { %v2486_v61 = vpop.f32.mrb[8].mxu0 }
 0x18b   :  { %v2487_v36 = vpop.f32.mrb[9].mxu0 }
 0x18c   :  { %v2488_v2 = vadd.f32 %v2487_v36, %v2486_v61  ;;  %v2489_v62 = vpop.f32.mrb[10].mxu0  ;;  %v2508_v63 = vpop.f32.mrb[8].mxu1 }
 0x18d   :  { %v2490_v0 = vpop.f32.mrb[11].mxu0  ;;  %v2509_v1 = vpop.f32.mrb[9].mxu1 }
 0x18e   :  { %v2114_v3 = vadd.f32 %v2488_v2, %v2074_v60  ;;  %v2510_v4 = vadd.f32 %v2509_v1, %v2508_v63  ;;  %v2511_v5 = vpop.f32.mrb[10].mxu1 }
 0x18f   :  { %v2512_v7 = vpop.f32.mrb[11].mxu1 }
 0x190   :  { %v2154_v8 = vadd.f32 %v2510_v4, %v2114_v3 }
 0x1b7   :  { %v2530_v9 = vpop.f32.mrb[12].mxu0 }
 0x1b8   :  { %v2531_v10 = vpop.f32.mrb[13].mxu0 }
 0x1b9   :  { %v2532_v12 = vadd.f32 %v2531_v10, %v2530_v9  ;;  %v2533_v13 = vpop.f32.mrb[14].mxu0  ;;  %v2552_v14 = vpop.f32.mrb[12].mxu1 }
 0x1ba   :  { %v2534_v6 = vpop.f32.mrb[15].mxu0  ;;  %v2553_v11 = vpop.f32.mrb[13].mxu1 }
 0x1bb   :  { %v2194_v15 = vadd.f32 %v2532_v12, %v2154_v8  ;;  %v2554_v16 = vadd.f32 %v2553_v11, %v2552_v14  ;;  %v2555_v17 = vpop.f32.mrb[14].mxu1 }
 0x1bc   :  { %v2556_v18 = vpop.f32.mrb[15].mxu1 }
 0x1bd   :  { %v2234_v19 = vadd.f32 %v2554_v16, %v2194_v15 }
 0x1bf   :  { %2239 = vst [vmem:[#allocation3] sm:$0x3] %v2234_v19 }
 0x1c0   :  { %2715 = shalt.err (!%p2712_p4)
}
 0x1c1   :  { %s2716_s21 = scalar_lea.hbm %s3300_s2, 32 }
 0x1c2   :  { %p2717_p5 = scmp.ne.s32.totalorder %s3300_s2, %s2716_s21  ;;  %p2720_p6 = scmp.lt.u32.totalorder %s2716_s21, %s3300_s2 }
 0x1c4   :  { %p2722_p7 = pnand %p2720_p6, %p2717_p5 }
 0x1c6   :  { %2725 = shalt.err (!%p2722_p7)
}
 0x1c7   :  { %2249 = dma.vmem_to_hbm [thread:$0]  %s2247_s17, 32, %s3300_s2, [#allocation4]  }
 0x1c8   :  { %2726 = dma.done.wait [#allocation4], 32  }
 0x1c9   :  { %2727 = vsyncadd [#allocation4], 4294967264 }
 0x1ca   :  { %2253 = vsyncpa [#allocation4], 1 }

// kernel: net_forward_eval.3
= control target key start
LH: loop header
LB: loop body
LE: loop exit
PB: predicated region body
PF: predicated region fallthrough
CT: control target
= control target key end

     0   :  { %vm2909_vm0 = vcmask 1041409   ;;  %vm2911_vm1 = vcmask 1045509   ;;  %vm2914_vm2 = vcmask 1042434   ;;  %vm2916_vm3 = vcmask 1046534   ;;  %s12412_s3 = inlined_call_operand.vmem [shape: bf16[2048,128], index: 3, kind: input, shape index: {}]   ;;  %s12413_s0 = inlined_call_operand.vmem [shape: bf16[64,2048], index: 0, kind: input, shape index: {}]   ;;  %s12414_s5 = inlined_call_operand.vmem [shape: bf16[128,2048], index: 5, kind: input, shape index: {}]   ;;  %s12415_s4 = inlined_call_operand.vmem [shape: f32[1,128], index: 4, kind: input, shape index: {}]   ;;  %s12416_s1 = inlined_call_operand.vmem [shape: f32[1,2048], index: 1, kind: input, shape index: {}]   ;;  %s12417_s2 = inlined_call_operand.vmem [shape: f32[1,2048], index: 2, kind: input, shape index: {}]   ;;  %s12418_s6 = inlined_call_operand.vmem [shape: bf16[2048,128], index: 6, kind: input, shape index: {}]   ;;  %s12419_s7 = inlined_call_operand.vmem [shape: f32[1,4,128], index: 7, kind: output, shape index: {}]  }
   0x1   :  { %v8187_v0 = vld [vmem:[%s12412_s3 + $0x40] sm:$0xff]   ;;  %v8191_v4 = vld [vmem:[%s12412_s3 + $0x48] sm:$0xff]   ;;  %v8195_v8 = vld [vmem:[%s12412_s3 + $0x50] sm:$0xff]   ;;  %vm2919_vm4 = vcmask 1043459   ;;  %vm2921_vm5 = vcmask 1047559  }
   0x2   :  { %v8188_v1 = vld [vmem:[%s12412_s3 + $0xc0] sm:$0xff]   ;;  %7690 = vmatprep.subr.bf16.mxu0 %v8187_v0  ;;  %v8192_v5 = vld [vmem:[%s12412_s3 + $0xc8] sm:$0xff]   ;;  %v8196_v9 = vld [vmem:[%s12412_s3 + $0xd0] sm:$0xff]  }
   0x3   :  { %v8189_v2 = vld [vmem:[%s12412_s3] sm:$0xff]   ;;  %7730 = vmatprep.subr.bf16.mxu1 %v8188_v1  ;;  %v8193_v6 = vld [vmem:[%s12412_s3 + $0x8] sm:$0xff]   ;;  %v8197_v10 = vld [vmem:[%s12412_s3 + $0x10] sm:$0xff]  }
   0x4   :  { %v8190_v3 = vld [vmem:[%s12412_s3 + $0x80] sm:$0xff]   ;;  %7691 = vmatpush3.bf16.msra.mxu0 %v8189_v2  ;;  %v8194_v7 = vld [vmem:[%s12412_s3 + $0x88] sm:$0xff]   ;;  %v8198_v11 = vld [vmem:[%s12412_s3 + $0x90] sm:$0xff]  }
   0x5   :  { %7731 = vmatpush3.bf16.msra.mxu1 %v8190_v3  ;;  %7692 = vmatprep.subr.bf16.mxu0 %v8191_v4  ;;  %v8199_v12 = vld [vmem:[%s12412_s3 + $0x58] sm:$0xff]   ;;  %v8203_v16 = vld [vmem:[%s12412_s3 + $0x60] sm:$0xff]   ;;  %v8207_v20 = vld [vmem:[%s12412_s3 + $0x68] sm:$0xff]  }
   0x6   :  { %7732 = vmatprep.subr.bf16.mxu1 %v8192_v5  ;;  %v8200_v13 = vld [vmem:[%s12412_s3 + $0xd8] sm:$0xff]   ;;  %v8204_v17 = vld [vmem:[%s12412_s3 + $0xe0] sm:$0xff]   ;;  %v8208_v21 = vld [vmem:[%s12412_s3 + $0xe8] sm:$0xff]  }
   0x7   :  { %v8201_v14 = vld [vmem:[%s12412_s3 + $0x18] sm:$0xff]   ;;  %v8205_v18 = vld [vmem:[%s12412_s3 + $0x20] sm:$0xff]   ;;  %v8209_v22 = vld [vmem:[%s12412_s3 + $0x28] sm:$0xff]  }
   0x8   :  { %7693 = vmatpush3.bf16.msra.mxu0 %v8193_v6  ;;  %v8202_v15 = vld [vmem:[%s12412_s3 + $0x98] sm:$0xff]   ;;  %v8206_v19 = vld [vmem:[%s12412_s3 + $0xa0] sm:$0xff]   ;;  %v8210_v23 = vld [vmem:[%s12412_s3 + $0xa8] sm:$0xff]  }
   0x9   :  { %7733 = vmatpush3.bf16.msra.mxu1 %v8194_v7  ;;  %7694 = vmatprep.subr.bf16.mxu0 %v8195_v8  ;;  %v8211_v24 = vld [vmem:[%s12412_s3 + $0x70] sm:$0xff]   ;;  %v8215_v28 = vld [vmem:[%s12412_s3 + $0x78] sm:$0xff]   ;;  %v27_v32 = vld [vmem:[%s12413_s0] sm:$0xff] }
   0xa   :  { %7734 = vmatprep.subr.bf16.mxu1 %v8196_v9  ;;  %v8212_v25 = vld [vmem:[%s12412_s3 + $0xf0] sm:$0xff]   ;;  %v8216_v29 = vld [vmem:[%s12412_s3 + $0xf8] sm:$0xff]   ;;  %v35_v33 = vld [vmem:[%s12413_s0 + $0x40] sm:$0xff] }
   0xb   :  { %v8213_v26 = vld [vmem:[%s12412_s3 + $0x30] sm:$0xff]   ;;  %v8217_v30 = vld [vmem:[%s12412_s3 + $0x38] sm:$0xff]   ;;  %v28_v34 = vld [vmem:[%s12413_s0 + $0x8] sm:$0xff]  ;;  %v7242_v35 = vcombine.low %v27_v32, %v35_v33  ;;  %v7243_v36 = vcombine.high %v27_v32, %v35_v33 }
   0xc   :  { %7695 = vmatpush3.bf16.msra.mxu0 %v8197_v10  ;;  %v8214_v27 = vld [vmem:[%s12412_s3 + $0xb0] sm:$0xff]   ;;  %v8218_v31 = vld [vmem:[%s12412_s3 + $0xb8] sm:$0xff]   ;;  %v36_v37 = vld [vmem:[%s12413_s0 + $0x48] sm:$0xff] }
   0xd   :  { %7735 = vmatpush3.bf16.msra.mxu1 %v8198_v11  ;;  %7696 = vmatprep.subr.bf16.mxu0 %v8199_v12  ;;  %v7244_v38 = vcombine.low %v28_v34, %v36_v37  ;;  %v7245_v39 = vcombine.high %v28_v34, %v36_v37  ;;  %v8219_v40 = vld [vmem:[%s12412_s3 + $0x140] sm:$0xff]   ;;  %v8223_v44 = vld [vmem:[%s12412_s3 + $0x148] sm:$0xff]   ;;  %v8227_v56 = vld [vmem:[%s12412_s3 + $0x150] sm:$0xff]  }
   0xe   :  { %7736 = vmatprep.subr.bf16.mxu1 %v8200_v13  ;;  %1474 = vmatprep.mubr.bf16.mxu0 %v7243_v36  ;;  %v8220_v41 = vld [vmem:[%s12412_s3 + $0x1c0] sm:$0xff]   ;;  %v8224_v45 = vld [vmem:[%s12412_s3 + $0x1c8] sm:$0xff]   ;;  %v8228_v57 = vld [vmem:[%s12412_s3 + $0x1d0] sm:$0xff]  }
   0xf   :  { %1539 = vmatprep.mubr.bf16.mxu1 %v7245_v39  ;;  %v8221_v42 = vld [vmem:[%s12412_s3 + $0x100] sm:$0xff]   ;;  %v8225_v46 = vld [vmem:[%s12412_s3 + $0x108] sm:$0xff]   ;;  %v8229_v58 = vld [vmem:[%s12412_s3 + $0x110] sm:$0xff]  }
  0x10   :  { %7697 = vmatpush3.bf16.msra.mxu0 %v8201_v14  ;;  %v8222_v43 = vld [vmem:[%s12412_s3 + $0x180] sm:$0xff]   ;;  %v8226_v47 = vld [vmem:[%s12412_s3 + $0x188] sm:$0xff]   ;;  %v8230_v59 = vld [vmem:[%s12412_s3 + $0x190] sm:$0xff]  }
  0x11   :  { %7737 = vmatpush3.bf16.msra.mxu1 %v8202_v15  ;;  %7698 = vmatprep.subr.bf16.mxu0 %v8203_v16  ;;  %v43_v48 = vld [vmem:[%s12413_s0 + $0x80] sm:$0xff]  ;;  %v44_v51 = vld [vmem:[%s12413_s0 + $0x88] sm:$0xff]  ;;  %v8231_v60 = vld [vmem:[%s12412_s3 + $0x158] sm:$0xff]  }
  0x12   :  { %7738 = vmatprep.subr.bf16.mxu1 %v8204_v17  ;;  %v51_v49 = vld [vmem:[%s12413_s0 + $0xc0] sm:$0xff]  ;;  %v52_v52 = vld [vmem:[%s12413_s0 + $0xc8] sm:$0xff]  ;;  %v8232_v61 = vld [vmem:[%s12412_s3 + $0x1d8] sm:$0xff]  }
  0x13   :  { %v7259_v50 = vcombine.high %v43_v48, %v51_v49  ;;  %v7258_v53 = vcombine.low %v43_v48, %v51_v49  ;;  %v7261_v54 = vcombine.high %v44_v51, %v52_v52  ;;  %v7260_v55 = vcombine.low %v44_v51, %v52_v52  ;;  %v8233_v62 = vld [vmem:[%s12412_s3 + $0x118] sm:$0xff]   ;;  %v59_v0 = vld [vmem:[%s12413_s0 + $0x100] sm:$0xff]  ;;  %v60_v2 = vld [vmem:[%s12413_s0 + $0x108] sm:$0xff] }
  0x14   :  { %7699 = vmatpush3.bf16.msra.mxu0 %v8205_v18  ;;  %v8234_v63 = vld [vmem:[%s12412_s3 + $0x198] sm:$0xff]   ;;  %v67_v1 = vld [vmem:[%s12413_s0 + $0x140] sm:$0xff]  ;;  %v68_v3 = vld [vmem:[%s12413_s0 + $0x148] sm:$0xff] }
  0x15   :  { %7739 = vmatpush3.bf16.msra.mxu1 %v8206_v19  ;;  %7700 = vmatprep.subr.bf16.mxu0 %v8207_v20  ;;  %v7275_v4 = vcombine.high %v59_v0, %v67_v1  ;;  %v7277_v5 = vcombine.high %v60_v2, %v68_v3  ;;  %v7274_v6 = vcombine.low %v59_v0, %v67_v1  ;;  %v8235_v8 = vld [vmem:[%s12412_s3 + $0x160] sm:$0xff]   ;;  %v8239_v12 = vld [vmem:[%s12412_s3 + $0x168] sm:$0xff]   ;;  %v29_v32 = vld [vmem:[%s12413_s0 + $0x10] sm:$0xff] }
  0x16   :  { %7740 = vmatprep.subr.bf16.mxu1 %v8208_v21  ;;  %v7276_v7 = vcombine.low %v60_v2, %v68_v3  ;;  %v8236_v9 = vld [vmem:[%s12412_s3 + $0x1e0] sm:$0xff]   ;;  %v8240_v13 = vld [vmem:[%s12412_s3 + $0x1e8] sm:$0xff]   ;;  %v37_v33 = vld [vmem:[%s12413_s0 + $0x50] sm:$0xff] }
  0x17   :  { %v8237_v10 = vld [vmem:[%s12412_s3 + $0x120] sm:$0xff]   ;;  %v8241_v14 = vld [vmem:[%s12412_s3 + $0x128] sm:$0xff]   ;;  %v7246_v34 = vcombine.low %v29_v32, %v37_v33  ;;  %v30_v36 = vld [vmem:[%s12413_s0 + $0x18] sm:$0xff] }
  0x18   :  { %7701 = vmatpush3.bf16.msra.mxu0 %v8209_v22  ;;  %v8238_v11 = vld [vmem:[%s12412_s3 + $0x1a0] sm:$0xff]   ;;  %v8242_v15 = vld [vmem:[%s12412_s3 + $0x1a8] sm:$0xff]   ;;  %v38_v37 = vld [vmem:[%s12413_s0 + $0x58] sm:$0xff] }
  0x19   :  { %7741 = vmatpush3.bf16.msra.mxu1 %v8210_v23  ;;  %7702 = vmatprep.subr.bf16.mxu0 %v8211_v24  ;;  %v75_v16 = vld [vmem:[%s12413_s0 + $0x180] sm:$0xff]  ;;  %v76_v18 = vld [vmem:[%s12413_s0 + $0x188] sm:$0xff]  ;;  %v8243_v24 = vld [vmem:[%s12412_s3 + $0x170] sm:$0xff]   ;;  %v7249_v39 = vcombine.high %v30_v36, %v38_v37 }
  0x1a   :  { %7742 = vmatprep.subr.bf16.mxu1 %v8212_v25  ;;  %v83_v17 = vld [vmem:[%s12413_s0 + $0x1c0] sm:$0xff]  ;;  %v84_v20 = vld [vmem:[%s12413_s0 + $0x1c8] sm:$0xff]  ;;  %v8244_v25 = vld [vmem:[%s12412_s3 + $0x1f0] sm:$0xff]  }
  0x1b   :  { %v7291_v19 = vcombine.high %v75_v16, %v83_v17  ;;  %v7290_v21 = vcombine.low %v75_v16, %v83_v17  ;;  %v7293_v22 = vcombine.high %v76_v18, %v84_v20  ;;  %v7292_v23 = vcombine.low %v76_v18, %v84_v20  ;;  %v45_v48 = vld [vmem:[%s12413_s0 + $0x90] sm:$0xff]  ;;  %v54_v51 = vld [vmem:[%s12413_s0 + $0xd8] sm:$0xff] }
  0x1c   :  { %7703 = vmatpush3.bf16.msra.mxu0 %v8213_v26  ;;  %v8245_v26 = vld [vmem:[%s12412_s3 + $0x130] sm:$0xff]   ;;  %v62_v2 = vld [vmem:[%s12413_s0 + $0x118] sm:$0xff] }
  0x1d   :  { %7743 = vmatpush3.bf16.msra.mxu1 %v8214_v27  ;;  %7704 = vmatprep.subr.bf16.mxu0 %v8215_v28  ;;  %v8246_v27 = vld [vmem:[%s12412_s3 + $0x1b0] sm:$0xff]   ;;  %v8247_v28 = vld [vmem:[%s12412_s3 + $0x178] sm:$0xff]  }
  0x1e   :  { %7744 = vmatprep.subr.bf16.mxu1 %v8216_v29  ;;  %v8248_v29 = vld [vmem:[%s12412_s3 + $0x1f8] sm:$0xff]   ;;  %v53_v49 = vld [vmem:[%s12413_s0 + $0xd0] sm:$0xff] }
  0x1f   :  { %v7263_v52 = vcombine.high %v45_v48, %v53_v49  ;;  %v61_v0 = vld [vmem:[%s12413_s0 + $0x110] sm:$0xff]  ;;  %v86_v20 = vld [vmem:[%s12413_s0 + $0x1d8] sm:$0xff] }
  0x20   :  { %7705 = vmatpush3.bf16.msra.mxu0 %v8217_v30  ;;  %v8249_v30 = vld [vmem:[%s12412_s3 + $0x138] sm:$0xff]   ;;  %v69_v1 = vld [vmem:[%s12413_s0 + $0x150] sm:$0xff] }
  0x21   :  { %7745 = vmatpush3.bf16.msra.mxu1 %v8218_v31  ;;  %7770 = vmatprep.subr.bf16.mxu0 %v8219_v40  ;;  %v8250_v31 = vld [vmem:[%s12412_s3 + $0x1b8] sm:$0xff]   ;;  %v8251_v40 = vld [vmem:[%s12412_s3 + $0x240] sm:$0xff]   ;;  %v7279_v3 = vcombine.high %v61_v0, %v69_v1  ;;  %v77_v16 = vld [vmem:[%s12413_s0 + $0x190] sm:$0xff] }
  0x22   :  { %7810 = vmatprep.subr.bf16.mxu1 %v8220_v41  ;;  %v8252_v41 = vld [vmem:[%s12412_s3 + $0x2c0] sm:$0xff]   ;;  %v85_v17 = vld [vmem:[%s12413_s0 + $0x1d0] sm:$0xff] }
  0x23   :  { %1475 = vmatmul.mubr.bf16.vlgmr.msra.gmra.mrb[0].mxu0 %v7242_v35  ;;  %v7247_v35 = vcombine.high %v29_v32, %v37_v33  ;;  %v7295_v18 = vcombine.high %v77_v16, %v85_v17  ;;  %v31_v32 = vld [vmem:[%s12413_s0 + $0x20] sm:$0xff] }
  0x24   :  { %1540 = vmatmul.mubr.bf16.vlgmr.msra.gmra.mrb[0].mxu1 %v7244_v38  ;;  %7771 = vmatpush3.bf16.msra.mxu0 %v8221_v42  ;;  %v7248_v38 = vcombine.low %v30_v36, %v38_v37  ;;  %v8253_v42 = vld [vmem:[%s12412_s3 + $0x200] sm:$0xff]  }
  0x25   :  { %7811 = vmatpush3.bf16.msra.mxu1 %v8222_v43  ;;  %7772 = vmatprep.subr.bf16.mxu0 %v8223_v44  ;;  %v8254_v43 = vld [vmem:[%s12412_s3 + $0x280] sm:$0xff]   ;;  %v8255_v44 = vld [vmem:[%s12412_s3 + $0x248] sm:$0xff]  }
  0x26   :  { %7812 = vmatprep.subr.bf16.mxu1 %v8224_v45  ;;  %1482 = vmatprep.mubr.bf16.mxu0 %v7259_v50  ;;  %v8256_v45 = vld [vmem:[%s12412_s3 + $0x2c8] sm:$0xff]   ;;  %v46_v50 = vld [vmem:[%s12413_s0 + $0x98] sm:$0xff]  ;;  %v39_v33 = vld [vmem:[%s12413_s0 + $0x60] sm:$0xff] }
  0x27   :  { %1547 = vmatprep.mubr.bf16.mxu1 %v7261_v54  ;;  %v7262_v54 = vcombine.low %v45_v48, %v53_v49  ;;  %v7250_v36 = vcombine.low %v31_v32, %v39_v33  ;;  %v7251_v37 = vcombine.high %v31_v32, %v39_v33  ;;  %v47_v48 = vld [vmem:[%s12413_s0 + $0xa0] sm:$0xff]  ;;  %v33_v32 = vld [vmem:[%s12413_s0 + $0x30] sm:$0xff] }
  0x28   :  { %7773 = vmatpush3.bf16.msra.mxu0 %v8225_v46  ;;  %v8257_v46 = vld [vmem:[%s12412_s3 + $0x208] sm:$0xff]   ;;  %v55_v49 = vld [vmem:[%s12413_s0 + $0xe0] sm:$0xff]  ;;  %v41_v33 = vld [vmem:[%s12413_s0 + $0x70] sm:$0xff] }
  0x29   :  { %7813 = vmatpush3.bf16.msra.mxu1 %v8226_v47  ;;  %7774 = vmatprep.subr.bf16.mxu0 %v8227_v56  ;;  %v8258_v47 = vld [vmem:[%s12412_s3 + $0x288] sm:$0xff]   ;;  %v8259_v56 = vld [vmem:[%s12412_s3 + $0x250] sm:$0xff]  }
  0x2a   :  { %7814 = vmatprep.subr.bf16.mxu1 %v8228_v57  ;;  %v8260_v57 = vld [vmem:[%s12412_s3 + $0x2d0] sm:$0xff]  }
  0x2b   :  { %1483 = vmatmul.mubr.bf16.gmra.mrb[4].mxu0 %v7258_v53  ;;  %v7265_v53 = vcombine.high %v46_v50, %v54_v51 }
  0x2c   :  { %1548 = vmatmul.mubr.bf16.gmra.mrb[4].mxu1 %v7260_v55  ;;  %7775 = vmatpush3.bf16.msra.mxu0 %v8229_v58  ;;  %v7264_v55 = vcombine.low %v46_v50, %v54_v51  ;;  %v8261_v58 = vld [vmem:[%s12412_s3 + $0x210] sm:$0xff]   ;;  %v48_v50 = vld [vmem:[%s12413_s0 + $0xa8] sm:$0xff]  ;;  %v7267_v51 = vcombine.high %v47_v48, %v55_v49 }
  0x2d   :  { %7815 = vmatpush3.bf16.msra.mxu1 %v8230_v59  ;;  %7776 = vmatprep.subr.bf16.mxu0 %v8231_v60  ;;  %v8262_v59 = vld [vmem:[%s12412_s3 + $0x290] sm:$0xff]   ;;  %v8263_v60 = vld [vmem:[%s12412_s3 + $0x258] sm:$0xff]  }
  0x2e   :  { %7816 = vmatprep.subr.bf16.mxu1 %v8232_v61  ;;  %1490 = vmatprep.mubr.bf16.mxu0 %v7275_v4  ;;  %v8264_v61 = vld [vmem:[%s12412_s3 + $0x2d8] sm:$0xff]  }
  0x2f   :  { %1555 = vmatprep.mubr.bf16.mxu1 %v7277_v5  ;;  %v70_v4 = vld [vmem:[%s12413_s0 + $0x158] sm:$0xff]  ;;  %v7278_v5 = vcombine.low %v61_v0, %v69_v1  ;;  %v63_v0 = vld [vmem:[%s12413_s0 + $0x120] sm:$0xff] }
  0x30   :  { %7777 = vmatpush3.bf16.msra.mxu0 %v8233_v62  ;;  %v8265_v62 = vld [vmem:[%s12412_s3 + $0x218] sm:$0xff]   ;;  %v71_v1 = vld [vmem:[%s12413_s0 + $0x160] sm:$0xff] }
  0x31   :  { %7817 = vmatpush3.bf16.msra.mxu1 %v8234_v63  ;;  %7778 = vmatprep.subr.bf16.mxu0 %v8235_v8  ;;  %v8266_v63 = vld [vmem:[%s12412_s3 + $0x298] sm:$0xff]   ;;  %v8267_v8 = vld [vmem:[%s12412_s3 + $0x260] sm:$0xff]  }
  0x32   :  { %7818 = vmatprep.subr.bf16.mxu1 %v8236_v9  ;;  %v8268_v9 = vld [vmem:[%s12412_s3 + $0x2e0] sm:$0xff]  }
  0x33   :  { %1491 = vmatmul.mubr.bf16.gmra.mrb[8].mxu0 %v7274_v6  ;;  %v7281_v6 = vcombine.high %v62_v2, %v70_v4 }
  0x34   :  { %1556 = vmatmul.mubr.bf16.gmra.mrb[8].mxu1 %v7276_v7  ;;  %7779 = vmatpush3.bf16.msra.mxu0 %v8237_v10  ;;  %v7280_v7 = vcombine.low %v62_v2, %v70_v4  ;;  %v8269_v10 = vld [vmem:[%s12412_s3 + $0x220] sm:$0xff]   ;;  %v7283_v2 = vcombine.high %v63_v0, %v71_v1  ;;  %v72_v4 = vld [vmem:[%s12413_s0 + $0x168] sm:$0xff] }
  0x35   :  { %7819 = vmatpush3.bf16.msra.mxu1 %v8238_v11  ;;  %7780 = vmatprep.subr.bf16.mxu0 %v8239_v12  ;;  %v8270_v11 = vld [vmem:[%s12412_s3 + $0x2a0] sm:$0xff]   ;;  %v8271_v12 = vld [vmem:[%s12412_s3 + $0x268] sm:$0xff]  }
  0x36   :  { %7820 = vmatprep.subr.bf16.mxu1 %v8240_v13  ;;  %1498 = vmatprep.mubr.bf16.mxu0 %v7291_v19  ;;  %v8272_v13 = vld [vmem:[%s12412_s3 + $0x2e8] sm:$0xff]   ;;  %v78_v19 = vld [vmem:[%s12413_s0 + $0x198] sm:$0xff] }
  0x37   :  { %1563 = vmatprep.mubr.bf16.mxu1 %v7293_v22  ;;  %v7297_v22 = vcombine.high %v78_v19, %v86_v20 }
  0x38   :  { %7781 = vmatpush3.bf16.msra.mxu0 %v8241_v14  ;;  %v8273_v14 = vld [vmem:[%s12412_s3 + $0x228] sm:$0xff]  }
  0x39   :  { %7821 = vmatpush3.bf16.msra.mxu1 %v8242_v15  ;;  %7782 = vmatprep.subr.bf16.mxu0 %v8243_v24  ;;  %v8274_v15 = vld [vmem:[%s12412_s3 + $0x2a8] sm:$0xff]   ;;  %v8275_v24 = vld [vmem:[%s12412_s3 + $0x270] sm:$0xff]  }
  0x3a   :  { %7822 = vmatprep.subr.bf16.mxu1 %v8244_v25  ;;  %v8276_v25 = vld [vmem:[%s12412_s3 + $0x2f0] sm:$0xff]  }
  0x3b   :  { %1499 = vmatmul.mubr.bf16.gmra.mrb[12].mxu0 %v7290_v21  ;;  %v7294_v21 = vcombine.low %v77_v16, %v85_v17  ;;  %v79_v16 = vld [vmem:[%s12413_s0 + $0x1a0] sm:$0xff] }
  0x3c   :  { %1564 = vmatmul.mubr.bf16.gmra.mrb[12].mxu1 %v7292_v23  ;;  %7783 = vmatpush3.bf16.msra.mxu0 %v8245_v26  ;;  %v7296_v23 = vcombine.low %v78_v19, %v86_v20  ;;  %v8277_v26 = vld [vmem:[%s12412_s3 + $0x230] sm:$0xff]   ;;  %v87_v17 = vld [vmem:[%s12413_s0 + $0x1e0] sm:$0xff]  ;;  %v88_v19 = vld [vmem:[%s12413_s0 + $0x1e8] sm:$0xff] }
  0x3d   :  { %7823 = vmatpush3.bf16.msra.mxu1 %v8246_v27  ;;  %7784 = vmatprep.subr.bf16.mxu0 %v8247_v28  ;;  %v8278_v27 = vld [vmem:[%s12412_s3 + $0x2b0] sm:$0xff]   ;;  %v8279_v28 = vld [vmem:[%s12412_s3 + $0x278] sm:$0xff]   ;;  %v7299_v20 = vcombine.high %v79_v16, %v87_v17 }
  0x3e   :  { %7824 = vmatprep.subr.bf16.mxu1 %v8248_v29  ;;  %1604 = vmatprep.mubr.bf16.mxu0 %v7247_v35  ;;  %v8280_v29 = vld [vmem:[%s12412_s3 + $0x2f8] sm:$0xff]   ;;  %v40_v35 = vld [vmem:[%s12413_s0 + $0x68] sm:$0xff] }
  0x3f   :  { %1669 = vmatprep.mubr.bf16.mxu1 %v7249_v39 }
  0x40   :  { %7785 = vmatpush3.bf16.msra.mxu0 %v8249_v30  ;;  %v8281_v30 = vld [vmem:[%s12412_s3 + $0x238] sm:$0xff]  }
  0x41   :  { %7825 = vmatpush3.bf16.msra.mxu1 %v8250_v31  ;;  %7850 = vmatprep.subr.bf16.mxu0 %v8251_v40  ;;  %v8282_v31 = vld [vmem:[%s12412_s3 + $0x2b8] sm:$0xff]   ;;  %v8283_v40 = vld [vmem:[%s12412_s3 + $0x340] sm:$0xff]  }
  0x42   :  { %7890 = vmatprep.subr.bf16.mxu1 %v8252_v41  ;;  %v8284_v41 = vld [vmem:[%s12412_s3 + $0x3c0] sm:$0xff]  }
  0x43   :  { %1605 = vmatmul.mubr.bf16.vlgmr.msra.gmra.mrb[16].mxu0 %v7246_v34  ;;  %v32_v34 = vld [vmem:[%s12413_s0 + $0x28] sm:$0xff] }
  0x44   :  { %1670 = vmatmul.mubr.bf16.vlgmr.msra.gmra.mrb[16].mxu1 %v7248_v38  ;;  %7851 = vmatpush3.bf16.msra.mxu0 %v8253_v42  ;;  %v7252_v38 = vcombine.low %v32_v34, %v40_v35  ;;  %v7253_v39 = vcombine.high %v32_v34, %v40_v35  ;;  %v8285_v42 = vld [vmem:[%s12412_s3 + $0x300] sm:$0xff]   ;;  %v34_v34 = vld [vmem:[%s12413_s0 + $0x38] sm:$0xff]  ;;  %v7254_v35 = vcombine.low %v33_v32, %v41_v33 }
  0x45   :  { %7891 = vmatpush3.bf16.msra.mxu1 %v8254_v43  ;;  %7852 = vmatprep.subr.bf16.mxu0 %v8255_v44  ;;  %v8286_v43 = vld [vmem:[%s12412_s3 + $0x380] sm:$0xff]   ;;  %v8287_v44 = vld [vmem:[%s12412_s3 + $0x348] sm:$0xff]  }
  0x46   :  { %7892 = vmatprep.subr.bf16.mxu1 %v8256_v45  ;;  %1612 = vmatprep.mubr.bf16.mxu0 %v7263_v52  ;;  %v8288_v45 = vld [vmem:[%s12412_s3 + $0x3c8] sm:$0xff]  }
  0x47   :  { %1677 = vmatprep.mubr.bf16.mxu1 %v7265_v53  ;;  %v56_v52 = vld [vmem:[%s12413_s0 + $0xe8] sm:$0xff]  ;;  %v7266_v53 = vcombine.low %v47_v48, %v55_v49  ;;  %v66_v48 = vld [vmem:[%s12413_s0 + $0x138] sm:$0xff] }
  0x48   :  { %7853 = vmatpush3.bf16.msra.mxu0 %v8257_v46  ;;  %v8289_v46 = vld [vmem:[%s12412_s3 + $0x308] sm:$0xff]   ;;  %v74_v49 = vld [vmem:[%s12413_s0 + $0x178] sm:$0xff] }
  0x49   :  { %7893 = vmatpush3.bf16.msra.mxu1 %v8258_v47  ;;  %7854 = vmatprep.subr.bf16.mxu0 %v8259_v56  ;;  %v8290_v47 = vld [vmem:[%s12412_s3 + $0x388] sm:$0xff]   ;;  %v8291_v56 = vld [vmem:[%s12412_s3 + $0x350] sm:$0xff]  }
  0x4a   :  { %7894 = vmatprep.subr.bf16.mxu1 %v8260_v57  ;;  %v8292_v57 = vld [vmem:[%s12412_s3 + $0x3d0] sm:$0xff]  }
  0x4b   :  { %1613 = vmatmul.mubr.bf16.gmra.mrb[20].mxu0 %v7262_v54  ;;  %v7269_v54 = vcombine.high %v48_v50, %v56_v52 }
  0x4c   :  { %1678 = vmatmul.mubr.bf16.gmra.mrb[20].mxu1 %v7264_v55  ;;  %7855 = vmatpush3.bf16.msra.mxu0 %v8261_v58  ;;  %v7268_v55 = vcombine.low %v48_v50, %v56_v52  ;;  %v8293_v58 = vld [vmem:[%s12412_s3 + $0x310] sm:$0xff]  }
  0x4d   :  { %7895 = vmatpush3.bf16.msra.mxu1 %v8262_v59  ;;  %7856 = vmatprep.subr.bf16.mxu0 %v8263_v60  ;;  %v8294_v59 = vld [vmem:[%s12412_s3 + $0x390] sm:$0xff]   ;;  %v8295_v60 = vld [vmem:[%s12412_s3 + $0x358] sm:$0xff]  }
  0x4e   :  { %7896 = vmatprep.subr.bf16.mxu1 %v8264_v61  ;;  %1620 = vmatprep.mubr.bf16.mxu0 %v7279_v3  ;;  %v8296_v61 = vld [vmem:[%s12412_s3 + $0x3d8] sm:$0xff]   ;;  %v64_v3 = vld [vmem:[%s12413_s0 + $0x128] sm:$0xff] }
  0x4f   :  { %1685 = vmatprep.mubr.bf16.mxu1 %v7281_v6  ;;  %v7285_v6 = vcombine.high %v64_v3, %v72_v4 }
  0x50   :  { %7857 = vmatpush3.bf16.msra.mxu0 %v8265_v62  ;;  %v8297_v62 = vld [vmem:[%s12412_s3 + $0x318] sm:$0xff]  }
  0x51   :  { %7897 = vmatpush3.bf16.msra.mxu1 %v8266_v63  ;;  %7858 = vmatprep.subr.bf16.mxu0 %v8267_v8  ;;  %v8298_v63 = vld [vmem:[%s12412_s3 + $0x398] sm:$0xff]   ;;  %v8299_v8 = vld [vmem:[%s12412_s3 + $0x360] sm:$0xff]  }
  0x52   :  { %7898 = vmatprep.subr.bf16.mxu1 %v8268_v9  ;;  %v8300_v9 = vld [vmem:[%s12412_s3 + $0x3e0] sm:$0xff]  }
  0x53   :  { %1621 = vmatmul.mubr.bf16.gmra.mrb[24].mxu0 %v7278_v5  ;;  %v7282_v5 = vcombine.low %v63_v0, %v71_v1  ;;  %v1974_v0 = vld [vmem:[%s12414_s5] sm:$0xff] }
  0x54   :  { %1686 = vmatmul.mubr.bf16.gmra.mrb[24].mxu1 %v7280_v7  ;;  %7859 = vmatpush3.bf16.msra.mxu0 %v8269_v10  ;;  %v7284_v7 = vcombine.low %v64_v3, %v72_v4  ;;  %v8301_v10 = vld [vmem:[%s12412_s3 + $0x320] sm:$0xff]  }
  0x55   :  { %7899 = vmatpush3.bf16.msra.mxu1 %v8270_v11  ;;  %7860 = vmatprep.subr.bf16.mxu0 %v8271_v12  ;;  %v8302_v11 = vld [vmem:[%s12412_s3 + $0x3a0] sm:$0xff]   ;;  %v8303_v12 = vld [vmem:[%s12412_s3 + $0x368] sm:$0xff]  }
  0x56   :  { %7900 = vmatprep.subr.bf16.mxu1 %v8272_v13  ;;  %1628 = vmatprep.mubr.bf16.mxu0 %v7295_v18  ;;  %v8304_v13 = vld [vmem:[%s12412_s3 + $0x3e8] sm:$0xff]   ;;  %v1976_v1 = vld [vmem:[%s12414_s5 + $0x40] sm:$0xff] }
  0x57   :  { %1693 = vmatprep.mubr.bf16.mxu1 %v7297_v22  ;;  %v80_v18 = vld [vmem:[%s12413_s0 + $0x1a8] sm:$0xff]  ;;  %v7298_v22 = vcombine.low %v79_v16, %v87_v17  ;;  %v7434_v3 = vcombine.low %v1974_v0, %v1976_v1  ;;  %v7435_v4 = vcombine.high %v1974_v0, %v1976_v1  ;;  %v1982_v16 = vld [vmem:[%s12414_s5 + $0x100] sm:$0xff]  ;;  %v9703_v0 = vld [vmem:[%s12414_s5 + $0x10] sm:$0xff] }
  0x58   :  { %7861 = vmatpush3.bf16.msra.mxu0 %v8273_v14  ;;  %v8305_v14 = vld [vmem:[%s12412_s3 + $0x328] sm:$0xff]   ;;  %v1984_v17 = vld [vmem:[%s12414_s5 + $0x140] sm:$0xff]  ;;  %v9708_v1 = vld [vmem:[%s12414_s5 + $0x50] sm:$0xff] }
  0x59   :  { %7901 = vmatpush3.bf16.msra.mxu1 %v8274_v15  ;;  %7862 = vmatprep.subr.bf16.mxu0 %v8275_v24  ;;  %v8306_v15 = vld [vmem:[%s12412_s3 + $0x3a8] sm:$0xff]   ;;  %v8307_v24 = vld [vmem:[%s12412_s3 + $0x370] sm:$0xff]  }
  0x5a   :  { %7902 = vmatprep.subr.bf16.mxu1 %v8276_v25  ;;  %v8308_v25 = vld [vmem:[%s12412_s3 + $0x3f0] sm:$0xff]  }
  0x5b   :  { %1629 = vmatmul.mubr.bf16.gmra.mrb[28].mxu0 %v7294_v21  ;;  %v7301_v21 = vcombine.high %v80_v18, %v88_v19 }
  0x5c   :  { %1694 = vmatmul.mubr.bf16.gmra.mrb[28].mxu1 %v7296_v23  ;;  %7863 = vmatpush3.bf16.msra.mxu0 %v8277_v26  ;;  %v7300_v23 = vcombine.low %v80_v18, %v88_v19  ;;  %v8309_v26 = vld [vmem:[%s12412_s3 + $0x330] sm:$0xff]   ;;  %v1983_v18 = vld [vmem:[%s12414_s5 + $0x108] sm:$0xff]  ;;  %v7442_v19 = vcombine.low %v1982_v16, %v1984_v17 }
  0x5d   :  { %7903 = vmatpush3.bf16.msra.mxu1 %v8278_v27  ;;  %7864 = vmatprep.subr.bf16.mxu0 %v8279_v28  ;;  %v8310_v27 = vld [vmem:[%s12412_s3 + $0x3b0] sm:$0xff]   ;;  %v8311_v28 = vld [vmem:[%s12412_s3 + $0x378] sm:$0xff]  }
  0x5e   :  { %7904 = vmatprep.subr.bf16.mxu1 %v8280_v29  ;;  %1734 = vmatprep.mubr.bf16.mxu0 %v7251_v37  ;;  %v8312_v29 = vld [vmem:[%s12412_s3 + $0x3f8] sm:$0xff]  }
  0x5f   :  { %1799 = vmatprep.mubr.bf16.mxu1 %v7253_v39  ;;  %v42_v37 = vld [vmem:[%s12413_s0 + $0x78] sm:$0xff]  ;;  %v57_v39 = vld [vmem:[%s12413_s0 + $0xf0] sm:$0xff] }
  0x60   :  { %7865 = vmatpush3.bf16.msra.mxu0 %v8281_v30  ;;  %v8313_v30 = vld [vmem:[%s12412_s3 + $0x338] sm:$0xff]  }
  0x61   :  { %7905 = vmatpush3.bf16.msra.mxu1 %v8282_v31  ;;  %7930 = vmatprep.subr.bf16.mxu0 %v8283_v40  ;;  %v8314_v31 = vld [vmem:[%s12412_s3 + $0x3b8] sm:$0xff]   ;;  %v7256_v40 = vcombine.low %v34_v34, %v42_v37 }
  0x62   :  { %7970 = vmatprep.subr.bf16.mxu1 %v8284_v41  ;;  %v7257_v41 = vcombine.high %v34_v34, %v42_v37  ;;  %v1991_v34 = vld [vmem:[%s12414_s5 + $0x208] sm:$0xff] }
  0x63   :  { %1735 = vmatmul.mubr.bf16.vlgmr.msra.gmra.mrb[32].mxu0 %v7250_v36  ;;  %v7255_v36 = vcombine.high %v33_v32, %v41_v33  ;;  %v1990_v32 = vld [vmem:[%s12414_s5 + $0x200] sm:$0xff] }
  0x64   :  { %1800 = vmatmul.mubr.bf16.vlgmr.msra.gmra.mrb[32].mxu1 %v7252_v38  ;;  %7931 = vmatpush3.bf16.msra.mxu0 %v8285_v42  ;;  %v49_v38 = vld [vmem:[%s12413_s0 + $0xb0] sm:$0xff]  ;;  %v1992_v33 = vld [vmem:[%s12414_s5 + $0x240] sm:$0xff] }
  0x65   :  { %7971 = vmatpush3.bf16.msra.mxu1 %v8286_v43  ;;  %7932 = vmatprep.subr.bf16.mxu0 %v8287_v44  ;;  %v7271_v42 = vcombine.high %v49_v38, %v57_v39  ;;  %v50_v43 = vld [vmem:[%s12413_s0 + $0xb8] sm:$0xff]  ;;  %v7270_v50 = vcombine.low %v49_v38, %v57_v39  ;;  %v7450_v37 = vcombine.low %v1990_v32, %v1992_v33 }
  0x66   :  { %7972 = vmatprep.subr.bf16.mxu1 %v8288_v45  ;;  %1742 = vmatprep.mubr.bf16.mxu0 %v7267_v51  ;;  %v58_v44 = vld [vmem:[%s12413_s0 + $0xf8] sm:$0xff] }
  0x67   :  { %1807 = vmatprep.mubr.bf16.mxu1 %v7269_v54  ;;  %v7273_v45 = vcombine.high %v50_v43, %v58_v44  ;;  %v7272_v51 = vcombine.low %v50_v43, %v58_v44  ;;  %v81_v54 = vld [vmem:[%s12413_s0 + $0x1b0] sm:$0xff]  ;;  %v1997_v44 = vld [vmem:[%s12414_s5 + $0x2c8] sm:$0xff] }
  0x68   :  { %7933 = vmatpush3.bf16.msra.mxu0 %v8289_v46  ;;  %v65_v46 = vld [vmem:[%s12413_s0 + $0x130] sm:$0xff] }
  0x69   :  { %7973 = vmatpush3.bf16.msra.mxu1 %v8290_v47  ;;  %7934 = vmatprep.subr.bf16.mxu0 %v8291_v56  ;;  %v73_v47 = vld [vmem:[%s12413_s0 + $0x170] sm:$0xff]  ;;  %v82_v56 = vld [vmem:[%s12413_s0 + $0x1b8] sm:$0xff] }
  0x6a   :  { %7974 = vmatprep.subr.bf16.mxu1 %v8292_v57  ;;  %v7287_v52 = vcombine.high %v65_v46, %v73_v47  ;;  %v90_v57 = vld [vmem:[%s12413_s0 + $0x1f8] sm:$0xff] }
  0x6b   :  { %1743 = vmatmul.mubr.bf16.gmra.mrb[36].mxu0 %v7266_v53  ;;  %v7289_v53 = vcombine.high %v66_v48, %v74_v49 }
  0x6c   :  { %1808 = vmatmul.mubr.bf16.gmra.mrb[36].mxu1 %v7268_v55  ;;  %7935 = vmatpush3.bf16.msra.mxu0 %v8293_v58  ;;  %v89_v55 = vld [vmem:[%s12413_s0 + $0x1f0] sm:$0xff]  ;;  %v7286_v58 = vcombine.low %v65_v46, %v73_v47 }
  0x6d   :  { %7975 = vmatpush3.bf16.msra.mxu1 %v8294_v59  ;;  %7936 = vmatprep.subr.bf16.mxu0 %v8295_v60  ;;  %v7288_v59 = vcombine.low %v66_v48, %v74_v49  ;;  %v7303_v60 = vcombine.high %v81_v54, %v89_v55  ;;  %v1998_v48 = vld [vmem:[%s12414_s5 + $0x300] sm:$0xff] }
  0x6e   :  { %7976 = vmatprep.subr.bf16.mxu1 %v8296_v61  ;;  %1750 = vmatprep.mubr.bf16.mxu0 %v7283_v2  ;;  %v7305_v61 = vcombine.high %v82_v56, %v90_v57  ;;  %v1975_v2 = vld [vmem:[%s12414_s5 + $0x8] sm:$0xff]  ;;  %v2000_v49 = vld [vmem:[%s12414_s5 + $0x340] sm:$0xff] }
  0x6f   :  { %1815 = vmatprep.mubr.bf16.mxu1 %v7285_v6 }
  0x70   :  { %7937 = vmatpush3.bf16.msra.mxu0 %v8297_v62  ;;  %v7302_v62 = vcombine.low %v81_v54, %v89_v55 }
  0x71   :  { %7977 = vmatpush3.bf16.msra.mxu1 %v8298_v63  ;;  %7938 = vmatprep.subr.bf16.mxu0 %v8299_v8  ;;  %v7304_v63 = vcombine.low %v82_v56, %v90_v57  ;;  %v1978_v8 = vld [vmem:[%s12414_s5 + $0x80] sm:$0xff] }
  0x72   :  { %7978 = vmatprep.subr.bf16.mxu1 %v8300_v9  ;;  %v1980_v9 = vld [vmem:[%s12414_s5 + $0xc0] sm:$0xff] }
  0x73   :  { %1751 = vmatmul.mubr.bf16.gmra.mrb[40].mxu0 %v7282_v5  ;;  %v1977_v5 = vld [vmem:[%s12414_s5 + $0x48] sm:$0xff]  ;;  %v2002_v56 = vld [vmem:[%s12414_s5 + $0x380] sm:$0xff] }
  0x74   :  { %1816 = vmatmul.mubr.bf16.gmra.mrb[40].mxu1 %v7284_v7  ;;  %7939 = vmatpush3.bf16.msra.mxu0 %v8301_v10  ;;  %v7436_v6 = vcombine.low %v1975_v2, %v1977_v5  ;;  %v7437_v7 = vcombine.high %v1975_v2, %v1977_v5  ;;  %v1979_v10 = vld [vmem:[%s12414_s5 + $0x88] sm:$0xff]  ;;  %v2004_v57 = vld [vmem:[%s12414_s5 + $0x3c0] sm:$0xff]  ;;  %v9713_v2 = vld [vmem:[%s12414_s5 + $0x18] sm:$0xff]  ;;  %v8987_v5 = vmov 0  }
  0x75   :  { %7979 = vmatpush3.bf16.msra.mxu1 %v8302_v11  ;;  %7940 = vmatprep.subr.bf16.mxu0 %v8303_v12  ;;  %v7439_v11 = vcombine.high %v1978_v8, %v1980_v9  ;;  %v1981_v12 = vld [vmem:[%s12414_s5 + $0xc8] sm:$0xff] }
  0x76   :  { %7980 = vmatprep.subr.bf16.mxu1 %v8304_v13  ;;  %1758 = vmatprep.mubr.bf16.mxu0 %v7299_v20  ;;  %v7438_v13 = vcombine.low %v1978_v8, %v1980_v9  ;;  %v7443_v20 = vcombine.high %v1982_v16, %v1984_v17 }
  0x77   :  { %1823 = vmatprep.mubr.bf16.mxu1 %v7301_v21  ;;  %v1985_v21 = vld [vmem:[%s12414_s5 + $0x148] sm:$0xff] }
  0x78   :  { %7941 = vmatpush3.bf16.msra.mxu0 %v8305_v14  ;;  %v7440_v14 = vcombine.low %v1979_v10, %v1981_v12 }
  0x79   :  { %7981 = vmatpush3.bf16.msra.mxu1 %v8306_v15  ;;  %7942 = vmatprep.subr.bf16.mxu0 %v8307_v24  ;;  %v7441_v15 = vcombine.high %v1979_v10, %v1981_v12  ;;  %v1986_v24 = vld [vmem:[%s12414_s5 + $0x180] sm:$0xff] }
  0x7a   :  { %7982 = vmatprep.subr.bf16.mxu1 %v8308_v25  ;;  %v1988_v25 = vld [vmem:[%s12414_s5 + $0x1c0] sm:$0xff] }
  0x7b   :  { %1759 = vmatmul.mubr.bf16.gmra.mrb[44].mxu0 %v7298_v22  ;;  %v7444_v22 = vcombine.low %v1983_v18, %v1985_v21 }
  0x7c   :  { %1824 = vmatmul.mubr.bf16.gmra.mrb[44].mxu1 %v7300_v23  ;;  %7943 = vmatpush3.bf16.msra.mxu0 %v8309_v26  ;;  %v7445_v23 = vcombine.high %v1983_v18, %v1985_v21  ;;  %v1987_v26 = vld [vmem:[%s12414_s5 + $0x188] sm:$0xff] }
  0x7d   :  { %7983 = vmatpush3.bf16.msra.mxu1 %v8310_v27  ;;  %7944 = vmatprep.subr.bf16.mxu0 %v8311_v28  ;;  %v7447_v27 = vcombine.high %v1986_v24, %v1988_v25  ;;  %v1989_v28 = vld [vmem:[%s12414_s5 + $0x1c8] sm:$0xff] }
  0x7e   :  { %7984 = vmatprep.subr.bf16.mxu1 %v8312_v29  ;;  %1864 = vmatprep.mubr.bf16.mxu0 %v7255_v36  ;;  %v7446_v29 = vcombine.low %v1986_v24, %v1988_v25  ;;  %v1993_v36 = vld [vmem:[%s12414_s5 + $0x248] sm:$0xff] }
  0x7f   :  { %1929 = vmatprep.mubr.bf16.mxu1 %v7257_v41  ;;  %v7452_v38 = vcombine.low %v1991_v34, %v1993_v36  ;;  %v7453_v39 = vcombine.high %v1991_v34, %v1993_v36  ;;  %v1996_v41 = vld [vmem:[%s12414_s5 + $0x2c0] sm:$0xff] }
  0x80   :  { %7945 = vmatpush3.bf16.msra.mxu0 %v8313_v30  ;;  %v7448_v30 = vcombine.low %v1987_v26, %v1989_v28 }
  0x81   :  { %7985 = vmatpush3.bf16.msra.mxu1 %v8314_v31  ;;  %2166 = vmatprep.subr.bf16.mxu0 %v7435_v4  ;;  %v7449_v31 = vcombine.high %v1987_v26, %v1989_v28  ;;  %v9720_v4 = vld [vmem:[%s12414_s5 + $0x58] sm:$0xff] }
  0x82   :  { %2239 = vmatprep.subr.bf16.mxu1 %v7437_v7  ;;  %v7468_v7 = vcombine.low %v9713_v2, %v9720_v4  ;;  %v7469_v8 = vcombine.high %v9713_v2, %v9720_v4  ;;  %v9826_v2 = vld [vmem:[%s12414_s5 + $0x1d8] sm:$0xff] }
  0x83   :  { %1865 = vmatmul.mubr.bf16.vlgmr.msra.gmra.mrb[48].mxu0 %v7254_v35  ;;  %v7451_v35 = vcombine.high %v1990_v32, %v1992_v33 }
  0x84   :  { %1930 = vmatmul.mubr.bf16.vlgmr.msra.gmra.mrb[48].mxu1 %v7256_v40  ;;  %1872 = vmatprep.mubr.bf16.mxu0 %v7271_v42  ;;  %v1994_v40 = vld [vmem:[%s12414_s5 + $0x280] sm:$0xff]  ;;  %v1995_v42 = vld [vmem:[%s12414_s5 + $0x288] sm:$0xff] }
  0x85   :  { %1937 = vmatprep.mubr.bf16.mxu1 %v7273_v45  ;;  %2167 = vmatpush1.bf16.msra.mxu0 %v7434_v3  ;;  %v7455_v43 = vcombine.high %v1994_v40, %v1996_v41  ;;  %v7454_v45 = vcombine.low %v1994_v40, %v1996_v41  ;;  %v7456_v46 = vcombine.low %v1995_v42, %v1997_v44 }
  0x86   :  { %2240 = vmatpush1.bf16.msra.mxu1 %v7436_v6  ;;  %2168 = vmatprep.subr.bf16.mxu0 %v7439_v11  ;;  %v7457_v47 = vcombine.high %v1995_v42, %v1997_v44  ;;  %v7467_v3 = vcombine.high %v9703_v0, %v9708_v1  ;;  %v7466_v6 = vcombine.low %v9703_v0, %v9708_v1  ;;  %v7241_v11 = vld [vmem:[%s12415_s4] ss:$0 sm:$0xff]  ;;  %v9816_v0 = vld [vmem:[%s12414_s5 + $0x1d0] sm:$0xff]  ;;  %v9821_v1 = vld [vmem:[%s12414_s5 + $0x198] sm:$0xff] }
  0x87   :  { %2241 = vmatprep.subr.bf16.mxu1 %v7441_v15 }
  0x89   :  { %2169 = vmatpush1.bf16.msra.mxu0 %v7438_v13 }
  0x8a   :  { %2242 = vmatpush1.bf16.msra.mxu1 %v7440_v14  ;;  %2170 = vmatprep.subr.bf16.mxu0 %v7443_v20 }
  0x8b   :  { %1873 = vmatmul.mubr.bf16.gmra.mrb[52].mxu0 %v7270_v50  ;;  %2243 = vmatprep.subr.bf16.mxu1 %v7445_v23  ;;  %v1999_v50 = vld [vmem:[%s12414_s5 + $0x308] sm:$0xff] }
  0x8c   :  { %1938 = vmatmul.mubr.bf16.gmra.mrb[52].mxu1 %v7272_v51  ;;  %1880 = vmatprep.mubr.bf16.mxu0 %v7287_v52  ;;  %v7459_v51 = vcombine.high %v1998_v48, %v2000_v49  ;;  %v2001_v52 = vld [vmem:[%s12414_s5 + $0x348] sm:$0xff] }
  0x8d   :  { %1945 = vmatprep.mubr.bf16.mxu1 %v7289_v53  ;;  %2171 = vmatpush1.bf16.msra.mxu0 %v7442_v19  ;;  %v7458_v53 = vcombine.low %v1998_v48, %v2000_v49  ;;  %v7460_v54 = vcombine.low %v1999_v50, %v2001_v52  ;;  %v7461_v55 = vcombine.high %v1999_v50, %v2001_v52 }
  0x8e   :  { %2244 = vmatpush1.bf16.msra.mxu1 %v7444_v22  ;;  %2172 = vmatprep.subr.bf16.mxu0 %v7447_v27 }
  0x8f   :  { %2245 = vmatprep.subr.bf16.mxu1 %v7449_v31 }
  0x91   :  { %2173 = vmatpush1.bf16.msra.mxu0 %v7446_v29 }
  0x92   :  { %2246 = vmatpush1.bf16.msra.mxu1 %v7448_v30  ;;  %2174 = vmatprep.subr.bf16.mxu0 %v7451_v35 }
  0x93   :  { %1881 = vmatmul.mubr.bf16.gmra.mrb[56].mxu0 %v7286_v58  ;;  %2247 = vmatprep.subr.bf16.mxu1 %v7453_v39  ;;  %v2003_v58 = vld [vmem:[%s12414_s5 + $0x388] sm:$0xff] }
  0x94   :  { %1946 = vmatmul.mubr.bf16.gmra.mrb[56].mxu1 %v7288_v59  ;;  %1888 = vmatprep.mubr.bf16.mxu0 %v7303_v60  ;;  %v7463_v59 = vcombine.high %v2002_v56, %v2004_v57  ;;  %v2005_v60 = vld [vmem:[%s12414_s5 + $0x3c8] sm:$0xff] }
  0x95   :  { %1953 = vmatprep.mubr.bf16.mxu1 %v7305_v61  ;;  %2175 = vmatpush1.bf16.msra.mxu0 %v7450_v37  ;;  %v7462_v61 = vcombine.low %v2002_v56, %v2004_v57 }
  0x96   :  { %2248 = vmatpush1.bf16.msra.mxu1 %v7452_v38  ;;  %2176 = vmatprep.subr.bf16.mxu0 %v7455_v43 }
  0x97   :  { %2249 = vmatprep.subr.bf16.mxu1 %v7457_v47 }
  0x99   :  { %2177 = vmatpush1.bf16.msra.mxu0 %v7454_v45 }
  0x9a   :  { %2250 = vmatpush1.bf16.msra.mxu1 %v7456_v46  ;;  %2178 = vmatprep.subr.bf16.mxu0 %v7459_v51 }
  0x9b   :  { %1889 = vmatmul.mubr.bf16.gmra.mrb[60].mxu0 %v7302_v62  ;;  %2251 = vmatprep.subr.bf16.mxu1 %v7461_v55  ;;  %v7464_v62 = vcombine.low %v2003_v58, %v2005_v60 }
  0x9c   :  { %1954 = vmatmul.mubr.bf16.gmra.mrb[60].mxu1 %v7304_v63  ;;  %v7465_v63 = vcombine.high %v2003_v58, %v2005_v60  ;;  %2198 = vmatprep.mubr.bf16.mxu0 %v8987_v5 }
  0x9d   :  { %2179 = vmatpush1.bf16.msra.mxu0 %v7458_v53  ;;  %2271 = vmatprep.mubr.bf16.mxu1 %v8987_v5 }
  0x9e   :  { %2252 = vmatpush1.bf16.msra.mxu1 %v7460_v54  ;;  %2180 = vmatprep.subr.bf16.mxu0 %v7463_v59 }
  0x9f   :  { %2253 = vmatprep.subr.bf16.mxu1 %v7465_v63 }
  0xa1   :  { %2181 = vmatpush1.bf16.msra.mxu0 %v7462_v61 }
  0xa2   :  { %2254 = vmatpush1.bf16.msra.mxu1 %v7464_v62  ;;  %3128 = vmatprep.subr.bf16.mxu0 %v7467_v3 }
  0xa3   :  { %3201 = vmatprep.subr.bf16.mxu1 %v7469_v8 }
  0xf6   :  { %v7706_v9 = vpop.f32.mrb[0].mxu0 }
  0xf7   :  { %v7746_v10 = vpop.f32.mrb[0].mxu1  ;;  %v7707_v12 = vpop.f32.mrb[1].mxu0 }
  0xf8   :  { %v7708_v13 = vadd.f32 %v7707_v12, %v7706_v9  ;;  %v7747_v14 = vpop.f32.mrb[1].mxu1  ;;  %v7709_v15 = vpop.f32.mrb[2].mxu0 }
  0xf9   :  { %v7748_v16 = vadd.f32 %v7747_v14, %v7746_v10  ;;  %v7749_v17 = vpop.f32.mrb[2].mxu1  ;;  %v7710_v18 = vpop.f32.mrb[3].mxu0 }
  0xfa   :  { %v1477_v19 = vadd.f32 %v7708_v13, %v7241_v11  ;;  %v7711_v20 = vadd.f32 %v7710_v18, %v7709_v15  ;;  %v7750_v21 = vpop.f32.mrb[3].mxu1 }
  0xfb   :  { %v7751_v22 = vadd.f32 %v7750_v21, %v7749_v17 }
  0xfc   :  { %v1542_v23 = vadd.f32 %v7748_v16, %v1477_v19  ;;  %v1480_v24 = vadd.f32 %v7711_v20, %v7241_v11 }
  0xfe   :  { %v9733_v25 = vadd.f32 %v7751_v22, %v1480_v24  ;;  %v7712_v26 = vpop.f32.mrb[4].mxu0 }
  0xff   :  { %v7752_v27 = vpop.f32.mrb[4].mxu1  ;;  %v7713_v28 = vpop.f32.mrb[5].mxu0 }
 0x100   :  { %v7714_v29 = vadd.f32 %v7713_v28, %v7712_v26  ;;  %v7753_v30 = vpop.f32.mrb[5].mxu1  ;;  %v7715_v31 = vpop.f32.mrb[6].mxu0 }
 0x101   :  { %v7754_v32 = vadd.f32 %v7753_v30, %v7752_v27  ;;  %v7755_v33 = vpop.f32.mrb[6].mxu1  ;;  %v7716_v34 = vpop.f32.mrb[7].mxu0 }
 0x102   :  { %v1485_v35 = vadd.f32 %v7714_v29, %v7241_v11  ;;  %v7717_v36 = vadd.f32 %v7716_v34, %v7715_v31  ;;  %v7756_v37 = vpop.f32.mrb[7].mxu1 }
 0x103   :  { %v7757_v38 = vadd.f32 %v7756_v37, %v7755_v33 }
 0x104   :  { %v1550_v39 = vadd.f32 %v7754_v32, %v1485_v35  ;;  %v1488_v40 = vadd.f32 %v7717_v36, %v7241_v11 }
 0x106   :  { %v9735_v41 = vadd.f32 %v7757_v38, %v1488_v40  ;;  %v7718_v42 = vpop.f32.mrb[8].mxu0 }
 0x107   :  { %v7758_v43 = vpop.f32.mrb[8].mxu1  ;;  %v7719_v44 = vpop.f32.mrb[9].mxu0 }
 0x108   :  { %v7759_v45 = vpop.f32.mrb[9].mxu1  ;;  %v7720_v46 = vadd.f32 %v7719_v44, %v7718_v42  ;;  %v7721_v48 = vpop.f32.mrb[10].mxu0 }
 0x109   :  { %v7760_v47 = vadd.f32 %v7759_v45, %v7758_v43  ;;  %v7761_v49 = vpop.f32.mrb[10].mxu1  ;;  %v7722_v50 = vpop.f32.mrb[11].mxu0 }
 0x10a   :  { %v7762_v51 = vpop.f32.mrb[11].mxu1  ;;  %v1493_v52 = vadd.f32 %v7720_v46, %v7241_v11  ;;  %v7723_v53 = vadd.f32 %v7722_v50, %v7721_v48 }
 0x10b   :  { %v7763_v54 = vadd.f32 %v7762_v51, %v7761_v49 }
 0x10c   :  { %v1558_v55 = vadd.f32 %v7760_v47, %v1493_v52  ;;  %v1496_v56 = vadd.f32 %v7723_v53, %v7241_v11 }
 0x10e   :  { %v9737_v57 = vadd.f32 %v7763_v54, %v1496_v56  ;;  %v7724_v58 = vpop.f32.mrb[12].mxu0 }
 0x10f   :  { %v7764_v59 = vpop.f32.mrb[12].mxu1  ;;  %v7725_v60 = vpop.f32.mrb[13].mxu0 }
 0x110   :  { %v7726_v61 = vadd.f32 %v7725_v60, %v7724_v58  ;;  %v7765_v62 = vpop.f32.mrb[13].mxu1  ;;  %v7727_v63 = vpop.f32.mrb[14].mxu0 }
 0x111   :  { %v7766_v3 = vadd.f32 %v7765_v62, %v7764_v59  ;;  %v7767_v8 = vpop.f32.mrb[14].mxu1  ;;  %v7728_v9 = vpop.f32.mrb[15].mxu0 }
 0x112   :  { %v1501_v10 = vadd.f32 %v7726_v61, %v7241_v11  ;;  %v7729_v12 = vadd.f32 %v7728_v9, %v7727_v63  ;;  %v7768_v13 = vpop.f32.mrb[15].mxu1 }
 0x113   :  { %v7769_v14 = vadd.f32 %v7768_v13, %v7767_v8 }
 0x114   :  { %v1566_v15 = vadd.f32 %v7766_v3, %v1501_v10  ;;  %v1504_v16 = vadd.f32 %v7729_v12, %v7241_v11 }
 0x116   :  { %v9739_v17 = vadd.f32 %v7769_v14, %v1504_v16  ;;  %v7786_v18 = vpop.f32.mrb[16].mxu0 }
 0x117   :  { %v7826_v19 = vpop.f32.mrb[16].mxu1  ;;  %v7787_v20 = vpop.f32.mrb[17].mxu0 }
 0x118   :  { %v7788_v21 = vadd.f32 %v7787_v20, %v7786_v18  ;;  %v7827_v22 = vpop.f32.mrb[17].mxu1  ;;  %v7789_v24 = vpop.f32.mrb[18].mxu0 }
 0x119   :  { %v7828_v26 = vadd.f32 %v7827_v22, %v7826_v19  ;;  %v7829_v27 = vpop.f32.mrb[18].mxu1  ;;  %v7790_v28 = vpop.f32.mrb[19].mxu0 }
 0x11a   :  { %v1607_v29 = vadd.f32 %v7788_v21, %v1542_v23  ;;  %v7791_v30 = vadd.f32 %v7790_v28, %v7789_v24  ;;  %v7830_v31 = vpop.f32.mrb[19].mxu1 }
 0x11b   :  { %v7831_v32 = vadd.f32 %v7830_v31, %v7829_v27 }
 0x11c   :  { %v1672_v33 = vadd.f32 %v7828_v26, %v1607_v29  ;;  %v1610_v34 = vadd.f32 %v7791_v30, %v9733_v25 }
 0x11e   :  { %v9742_v35 = vadd.f32 %v7831_v32, %v1610_v34  ;;  %v7792_v11 = vpop.f32.mrb[20].mxu0 }
 0x11f   :  { %v7832_v36 = vpop.f32.mrb[20].mxu1  ;;  %v7793_v37 = vpop.f32.mrb[21].mxu0 }
 0x120   :  { %v7833_v38 = vpop.f32.mrb[21].mxu1  ;;  %v7794_v40 = vadd.f32 %v7793_v37, %v7792_v11  ;;  %v7795_v43 = vpop.f32.mrb[22].mxu0 }
 0x121   :  { %v7834_v42 = vadd.f32 %v7833_v38, %v7832_v36  ;;  %v7835_v44 = vpop.f32.mrb[22].mxu1  ;;  %v7796_v45 = vpop.f32.mrb[23].mxu0 }
 0x122   :  { %v7836_v46 = vpop.f32.mrb[23].mxu1  ;;  %v1615_v47 = vadd.f32 %v7794_v40, %v1550_v39  ;;  %v7797_v23 = vadd.f32 %v7796_v45, %v7795_v43 }
 0x123   :  { %v7837_v48 = vadd.f32 %v7836_v46, %v7835_v44 }
 0x124   :  { %v1680_v49 = vadd.f32 %v7834_v42, %v1615_v47  ;;  %v1618_v50 = vadd.f32 %v7797_v23, %v9735_v41 }
 0x126   :  { %v9745_v51 = vadd.f32 %v7837_v48, %v1618_v50  ;;  %v7798_v25 = vpop.f32.mrb[24].mxu0 }
 0x127   :  { %v7838_v52 = vpop.f32.mrb[24].mxu1  ;;  %v7799_v53 = vpop.f32.mrb[25].mxu0 }
 0x128   :  { %v7800_v54 = vadd.f32 %v7799_v53, %v7798_v25  ;;  %v7839_v56 = vpop.f32.mrb[25].mxu1  ;;  %v7801_v58 = vpop.f32.mrb[26].mxu0 }
 0x129   :  { %v7840_v59 = vadd.f32 %v7839_v56, %v7838_v52  ;;  %v7841_v60 = vpop.f32.mrb[26].mxu1  ;;  %v7802_v61 = vpop.f32.mrb[27].mxu0 }
 0x12a   :  { %v1623_v62 = vadd.f32 %v7800_v54, %v1558_v55  ;;  %v7803_v63 = vadd.f32 %v7802_v61, %v7801_v58  ;;  %v7842_v3 = vpop.f32.mrb[27].mxu1 }
 0x12b   :  { %v7843_v39 = vadd.f32 %v7842_v3, %v7841_v60 }
 0x12c   :  { %v1688_v8 = vadd.f32 %v7840_v59, %v1623_v62  ;;  %v1626_v9 = vadd.f32 %v7803_v63, %v9737_v57 }
 0x12e   :  { %v9748_v10 = vadd.f32 %v7843_v39, %v1626_v9  ;;  %v7804_v41 = vpop.f32.mrb[28].mxu0 }
 0x12f   :  { %v7844_v12 = vpop.f32.mrb[28].mxu1  ;;  %v7805_v13 = vpop.f32.mrb[29].mxu0 }
 0x130   :  { %v7806_v14 = vadd.f32 %v7805_v13, %v7804_v41  ;;  %v7845_v16 = vpop.f32.mrb[29].mxu1  ;;  %v7807_v18 = vpop.f32.mrb[30].mxu0 }
 0x131   :  { %v7846_v19 = vadd.f32 %v7845_v16, %v7844_v12  ;;  %v7847_v20 = vpop.f32.mrb[30].mxu1  ;;  %v7808_v21 = vpop.f32.mrb[31].mxu0 }
 0x132   :  { %v1631_v22 = vadd.f32 %v7806_v14, %v1566_v15  ;;  %v7809_v24 = vadd.f32 %v7808_v21, %v7807_v18  ;;  %v7848_v55 = vpop.f32.mrb[31].mxu1 }
 0x133   :  { %v7849_v26 = vadd.f32 %v7848_v55, %v7847_v20 }
 0x134   :  { %v1696_v27 = vadd.f32 %v7846_v19, %v1631_v22  ;;  %v1634_v28 = vadd.f32 %v7809_v24, %v9739_v17 }
 0x136   :  { %v9751_v29 = vadd.f32 %v7849_v26, %v1634_v28  ;;  %v7866_v57 = vpop.f32.mrb[32].mxu0 }
 0x137   :  { %v7906_v30 = vpop.f32.mrb[32].mxu1  ;;  %v7867_v31 = vpop.f32.mrb[33].mxu0 }
 0x138   :  { %v7907_v32 = vpop.f32.mrb[33].mxu1  ;;  %v7868_v34 = vadd.f32 %v7867_v31, %v7866_v57  ;;  %v7869_v36 = vpop.f32.mrb[34].mxu0 }
 0x139   :  { %v7908_v11 = vadd.f32 %v7907_v32, %v7906_v30  ;;  %v7909_v37 = vpop.f32.mrb[34].mxu1  ;;  %v7870_v38 = vpop.f32.mrb[35].mxu0 }
 0x13a   :  { %v7910_v40 = vpop.f32.mrb[35].mxu1  ;;  %v1737_v42 = vadd.f32 %v7868_v34, %v1672_v33  ;;  %v7871_v15 = vadd.f32 %v7870_v38, %v7869_v36 }
 0x13b   :  { %v7911_v43 = vadd.f32 %v7910_v40, %v7909_v37 }
 0x13c   :  { %v1802_v44 = vadd.f32 %v7908_v11, %v1737_v42  ;;  %v1740_v45 = vadd.f32 %v7871_v15, %v9742_v35 }
 0x13e   :  { %v9754_v46 = vadd.f32 %v7911_v43, %v1740_v45  ;;  %v7872_v17 = vpop.f32.mrb[36].mxu0 }
 0x13f   :  { %v7912_v47 = vpop.f32.mrb[36].mxu1  ;;  %v7873_v23 = vpop.f32.mrb[37].mxu0 }
 0x140   :  { %v7874_v48 = vadd.f32 %v7873_v23, %v7872_v17  ;;  %v7913_v50 = vpop.f32.mrb[37].mxu1  ;;  %v7875_v25 = vpop.f32.mrb[38].mxu0 }
 0x141   :  { %v7914_v52 = vadd.f32 %v7913_v50, %v7912_v47  ;;  %v7915_v53 = vpop.f32.mrb[38].mxu1  ;;  %v7876_v54 = vpop.f32.mrb[39].mxu0 }
 0x142   :  { %v1745_v56 = vadd.f32 %v7874_v48, %v1680_v49  ;;  %v7877_v58 = vadd.f32 %v7876_v54, %v7875_v25  ;;  %v7916_v59 = vpop.f32.mrb[39].mxu1 }
 0x143   :  { %v7917_v33 = vadd.f32 %v7916_v59, %v7915_v53  ;;  %v2942_v59 = vld [vmem:[%s12414_s5 + $0xd0] sm:$0xff] }
 0x144   :  { %v9756_v60 = vadd.f32 %v7914_v52, %v1745_v56  ;;  %v1748_v61 = vadd.f32 %v7877_v58, %v9745_v51  ;;  %v2940_v58 = vld [vmem:[%s12414_s5 + $0x90] sm:$0xff] }
 0x146   :  { %v9759_v35 = vadd.f32 %v7917_v33, %v1748_v61  ;;  %v7878_v62 = vpop.f32.mrb[40].mxu0 }
 0x147   :  { %v7918_v63 = vpop.f32.mrb[40].mxu1  ;;  %v7879_v3 = vpop.f32.mrb[41].mxu0 }
 0x148   :  { %v7880_v39 = vadd.f32 %v7879_v3, %v7878_v62  ;;  %v7919_v9 = vpop.f32.mrb[41].mxu1  ;;  %v7881_v41 = vpop.f32.mrb[42].mxu0 }
 0x149   :  { %v7920_v12 = vadd.f32 %v7919_v9, %v7918_v63  ;;  %v7921_v13 = vpop.f32.mrb[42].mxu1  ;;  %v7882_v14 = vpop.f32.mrb[43].mxu0 }
 0x14a   :  { %v1753_v16 = vadd.f32 %v7880_v39, %v1688_v8  ;;  %v7883_v49 = vadd.f32 %v7882_v14, %v7881_v41  ;;  %v7922_v18 = vpop.f32.mrb[43].mxu1  ;;  %v7471_v14 = vcombine.high %v2940_v58, %v2942_v59 }
 0x14b   :  { %v7923_v19 = vadd.f32 %v7922_v18, %v7921_v13 }
 0x14c   :  { %v9761_v20 = vadd.f32 %v7920_v12, %v1753_v16  ;;  %v1756_v21 = vadd.f32 %v7883_v49, %v9748_v10 }
 0x14e   :  { %v9764_v51 = vadd.f32 %v7923_v19, %v1756_v21  ;;  %v7884_v22 = vpop.f32.mrb[44].mxu0 }
 0x14f   :  { %v7924_v24 = vpop.f32.mrb[44].mxu1  ;;  %v7885_v55 = vpop.f32.mrb[45].mxu0 }
 0x150   :  { %v7925_v26 = vpop.f32.mrb[45].mxu1  ;;  %v7886_v28 = vadd.f32 %v7885_v55, %v7884_v22  ;;  %v7887_v30 = vpop.f32.mrb[46].mxu0  ;;  %v2944_v22 = vld [vmem:[%s12414_s5 + $0x110] sm:$0xff] }
 0x151   :  { %v7926_v57 = vadd.f32 %v7925_v26, %v7924_v24  ;;  %v7927_v31 = vpop.f32.mrb[46].mxu1  ;;  %v7888_v32 = vpop.f32.mrb[47].mxu0  ;;  %v2946_v55 = vld [vmem:[%s12414_s5 + $0x150] sm:$0xff]  ;;  %v2945_v26 = vld [vmem:[%s12414_s5 + $0x118] sm:$0xff] }
 0x152   :  { %v7928_v34 = vpop.f32.mrb[47].mxu1  ;;  %v1761_v8 = vadd.f32 %v7886_v28, %v1696_v27  ;;  %v7889_v11 = vadd.f32 %v7888_v32, %v7887_v30  ;;  %v7470_v30 = vcombine.low %v2940_v58, %v2942_v59  ;;  %v9811_v32 = vld [vmem:[%s12414_s5 + $0x190] sm:$0xff] }
 0x153   :  { %v7929_v36 = vadd.f32 %v7928_v34, %v7927_v31 }
 0x154   :  { %v9766_v37 = vadd.f32 %v7926_v57, %v1761_v8  ;;  %v1764_v38 = vadd.f32 %v7889_v11, %v9751_v29  ;;  %v7475_v8 = vcombine.high %v2944_v22, %v2946_v55 }
 0x156   :  { %v9769_v10 = vadd.f32 %v7929_v36, %v1764_v38  ;;  %v7946_v40 = vpop.f32.mrb[48].mxu0 }
 0x157   :  { %v7986_v42 = vpop.f32.mrb[48].mxu1  ;;  %v7947_v15 = vpop.f32.mrb[49].mxu0 }
 0x158   :  { %v7948_v43 = vadd.f32 %v7947_v15, %v7946_v40  ;;  %v7987_v45 = vpop.f32.mrb[49].mxu1  ;;  %v7949_v17 = vpop.f32.mrb[50].mxu0 }
 0x159   :  { %v7988_v47 = vadd.f32 %v7987_v45, %v7986_v42  ;;  %v7989_v23 = vpop.f32.mrb[50].mxu1  ;;  %v7950_v48 = vpop.f32.mrb[51].mxu0 }
 0x15a   :  { %v1867_v50 = vadd.f32 %v7948_v43, %v1802_v44  ;;  %v7951_v25 = vadd.f32 %v7950_v48, %v7949_v17  ;;  %v7990_v27 = vpop.f32.mrb[51].mxu1  ;;  %v2941_v44 = vld [vmem:[%s12414_s5 + $0x98] sm:$0xff]  ;;  %v7481_v48 = vcombine.high %v9821_v1, %v9826_v2 }
 0x15b   :  { %v7991_v52 = vadd.f32 %v7990_v27, %v7989_v23  ;;  %v7479_v23 = vcombine.high %v9811_v32, %v9816_v0 }
 0x15c   :  { %v1932_v53 = vadd.f32 %v7988_v47, %v1867_v50  ;;  %v1870_v54 = vadd.f32 %v7951_v25, %v9754_v46  ;;  %v2943_v46 = vld [vmem:[%s12414_s5 + $0xd8] sm:$0xff] }
 0x15d   :  { %v7473_v21 = vcombine.high %v2941_v44, %v2943_v46  ;;  %v7472_v31 = vcombine.low %v2941_v44, %v2943_v46  ;;  %v2956_v44 = vld [vmem:[%s12414_s5 + $0x290] sm:$0xff] }
 0x15e   :  { %v1935_v56 = vadd.f32 %v7991_v52, %v1870_v54  ;;  %v7952_v29 = vpop.f32.mrb[52].mxu0  ;;  %v1962_v62 = vmax.f32 %v1932_v53, 0.0  ;;  %v2952_v53 = vld [vmem:[%s12414_s5 + $0x210] sm:$0xff] }
 0x15f   :  { %v7992_v33 = vpop.f32.mrb[52].mxu1  ;;  %v7953_v61 = vpop.f32.mrb[53].mxu0 }
 0x160   :  { %v1963_v63 = vmax.f32 %v1935_v56, 0.0  ;;  %v7954_v3 = vadd.f32 %v7953_v61, %v7952_v29  ;;  %v7993_v39 = vpop.f32.mrb[53].mxu1  ;;  %v7955_v9 = vpop.f32.mrb[54].mxu0  ;;  %v2954_v56 = vld [vmem:[%s12414_s5 + $0x250] sm:$0xff]  ;;  %v2953_v29 = vld [vmem:[%s12414_s5 + $0x218] sm:$0xff]  ;;  %v7480_v61 = vcombine.low %v9821_v1, %v9826_v2 }
 0x161   :  { %v7994_v41 = vadd.f32 %v7993_v39, %v7992_v33  ;;  %v7995_v12 = vpop.f32.mrb[54].mxu1  ;;  %v7956_v13 = vpop.f32.mrb[55].mxu0  ;;  %v7478_v33 = vcombine.low %v9811_v32, %v9816_v0  ;;  %v2957_v39 = vld [vmem:[%s12414_s5 + $0x298] sm:$0xff] }
 0x162   :  { %v9784_v16 = vpack.c.bf16 %v1963_v63, %v1962_v62  ;;  %v1875_v49 = vadd.f32 %v7954_v3, %v9756_v60  ;;  %v7957_v18 = vadd.f32 %v7956_v13, %v7955_v9  ;;  %v7996_v19 = vpop.f32.mrb[55].mxu1  ;;  %v2947_v60 = vld [vmem:[%s12414_s5 + $0x158] sm:$0xff]  ;;  %v2958_v3 = vld [vmem:[%s12414_s5 + $0x2d0] sm:$0xff]  ;;  %v7482_v13 = vcombine.low %v2952_v53, %v2954_v56 }
 0x163   :  { %v7997_v24 = vadd.f32 %v7996_v19, %v7995_v12  ;;  %v7477_v11 = vcombine.high %v2945_v26, %v2947_v60  ;;  %v7476_v43 = vcombine.low %v2945_v26, %v2947_v60  ;;  %v2959_v9 = vld [vmem:[%s12414_s5 + $0x2d8] sm:$0xff]  ;;  %v7487_v60 = vcombine.high %v2956_v44, %v2958_v3 }
 0x164   :  { %v1940_v28 = vadd.f32 %v7994_v41, %v1875_v49  ;;  %v1878_v57 = vadd.f32 %v7957_v18, %v9759_v35  ;;  %2199 = vmatmul.mubr.bf16.vlgmr.msra.gmra.mrb[64].mxu0 %v9784_v16  ;;  %2272 = vmatmul.mubr.bf16.vlgmr.msra.gmra.mrb[64].mxu1 %v9784_v16  ;;  %v7486_v2 = vcombine.low %v2956_v44, %v2958_v3  ;;  %v3902_v3 = vld [vmem:[%s12414_s5 + $0x160] sm:$0xff] }
 0x165   :  { %3129 = vmatpush1.bf16.msra.mxu0 %v7466_v6  ;;  %3202 = vmatpush1.bf16.msra.mxu1 %v7468_v7  ;;  %v7474_v7 = vcombine.low %v2944_v22, %v2946_v55 }
 0x166   :  { %v1943_v35 = vadd.f32 %v7997_v24, %v1878_v57  ;;  %v7958_v34 = vpop.f32.mrb[56].mxu0  ;;  %3130 = vmatprep.subr.bf16.mxu0 %v7471_v14  ;;  %3203 = vmatprep.subr.bf16.mxu1 %v7473_v21  ;;  %v1964_v36 = vmax.f32 %v1940_v28, 0.0  ;;  %v7489_v28 = vcombine.high %v2957_v39, %v2959_v9 }
 0x167   :  { %v7998_v4 = vpop.f32.mrb[56].mxu1  ;;  %v7959_v6 = vpop.f32.mrb[57].mxu0  ;;  %2208 = vmatprep.mubr.bf16.mxu0 %v8987_v5  ;;  %2281 = vmatprep.mubr.bf16.mxu1 %v8987_v5 }
 0x168   :  { %v1965_v38 = vmax.f32 %v1943_v35, 0.0  ;;  %v7960_v40 = vadd.f32 %v7959_v6, %v7958_v34  ;;  %v7999_v42 = vpop.f32.mrb[57].mxu1  ;;  %v7961_v15 = vpop.f32.mrb[58].mxu0  ;;  %v2960_v35 = vld [vmem:[%s12414_s5 + $0x310] sm:$0xff] }
 0x169   :  { %v8000_v45 = vadd.f32 %v7999_v42, %v7998_v4  ;;  %v8001_v17 = vpop.f32.mrb[58].mxu1  ;;  %v7962_v47 = vpop.f32.mrb[59].mxu0  ;;  %3131 = vmatpush1.bf16.msra.mxu0 %v7470_v30  ;;  %3204 = vmatpush1.bf16.msra.mxu1 %v7472_v31  ;;  %v7488_v4 = vcombine.low %v2957_v39, %v2959_v9  ;;  %v2967_v42 = vld [vmem:[%s12414_s5 + $0x3d8] sm:$0xff]  ;;  %v3901_v39 = vld [vmem:[%s12414_s5 + $0x128] sm:$0xff] }
 0x16a   :  { %v9834_v50 = vpack.c.bf16 %v1965_v38, %v1964_v36  ;;  %v1883_v25 = vadd.f32 %v7960_v40, %v9761_v20  ;;  %v7963_v27 = vadd.f32 %v7962_v47, %v7961_v15  ;;  %v8002_v52 = vpop.f32.mrb[59].mxu1  ;;  %3132 = vmatprep.subr.bf16.mxu0 %v7475_v8  ;;  %3205 = vmatprep.subr.bf16.mxu1 %v7477_v11  ;;  %v2955_v20 = vld [vmem:[%s12414_s5 + $0x258] sm:$0xff]  ;;  %v2962_v8 = vld [vmem:[%s12414_s5 + $0x350] sm:$0xff]  ;;  %v3903_v9 = vld [vmem:[%s12414_s5 + $0x168] sm:$0xff] }
 0x16b   :  { %v8003_v54 = vadd.f32 %v8002_v52, %v8001_v17  ;;  %v7485_v63 = vcombine.high %v2953_v29, %v2955_v20  ;;  %v7484_v22 = vcombine.low %v2953_v29, %v2955_v20  ;;  %v2961_v11 = vld [vmem:[%s12414_s5 + $0x318] sm:$0xff]  ;;  %v2964_v38 = vld [vmem:[%s12414_s5 + $0x390] sm:$0xff]  ;;  %v3893_v52 = vld [vmem:[%s12414_s5 + $0x28] sm:$0xff] }
 0x16c   :  { %v1948_v58 = vadd.f32 %v8000_v45, %v1883_v25  ;;  %v1886_v59 = vadd.f32 %v7963_v27, %v9764_v51  ;;  %2209 = vmatmul.mubr.bf16.gmra.mrb[68].mxu0 %v9834_v50  ;;  %2282 = vmatmul.mubr.bf16.gmra.mrb[68].mxu1 %v9834_v50  ;;  %v7483_v51 = vcombine.high %v2952_v53, %v2954_v56  ;;  %v2965_v40 = vld [vmem:[%s12414_s5 + $0x398] sm:$0xff]  ;;  %v3892_v25 = vld [vmem:[%s12414_s5 + $0x20] sm:$0xff]  ;;  %v3895_v53 = vld [vmem:[%s12414_s5 + $0x68] sm:$0xff] }
 0x16d   :  { %3133 = vmatpush1.bf16.msra.mxu0 %v7474_v7  ;;  %3206 = vmatpush1.bf16.msra.mxu1 %v7476_v43  ;;  %v7491_v7 = vcombine.high %v2960_v35, %v2962_v8  ;;  %v7490_v45 = vcombine.low %v2960_v35, %v2962_v8  ;;  %v3894_v27 = vld [vmem:[%s12414_s5 + $0x60] sm:$0xff]  ;;  %v7496_v56 = vcombine.low %v2965_v40, %v2967_v42 }
 0x16e   :  { %v1951_v46 = vadd.f32 %v8003_v54, %v1886_v59  ;;  %v7964_v62 = vpop.f32.mrb[60].mxu0  ;;  %3134 = vmatprep.subr.bf16.mxu0 %v7479_v23  ;;  %3207 = vmatprep.subr.bf16.mxu1 %v7481_v48  ;;  %v1966_v14 = vmax.f32 %v1948_v58, 0.0  ;;  %v7497_v48 = vcombine.high %v2965_v40, %v2967_v42  ;;  %v7499_v29 = vcombine.high %v3892_v25, %v3894_v27  ;;  %v3896_v58 = vld [vmem:[%s12414_s5 + $0xa0] sm:$0xff]  ;;  %v3919_v40 = vld [vmem:[%s12414_s5 + $0x368] sm:$0xff] }
 0x16f   :  { %v8004_v41 = vpop.f32.mrb[60].mxu1  ;;  %v7965_v12 = vpop.f32.mrb[61].mxu0  ;;  %2218 = vmatprep.mubr.bf16.mxu0 %v8987_v5  ;;  %2291 = vmatprep.mubr.bf16.mxu1 %v8987_v5  ;;  %v7501_v20 = vcombine.high %v3893_v52, %v3895_v53  ;;  %v3898_v59 = vld [vmem:[%s12414_s5 + $0xe0] sm:$0xff]  ;;  %v7498_v44 = vcombine.low %v3892_v25, %v3894_v27  ;;  %v3923_v25 = vld [vmem:[%s12414_s5 + $0x3e8] sm:$0xff] }
 0x170   :  { %v1967_v49 = vmax.f32 %v1951_v46, 0.0  ;;  %v7966_v18 = vadd.f32 %v7965_v12, %v7964_v62  ;;  %v8005_v19 = vpop.f32.mrb[61].mxu1  ;;  %v7967_v21 = vpop.f32.mrb[62].mxu0  ;;  %v7500_v46 = vcombine.low %v3893_v52, %v3895_v53  ;;  %v7503_v62 = vcombine.high %v3896_v58, %v3898_v59 }
 0x171   :  { %v8006_v24 = vadd.f32 %v8005_v19, %v8004_v41  ;;  %v8007_v55 = vpop.f32.mrb[62].mxu1  ;;  %v7968_v26 = vpop.f32.mrb[63].mxu0  ;;  %3135 = vmatpush1.bf16.msra.mxu0 %v7478_v33  ;;  %3208 = vmatpush1.bf16.msra.mxu1 %v7480_v61  ;;  %v3897_v33 = vld [vmem:[%s12414_s5 + $0xa8] sm:$0xff]  ;;  %v7502_v41 = vcombine.low %v3896_v58, %v3898_v59  ;;  %v4851_v58 = vld [vmem:[%s12414_s5 + $0x78] sm:$0xff] }
 0x172   :  { %v9870_v57 = vpack.c.bf16 %v1967_v49, %v1966_v14  ;;  %v1891_v30 = vadd.f32 %v7966_v18, %v9766_v37  ;;  %v7969_v31 = vadd.f32 %v7968_v26, %v7967_v21  ;;  %v8008_v32 = vpop.f32.mrb[63].mxu1  ;;  %3136 = vmatprep.subr.bf16.mxu0 %v7483_v51  ;;  %3209 = vmatprep.subr.bf16.mxu1 %v7485_v63  ;;  %v2963_v37 = vld [vmem:[%s12414_s5 + $0x358] sm:$0xff]  ;;  %v3899_v61 = vld [vmem:[%s12414_s5 + $0xe8] sm:$0xff]  ;;  %v3900_v63 = vld [vmem:[%s12414_s5 + $0x120] sm:$0xff] }
 0x173   :  { %v8009_v34 = vadd.f32 %v8008_v32, %v8007_v55  ;;  %v7493_v36 = vcombine.high %v2961_v11, %v2963_v37  ;;  %v7492_v17 = vcombine.low %v2961_v11, %v2963_v37  ;;  %v7505_v51 = vcombine.high %v3897_v33, %v3899_v61  ;;  %v3904_v49 = vld [vmem:[%s12414_s5 + $0x1a0] sm:$0xff]  ;;  %v3905_v19 = vld [vmem:[%s12414_s5 + $0x1a8] sm:$0xff] }
 0x174   :  { %v1956_v0 = vadd.f32 %v8006_v24, %v1891_v30  ;;  %v1894_v1 = vadd.f32 %v7969_v31, %v9769_v10  ;;  %2219 = vmatmul.mubr.bf16.gmra.mrb[72].mxu0 %v9870_v57  ;;  %2292 = vmatmul.mubr.bf16.gmra.mrb[72].mxu1 %v9870_v57  ;;  %v2966_v10 = vld [vmem:[%s12414_s5 + $0x3d0] sm:$0xff]  ;;  %v7504_v12 = vcombine.low %v3897_v33, %v3899_v61  ;;  %v3906_v18 = vld [vmem:[%s12414_s5 + $0x1e0] sm:$0xff]  ;;  %v3907_v21 = vld [vmem:[%s12414_s5 + $0x1e8] sm:$0xff] }
 0x175   :  { %3137 = vmatpush1.bf16.msra.mxu0 %v7482_v13  ;;  %3210 = vmatpush1.bf16.msra.mxu1 %v7484_v22  ;;  %v7495_v23 = vcombine.high %v2964_v38, %v2966_v10  ;;  %v7494_v54 = vcombine.low %v2964_v38, %v2966_v10  ;;  %v7507_v13 = vcombine.high %v3900_v63, %v3902_v3  ;;  %v3909_v30 = vld [vmem:[%s12414_s5 + $0x228] sm:$0xff]  ;;  %v3912_v11 = vld [vmem:[%s12414_s5 + $0x2a0] sm:$0xff] }
 0x176   :  { %v1959_v6 = vadd.f32 %v8009_v34, %v1894_v1  ;;  %3138 = vmatprep.subr.bf16.mxu0 %v7487_v60  ;;  %3211 = vmatprep.subr.bf16.mxu1 %v7489_v28  ;;  %v1968_v15 = vmax.f32 %v1956_v0, 0.0  ;;  %v7509_v14 = vcombine.high %v3901_v39, %v3903_v9  ;;  %v7506_v22 = vcombine.low %v3900_v63, %v3902_v3  ;;  %v3908_v60 = vld [vmem:[%s12414_s5 + $0x220] sm:$0xff]  ;;  %v3911_v31 = vld [vmem:[%s12414_s5 + $0x268] sm:$0xff]  ;;  %v4855_v63 = vld [vmem:[%s12414_s5 + $0xf8] sm:$0xff] }
 0x177   :  { %2228 = vmatprep.mubr.bf16.mxu0 %v8987_v5  ;;  %2301 = vmatprep.mubr.bf16.mxu1 %v8987_v5  ;;  %v7508_v24 = vcombine.low %v3901_v39, %v3903_v9  ;;  %v7511_v55 = vcombine.high %v3904_v49, %v3906_v18  ;;  %v7513_v26 = vcombine.high %v3905_v19, %v3907_v21  ;;  %v3910_v28 = vld [vmem:[%s12414_s5 + $0x260] sm:$0xff]  ;;  %v3913_v0 = vld [vmem:[%s12414_s5 + $0x2a8] sm:$0xff] }
 0x178   :  { %v1969_v43 = vmax.f32 %v1959_v6, 0.0  ;;  %v7510_v32 = vcombine.low %v3904_v49, %v3906_v18  ;;  %v7512_v35 = vcombine.low %v3905_v19, %v3907_v21  ;;  %v7515_v34 = vcombine.high %v3908_v60, %v3910_v28  ;;  %v3914_v37 = vld [vmem:[%s12414_s5 + $0x2e0] sm:$0xff]  ;;  %v3915_v1 = vld [vmem:[%s12414_s5 + $0x2e8] sm:$0xff]  ;;  %v4859_v49 = vld [vmem:[%s12414_s5 + $0x178] sm:$0xff] }
 0x179   :  { %3139 = vmatpush1.bf16.msra.mxu0 %v7486_v2  ;;  %3212 = vmatpush1.bf16.msra.mxu1 %v7488_v4  ;;  %v7517_v8 = vcombine.high %v3909_v30, %v3911_v31  ;;  %v7514_v2 = vcombine.low %v3908_v60, %v3910_v28  ;;  %v7516_v4 = vcombine.low %v3909_v30, %v3911_v31  ;;  %v3918_v38 = vld [vmem:[%s12414_s5 + $0x360] sm:$0xff]  ;;  %v3917_v10 = vld [vmem:[%s12414_s5 + $0x328] sm:$0xff]  ;;  %v4863_v60 = vld [vmem:[%s12414_s5 + $0x1f8] sm:$0xff] }
 0x17a   :  { %v9902_v47 = vpack.c.bf16 %v1969_v43, %v1968_v15  ;;  %3140 = vmatprep.subr.bf16.mxu0 %v7491_v7  ;;  %3213 = vmatprep.subr.bf16.mxu1 %v7493_v36  ;;  %v7519_v6 = vcombine.high %v3912_v11, %v3914_v37  ;;  %v7521_v7 = vcombine.high %v3913_v0, %v3915_v1  ;;  %v3916_v36 = vld [vmem:[%s12414_s5 + $0x320] sm:$0xff] }
 0x17b   :  { %v7518_v42 = vcombine.low %v3912_v11, %v3914_v37  ;;  %v7520_v15 = vcombine.low %v3913_v0, %v3915_v1  ;;  %v7523_v43 = vcombine.high %v3916_v36, %v3918_v38  ;;  %v7522_v27 = vcombine.low %v3916_v36, %v3918_v38  ;;  %v4867_v11 = vld [vmem:[%s12414_s5 + $0x278] sm:$0xff] }
 0x17c   :  { %2229 = vmatmul.mubr.bf16.gmra.mrb[76].mxu0 %v9902_v47  ;;  %2302 = vmatmul.mubr.bf16.gmra.mrb[76].mxu1 %v9902_v47  ;;  %v7524_v52 = vcombine.low %v3917_v10, %v3919_v40  ;;  %v4871_v36 = vld [vmem:[%s12414_s5 + $0x2f8] sm:$0xff] }
 0x17d   :  { %3141 = vmatpush1.bf16.msra.mxu0 %v7490_v45  ;;  %3214 = vmatpush1.bf16.msra.mxu1 %v7492_v17  ;;  %v7525_v45 = vcombine.high %v3917_v10, %v3919_v40  ;;  %v3920_v17 = vld [vmem:[%s12414_s5 + $0x3a0] sm:$0xff] }
 0x17e   :  { %3142 = vmatprep.subr.bf16.mxu0 %v7495_v23  ;;  %3215 = vmatprep.subr.bf16.mxu1 %v7497_v48  ;;  %v3922_v23 = vld [vmem:[%s12414_s5 + $0x3e0] sm:$0xff]  ;;  %v3921_v48 = vld [vmem:[%s12414_s5 + $0x3a8] sm:$0xff] }
 0x17f   :  { %3160 = vmatprep.mubr.bf16.mxu0 %v8987_v5  ;;  %3233 = vmatprep.mubr.bf16.mxu1 %v8987_v5  ;;  %v7527_v53 = vcombine.high %v3920_v17, %v3922_v23  ;;  %v7526_v59 = vcombine.low %v3920_v17, %v3922_v23  ;;  %v7528_v33 = vcombine.low %v3921_v48, %v3923_v25  ;;  %v4875_v17 = vld [vmem:[%s12414_s5 + $0x378] sm:$0xff] }
 0x181   :  { %3143 = vmatpush1.bf16.msra.mxu0 %v7494_v54  ;;  %3216 = vmatpush1.bf16.msra.mxu1 %v7496_v56  ;;  %v7529_v54 = vcombine.high %v3921_v48, %v3923_v25  ;;  %v4848_v56 = vld [vmem:[%s12414_s5 + $0x30] sm:$0xff] }
 0x182   :  { %4084 = vmatprep.subr.bf16.mxu0 %v7499_v29  ;;  %4157 = vmatprep.subr.bf16.mxu1 %v7501_v20  ;;  %v4850_v29 = vld [vmem:[%s12414_s5 + $0x70] sm:$0xff]  ;;  %v4849_v20 = vld [vmem:[%s12414_s5 + $0x38] sm:$0xff] }
 0x183   :  { %v7531_v61 = vcombine.high %v4848_v56, %v4850_v29  ;;  %v7530_v3 = vcombine.low %v4848_v56, %v4850_v29  ;;  %v7532_v39 = vcombine.low %v4849_v20, %v4851_v58  ;;  %v4879_v56 = vld [vmem:[%s12414_s5 + $0x3f8] sm:$0xff] }
 0x184   :  { %3161 = vmatmul.mubr.bf16.vlgmr.msra.gmra.mrb[80].mxu0 %v9784_v16  ;;  %3234 = vmatmul.mubr.bf16.vlgmr.msra.gmra.mrb[80].mxu1 %v9784_v16 }
 0x185   :  { %4085 = vmatpush1.bf16.msra.mxu0 %v7498_v44  ;;  %4158 = vmatpush1.bf16.msra.mxu1 %v7500_v46  ;;  %v7533_v44 = vcombine.high %v4849_v20, %v4851_v58  ;;  %v4852_v46 = vld [vmem:[%s12414_s5 + $0xb0] sm:$0xff] }
 0x186   :  { %4086 = vmatprep.subr.bf16.mxu0 %v7503_v62  ;;  %4159 = vmatprep.subr.bf16.mxu1 %v7505_v51  ;;  %v4854_v62 = vld [vmem:[%s12414_s5 + $0xf0] sm:$0xff]  ;;  %v4853_v51 = vld [vmem:[%s12414_s5 + $0xb8] sm:$0xff] }
 0x187   :  { %3170 = vmatprep.mubr.bf16.mxu0 %v8987_v5  ;;  %3243 = vmatprep.mubr.bf16.mxu1 %v8987_v5  ;;  %v7535_v9 = vcombine.high %v4852_v46, %v4854_v62  ;;  %v7534_v18 = vcombine.low %v4852_v46, %v4854_v62  ;;  %v7536_v19 = vcombine.low %v4853_v51, %v4855_v63 }
 0x189   :  { %4087 = vmatpush1.bf16.msra.mxu0 %v7502_v41  ;;  %4160 = vmatpush1.bf16.msra.mxu1 %v7504_v12  ;;  %v7537_v41 = vcombine.high %v4853_v51, %v4855_v63  ;;  %v4856_v12 = vld [vmem:[%s12414_s5 + $0x130] sm:$0xff]  ;;  %v2474_v63 = vld [vmem:[%s12413_s0 + $0x40] sm:$0xff] }
 0x18a   :  { %4088 = vmatprep.subr.bf16.mxu0 %v7507_v13  ;;  %4161 = vmatprep.subr.bf16.mxu1 %v7509_v14  ;;  %v4858_v13 = vld [vmem:[%s12414_s5 + $0x170] sm:$0xff]  ;;  %v4857_v14 = vld [vmem:[%s12414_s5 + $0x138] sm:$0xff] }
 0x18b   :  { %v7539_v21 = vcombine.high %v4856_v12, %v4858_v13  ;;  %v7538_v28 = vcombine.low %v4856_v12, %v4858_v13  ;;  %v7540_v30 = vcombine.low %v4857_v14, %v4859_v49 }
 0x18c   :  { %3171 = vmatmul.mubr.bf16.gmra.mrb[84].mxu0 %v9834_v50  ;;  %3244 = vmatmul.mubr.bf16.gmra.mrb[84].mxu1 %v9834_v50 }
 0x18d   :  { %4089 = vmatpush1.bf16.msra.mxu0 %v7506_v22  ;;  %4162 = vmatpush1.bf16.msra.mxu1 %v7508_v24  ;;  %v7541_v22 = vcombine.high %v4857_v14, %v4859_v49  ;;  %v4860_v24 = vld [vmem:[%s12414_s5 + $0x1b0] sm:$0xff] }
 0x18e   :  { %4090 = vmatprep.subr.bf16.mxu0 %v7511_v55  ;;  %4163 = vmatprep.subr.bf16.mxu1 %v7513_v26  ;;  %v4862_v55 = vld [vmem:[%s12414_s5 + $0x1f0] sm:$0xff]  ;;  %v4861_v26 = vld [vmem:[%s12414_s5 + $0x1b8] sm:$0xff] }
 0x18f   :  { %3180 = vmatprep.mubr.bf16.mxu0 %v8987_v5  ;;  %3253 = vmatprep.mubr.bf16.mxu1 %v8987_v5  ;;  %v7543_v31 = vcombine.high %v4860_v24, %v4862_v55  ;;  %v7542_v37 = vcombine.low %v4860_v24, %v4862_v55  ;;  %v7544_v0 = vcombine.low %v4861_v26, %v4863_v60  ;;  %v2493_v24 = vunpack.c.h.bf16 %v2474_v63 }
 0x191   :  { %4091 = vmatpush1.bf16.msra.mxu0 %v7510_v32  ;;  %4164 = vmatpush1.bf16.msra.mxu1 %v7512_v35  ;;  %v7545_v32 = vcombine.high %v4861_v26, %v4863_v60  ;;  %v4864_v35 = vld [vmem:[%s12414_s5 + $0x230] sm:$0xff] }
 0x192   :  { %4092 = vmatprep.subr.bf16.mxu0 %v7515_v34  ;;  %4165 = vmatprep.subr.bf16.mxu1 %v7517_v8  ;;  %v4866_v34 = vld [vmem:[%s12414_s5 + $0x270] sm:$0xff]  ;;  %v4865_v8 = vld [vmem:[%s12414_s5 + $0x238] sm:$0xff] }
 0x193   :  { %v7547_v1 = vcombine.high %v4864_v35, %v4866_v34  ;;  %v7546_v38 = vcombine.low %v4864_v35, %v4866_v34  ;;  %v7548_v10 = vcombine.low %v4865_v8, %v4867_v11 }
 0x194   :  { %3181 = vmatmul.mubr.bf16.gmra.mrb[88].mxu0 %v9870_v57  ;;  %3254 = vmatmul.mubr.bf16.gmra.mrb[88].mxu1 %v9870_v57 }
 0x195   :  { %4093 = vmatpush1.bf16.msra.mxu0 %v7514_v2  ;;  %4166 = vmatpush1.bf16.msra.mxu1 %v7516_v4  ;;  %v7549_v2 = vcombine.high %v4865_v8, %v4867_v11  ;;  %v4868_v4 = vld [vmem:[%s12414_s5 + $0x2b0] sm:$0xff]  ;;  %v2478_v8 = vld [vmem:[%s12413_s0 + $0xc0] sm:$0xff]  ;;  %v2479_v11 = vld [vmem:[%s12413_s0 + $0xc8] sm:$0xff] }
 0x196   :  { %4094 = vmatprep.subr.bf16.mxu0 %v7519_v6  ;;  %4167 = vmatprep.subr.bf16.mxu1 %v7521_v7  ;;  %v4870_v6 = vld [vmem:[%s12414_s5 + $0x2f0] sm:$0xff]  ;;  %v4869_v7 = vld [vmem:[%s12414_s5 + $0x2b8] sm:$0xff] }
 0x197   :  { %3190 = vmatprep.mubr.bf16.mxu0 %v8987_v5  ;;  %3263 = vmatprep.mubr.bf16.mxu1 %v8987_v5  ;;  %v7551_v40 = vcombine.high %v4868_v4, %v4870_v6  ;;  %v7550_v23 = vcombine.low %v4868_v4, %v4870_v6  ;;  %v7552_v48 = vcombine.low %v4869_v7, %v4871_v36 }
 0x199   :  { %4095 = vmatpush1.bf16.msra.mxu0 %v7518_v42  ;;  %4168 = vmatpush1.bf16.msra.mxu1 %v7520_v15  ;;  %v7553_v42 = vcombine.high %v4869_v7, %v4871_v36  ;;  %v4872_v15 = vld [vmem:[%s12414_s5 + $0x330] sm:$0xff] }
 0x19a   :  { %4096 = vmatprep.subr.bf16.mxu0 %v7523_v43  ;;  %4169 = vmatprep.subr.bf16.mxu1 %v7525_v45  ;;  %v4874_v43 = vld [vmem:[%s12414_s5 + $0x370] sm:$0xff]  ;;  %v4873_v45 = vld [vmem:[%s12414_s5 + $0x338] sm:$0xff] }
 0x19b   :  { %v7555_v25 = vcombine.high %v4872_v15, %v4874_v43  ;;  %v7554_v29 = vcombine.low %v4872_v15, %v4874_v43  ;;  %v7556_v20 = vcombine.low %v4873_v45, %v4875_v17 }
 0x19c   :  { %3191 = vmatmul.mubr.bf16.gmra.mrb[92].mxu0 %v9902_v47  ;;  %3264 = vmatmul.mubr.bf16.gmra.mrb[92].mxu1 %v9902_v47 }
 0x19d   :  { %4097 = vmatpush1.bf16.msra.mxu0 %v7522_v27  ;;  %4170 = vmatpush1.bf16.msra.mxu1 %v7524_v52  ;;  %v7557_v27 = vcombine.high %v4873_v45, %v4875_v17  ;;  %v4876_v52 = vld [vmem:[%s12414_s5 + $0x3b0] sm:$0xff]  ;;  %v2501_v45 = vunpack.c.h.bf16 %v2478_v8  ;;  %v2503_v17 = vunpack.c.h.bf16 %v2479_v11 }
 0x19e   :  { %4098 = vmatprep.subr.bf16.mxu0 %v7527_v53  ;;  %4171 = vmatprep.subr.bf16.mxu1 %v7529_v54  ;;  %v4878_v53 = vld [vmem:[%s12414_s5 + $0x3f0] sm:$0xff]  ;;  %v4877_v54 = vld [vmem:[%s12414_s5 + $0x3b8] sm:$0xff] }
 0x19f   :  { %4116 = vmatprep.mubr.bf16.mxu0 %v8987_v5  ;;  %4189 = vmatprep.mubr.bf16.mxu1 %v8987_v5  ;;  %v7559_v58 = vcombine.high %v4876_v52, %v4878_v53 }
 0x1a1   :  { %4099 = vmatpush1.bf16.msra.mxu0 %v7526_v59  ;;  %4172 = vmatpush1.bf16.msra.mxu1 %v7528_v33  ;;  %v7561_v59 = vcombine.high %v4877_v54, %v4879_v56  ;;  %v7558_v33 = vcombine.low %v4876_v52, %v4878_v53  ;;  %v2480_v52 = vld [vmem:[%s12413_s0 + $0x100] sm:$0xff]  ;;  %v2481_v53 = vld [vmem:[%s12413_s0 + $0x108] sm:$0xff] }
 0x1a2   :  { %5040 = vmatprep.subr.bf16.mxu0 %v7531_v61  ;;  %5113 = vmatprep.subr.bf16.mxu1 %v7533_v44  ;;  %v7560_v61 = vcombine.low %v4877_v54, %v4879_v56 }
 0x1a4   :  { %4117 = vmatmul.mubr.bf16.vlgmr.msra.gmra.mrb[96].mxu0 %v9784_v16  ;;  %4190 = vmatmul.mubr.bf16.vlgmr.msra.gmra.mrb[96].mxu1 %v9784_v16 }
 0x1a5   :  { %5041 = vmatpush1.bf16.msra.mxu0 %v7530_v3  ;;  %5114 = vmatpush1.bf16.msra.mxu1 %v7532_v39  ;;  %v2475_v3 = vld [vmem:[%s12413_s0 + $0x48] sm:$0xff] }
 0x1a6   :  { %5042 = vmatprep.subr.bf16.mxu0 %v7535_v9  ;;  %5115 = vmatprep.subr.bf16.mxu1 %v7537_v41  ;;  %v2574_v41 = vld [vmem:[%s12417_s2] sm:$0xf]  ;;  %v2495_v55 = vunpack.c.h.bf16 %v2475_v3 }
 0x1a7   :  { %4126 = vmatprep.mubr.bf16.mxu0 %v8987_v5  ;;  %4199 = vmatprep.mubr.bf16.mxu1 %v8987_v5 }
 0x1a9   :  { %5043 = vmatpush1.bf16.msra.mxu0 %v7534_v18  ;;  %5116 = vmatpush1.bf16.msra.mxu1 %v7536_v19 }
 0x1aa   :  { %5044 = vmatprep.subr.bf16.mxu0 %v7539_v21  ;;  %5117 = vmatprep.subr.bf16.mxu1 %v7541_v22  ;;  %v2492_v21 = vunpack.c.l.bf16 %v2474_v63  ;;  %v2494_v22 = vunpack.c.l.bf16 %v2475_v3  ;;  %v2506_v63 = vunpack.c.l.bf16 %v2481_v53  ;;  %v2505_v3 = vunpack.c.h.bf16 %v2480_v52 }
 0x1ac   :  { %4127 = vmatmul.mubr.bf16.gmra.mrb[100].mxu0 %v9834_v50  ;;  %4200 = vmatmul.mubr.bf16.gmra.mrb[100].mxu1 %v9834_v50 }
 0x1ad   :  { %5045 = vmatpush1.bf16.msra.mxu0 %v7538_v28  ;;  %5118 = vmatpush1.bf16.msra.mxu1 %v7540_v30  ;;  %v2476_v28 = vld [vmem:[%s12413_s0 + $0x80] sm:$0xff]  ;;  %v2477_v30 = vld [vmem:[%s12413_s0 + $0x88] sm:$0xff] }
 0x1ae   :  { %5046 = vmatprep.subr.bf16.mxu0 %v7543_v31  ;;  %5119 = vmatprep.subr.bf16.mxu1 %v7545_v32  ;;  %v2496_v7 = vunpack.c.l.bf16 %v2476_v28  ;;  %v2498_v36 = vunpack.c.l.bf16 %v2477_v30 }
 0x1af   :  { %4136 = vmatprep.mubr.bf16.mxu0 %v8987_v5  ;;  %4209 = vmatprep.mubr.bf16.mxu1 %v8987_v5 }
 0x1b1   :  { %5047 = vmatpush1.bf16.msra.mxu0 %v7542_v37  ;;  %5120 = vmatpush1.bf16.msra.mxu1 %v7544_v0 }
 0x1b2   :  { %5048 = vmatprep.subr.bf16.mxu0 %v7547_v1  ;;  %5121 = vmatprep.subr.bf16.mxu1 %v7549_v2 }
 0x1b4   :  { %4137 = vmatmul.mubr.bf16.gmra.mrb[104].mxu0 %v9870_v57  ;;  %4210 = vmatmul.mubr.bf16.gmra.mrb[104].mxu1 %v9870_v57 }
 0x1b5   :  { %5049 = vmatpush1.bf16.msra.mxu0 %v7546_v38  ;;  %5122 = vmatpush1.bf16.msra.mxu1 %v7548_v10  ;;  %v2497_v38 = vunpack.c.h.bf16 %v2476_v28  ;;  %v2499_v10 = vunpack.c.h.bf16 %v2477_v30  ;;  %v2484_v30 = vld [vmem:[%s12413_s0 + $0x180] sm:$0xff] }
 0x1b6   :  { %5050 = vmatprep.subr.bf16.mxu0 %v7551_v40  ;;  %5123 = vmatprep.subr.bf16.mxu1 %v7553_v42  ;;  %v2500_v40 = vunpack.c.l.bf16 %v2478_v8  ;;  %v2502_v42 = vunpack.c.l.bf16 %v2479_v11 }
 0x1b7   :  { %4146 = vmatprep.mubr.bf16.mxu0 %v8987_v5  ;;  %4219 = vmatprep.mubr.bf16.mxu1 %v8987_v5 }
 0x1b9   :  { %5051 = vmatpush1.bf16.msra.mxu0 %v7550_v23  ;;  %5124 = vmatpush1.bf16.msra.mxu1 %v7552_v48 }
 0x1ba   :  { %5052 = vmatprep.subr.bf16.mxu0 %v7555_v25  ;;  %5125 = vmatprep.subr.bf16.mxu1 %v7557_v27 }
 0x1bc   :  { %4147 = vmatmul.mubr.bf16.gmra.mrb[108].mxu0 %v9902_v47  ;;  %4220 = vmatmul.mubr.bf16.gmra.mrb[108].mxu1 %v9902_v47 }
 0x1bd   :  { %5053 = vmatpush1.bf16.msra.mxu0 %v7554_v29  ;;  %5126 = vmatpush1.bf16.msra.mxu1 %v7556_v20 }
 0x1be   :  { %5054 = vmatprep.subr.bf16.mxu0 %v7559_v58  ;;  %5127 = vmatprep.subr.bf16.mxu1 %v7561_v59  ;;  %v2482_v58 = vld [vmem:[%s12413_s0 + $0x140] sm:$0xff]  ;;  %v2483_v59 = vld [vmem:[%s12413_s0 + $0x148] sm:$0xff] }
 0x1bf   :  { %5072 = vmatprep.mubr.bf16.mxu0 %v8987_v5  ;;  %5145 = vmatprep.mubr.bf16.mxu1 %v8987_v5 }
 0x1c1   :  { %5055 = vmatpush1.bf16.msra.mxu0 %v7558_v33  ;;  %5128 = vmatpush1.bf16.msra.mxu1 %v7560_v61 }
 0x1c4   :  { %5073 = vmatmul.mubr.bf16.vlgmr.msra.gmra.mrb[112].mxu0 %v9784_v16  ;;  %5146 = vmatmul.mubr.bf16.vlgmr.msra.gmra.mrb[112].mxu1 %v9784_v16  ;;  %v2522_v16 = vlaneseq }
 0x1c5   :  { %5082 = vmatprep.mubr.bf16.mxu0 %v8987_v5  ;;  %5155 = vmatprep.mubr.bf16.mxu1 %v8987_v5 }
 0x1c6   :  { %v2523_v44 = vshrl.u32 %v2522_v16, 7 }
 0x1c8   :  { %v10146_v46 = vsub.s32 0, %v2523_v44  ;;  %v10154_v62 = vsub.s32 2, %v2523_v44  ;;  %v10156_v51 = vsub.s32 1, %v2523_v44 }
 0x1ca   :  { %12482 = vst [vmem:[#allocation3_spill] sm:$0xff] %v10146_v46  ;;  %12483 = vst [vmem:[#allocation4_spill] sm:$0xff] %v10154_v62  ;;  %v10186_v60 = vrot.slane %v2574_v41, %v10146_v46  ;;  %v10196_v32 = vrot.slane %v2574_v41, %v10154_v62  ;;  %v10200_v34 = vrot.slane %v2574_v41, %v10156_v51 }
 0x1cb   :  { %12484 = vst [vmem:[#allocation5_spill] sm:$0xff] %v10156_v51 }
 0x1cc   :  { %5083 = vmatmul.mubr.bf16.gmra.mrb[116].mxu0 %v9834_v50  ;;  %5156 = vmatmul.mubr.bf16.gmra.mrb[116].mxu1 %v9834_v50  ;;  %v2472_v50 = vld [vmem:[%s12413_s0] sm:$0xff] }
 0x1cd   :  { %5092 = vmatprep.mubr.bf16.mxu0 %v8987_v5  ;;  %5165 = vmatprep.mubr.bf16.mxu1 %v8987_v5  ;;  %v2488_v39 = vunpack.c.l.bf16 %v2472_v50  ;;  %v2489_v14 = vunpack.c.h.bf16 %v2472_v50 }
 0x1d4   :  { %5093 = vmatmul.mubr.bf16.gmra.mrb[120].mxu0 %v9870_v57  ;;  %5166 = vmatmul.mubr.bf16.gmra.mrb[120].mxu1 %v9870_v57  ;;  %v2520_v57 = vld [vmem:[%s12416_s1] sm:$0xf] }
 0x1d5   :  { %5102 = vmatprep.mubr.bf16.mxu0 %v8987_v5  ;;  %5175 = vmatprep.mubr.bf16.mxu1 %v8987_v5  ;;  %v2473_v5 = vld [vmem:[%s12413_s0 + $0x8] sm:$0xff]  ;;  %v10170_v9 = vrot.slane %v2520_v57, %v10146_v46  ;;  %v10176_v13 = vrot.slane %v2520_v57, %v10154_v62  ;;  %v10179_v49 = vrot.slane %v2520_v57, %v10156_v51 }
 0x1d6   :  { %v2490_v12 = vunpack.c.l.bf16 %v2473_v5  ;;  %v2491_v18 = vunpack.c.h.bf16 %v2473_v5  ;;  %v2504_v5 = vunpack.c.l.bf16 %v2480_v52 }
 0x1d7   :  { %v2542_v26 = vmul.f32 %v10170_v9, %v2488_v39  ;;  %v2543_v35 = vmul.f32 %v10179_v49, %v2489_v14  ;;  %v2546_v1 = vmul.f32 %v10170_v9, %v2492_v21  ;;  %v2548_v2 = vmul.f32 %v10176_v13, %v2494_v22 }
 0x1d8   :  { %v2544_v31 = vmul.f32 %v10176_v13, %v2490_v12  ;;  %v2547_v4 = vmul.f32 %v10179_v49, %v2493_v24  ;;  %v2550_v29 = vmul.f32 %v10170_v9, %v2496_v7  ;;  %v2552_v20 = vmul.f32 %v10176_v13, %v2498_v36 }
 0x1d9   :  { %v10217_v15 = vadd.f32 %v10186_v60, %v2542_v26  ;;  %v10223_v23 = vadd.f32 %v10200_v34, %v2543_v35  ;;  %v10229_v25 = vadd.f32 %v10186_v60, %v2546_v1  ;;  %v10232_v27 = vadd.f32 %v10196_v32, %v2548_v2  ;;  %v2486_v1 = vld [vmem:[%s12413_s0 + $0x1c0] sm:$0xff]  ;;  %v2487_v2 = vld [vmem:[%s12413_s0 + $0x1c8] sm:$0xff] }
 0x1da   :  { %v10220_v43 = vadd.f32 %v10196_v32, %v2544_v31  ;;  %v10241_v54 = vadd.f32 %v10200_v34, %v2547_v4  ;;  %v2551_v33 = vmul.f32 %v10179_v49, %v2497_v38  ;;  %v2554_v16 = vmul.f32 %v10170_v9, %v2500_v40  ;;  %v2485_v31 = vld [vmem:[%s12413_s0 + $0x188] sm:$0xff] }
 0x1db   :  { %v2555_v50 = vmul.f32 %v10179_v49, %v2501_v45  ;;  %v2507_v39 = vunpack.c.h.bf16 %v2481_v53  ;;  %v2510_v12 = vunpack.c.l.bf16 %v2483_v59  ;;  %v10261_v14 = vadd.f32 %v10186_v60, %v2550_v29 }
 0x1dc   :  { %5103 = vmatmul.mubr.bf16.gmra.mrb[124].mxu0 %v9902_v47  ;;  %5176 = vmatmul.mubr.bf16.gmra.mrb[124].mxu1 %v9902_v47  ;;  %v10161_v47 = vsub.s32 3, %v2523_v44  ;;  %v2556_v44 = vmul.f32 %v10176_v13, %v2502_v42  ;;  %v2509_v21 = vunpack.c.h.bf16 %v2482_v58  ;;  %v2511_v22 = vunpack.c.h.bf16 %v2483_v59 }
 0x1dd   :  { %v10267_v24 = vadd.f32 %v10200_v34, %v2551_v33  ;;  %v10273_v26 = vadd.f32 %v10186_v60, %v2554_v16  ;;  %v10285_v35 = vadd.f32 %v10200_v34, %v2555_v50  ;;  %v2558_v11 = vmul.f32 %v10170_v9, %v2504_v5  ;;  %v3434_v50 = vld [vmem:[%s12413_s0 + $0x10] sm:$0xff] }
 0x1de   :  { %12485 = vst [vmem:[#allocation6_spill] sm:$0xff] %v10161_v47  ;;  %v10182_v19 = vrot.slane %v2520_v57, %v10161_v47  ;;  %v10210_v0 = vrot.slane %v2574_v41, %v10161_v47  ;;  %v2508_v41 = vunpack.c.l.bf16 %v2482_v58  ;;  %v10276_v28 = vadd.f32 %v10196_v32, %v2556_v44 }
 0x1df   :  { %v2559_v4 = vmul.f32 %v10179_v49, %v2505_v3  ;;  %v2564_v36 = vmul.f32 %v10176_v13, %v2510_v12  ;;  %v2563_v38 = vmul.f32 %v10179_v49, %v2509_v21  ;;  %v2512_v40 = vunpack.c.l.bf16 %v2484_v30 }
 0x1e0   :  { %v2545_v37 = vmul.f32 %v10182_v19, %v2491_v18  ;;  %v2549_v6 = vmul.f32 %v10182_v19, %v2495_v55  ;;  %v2553_v61 = vmul.f32 %v10182_v19, %v2499_v10  ;;  %v2557_v57 = vmul.f32 %v10182_v19, %v2503_v17 }
 0x1e1   :  { %v10264_v18 = vadd.f32 %v10196_v32, %v2552_v20  ;;  %v2562_v7 = vmul.f32 %v10170_v9, %v2508_v41  ;;  %v2565_v10 = vmul.f32 %v10182_v19, %v2511_v22  ;;  %v2514_v42 = vunpack.c.l.bf16 %v2485_v31  ;;  %v3435_v41 = vld [vmem:[%s12413_s0 + $0x18] sm:$0xff] }
 0x1e2   :  { %v10226_v48 = vadd.f32 %v10210_v0, %v2545_v37  ;;  %v10244_v56 = vadd.f32 %v10210_v0, %v2549_v6  ;;  %v10270_v55 = vadd.f32 %v10210_v0, %v2553_v61  ;;  %v10288_v8 = vadd.f32 %v10210_v0, %v2557_v57  ;;  %v3482_v57 = vld [vmem:[%s12416_s1 + $0x4] sm:$0xf] }
 0x1e3   :  { %v2560_v37 = vmul.f32 %v10176_v13, %v2506_v63  ;;  %v2561_v6 = vmul.f32 %v10182_v19, %v2507_v39  ;;  %v2513_v45 = vunpack.c.h.bf16 %v2484_v30  ;;  %v2515_v17 = vunpack.c.h.bf16 %v2485_v31 }
 0x1e4   :  { %v2516_v52 = vunpack.c.l.bf16 %v2486_v1  ;;  %v2518_v53 = vunpack.c.l.bf16 %v2487_v2  ;;  %v10305_v29 = vadd.f32 %v10186_v60, %v2558_v11  ;;  %v2517_v58 = vunpack.c.h.bf16 %v2486_v1 }
 0x1e5   :  { %v10308_v20 = vadd.f32 %v10196_v32, %v2560_v37  ;;  %v2519_v59 = vunpack.c.h.bf16 %v2487_v2  ;;  %v10311_v33 = vadd.f32 %v10200_v34, %v2559_v4  ;;  %v10314_v61 = vadd.f32 %v10210_v0, %v2561_v6  ;;  %v3536_v2 = vld [vmem:[%s12417_s2 + $0x4] sm:$0xf] }
 0x1e6   :  { %v10317_v16 = vadd.f32 %v10186_v60, %v2562_v7  ;;  %v10320_v44 = vadd.f32 %v10196_v32, %v2564_v36  ;;  %v10329_v5 = vadd.f32 %v10200_v34, %v2563_v38  ;;  %v10332_v63 = vadd.f32 %v10210_v0, %v2565_v10 }
 0x1e7   :  { %v2566_v3 = vmul.f32 %v10170_v9, %v2512_v40  ;;  %v2568_v39 = vmul.f32 %v10176_v13, %v2514_v42  ;;  %v2567_v12 = vmul.f32 %v10179_v49, %v2513_v45  ;;  %v2569_v21 = vmul.f32 %v10182_v19, %v2515_v17 }
 0x1e8   :  { %12486 = vst [vmem:[#allocation7_spill] sm:$0xff] %v10317_v16  ;;  %12487 = vst [vmem:[#allocation8_spill] sm:$0xff] %v10320_v44  ;;  %v2570_v22 = vmul.f32 %v10170_v9, %v2516_v52  ;;  %v2572_v30 = vmul.f32 %v10176_v13, %v2518_v53  ;;  %v2571_v31 = vmul.f32 %v10179_v49, %v2517_v58  ;;  %v3450_v37 = vunpack.c.l.bf16 %v3434_v50  ;;  %v3436_v58 = vld [vmem:[%s12413_s0 + $0x50] sm:$0xff] }
 0x1e9   :  { %12488 = vst [vmem:[#allocation9_spill] sm:$0xff] %v10329_v5  ;;  %12489 = vst [vmem:[#allocation10_spill] sm:$0xff] %v10332_v63  ;;  %v2573_v11 = vmul.f32 %v10182_v19, %v2519_v59  ;;  %v10346_v1 = vrot.slane %v3482_v57, %v10146_v46  ;;  %v3452_v4 = vunpack.c.l.bf16 %v3435_v41  ;;  %v10352_v6 = vrot.slane %v3482_v57, %v10154_v62 }
 0x1ea   :  { %v3451_v7 = vunpack.c.h.bf16 %v3434_v50  ;;  %v10355_v9 = vrot.slane %v3482_v57, %v10156_v51  ;;  %v10358_v13 = vadd.f32 %v10186_v60, %v2566_v3  ;;  %v10361_v49 = vadd.f32 %v10196_v32, %v2568_v39 }
 0x1eb   :  { %12490 = vst [vmem:[#allocation11_spill] sm:$0xff] %v10346_v1  ;;  %12491 = vst [vmem:[#allocation12_spill] sm:$0xff] %v10352_v6  ;;  %v3453_v19 = vunpack.c.h.bf16 %v3435_v41  ;;  %v10364_v36 = vrot.slane %v3482_v57, %v10161_v47  ;;  %v10367_v38 = vadd.f32 %v10200_v34, %v2567_v12  ;;  %v10370_v10 = vadd.f32 %v10210_v0, %v2569_v21 }
 0x1ec   :  { %12492 = vst [vmem:[#allocation13_spill] sm:$0xff] %v10355_v9  ;;  %12493 = vst [vmem:[#allocation14_spill] sm:$0xff] %v10358_v13  ;;  %v10373_v40 = vadd.f32 %v10186_v60, %v2570_v22  ;;  %v10376_v42 = vadd.f32 %v10196_v32, %v2572_v30  ;;  %v10379_v45 = vadd.f32 %v10200_v34, %v2571_v31  ;;  %v3437_v60 = vld [vmem:[%s12413_s0 + $0x58] sm:$0xff] }
 0x1ed   :  { %12494 = vst [vmem:[#allocation15_spill] sm:$0xff] %v10361_v49  ;;  %12495 = vst [vmem:[#allocation16_spill] sm:$0xff] %v10364_v36  ;;  %v10382_v17 = vadd.f32 %v10210_v0, %v2573_v11  ;;  %v3504_v52 = vmul.f32 %v10346_v1, %v3450_v37  ;;  %v10386_v53 = vrot.slane %v3536_v2, %v10146_v46 }
 0x1ee   :  { %12496 = vst [vmem:[#allocation17_spill] sm:$0xff] %v10367_v38  ;;  %12497 = vst [vmem:[#allocation18_spill] sm:$0xff] %v10370_v10  ;;  %v3506_v34 = vmul.f32 %v10352_v6, %v3452_v4  ;;  %v10396_v0 = vrot.slane %v3536_v2, %v10154_v62  ;;  %v10399_v50 = vmul.f32 %v10355_v9, %v3451_v7  ;;  %v3454_v4 = vunpack.c.l.bf16 %v3436_v58 }
 0x1ef   :  { %12498 = vst [vmem:[#allocation19_spill] sm:$0xff] %v10373_v40  ;;  %12499 = vst [vmem:[#allocation20_spill] sm:$0xff] %v10376_v42  ;;  %v10402_v57 = vrot.slane %v3536_v2, %v10156_v51  ;;  %v10405_v21 = vmul.f32 %v10364_v36, %v3453_v19  ;;  %v10408_v22 = vrot.slane %v3536_v2, %v10161_v47  ;;  %v3456_v7 = vunpack.c.l.bf16 %v3437_v60 }
 0x1f0   :  { %12500 = vst [vmem:[#allocation21_spill] sm:$0xff] %v10379_v45  ;;  %12501 = vst [vmem:[#allocation22_spill] sm:$0xff] %v10382_v17  ;;  %v3455_v40 = vunpack.c.h.bf16 %v3436_v58  ;;  %v3457_v19 = vunpack.c.h.bf16 %v3437_v60  ;;  %v3508_v58 = vmul.f32 %v10346_v1, %v3454_v4 }
 0x1f1   :  { %12502 = vst [vmem:[#allocation23_spill] sm:$0xff] %v10386_v53  ;;  %12503 = vst [vmem:[#allocation24_spill] sm:$0xff] %v10396_v0 }
 0x1f2   :  { %12504 = vst [vmem:[#allocation25_spill] sm:$0xff] %v10402_v57  ;;  %12505 = vst [vmem:[#allocation26_spill] sm:$0xff] %v10408_v22 }
 0x237   :  { %v2200_v32 = vpop.f32.mrb[64].mxu0  ;;  %v2273_v59 = vpop.f32.mrb[64].mxu1 }
 0x238   :  { %v2312_v3 = vsub.f32 0.0, %v2200_v32  ;;  %v2314_v39 = vsub.f32 0.0, %v2273_v59  ;;  %v2202_v41 = vpop.f32.mrb[65].mxu0  ;;  %v2275_v12 = vpop.f32.mrb[65].mxu1 }
 0x239   :  { %v2313_v30 = vsub.f32 0.0, %v2202_v41  ;;  %v2315_v31 = vsub.f32 0.0, %v2275_v12  ;;  %v2204_v11 = vpop.f32.mrb[66].mxu0  ;;  %v2277_v37 = vpop.f32.mrb[66].mxu1  ;;  %v10411_v41 = vadd.f32 %v10386_v53, %v3504_v52 }
 0x23a   :  { %v2344_v62 = vmul.f32 1.442695, %v2312_v3  ;;  %v2348_v46 = vmul.f32 1.442695, %v2314_v39  ;;  %v2316_v51 = vsub.f32 0.0, %v2204_v11  ;;  %v2318_v17 = vsub.f32 0.0, %v2277_v37 }
 0x23b   :  { %v2346_v32 = vmul.f32 1.442695, %v2313_v30  ;;  %v2350_v59 = vmul.f32 1.442695, %v2315_v31  ;;  %v2206_v45 = vpop.f32.mrb[67].mxu0  ;;  %v2279_v42 = vpop.f32.mrb[67].mxu1  ;;  %v10414_v3 = vadd.f32 %v10396_v0, %v3506_v34 }
 0x23c   :  { %8443 = vpow2.f32 %v2344_v62  ;;  %v2352_v10 = vmul.f32 1.442695, %v2316_v51  ;;  %v2317_v2 = vsub.f32 0.0, %v2206_v45  ;;  %12506 = vst [vmem:[#allocation27_spill] sm:$0xff] %v10411_v41  ;;  %v2356_v12 = vmul.f32 1.442695, %v2318_v17 }
 0x23d   :  { %8445 = vpow2.f32 %v2348_v46  ;;  %v2319_v47 = vsub.f32 0.0, %v2279_v42  ;;  %12507 = vst [vmem:[#allocation28_spill] sm:$0xff] %v10414_v3  ;;  %v3438_v39 = vld [vmem:[%s12413_s0 + $0x90] sm:$0xff]  ;;  %v3510_v62 = vmul.f32 %v10352_v6, %v3456_v7  ;;  %v3509_v46 = vmul.f32 %v10355_v9, %v3455_v40  ;;  %v10426_v37 = vld [vmem:[%s12413_s0 + $0x98] sm:$0xff] }
 0x23e   :  { %8447 = vpow2.f32 %v2346_v32  ;;  %v2354_v30 = vmul.f32 1.442695, %v2317_v2  ;;  %v3511_v42 = vmul.f32 %v10364_v36, %v3457_v19  ;;  %v3458_v11 = vunpack.c.l.bf16 %v3438_v39  ;;  %12508 = vst [vmem:[#allocation29_spill] sm:$0xff] %v10426_v37 }
 0x23f   :  { %8449 = vpow2.f32 %v2350_v59  ;;  %v2358_v51 = vmul.f32 1.442695, %v2319_v47  ;;  %v2210_v45 = vpop.f32.mrb[68].mxu0  ;;  %v2283_v52 = vpop.f32.mrb[68].mxu1  ;;  %v3459_v59 = vunpack.c.h.bf16 %v3438_v39  ;;  %v3460_v41 = vunpack.c.l.bf16 %v10426_v37 }
 0x240   :  { %8451 = vpow2.f32 %v2352_v10  ;;  %v2320_v17 = vsub.f32 0.0, %v2210_v45  ;;  %v2322_v60 = vsub.f32 0.0, %v2283_v52  ;;  %v2212_v34 = vpop.f32.mrb[69].mxu0  ;;  %v2285_v31 = vpop.f32.mrb[69].mxu1 }
 0x241   :  { %8453 = vpow2.f32 %v2356_v12  ;;  %v2321_v4 = vsub.f32 0.0, %v2212_v34  ;;  %v2323_v47 = vsub.f32 0.0, %v2285_v31  ;;  %v2214_v7 = vpop.f32.mrb[70].mxu0  ;;  %v2287_v32 = vpop.f32.mrb[70].mxu1  ;;  %v10431_v12 = vadd.f32 %v10402_v57, %v10399_v50 }
 0x242   :  { %8455 = vpow2.f32 %v2354_v30  ;;  %v2360_v40 = vmul.f32 1.442695, %v2320_v17  ;;  %v2364_v19 = vmul.f32 1.442695, %v2322_v60  ;;  %v2324_v10 = vsub.f32 0.0, %v2214_v7  ;;  %v2216_v2 = vpop.f32.mrb[71].mxu0 }
 0x243   :  { %8457 = vpow2.f32 %v2358_v51  ;;  %v2362_v45 = vmul.f32 1.442695, %v2321_v4  ;;  %v2366_v52 = vmul.f32 1.442695, %v2323_v47  ;;  %v2289_v3 = vpop.f32.mrb[71].mxu1  ;;  %12509 = vst [vmem:[#allocation30_spill] sm:$0xff] %v10431_v12  ;;  %v3512_v34 = vmul.f32 %v10346_v1, %v3458_v11 }
 0x244   :  { %8459 = vpow2.f32 %v2360_v40  ;;  %v2368_v36 = vmul.f32 1.442695, %v2324_v10  ;;  %v2326_v39 = vsub.f32 0.0, %v2287_v32  ;;  %v10436_v30 = vadd.f32 %v10408_v22, %v10405_v21 }
 0x245   :  { %8461 = vpow2.f32 %v2364_v19  ;;  %v10439_v51 = vadd.f32 %v10386_v53, %v3508_v58  ;;  %v10442_v60 = vadd.f32 %v10396_v0, %v3510_v62  ;;  %v10445_v31 = vadd.f32 %v10402_v57, %v3509_v46 }
 0x246   :  { %12510 = vst [vmem:[#allocation31_spill] sm:$0xff] %v10436_v30  ;;  %v8444_v17 = vpop.eup %8443  ;;  %8463 = vpow2.f32 %v2362_v45  ;;  %v10448_v50 = vadd.f32 %v10408_v22, %v3511_v42  ;;  %v3514_v7 = vmul.f32 %v10352_v6, %v3460_v41  ;;  %v3513_v58 = vmul.f32 %v10355_v9, %v3459_v59 }
 0x247   :  { %12511 = vst [vmem:[#allocation32_spill] sm:$0xff] %v10439_v51  ;;  %12512 = vst [vmem:[#allocation33_spill] sm:$0xff] %v10442_v60  ;;  %v8446_v11 = vpop.eup %8445  ;;  %v2408_v4 = vadd.f32 1.0, %v8444_v17  ;;  %8465 = vpow2.f32 %v2366_v52  ;;  %v2220_v47 = vpop.f32.mrb[72].mxu0  ;;  %v2325_v62 = vsub.f32 0.0, %v2216_v2  ;;  %v10453_v46 = vadd.f32 %v10386_v53, %v3512_v34 }
 0x248   :  { %12513 = vst [vmem:[#allocation34_spill] sm:$0xff] %v10445_v31  ;;  %12514 = vst [vmem:[#allocation35_spill] sm:$0xff] %v10448_v50  ;;  %v2293_v21 = vpop.f32.mrb[72].mxu1  ;;  %v8448_v32 = vpop.eup %8447  ;;  %v2410_v40 = vadd.f32 1.0, %v8446_v11  ;;  %8467 = vpow2.f32 %v2368_v36  ;;  %v10455_v17 = vmul.f32 1.442695, %v2326_v39  ;;  %v10465_v51 = vadd.f32 %v10402_v57, %v3513_v58 }
 0x249   :  { %v2222_v19 = vpop.f32.mrb[73].mxu0  ;;  %v2295_v10 = vpop.f32.mrb[73].mxu1  ;;  %12515 = vst [vmem:[#allocation36_spill] sm:$0xff] %v10453_v46  ;;  %8469 = vrcp.f32 %v2408_v4  ;;  %v2409_v45 = vadd.f32 1.0, %v8448_v32  ;;  %v2327_v52 = vsub.f32 0.0, %v2289_v3  ;;  %v2328_v11 = vsub.f32 0.0, %v2220_v47 }
 0x24a   :  { %v8450_v42 = vpop.eup %8449  ;;  %v2224_v50 = vpop.f32.mrb[74].mxu0  ;;  %8471 = vrcp.f32 %v2410_v40  ;;  %v2330_v36 = vsub.f32 0.0, %v2293_v21  ;;  %v2329_v34 = vsub.f32 0.0, %v2222_v19  ;;  %v10460_v4 = vadd.f32 %v10396_v0, %v3514_v7  ;;  %12517 = vst [vmem:[#allocation38_spill] sm:$0xff] %v10465_v51 }
 0x24b   :  { %v10457_v31 = vpop.f32.mrb[74].mxu1  ;;  %v8452_v41 = vpop.eup %8451  ;;  %v2411_v59 = vadd.f32 1.0, %v8450_v42  ;;  %8473 = vrcp.f32 %v2409_v45  ;;  %v10462_v32 = vmul.f32 1.442695, %v2325_v62  ;;  %v10467_v21 = vmul.f32 1.442695, %v2327_v52 }
 0x24c   :  { %v2226_v2 = vpop.f32.mrb[75].mxu0  ;;  %v8454_v9 = vpop.eup %8453  ;;  %v2412_v60 = vadd.f32 1.0, %v8452_v41  ;;  %12516 = vst [vmem:[#allocation37_spill] sm:$0xff] %v10460_v4  ;;  %v2331_v42 = vsub.f32 0.0, %v2295_v10  ;;  %v10469_v41 = vmul.f32 1.442695, %v2328_v11 }
 0x24d   :  { %v2299_v46 = vpop.f32.mrb[75].mxu1  ;;  %v8456_v39 = vpop.eup %8455  ;;  %8475 = vrcp.f32 %v2411_v59  ;;  %v2414_v3 = vadd.f32 1.0, %v8454_v9  ;;  %v10471_v7 = vmul.f32 1.442695, %v2330_v36  ;;  %v10473_v62 = vmul.f32 1.442695, %v2329_v34 }
 0x24e   :  { %v8458_v40 = vpop.eup %8457  ;;  %8477 = vrcp.f32 %v2412_v60  ;;  %v2413_v47 = vadd.f32 1.0, %v8456_v39  ;;  %v2332_v58 = vsub.f32 0.0, %v2224_v50  ;;  %v2334_v52 = vsub.f32 0.0, %v10457_v31 }
 0x24f   :  { %v8460_v45 = vpop.eup %8459  ;;  %8479 = vrcp.f32 %v2414_v3  ;;  %v2415_v19 = vadd.f32 1.0, %v8458_v40  ;;  %v2230_v57 = vpop.f32.mrb[76].mxu0  ;;  %v2333_v10 = vsub.f32 0.0, %v2226_v2  ;;  %v2335_v36 = vsub.f32 0.0, %v2299_v46 }
 0x250   :  { %v8462_v59 = vpop.eup %8461  ;;  %8481 = vrcp.f32 %v2413_v47  ;;  %v2416_v9 = vadd.f32 1.0, %v8460_v45  ;;  %v2303_v39 = vpop.f32.mrb[76].mxu1  ;;  %v2336_v4 = vsub.f32 0.0, %v2230_v57  ;;  %v10478_v45 = vmul.f32 1.442695, %v2331_v42 }
 0x251   :  { %v8464_v51 = vpop.eup %8463  ;;  %8483 = vrcp.f32 %v2415_v19  ;;  %v2418_v60 = vadd.f32 1.0, %v8462_v59  ;;  %v2232_v3 = vpop.f32.mrb[77].mxu0  ;;  %v2338_v19 = vsub.f32 0.0, %v2303_v39  ;;  %v10491_v42 = vmul.f32 1.442695, %v2333_v10 }
 0x252   :  { %v8466_v40 = vpop.eup %8465  ;;  %8485 = vrcp.f32 %v2416_v9  ;;  %v2417_v11 = vadd.f32 1.0, %v8464_v51  ;;  %v2305_v0 = vpop.f32.mrb[77].mxu1  ;;  %v10484_v9 = vmul.f32 1.442695, %v2332_v58  ;;  %v2337_v51 = vsub.f32 0.0, %v2232_v3 }
 0x253   :  { %v10476_v47 = vpop.f32.mrb[78].mxu0  ;;  %v8468_v34 = vpop.eup %8467  ;;  %8487 = vrcp.f32 %v2418_v60  ;;  %v2419_v50 = vadd.f32 1.0, %v8466_v40  ;;  %v10489_v60 = vmul.f32 1.442695, %v2334_v52  ;;  %v2339_v39 = vsub.f32 0.0, %v2305_v0 }
 0x254   :  { %v10480_v59 = vpop.f32.mrb[78].mxu1  ;;  %v10482_v31 = vpop.f32.mrb[79].mxu0  ;;  %8489 = vrcp.f32 %v2417_v11  ;;  %v2420_v30 = vadd.f32 1.0, %v8468_v34  ;;  %v10494_v6 = vmul.f32 1.442695, %v2335_v36 }
 0x255   :  { %v8470_v2 = vpop.eup %8469  ;;  %v10486_v57 = vpop.f32.mrb[79].mxu1  ;;  %v10496_v11 = vmul.f32 1.442695, %v2336_v4  ;;  %8491 = vrcp.f32 %v2419_v50 }
 0x256   :  { %v8472_v46 = vpop.eup %8471  ;;  %v2628_v12 = vmul.f32 %v8470_v2, %v10217_v15  ;;  %v10500_v15 = vmul.f32 1.442695, %v2338_v19  ;;  %8493 = vrcp.f32 %v2420_v30  ;;  %v10503_v2 = vmul.f32 1.442695, %v2337_v51 }
 0x257   :  { %v8474_v40 = vpop.eup %8473  ;;  %v2630_v53 = vmul.f32 %v8472_v46, %v10220_v43  ;;  %v10505_v43 = vpop.f32.mrb[80].mxu0  ;;  %8495 = vpow2.f32 %v10455_v17  ;;  %v2340_v51 = vsub.f32 0.0, %v10476_v47 }
 0x258   :  { %v8476_v3 = vpop.eup %8475  ;;  %v2660_v34 = vmax.f32 %v2628_v12, 1e-06  ;;  %v2629_v22 = vmul.f32 %v8474_v40, %v10223_v23  ;;  %v10507_v4 = vpop.f32.mrb[80].mxu1  ;;  %v10511_v23 = vmul.f32 1.442695, %v2339_v39  ;;  %8497 = vpow2.f32 %v10462_v32 }
 0x259   :  { %v8478_v52 = vpop.eup %8477  ;;  %v2662_v10 = vmax.f32 %v2630_v53, 1e-06  ;;  %v2631_v0 = vmul.f32 %v8476_v3, %v10226_v48  ;;  %v10513_v50 = vpop.f32.mrb[81].mxu0  ;;  %8499 = vpow2.f32 %v10467_v21 }
 0x25a   :  { %v8480_v36 = vpop.eup %8479  ;;  %v2661_v46 = vmax.f32 %v2629_v22, 1e-06  ;;  %v2632_v12 = vmul.f32 %v8478_v52, %v10229_v25  ;;  %v10515_v53 = vpop.f32.mrb[81].mxu1  ;;  %v2692_v17 = vmul.f32 %v2660_v34, %v2660_v34  ;;  %8501 = vpow2.f32 %v10469_v41 }
 0x25b   :  { %v8482_v48 = vpop.eup %8481  ;;  %v2663_v30 = vmax.f32 %v2631_v0, 1e-06  ;;  %v2634_v19 = vmul.f32 %v8480_v36, %v10232_v27  ;;  %v10520_v40 = vpop.f32.mrb[82].mxu0  ;;  %v2694_v36 = vmul.f32 %v2662_v10, %v2662_v10 }
 0x25c   :  { %v10522_v22 = vpop.f32.mrb[82].mxu1  ;;  %v8484_v25 = vpop.eup %8483  ;;  %v2664_v39 = vmax.f32 %v2632_v12, 1e-06  ;;  %v2633_v3 = vmul.f32 %v8482_v48, %v10241_v54  ;;  %v2693_v1 = vmul.f32 %v2661_v46, %v2661_v46 }
 0x25d   :  { %12518 = vst [vmem:[#allocation39_spill] sm:$0xff] %v10522_v22  ;;  %v10526_v52 = vpop.f32.mrb[83].mxu0  ;;  %v10528_v0 = vpop.f32.mrb[83].mxu1  ;;  %v2666_v32 = vmax.f32 %v2634_v19, 1e-06  ;;  %v2635_v47 = vmul.f32 %v8484_v25, %v10244_v56  ;;  %v2695_v48 = vmul.f32 %v2663_v30, %v2663_v30  ;;  %v2726_v63 = vmul.f32 %v2694_v36, %v2662_v10 }
 0x25e   :  { %12519 = vst [vmem:[#allocation40_spill] sm:$0xff] %v10526_v52  ;;  %12520 = vst [vmem:[#allocation41_spill] sm:$0xff] %v10528_v0  ;;  %v8486_v27 = vpop.eup %8485  ;;  %v2696_v37 = vmul.f32 %v2664_v39, %v2664_v39  ;;  %v2665_v38 = vmax.f32 %v2633_v3, 1e-06  ;;  %v2724_v0 = vmul.f32 %v2692_v17, %v2660_v34 }
 0x25f   :  { %v8488_v58 = vpop.eup %8487  ;;  %v2636_v12 = vmul.f32 %v8486_v27, %v10261_v14  ;;  %v2698_v21 = vmul.f32 %v2666_v32, %v2666_v32  ;;  %v2667_v49 = vmax.f32 %v2635_v47, 1e-06  ;;  %v10535_v5 = vpop.f32.mrb[84].mxu0  ;;  %v2725_v27 = vmul.f32 %v2693_v1, %v2661_v46 }
 0x260   :  { %v8490_v54 = vpop.eup %8489  ;;  %v2728_v22 = vmul.f32 %v2696_v37, %v2664_v39  ;;  %v2697_v13 = vmul.f32 %v2665_v38, %v2665_v38  ;;  %v2638_v41 = vmul.f32 %v8488_v58, %v10264_v18  ;;  %v10537_v3 = vpop.f32.mrb[84].mxu1  ;;  %v2727_v10 = vmul.f32 %v2695_v48, %v2663_v30 }
 0x261   :  { %v2668_v19 = vmax.f32 %v2636_v12, 1e-06  ;;  %v2730_v56 = vmul.f32 %v2698_v21, %v2666_v32  ;;  %v2699_v25 = vmul.f32 %v2667_v49, %v2667_v49  ;;  %v8492_v14 = vpop.eup %8491  ;;  %v2637_v47 = vmul.f32 %v8490_v54, %v10267_v24  ;;  %v10540_v52 = vpop.f32.mrb[85].mxu0 }
 0x262   :  { %v2756_v44 = vadd.f32 %v2728_v22, %v2724_v0  ;;  %v2729_v16 = vmul.f32 %v2697_v13, %v2665_v38  ;;  %v10542_v37 = vpop.f32.mrb[85].mxu1  ;;  %v8494_v34 = vpop.eup %8493  ;;  %v10548_v46 = vmul.f32 1.442695, %v2340_v51  ;;  %v2639_v0 = vmul.f32 %v8492_v14, %v10270_v55 }
 0x263   :  { %v2770_v17 = vadd.f32 %v2730_v56, %v2726_v63  ;;  %v2731_v39 = vmul.f32 %v2699_v25, %v2667_v49  ;;  %v2700_v36 = vmul.f32 %v2668_v19, %v2668_v19  ;;  %v10544_v18 = vpop.f32.mrb[86].mxu0  ;;  %v10546_v58 = vpop.f32.mrb[86].mxu1  ;;  %v10555_v49 = vmax.f32 %v2638_v41, 1e-06 }
 0x264   :  { %12521 = vst [vmem:[#allocation42_spill] sm:$0xff] %v10544_v18  ;;  %12522 = vst [vmem:[#allocation43_spill] sm:$0xff] %v10546_v58  ;;  %v8496_v32 = vpop.eup %8495  ;;  %v2757_v12 = vrot.slane %v2756_v44, 4  ;;  %v2763_v1 = vadd.f32 %v2729_v16, %v2725_v27  ;;  %v10551_v13 = vpop.f32.mrb[87].mxu0  ;;  %v10558_v56 = vmax.f32 %v2637_v47, 1e-06  ;;  %v2640_v16 = vmul.f32 %v8494_v34, %v10273_v26 }
 0x265   :  { %12523 = vst [vmem:[#allocation44_spill] sm:$0xff] %v10551_v13  ;;  %v10553_v38 = vpop.f32.mrb[87].mxu1  ;;  %v8498_v22 = vpop.eup %8497  ;;  %v2771_v30 = vrot.slane %v2770_v17, 4  ;;  %v2777_v63 = vadd.f32 %v2731_v39, %v2727_v10  ;;  %v2732_v24 = vmul.f32 %v2700_v36, %v2668_v19  ;;  %v2422_v13 = vadd.f32 1.0, %v8496_v32 }
 0x266   :  { %12524 = vst [vmem:[#allocation45_spill] sm:$0xff] %v10553_v38  ;;  %v8500_v54 = vpop.eup %8499  ;;  %v2758_v48 = vadd.f32 %v2757_v12, %v2756_v44  ;;  %v2764_v21 = vrot.slane %v2763_v1, 4  ;;  %v2672_v18 = vmax.f32 %v2640_v16, 1e-06  ;;  %v2421_v10 = vadd.f32 1.0, %v8498_v22 }
 0x267   :  { %v8502_v51 = vpop.eup %8501  ;;  %v2772_v25 = vadd.f32 %v2771_v30, %v2770_v17  ;;  %v2778_v27 = vrot.slane %v2777_v63, 4  ;;  %8503 = vrcp.f32 %v2422_v13  ;;  %v2423_v55 = vadd.f32 1.0, %v8500_v54  ;;  %v10561_v14 = vpop.f32.mrb[88].mxu0 }
 0x268   :  { %v2759_v38 = vrot.slane %v2758_v48, 2  ;;  %v2765_v58 = vadd.f32 %v2764_v21, %v2763_v1  ;;  %v10563_v44 = vpop.f32.mrb[88].mxu1  ;;  %v2704_v26 = vmul.f32 %v2672_v18, %v2672_v18  ;;  %8505 = vrcp.f32 %v2421_v10  ;;  %v10565_v34 = vpop.f32.mrb[89].mxu0 }
 0x269   :  { %v2773_v41 = vrot.slane %v2772_v25, 2  ;;  %v2779_v39 = vadd.f32 %v2778_v27, %v2777_v63  ;;  %v10567_v19 = vpop.f32.mrb[89].mxu1  ;;  %8507 = vrcp.f32 %v2423_v55  ;;  %v2424_v32 = vadd.f32 1.0, %v8502_v51  ;;  %v10569_v1 = vpop.f32.mrb[90].mxu0 }
 0x26a   :  { %v2760_v47 = vadd.f32 %v2759_v38, %v2758_v48  ;;  %v2766_v12 = vrot.slane %v2765_v58, 2  ;;  %v10571_v13 = vpop.f32.mrb[90].mxu1  ;;  %v2736_v63 = vmul.f32 %v2704_v26, %v2672_v18  ;;  %8509 = vpow2.f32 %v10471_v7  ;;  %v10574_v38 = vpop.f32.mrb[91].mxu0 }
 0x26b   :  { %v2774_v17 = vadd.f32 %v2773_v41, %v2772_v25  ;;  %v2780_v36 = vrot.slane %v2779_v39, 2  ;;  %v10576_v54 = vpop.f32.mrb[91].mxu1  ;;  %v2702_v16 = vmul.f32 %v10555_v49, %v10555_v49  ;;  %8511 = vrcp.f32 %v2424_v32 }
 0x26c   :  { %v2761_v22 = vrot.slane %v2760_v47, 1  ;;  %v2767_v30 = vadd.f32 %v2766_v12, %v2765_v58  ;;  %v2784_v27 = vadd.f32 %v2736_v63, %v2732_v24  ;;  %8513 = vpow2.f32 %v10473_v62 }
 0x26d   :  { %v2775_v48 = vrot.slane %v2774_v17, 1  ;;  %v2781_v21 = vadd.f32 %v2780_v36, %v2779_v39  ;;  %v2671_v18 = vmax.f32 %v2639_v0, 1e-06  ;;  %8515 = vpow2.f32 %v10478_v45 }
 0x26e   :  { %v2762_v51 = vadd.f32 %v2761_v22, %v2760_v47  ;;  %v2768_v25 = vrot.slane %v2767_v30, 1  ;;  %v2785_v55 = vrot.slane %v2784_v27, 4  ;;  %8517 = vpow2.f32 %v10484_v9 }
 0x26f   :  { %v2776_v10 = vadd.f32 %v2775_v48, %v2774_v17  ;;  %v2782_v58 = vrot.slane %v2781_v21, 1  ;;  %8519 = vpow2.f32 %v10489_v60  ;;  %v12527_v24 = vsub.f32 0.0, %v10480_v59  ;;  %v10592_v62 = vpop.f32.mrb[92].mxu0  ;;  %v10594_v0 = vpop.f32.mrb[92].mxu1 }
 0x270   :  { %v10582_v7 = vmul.f32 0.0625, %v2762_v51  ;;  %v2769_v41 = vadd.f32 %v2768_v25, %v2767_v30  ;;  %12528 = vst [vmem:[#allocation48_spill] sm:$0xff] %v10594_v0  ;;  %v2701_v26 = vmul.f32 %v10558_v56, %v10558_v56  ;;  %v2786_v17 = vadd.f32 %v2785_v55, %v2784_v27  ;;  %v10601_v9 = vpop.f32.mrb[93].mxu0 }
 0x271   :  { %v10585_v39 = vmul.f32 0.0625, %v2776_v10  ;;  %v2783_v12 = vadd.f32 %v2782_v58, %v2781_v21  ;;  %v10590_v47 = vmul.f32 1.442695, %v12527_v24  ;;  %8521 = vpow2.f32 %v10491_v42  ;;  %12530 = vst [vmem:[#allocation50_spill] sm:$0xff] %v10601_v9  ;;  %v8504_v36 = vpop.eup %8503 }
 0x272   :  { %12525 = vst [vmem:[#allocation46_spill] sm:$0xff] %v10582_v7  ;;  %v10596_v45 = vmul.f32 0.0625, %v2769_v41  ;;  %v2734_v59 = vmul.f32 %v2702_v16, %v10555_v49  ;;  %v2703_v32 = vmul.f32 %v2671_v18, %v2671_v18  ;;  %8523 = vpow2.f32 %v10494_v6  ;;  %v8506_v22 = vpop.eup %8505  ;;  %v10616_v6 = vpop.f32.mrb[93].mxu1 }
 0x273   :  { %12526 = vst [vmem:[#allocation47_spill] sm:$0xff] %v10585_v39  ;;  %v10603_v60 = vmul.f32 0.0625, %v2783_v12  ;;  %v2787_v63 = vrot.slane %v2786_v17, 2  ;;  %v2642_v48 = vmul.f32 %v8504_v36, %v10276_v28  ;;  %8525 = vpow2.f32 %v10496_v11  ;;  %v8508_v42 = vpop.eup %8507  ;;  %12532 = vst [vmem:[#allocation52_spill] sm:$0xff] %v10616_v6 }
 0x274   :  { %12529 = vst [vmem:[#allocation49_spill] sm:$0xff] %v10596_v45  ;;  %v2641_v51 = vmul.f32 %v8506_v22, %v10285_v35  ;;  %8527 = vpow2.f32 %v10500_v15  ;;  %v2343_v49 = vsub.f32 0.0, %v10486_v57  ;;  %v8510_v16 = vpop.eup %8509  ;;  %v2733_v25 = vmul.f32 %v2701_v26, %v10558_v56 }
 0x275   :  { %12531 = vst [vmem:[#allocation51_spill] sm:$0xff] %v10603_v60  ;;  %v2674_v27 = vmax.f32 %v2642_v48, 1e-06  ;;  %v2643_v28 = vmul.f32 %v8508_v42, %v10288_v8  ;;  %8529 = vpow2.f32 %v10503_v2  ;;  %v8512_v11 = vpop.eup %8511  ;;  %v2735_v10 = vmul.f32 %v2703_v32, %v2671_v18  ;;  %v12543_v60 = vld [vmem:[#allocation39_spill] sm:$0xff] }
 0x276   :  { %v2673_v58 = vmax.f32 %v2641_v51, 1e-06  ;;  %v2426_v41 = vadd.f32 1.0, %v8510_v16  ;;  %8531 = vpow2.f32 %v10511_v23  ;;  %v8514_v35 = vpop.eup %8513  ;;  %v2788_v15 = vadd.f32 %v2787_v63, %v2786_v17  ;;  %v10630_v17 = vpop.f32.mrb[94].mxu0 }
 0x277   :  { %v2706_v55 = vmul.f32 %v2674_v27, %v2674_v27  ;;  %v2675_v57 = vmax.f32 %v2643_v28, 1e-06  ;;  %v12533_v12 = vsub.f32 0.0, %v10482_v31  ;;  %v8516_v56 = vpop.eup %8515  ;;  %v2425_v8 = vadd.f32 1.0, %v8514_v35  ;;  %12534 = vst [vmem:[#allocation53_spill] sm:$0xff] %v10630_v17 }
 0x278   :  { %v2705_v26 = vmul.f32 %v2673_v58, %v2673_v58  ;;  %8533 = vrcp.f32 %v2426_v41  ;;  %v10626_v36 = vmul.f32 1.442695, %v2343_v49  ;;  %v8518_v2 = vpop.eup %8517  ;;  %v3274_v22 = vsub.f32 0.0, %v10505_v43 }
 0x279   :  { %v10624_v24 = vmul.f32 1.442695, %v12533_v12  ;;  %v2738_v18 = vmul.f32 %v2706_v55, %v2674_v27  ;;  %v2707_v32 = vmul.f32 %v2675_v57, %v2675_v57  ;;  %v3276_v23 = vsub.f32 0.0, %v10507_v4  ;;  %v8520_v63 = vpop.eup %8519 }
 0x27a   :  { %v2737_v48 = vmul.f32 %v2705_v26, %v2673_v58  ;;  %8535 = vrcp.f32 %v2425_v8  ;;  %v2427_v31 = vadd.f32 1.0, %v8516_v56  ;;  %v2428_v42 = vadd.f32 1.0, %v8518_v2 }
 0x27b   :  { %v8522_v51 = vpop.eup %8521  ;;  %v2789_v16 = vrot.slane %v2788_v15, 1  ;;  %v2798_v28 = vadd.f32 %v2738_v18, %v2734_v59  ;;  %v2739_v41 = vmul.f32 %v2707_v32, %v2675_v57  ;;  %v2644_v49 = vmul.f32 %v8512_v11, %v10305_v29 }
 0x27c   :  { %v8524_v35 = vpop.eup %8523  ;;  %v2791_v27 = vadd.f32 %v2737_v48, %v2733_v25  ;;  %8537 = vrcp.f32 %v2427_v31  ;;  %v2430_v55 = vadd.f32 1.0, %v8520_v63  ;;  %v2429_v43 = vadd.f32 1.0, %v8522_v51  ;;  %v10634_v25 = vpop.f32.mrb[94].mxu1 }
 0x27d   :  { %v8526_v12 = vpop.eup %8525  ;;  %v2799_v4 = vrot.slane %v2798_v28, 4  ;;  %v2805_v21 = vadd.f32 %v2739_v41, %v2735_v10  ;;  %8539 = vrcp.f32 %v2428_v42  ;;  %v3275_v58 = vsub.f32 0.0, %v10513_v50  ;;  %12535 = vst [vmem:[#allocation54_spill] sm:$0xff] %v10634_v25 }
 0x27e   :  { %v8528_v26 = vpop.eup %8527  ;;  %v2792_v56 = vrot.slane %v2791_v27, 4  ;;  %8541 = vrcp.f32 %v2430_v55  ;;  %v2431_v8 = vadd.f32 1.0, %v8524_v35  ;;  %v2432_v2 = vadd.f32 1.0, %v8526_v12 }
 0x27f   :  { %v8530_v59 = vpop.eup %8529  ;;  %v2790_v57 = vadd.f32 %v2789_v16, %v2788_v15  ;;  %v2800_v18 = vadd.f32 %v2799_v4, %v2798_v28  ;;  %v2806_v29 = vrot.slane %v2805_v21, 4  ;;  %8543 = vrcp.f32 %v2429_v43 }
 0x280   :  { %v8532_v11 = vpop.eup %8531  ;;  %v2793_v32 = vadd.f32 %v2792_v56, %v2791_v27  ;;  %v10636_v63 = vmax.f32 %v2644_v49, 1e-06  ;;  %8545 = vrcp.f32 %v2431_v8  ;;  %v2434_v10 = vadd.f32 1.0, %v8528_v26 }
 0x281   :  { %v2801_v48 = vrot.slane %v2800_v18, 2  ;;  %v2807_v50 = vadd.f32 %v2806_v29, %v2805_v21  ;;  %8547 = vrcp.f32 %v2432_v2  ;;  %v10638_v31 = vmul.f32 1.442695, %v3274_v22  ;;  %v10652_v29 = vpop.f32.mrb[95].mxu0 }
 0x282   :  { %v8534_v42 = vpop.eup %8533  ;;  %v2794_v51 = vrot.slane %v2793_v32, 2  ;;  %v2433_v41 = vadd.f32 1.0, %v8530_v59  ;;  %v10640_v15 = vmul.f32 1.442695, %v3276_v23  ;;  %v10642_v16 = vmul.f32 1.442695, %v3275_v58 }
 0x283   :  { %v2802_v28 = vadd.f32 %v2801_v48, %v2800_v18  ;;  %v2808_v35 = vrot.slane %v2807_v50, 2  ;;  %v2646_v27 = vmul.f32 %v8534_v42, %v10308_v20  ;;  %v2435_v49 = vadd.f32 1.0, %v8532_v11  ;;  %12536 = vst [vmem:[#allocation55_spill] sm:$0xff] %v10652_v29  ;;  %v12537_v48 = vld [vmem:[#allocation7_spill] sm:$0xff]  ;;  %v10674_v7 = vpop.f32.mrb[96].mxu0 }
 0x284   :  { %v8536_v55 = vpop.eup %8535  ;;  %v10645_v43 = vmul.f32 0.0625, %v2790_v57  ;;  %v2795_v12 = vadd.f32 %v2794_v51, %v2793_v32  ;;  %v2708_v21 = vmul.f32 %v10636_v63, %v10636_v63  ;;  %8549 = vrcp.f32 %v2434_v10 }
 0x285   :  { %v2803_v22 = vrot.slane %v2802_v28, 1  ;;  %v2809_v4 = vadd.f32 %v2808_v35, %v2807_v50  ;;  %v2678_v26 = vmax.f32 %v2646_v27, 1e-06  ;;  %v2645_v23 = vmul.f32 %v8536_v55, %v10311_v33 }
 0x286   :  { %v8538_v58 = vpop.eup %8537  ;;  %v2796_v56 = vrot.slane %v2795_v12, 1  ;;  %8551 = vrcp.f32 %v2433_v41  ;;  %v3277_v8 = vsub.f32 0.0, %v10515_v53  ;;  %v3278_v20 = vsub.f32 0.0, %v10520_v40  ;;  %v10658_v40 = vpop.f32.mrb[95].mxu1 }
 0x287   :  { %v8540_v2 = vpop.eup %8539  ;;  %v2804_v59 = vadd.f32 %v2803_v22, %v2802_v28  ;;  %v2810_v57 = vrot.slane %v2809_v4, 1  ;;  %v2677_v18 = vmax.f32 %v2645_v23, 1e-06  ;;  %8553 = vrcp.f32 %v2435_v49  ;;  %12538 = vst [vmem:[#allocation7_spill] sm:$0xff] %v10658_v40  ;;  %v12539_v49 = vld [vmem:[#allocation8_spill] sm:$0xff]  ;;  %v12540_v23 = vld [vmem:[#allocation9_spill] sm:$0xff] }
 0x288   :  { %v8542_v11 = vpop.eup %8541  ;;  %v2797_v32 = vadd.f32 %v2796_v56, %v2795_v12  ;;  %v2647_v10 = vmul.f32 %v8538_v58, %v10314_v61  ;;  %v2648_v33 = vmul.f32 %v8540_v2, %v12537_v48  ;;  %8555 = vpow2.f32 %v10548_v46  ;;  %v12541_v46 = vld [vmem:[#allocation10_spill] sm:$0xff]  ;;  %12545 = vst [vmem:[#allocation8_spill] sm:$0xff] %v10674_v7 }
 0x289   :  { %v8544_v50 = vpop.eup %8543  ;;  %v2874_v42 = vmul.f32 0.0625, %v2804_v59  ;;  %v2811_v53 = vadd.f32 %v2810_v57, %v2809_v4  ;;  %v2710_v51 = vmul.f32 %v2678_v26, %v2678_v26  ;;  %8557 = vpow2.f32 %v10590_v47 }
 0x28a   :  { %v8546_v41 = vpop.eup %8545  ;;  %v2873_v28 = vmul.f32 0.0625, %v2797_v32  ;;  %v2679_v35 = vmax.f32 %v2647_v10, 1e-06  ;;  %v2680_v27 = vmax.f32 %v2648_v33, 1e-06  ;;  %v2650_v55 = vmul.f32 %v8542_v11, %v12539_v49  ;;  %v12542_v32 = vld [vmem:[#allocation14_spill] sm:$0xff] }
 0x28b   :  { %v8548_v12 = vpop.eup %8547  ;;  %v2875_v61 = vmul.f32 0.0625, %v2811_v53  ;;  %v2709_v22 = vmul.f32 %v2677_v18, %v2677_v18  ;;  %v2649_v58 = vmul.f32 %v8544_v50, %v12540_v23  ;;  %v2651_v56 = vmul.f32 %v8546_v41, %v12541_v46 }
 0x28c   :  { %v2902_v4 = vcombine.low %v10645_v43, %v2873_v28  ;;  %v2711_v2 = vmul.f32 %v2679_v35, %v2679_v35  ;;  %v2712_v59 = vmul.f32 %v2680_v27, %v2680_v27  ;;  %v2682_v47 = vmax.f32 %v2650_v55, 1e-06 }
 0x28d   :  { %v2903_v57 = vcombine.low %v2874_v42, %v2875_v61  ;;  %v2681_v48 = vmax.f32 %v2649_v58, 1e-06  ;;  %v2683_v30 = vmax.f32 %v2651_v56, 1e-06  ;;  %v2652_v10 = vmul.f32 %v8548_v12, %v12542_v32 }
 0x28e   :  { %v8550_v33 = vpop.eup %8549  ;;  %v2740_v11 = vmul.f32 %v2708_v21, %v10636_v63  ;;  %v2744_v49 = vmul.f32 %v2712_v59, %v2680_v27  ;;  %v2714_v53 = vmul.f32 %v2682_v47, %v2682_v47  ;;  %v3280_v39 = vsub.f32 0.0, %v12543_v60  ;;  %v12544_v59 = vld [vmem:[#allocation15_spill] sm:$0xff] }
 0x28f   :  { %v2713_v50 = vmul.f32 %v2681_v48, %v2681_v48  ;;  %v2715_v23 = vmul.f32 %v2683_v30, %v2683_v30  ;;  %v10667_v41 = vmul.f32 1.442695, %v3277_v8  ;;  %v10669_v43 = vmul.f32 1.442695, %v3278_v20 }
 0x290   :  { %v8552_v28 = vpop.eup %8551  ;;  %v2742_v55 = vmul.f32 %v2710_v51, %v2678_v26  ;;  %v2741_v42 = vmul.f32 %v2709_v22, %v2677_v18  ;;  %v2812_v61 = vadd.f32 %v2744_v49, %v2740_v11  ;;  %v2746_v58 = vmul.f32 %v2714_v53, %v2682_v47  ;;  %v12546_v18 = vld [vmem:[#allocation17_spill] sm:$0xff]  ;;  %v12547_v22 = vld [vmem:[#allocation40_spill] sm:$0xff]  ;;  %v10688_v53 = vpop.f32.mrb[97].mxu0 }
 0x291   :  { %v8554_v46 = vpop.eup %8553  ;;  %v2743_v12 = vmul.f32 %v2711_v2, %v2679_v35  ;;  %v2745_v56 = vmul.f32 %v2713_v50, %v2681_v48  ;;  %v2747_v32 = vmul.f32 %v2715_v23, %v2683_v30  ;;  %v10671_v63 = vmax.f32 %v2652_v10, 1e-06  ;;  %v10678_v35 = vpop.f32.mrb[96].mxu1  ;;  %12551 = vst [vmem:[#allocation39_spill] sm:$0xff] %v10688_v53 }
 0x292   :  { %v8556_v21 = vpop.eup %8555  ;;  %v2813_v27 = vrot.slane %v2812_v61, 4  ;;  %v2826_v60 = vadd.f32 %v2746_v58, %v2742_v55  ;;  %v2654_v45 = vmul.f32 %v8550_v33, %v12544_v59  ;;  %v3318_v8 = vmul.f32 1.442695, %v3280_v39  ;;  %12548 = vst [vmem:[#allocation9_spill] sm:$0xff] %v10678_v35  ;;  %v12552_v55 = vld [vmem:[#allocation18_spill] sm:$0xff]  ;;  %v12591_v35 = vld [vmem:[#allocation35_spill] sm:$0xff] }
 0x293   :  { %v8558_v20 = vpop.eup %8557  ;;  %v2819_v40 = vadd.f32 %v2745_v56, %v2741_v42  ;;  %v2833_v26 = vadd.f32 %v2747_v32, %v2743_v12  ;;  %v2653_v51 = vmul.f32 %v8552_v28, %v12546_v18  ;;  %v3279_v47 = vsub.f32 0.0, %v12547_v22  ;;  %v10693_v42 = vpop.f32.mrb[97].mxu1 }
 0x294   :  { %v10680_v30 = vrot.slane %v2902_v4, 7  ;;  %v10682_v2 = vrot.slane %v2903_v57, 7  ;;  %v2814_v48 = vadd.f32 %v2813_v27, %v2812_v61  ;;  %v2827_v10 = vrot.slane %v2826_v60, 4  ;;  %12553 = vst [vmem:[#allocation15_spill] sm:$0xff] %v10693_v42  ;;  %v10704_v22 = vpop.f32.mrb[98].mxu1 }
 0x295   :  { %v2820_v11 = vrot.slane %v2819_v40, 4  ;;  %v2834_v33 = vrot.slane %v2833_v26, 4  ;;  %v10686_v39 = vmul.f32 %v10671_v63, %v10671_v63  ;;  %v2436_v49 = vadd.f32 1.0, %v8556_v21  ;;  %12556 = vst [vmem:[#allocation40_spill] sm:$0xff] %v10704_v22 }
 0x296   :  { %12549 = vst [vmem:[#allocation10_spill] sm:$0xff] %v10680_v30  ;;  %12550 = vst [vmem:[#allocation14_spill] sm:$0xff] %v10682_v2  ;;  %v2815_v50 = vrot.slane %v2814_v48, 2  ;;  %v2828_v23 = vadd.f32 %v2827_v10, %v2826_v60  ;;  %v10690_v28 = vmax.f32 %v2654_v45, 1e-06  ;;  %v2655_v4 = vmul.f32 %v8554_v46, %v12552_v55  ;;  %v12554_v46 = vld [vmem:[#allocation41_spill] sm:$0xff] }
 0x297   :  { %v2821_v57 = vadd.f32 %v2820_v11, %v2819_v40  ;;  %v2835_v61 = vadd.f32 %v2834_v33, %v2833_v26  ;;  %v10695_v58 = vmax.f32 %v2653_v51, 1e-06  ;;  %8559 = vrcp.f32 %v2436_v49  ;;  %v10700_v40 = vpop.f32.mrb[98].mxu0  ;;  %v12578_v2 = vld [vmem:[#allocation12_spill] sm:$0xff] }
 0x298   :  { %v2816_v12 = vadd.f32 %v2815_v50, %v2814_v48  ;;  %v2829_v56 = vrot.slane %v2828_v23, 2  ;;  %v2438_v32 = vadd.f32 1.0, %v8558_v20  ;;  %8561 = vpow2.f32 %v10624_v24  ;;  %12555 = vst [vmem:[#allocation17_spill] sm:$0xff] %v10700_v40 }
 0x299   :  { %v2822_v21 = vrot.slane %v2821_v57, 2  ;;  %v2836_v27 = vrot.slane %v2835_v61, 2  ;;  %8563 = vpow2.f32 %v10626_v36  ;;  %v3316_v45 = vmul.f32 1.442695, %v3279_v47 }
 0x29a   :  { %v2817_v60 = vrot.slane %v2816_v12, 1  ;;  %v2830_v59 = vadd.f32 %v2829_v56, %v2828_v23  ;;  %8565 = vrcp.f32 %v2438_v32  ;;  %v3281_v18 = vsub.f32 0.0, %v12554_v46  ;;  %v12563_v32 = vld [vmem:[#allocation19_spill] sm:$0xff] }
 0x29b   :  { %v2823_v26 = vadd.f32 %v2822_v21, %v2821_v57  ;;  %v2837_v51 = vadd.f32 %v2836_v27, %v2835_v61  ;;  %8567 = vpow2.f32 %v10638_v31  ;;  %v3282_v20 = vsub.f32 0.0, %v10535_v5  ;;  %v10718_v61 = vpop.f32.mrb[99].mxu1  ;;  %v12573_v27 = vld [vmem:[#allocation21_spill] sm:$0xff] }
 0x29c   :  { %v2818_v24 = vadd.f32 %v2817_v60, %v2816_v12  ;;  %v2831_v48 = vrot.slane %v2830_v59, 1  ;;  %8569 = vpow2.f32 %v10640_v15  ;;  %v3320_v36 = vmul.f32 1.442695, %v3281_v18  ;;  %v10714_v15 = vpop.f32.mrb[99].mxu0  ;;  %12560 = vst [vmem:[#allocation57_spill] sm:$0xff] %v10718_v61  ;;  %v12584_v61 = vld [vmem:[#allocation24_spill] sm:$0xff] }
 0x29d   :  { %v2824_v47 = vrot.slane %v2823_v26, 1  ;;  %v2838_v10 = vrot.slane %v2837_v51, 1  ;;  %8571 = vpow2.f32 %v10642_v16  ;;  %v3322_v11 = vmul.f32 1.442695, %v3282_v20  ;;  %12558 = vst [vmem:[#allocation41_spill] sm:$0xff] %v10714_v15 }
 0x29e   :  { %v10708_v33 = vmul.f32 0.0625, %v2818_v24  ;;  %v2832_v49 = vadd.f32 %v2831_v48, %v2830_v59  ;;  %8573 = vpow2.f32 %v10667_v41  ;;  %v3284_v31 = vsub.f32 0.0, %v10537_v3  ;;  %v12564_v24 = vld [vmem:[#allocation20_spill] sm:$0xff] }
 0x29f   :  { %v2825_v5 = vadd.f32 %v2824_v47, %v2823_v26  ;;  %v2839_v50 = vadd.f32 %v2838_v10, %v2837_v51  ;;  %8575 = vpow2.f32 %v10669_v43  ;;  %v3283_v23 = vsub.f32 0.0, %v10540_v52 }
 0x2a0   :  { %12557 = vst [vmem:[#allocation18_spill] sm:$0xff] %v10708_v33  ;;  %v10716_v55 = vmul.f32 0.0625, %v2832_v49  ;;  %v2687_v57 = vmax.f32 %v2655_v4, 1e-06  ;;  %8577 = vpow2.f32 %v3318_v8  ;;  %v3326_v16 = vmul.f32 1.442695, %v3284_v31 }
 0x2a1   :  { %v8560_v12 = vpop.eup %8559  ;;  %v10720_v56 = vmul.f32 0.0625, %v2825_v5  ;;  %v10722_v41 = vmul.f32 0.0625, %v2839_v50  ;;  %v2718_v3 = vmul.f32 %v10690_v28, %v10690_v28  ;;  %8579 = vpow2.f32 %v3316_v45  ;;  %v10738_v31 = vpop.f32.mrb[100].mxu0 }
 0x2a2   :  { %12559 = vst [vmem:[#allocation56_spill] sm:$0xff] %v10716_v55  ;;  %v8562_v43 = vpop.eup %8561  ;;  %v2717_v52 = vmul.f32 %v10695_v58, %v10695_v58  ;;  %v2656_v21 = vmul.f32 %v8560_v12, %v12563_v32  ;;  %8581 = vpow2.f32 %v3320_v36  ;;  %v3324_v8 = vmul.f32 1.442695, %v3283_v23  ;;  %12565 = vst [vmem:[#allocation19_spill] sm:$0xff] %v10738_v31  ;;  %v10740_v5 = vpop.f32.mrb[100].mxu1  ;;  %v12582_v31 = vld [vmem:[#allocation30_spill] sm:$0xff] }
 0x2a3   :  { %12561 = vst [vmem:[#allocation58_spill] sm:$0xff] %v10720_v56  ;;  %12562 = vst [vmem:[#allocation59_spill] sm:$0xff] %v10722_v41  ;;  %v8564_v4 = vpop.eup %8563  ;;  %v2437_v59 = vadd.f32 1.0, %v8562_v43  ;;  %8583 = vpow2.f32 %v3322_v11  ;;  %v2719_v18 = vmul.f32 %v2687_v57, %v2687_v57  ;;  %v2748_v20 = vmul.f32 %v10686_v39, %v10671_v63 }
 0x2a4   :  { %v8566_v46 = vpop.eup %8565  ;;  %v2688_v45 = vmax.f32 %v2656_v21, 1e-06  ;;  %v2439_v26 = vadd.f32 1.0, %v8564_v4  ;;  %8585 = vpow2.f32 %v3326_v16  ;;  %v3285_v36 = vsub.f32 0.0, %v10542_v37  ;;  %12566 = vst [vmem:[#allocation20_spill] sm:$0xff] %v10740_v5 }
 0x2a5   :  { %v8568_v51 = vpop.eup %8567  ;;  %v2658_v48 = vmul.f32 %v8566_v46, %v12564_v24  ;;  %8587 = vrcp.f32 %v2437_v59  ;;  %v2750_v10 = vmul.f32 %v2718_v3, %v10690_v28  ;;  %v10743_v23 = vmul.f32 %v2717_v52, %v10695_v58  ;;  %v10750_v3 = vld [vmem:[%s12413_s0 + $0xd0] sm:$0xff]  ;;  %v12569_v46 = vld [vmem:[#allocation16_spill] sm:$0xff] }
 0x2a6   :  { %v8570_v47 = vpop.eup %8569  ;;  %v2720_v49 = vmul.f32 %v2688_v45, %v2688_v45  ;;  %8589 = vrcp.f32 %v2439_v26  ;;  %v3370_v11 = vadd.f32 1.0, %v8568_v51  ;;  %v10745_v12 = vmul.f32 %v2719_v18, %v2687_v57  ;;  %v12567_v57 = vld [vmem:[#allocation29_spill] sm:$0xff] }
 0x2a7   :  { %v8572_v50 = vpop.eup %8571  ;;  %v2690_v63 = vmax.f32 %v2658_v48, 1e-06  ;;  %v3372_v39 = vadd.f32 1.0, %v8570_v47  ;;  %8591 = vpow2.f32 %v3324_v8  ;;  %v10752_v58 = vmul.f32 1.442695, %v3285_v36  ;;  %v10761_v48 = vld [vmem:[%s12413_s0 + $0xd8] sm:$0xff] }
 0x2a8   :  { %v8574_v16 = vpop.eup %8573  ;;  %v2752_v37 = vmul.f32 %v2720_v49, %v2688_v45  ;;  %8593 = vrcp.f32 %v3370_v11  ;;  %v3371_v28 = vadd.f32 1.0, %v8572_v50  ;;  %v12568_v59 = vunpack.c.h.bf16 %v12567_v57  ;;  %v12570_v49 = vld [vmem:[#allocation42_spill] sm:$0xff] }
 0x2a9   :  { %v8576_v43 = vpop.eup %8575  ;;  %v2722_v32 = vmul.f32 %v2690_v63, %v2690_v63  ;;  %8595 = vrcp.f32 %v3372_v39  ;;  %v3373_v21 = vadd.f32 1.0, %v8574_v16  ;;  %v3462_v24 = vunpack.c.l.bf16 %v10750_v3 }
 0x2aa   :  { %v8578_v52 = vpop.eup %8577  ;;  %v2840_v4 = vadd.f32 %v2752_v37, %v2748_v20  ;;  %8597 = vrcp.f32 %v3371_v28  ;;  %v3374_v8 = vadd.f32 1.0, %v8576_v43  ;;  %v3515_v18 = vmul.f32 %v12569_v46, %v12568_v59 }
 0x2ab   :  { %v8580_v45 = vpop.eup %8579  ;;  %v2754_v26 = vmul.f32 %v2722_v32, %v2690_v63  ;;  %8599 = vrcp.f32 %v3373_v21  ;;  %v3376_v51 = vadd.f32 1.0, %v8578_v52  ;;  %v3286_v11 = vsub.f32 0.0, %v12570_v49  ;;  %v12571_v63 = vld [vmem:[#allocation43_spill] sm:$0xff] }
 0x2ac   :  { %v8582_v36 = vpop.eup %8581  ;;  %v2841_v47 = vrot.slane %v2840_v4, 4  ;;  %8601 = vrcp.f32 %v3374_v8  ;;  %v3375_v20 = vadd.f32 1.0, %v8580_v45  ;;  %v3288_v37 = vsub.f32 0.0, %v12571_v63  ;;  %v12572_v8 = vld [vmem:[#allocation11_spill] sm:$0xff]  ;;  %v12577_v63 = vld [vmem:[#allocation26_spill] sm:$0xff] }
 0x2ad   :  { %v8584_v50 = vpop.eup %8583  ;;  %v2854_v39 = vadd.f32 %v2754_v26, %v2750_v10  ;;  %8603 = vrcp.f32 %v3376_v51  ;;  %v3377_v16 = vadd.f32 1.0, %v8582_v36  ;;  %v3464_v21 = vunpack.c.l.bf16 %v10761_v48  ;;  %v12574_v26 = vld [vmem:[#allocation44_spill] sm:$0xff]  ;;  %v10769_v36 = vpop.f32.mrb[101].mxu0 }
 0x2ae   :  { %v8586_v28 = vpop.eup %8585  ;;  %v2842_v43 = vadd.f32 %v2841_v47, %v2840_v4  ;;  %8605 = vrcp.f32 %v3375_v20  ;;  %v3378_v32 = vadd.f32 1.0, %v8584_v50  ;;  %v3516_v45 = vmul.f32 %v12572_v8, %v3462_v24  ;;  %12575 = vst [vmem:[#allocation29_spill] sm:$0xff] %v10769_v36  ;;  %v12576_v20 = vld [vmem:[#allocation22_spill] sm:$0xff] }
 0x2af   :  { %v8588_v52 = vpop.eup %8587  ;;  %v2855_v57 = vrot.slane %v2854_v39, 4  ;;  %8607 = vrcp.f32 %v3377_v16  ;;  %v3380_v59 = vadd.f32 1.0, %v8586_v28  ;;  %v3287_v51 = vsub.f32 0.0, %v12574_v26  ;;  %v12579_v26 = vld [vmem:[#allocation27_spill] sm:$0xff] }
 0x2b0   :  { %v8590_v60 = vpop.eup %8589  ;;  %v2843_v49 = vrot.slane %v2842_v43, 2  ;;  %v2657_v10 = vmul.f32 %v8588_v52, %v12573_v27  ;;  %8609 = vrcp.f32 %v3378_v32  ;;  %v10773_v41 = vadd.f32 %v12577_v63, %v3515_v18  ;;  %v12581_v18 = vld [vmem:[#allocation23_spill] sm:$0xff] }
 0x2b1   :  { %v8592_v4 = vpop.eup %8591  ;;  %v2856_v47 = vadd.f32 %v2855_v57, %v2854_v39  ;;  %v2659_v50 = vmul.f32 %v8590_v60, %v12576_v20  ;;  %v3330_v16 = vmul.f32 1.442695, %v3286_v11  ;;  %8611 = vrcp.f32 %v3380_v59  ;;  %v12580_v60 = vld [vmem:[#allocation28_spill] sm:$0xff] }
 0x2b2   :  { %v8594_v28 = vpop.eup %8593  ;;  %v2844_v55 = vadd.f32 %v2843_v49, %v2842_v43  ;;  %v2689_v24 = vmax.f32 %v2657_v10, 1e-06  ;;  %v3518_v56 = vmul.f32 %v12578_v2, %v3464_v21  ;;  %v10777_v30 = vmul.f32 1.442695, %v3288_v37  ;;  %v12583_v37 = vld [vmem:[#allocation31_spill] sm:$0xff] }
 0x2b3   :  { %v8596_v27 = vpop.eup %8595  ;;  %v2857_v32 = vrot.slane %v2856_v47, 2  ;;  %v2691_v52 = vmax.f32 %v2659_v50, 1e-06  ;;  %v3590_v33 = vmul.f32 %v8594_v28, %v12579_v26  ;;  %v10781_v36 = vadd.f32 %v12581_v18, %v3516_v45 }
 0x2b4   :  { %v8598_v39 = vpop.eup %8597  ;;  %v2721_v57 = vmul.f32 %v2689_v24, %v2689_v24  ;;  %v3592_v20 = vmul.f32 %v8596_v27, %v12580_v60  ;;  %v10783_v11 = vmul.f32 1.442695, %v3287_v51  ;;  %v2845_v59 = vrot.slane %v2844_v55, 1  ;;  %v10790_v27 = vpop.f32.mrb[101].mxu1 }
 0x2b5   :  { %v8600_v43 = vpop.eup %8599  ;;  %v2858_v49 = vadd.f32 %v2857_v32, %v2856_v47  ;;  %v2723_v21 = vmul.f32 %v2691_v52, %v2691_v52  ;;  %v3379_v10 = vadd.f32 1.0, %v8592_v4  ;;  %v3591_v28 = vmul.f32 %v8598_v39, %v12582_v31  ;;  %12585 = vst [vmem:[#allocation16_spill] sm:$0xff] %v10790_v27 }
 0x2b6   :  { %v8602_v5 = vpop.eup %8601  ;;  %v2753_v50 = vmul.f32 %v2721_v57, %v2689_v24  ;;  %v3593_v26 = vmul.f32 %v8600_v43, %v12583_v37  ;;  %v10788_v15 = vadd.f32 %v12584_v61, %v3518_v56  ;;  %v3622_v51 = vmax.f32 %v3590_v33, 1e-06  ;;  %v12586_v57 = vld [vmem:[#allocation45_spill] sm:$0xff] }
 0x2b7   :  { %v8604_v45 = vpop.eup %8603  ;;  %v2755_v60 = vmul.f32 %v2723_v21, %v2691_v52  ;;  %v3624_v22 = vmax.f32 %v3592_v20, 1e-06  ;;  %8613 = vpow2.f32 %v10752_v58  ;;  %v2859_v32 = vrot.slane %v2858_v49, 1  ;;  %v12587_v21 = vld [vmem:[#allocation32_spill] sm:$0xff] }
 0x2b8   :  { %v8606_v47 = vpop.eup %8605  ;;  %v2847_v4 = vadd.f32 %v2753_v50, %v10743_v23  ;;  %8615 = vpow2.f32 %v3330_v16  ;;  %v2846_v39 = vadd.f32 %v2845_v59, %v2844_v55  ;;  %v3623_v33 = vmax.f32 %v3591_v28, 1e-06  ;;  %v12588_v23 = vld [vmem:[#allocation33_spill] sm:$0xff]  ;;  %v10799_v50 = vpop.f32.mrb[102].mxu0 }
 0x2b9   :  { %v8608_v24 = vpop.eup %8607  ;;  %v2861_v56 = vadd.f32 %v2755_v60, %v10745_v12  ;;  %8617 = vrcp.f32 %v3379_v10  ;;  %v3625_v20 = vmax.f32 %v3593_v26, 1e-06  ;;  %v3594_v58 = vmul.f32 %v8602_v5, %v12587_v21  ;;  %12589 = vst [vmem:[#allocation42_spill] sm:$0xff] %v10799_v50  ;;  %v12590_v10 = vld [vmem:[#allocation34_spill] sm:$0xff]  ;;  %v12592_v26 = vld [vmem:[#allocation36_spill] sm:$0xff]  ;;  %v12593_v50 = vld [vmem:[#allocation37_spill] sm:$0xff] }
 0x2ba   :  { %v8610_v37 = vpop.eup %8609  ;;  %v2848_v52 = vrot.slane %v2847_v4, 4  ;;  %v3654_v40 = vmul.f32 %v3622_v51, %v3622_v51  ;;  %v3656_v42 = vmul.f32 %v3624_v22, %v3624_v22  ;;  %v3596_v16 = vmul.f32 %v8604_v45, %v12588_v23 }
 0x2bb   :  { %v2862_v27 = vrot.slane %v2861_v56, 4  ;;  %v8612_v31 = vpop.eup %8611  ;;  %v2860_v55 = vadd.f32 %v2859_v32, %v2858_v49  ;;  %v3626_v12 = vmax.f32 %v3594_v58, 1e-06  ;;  %v3595_v60 = vmul.f32 %v8606_v47, %v12590_v10 }
 0x2bc   :  { %v2849_v59 = vadd.f32 %v2848_v52, %v2847_v4  ;;  %v3628_v53 = vmax.f32 %v3596_v16, 1e-06  ;;  %v3597_v28 = vmul.f32 %v8608_v24, %v12591_v35  ;;  %v3598_v7 = vmul.f32 %v8610_v37, %v12592_v26  ;;  %v10805_v24 = vpop.f32.mrb[102].mxu1 }
 0x2bd   :  { %v2863_v43 = vadd.f32 %v2862_v27, %v2861_v56  ;;  %v3655_v5 = vmul.f32 %v3623_v33, %v3623_v33  ;;  %v3657_v21 = vmul.f32 %v3625_v20, %v3625_v20  ;;  %v3658_v29 = vmul.f32 %v3626_v12, %v3626_v12 }
 0x2be   :  { %v3627_v25 = vmax.f32 %v3595_v60, 1e-06  ;;  %v2850_v17 = vrot.slane %v2849_v59, 2  ;;  %v3660_v45 = vmul.f32 %v3628_v53, %v3628_v53  ;;  %v3629_v23 = vmax.f32 %v3597_v28, 1e-06 }
 0x2bf   :  { %v3600_v6 = vmul.f32 %v8612_v31, %v12593_v50  ;;  %v3686_v49 = vmul.f32 %v3654_v40, %v3622_v51  ;;  %v3688_v32 = vmul.f32 %v3656_v42, %v3624_v22  ;;  %v3690_v4 = vmul.f32 %v3658_v29, %v3626_v12 }
 0x2c0   :  { %v3659_v52 = vmul.f32 %v3627_v25, %v3627_v25  ;;  %v2864_v27 = vrot.slane %v2863_v43, 2  ;;  %v3692_v56 = vmul.f32 %v3660_v45, %v3628_v53  ;;  %v3661_v58 = vmul.f32 %v3629_v23, %v3629_v23 }
 0x2c1   :  { %v8614_v47 = vpop.eup %8613  ;;  %v3630_v35 = vmax.f32 %v3598_v7, 1e-06  ;;  %v3687_v16 = vmul.f32 %v3655_v5, %v3623_v33  ;;  %v3689_v10 = vmul.f32 %v3657_v21, %v3625_v20  ;;  %v3718_v60 = vadd.f32 %v3690_v4, %v3686_v49  ;;  %v12596_v20 = vld [vmem:[#allocation38_spill] sm:$0xff]  ;;  %v10812_v21 = vpop.f32.mrb[103].mxu0 }
 0x2c2   :  { %v8616_v37 = vpop.eup %8615  ;;  %v3691_v26 = vmul.f32 %v3659_v52, %v3627_v25  ;;  %v2851_v28 = vadd.f32 %v2850_v17, %v2849_v59  ;;  %v3732_v0 = vadd.f32 %v3692_v56, %v3688_v32  ;;  %v3693_v31 = vmul.f32 %v3661_v58, %v3629_v23  ;;  %v10814_v32 = vpop.f32.mrb[103].mxu1 }
 0x2c3   :  { %v8618_v9 = vpop.eup %8617  ;;  %v3632_v40 = vmax.f32 %v3600_v6, 1e-06  ;;  %v10807_v42 = vmul.f32 0.0625, %v2846_v39  ;;  %v10809_v29 = vmul.f32 0.0625, %v2860_v55  ;;  %v3719_v22 = vrot.slane %v3718_v60, 4 }
 0x2c4   :  { %v3725_v53 = vadd.f32 %v3691_v26, %v3687_v16  ;;  %v2865_v51 = vadd.f32 %v2864_v27, %v2863_v43  ;;  %v3733_v7 = vrot.slane %v3732_v0, 4  ;;  %v3739_v50 = vadd.f32 %v3693_v31, %v3689_v10 }
 0x2c5   :  { %12594 = vst [vmem:[#allocation43_spill] sm:$0xff] %v10807_v42  ;;  %12595 = vst [vmem:[#allocation11_spill] sm:$0xff] %v10809_v29  ;;  %v3662_v12 = vmul.f32 %v3630_v35, %v3630_v35  ;;  %v3720_v45 = vadd.f32 %v3719_v22, %v3718_v60  ;;  %v3599_v5 = vmul.f32 %v8618_v9, %v12596_v20  ;;  %v3381_v25 = vadd.f32 1.0, %v8614_v47 }
 0x2c6   :  { %v3726_v33 = vrot.slane %v3725_v53, 4  ;;  %v2852_v17 = vrot.slane %v2851_v28, 1  ;;  %v3734_v59 = vadd.f32 %v3733_v7, %v3732_v0  ;;  %v3740_v6 = vrot.slane %v3739_v50, 4 }
 0x2c7   :  { %v3664_v39 = vmul.f32 %v3632_v40, %v3632_v40  ;;  %v3721_v23 = vrot.slane %v3720_v45, 2  ;;  %8619 = vrcp.f32 %v3381_v25  ;;  %v3382_v49 = vadd.f32 1.0, %v8616_v37 }
 0x2c8   :  { %v3727_v55 = vadd.f32 %v3726_v33, %v3725_v53  ;;  %v2866_v43 = vrot.slane %v2865_v51, 1  ;;  %v3735_v4 = vrot.slane %v3734_v59, 2  ;;  %v3741_v52 = vadd.f32 %v3740_v6, %v3739_v50 }
 0x2c9   :  { %8621 = vpow2.f32 %v10777_v30  ;;  %v3722_v27 = vadd.f32 %v3721_v23, %v3720_v45  ;;  %v3631_v47 = vmax.f32 %v3599_v5, 1e-06  ;;  %v10817_v0 = vmul.f32 %v3662_v12, %v3630_v35 }
 0x2ca   :  { %v3728_v9 = vrot.slane %v3727_v55, 2  ;;  %8623 = vrcp.f32 %v3382_v49  ;;  %v3736_v56 = vadd.f32 %v3735_v4, %v3734_v59  ;;  %v3742_v58 = vrot.slane %v3741_v52, 2  ;;  %v3443_v49 = vld [vmem:[%s12413_s0 + $0x118] sm:$0xff] }
 0x2cb   :  { %8625 = vpow2.f32 %v10783_v11  ;;  %v2853_v16 = vadd.f32 %v2852_v17, %v2851_v28  ;;  %v3723_v10 = vrot.slane %v3722_v27, 1  ;;  %v12597_v60 = vsub.f32 0.0, %v12586_v57  ;;  %v3442_v57 = vld [vmem:[%s12413_s0 + $0x110] sm:$0xff] }
 0x2cc   :  { %v3729_v37 = vadd.f32 %v3728_v9, %v3727_v55  ;;  %v3737_v31 = vrot.slane %v3736_v56, 1  ;;  %v3743_v22 = vadd.f32 %v3742_v58, %v3741_v52  ;;  %v10822_v53 = vmul.f32 %v3664_v39, %v3632_v40  ;;  %v12603_v39 = vld [vmem:[#allocation13_spill] sm:$0xff] }
 0x2cd   :  { %v3336_v26 = vmul.f32 1.442695, %v12597_v60  ;;  %v3290_v30 = vsub.f32 0.0, %v10561_v14  ;;  %v3724_v7 = vadd.f32 %v3723_v10, %v3722_v27  ;;  %v3663_v45 = vmul.f32 %v3631_v47, %v3631_v47  ;;  %v10857_v10 = vpop.f32.mrb[104].mxu1 }
 0x2ce   :  { %v3730_v50 = vrot.slane %v3729_v37, 1  ;;  %v3738_v35 = vadd.f32 %v3737_v31, %v3736_v56  ;;  %v3744_v12 = vrot.slane %v3743_v22, 1  ;;  %v3465_v11 = vunpack.c.h.bf16 %v10761_v48 }
 0x2cf   :  { %8627 = vpow2.f32 %v3336_v26  ;;  %v3338_v28 = vmul.f32 1.442695, %v3290_v30  ;;  %v10829_v33 = vadd.f32 %v2866_v43, %v2865_v51  ;;  %v10831_v20 = vmul.f32 0.0625, %v3724_v7 }
 0x2d0   :  { %v3731_v40 = vadd.f32 %v3730_v50, %v3729_v37  ;;  %v3292_v14 = vsub.f32 0.0, %v10563_v44  ;;  %v10834_v5 = vmul.f32 0.0625, %v2853_v16  ;;  %v10836_v25 = vmul.f32 0.0625, %v3738_v35  ;;  %v10855_v16 = vpop.f32.mrb[104].mxu0 }
 0x2d1   :  { %12598 = vst [vmem:[#allocation21_spill] sm:$0xff] %v10831_v20  ;;  %v3745_v17 = vadd.f32 %v3744_v12, %v3743_v22  ;;  %8629 = vpow2.f32 %v3338_v28  ;;  %v8620_v59 = vpop.eup %8619  ;;  %v12602_v6 = vunpack.c.h.bf16 %v10750_v3  ;;  %v3466_v51 = vunpack.c.l.bf16 %v3442_v57  ;;  %v12605_v22 = vld [vmem:[#allocation25_spill] sm:$0xff]  ;;  %v10867_v35 = vpop.f32.mrb[105].mxu0 }
 0x2d2   :  { %12599 = vst [vmem:[#allocation44_spill] sm:$0xff] %v10834_v5  ;;  %12600 = vst [vmem:[#allocation22_spill] sm:$0xff] %v10836_v25  ;;  %v10838_v48 = vmul.f32 0.0625, %v3731_v40  ;;  %v3342_v55 = vmul.f32 1.442695, %v3292_v14  ;;  %v10848_v4 = vmul.f32 %v3663_v45, %v3631_v47  ;;  %v3519_v52 = vmul.f32 %v12569_v46, %v3465_v11  ;;  %v10869_v12 = vpop.f32.mrb[105].mxu1 }
 0x2d3   :  { %v3517_v23 = vmul.f32 %v12603_v39, %v12602_v6  ;;  %v8622_v44 = vpop.eup %8621  ;;  %v10846_v43 = vmul.f32 0.0625, %v3745_v17  ;;  %v3291_v27 = vsub.f32 0.0, %v10565_v34  ;;  %v3601_v56 = vmul.f32 %v8620_v59, %v10773_v41 }
 0x2d4   :  { %12601 = vst [vmem:[#allocation26_spill] sm:$0xff] %v10838_v48  ;;  %v8624_v9 = vpop.eup %8623  ;;  %v3384_v58 = vadd.f32 1.0, %v8622_v44  ;;  %8631 = vpow2.f32 %v3342_v55  ;;  %v3468_v26 = vunpack.c.l.bf16 %v3443_v49  ;;  %v3520_v41 = vmul.f32 %v12572_v8, %v3466_v51  ;;  %v10885_v44 = vpop.f32.mrb[106].mxu0 }
 0x2d5   :  { %12604 = vst [vmem:[#allocation12_spill] sm:$0xff] %v10846_v43  ;;  %v8626_v37 = vpop.eup %8625  ;;  %v3602_v60 = vmul.f32 %v8624_v9, %v10781_v36  ;;  %v3340_v34 = vmul.f32 1.442695, %v3291_v27  ;;  %v10863_v30 = vadd.f32 %v12605_v22, %v3517_v23  ;;  %v3467_v50 = vunpack.c.h.bf16 %v3442_v57 }
 0x2d6   :  { %8633 = vrcp.f32 %v3384_v58  ;;  %v3383_v31 = vadd.f32 1.0, %v8626_v37  ;;  %v3293_v45 = vsub.f32 0.0, %v10567_v19  ;;  %v3633_v36 = vmax.f32 %v3601_v56, 1e-06  ;;  %v10879_v19 = vld [vmem:[%s12413_s0 + $0x150] sm:$0xff]  ;;  %v10893_v56 = vld [vmem:[%s12413_s0 + $0x158] sm:$0xff] }
 0x2d7   :  { %v3634_v7 = vmax.f32 %v3602_v60, 1e-06  ;;  %8635 = vpow2.f32 %v3340_v34  ;;  %v10872_v28 = vadd.f32 %v12577_v63, %v3519_v52  ;;  %v3294_v40 = vsub.f32 0.0, %v10569_v1  ;;  %v10887_v1 = vpop.f32.mrb[106].mxu1 }
 0x2d8   :  { %8637 = vrcp.f32 %v3383_v31  ;;  %v3522_v59 = vmul.f32 %v12578_v2, %v3468_v26  ;;  %v3344_v6 = vmul.f32 1.442695, %v3293_v45  ;;  %v10882_v57 = vadd.f32 %v12581_v18, %v3520_v41 }
 0x2d9   :  { %v8628_v11 = vpop.eup %8627  ;;  %v3666_v14 = vmul.f32 %v3634_v7, %v3634_v7  ;;  %v3469_v23 = vunpack.c.h.bf16 %v3443_v49  ;;  %v3346_v51 = vmul.f32 1.442695, %v3294_v40  ;;  %v3296_v55 = vsub.f32 0.0, %v10571_v13  ;;  %v10906_v40 = vpop.f32.mrb[107].mxu0 }
 0x2da   :  { %v3385_v17 = vadd.f32 1.0, %v8628_v11  ;;  %v3521_v9 = vmul.f32 %v12603_v39, %v3467_v50  ;;  %v3295_v58 = vsub.f32 0.0, %v10574_v38  ;;  %v3665_v49 = vmul.f32 %v3633_v36, %v3633_v36 }
 0x2db   :  { %v8630_v52 = vpop.eup %8629  ;;  %v3698_v27 = vmul.f32 %v3666_v14, %v3634_v7  ;;  %v3470_v13 = vunpack.c.l.bf16 %v10879_v19  ;;  %v10899_v26 = vadd.f32 %v12584_v61, %v3522_v59  ;;  %v3350_v34 = vmul.f32 1.442695, %v3296_v55 }
 0x2dc   :  { %8639 = vrcp.f32 %v3385_v17  ;;  %v3386_v37 = vadd.f32 1.0, %v8630_v52  ;;  %v3523_v41 = vmul.f32 %v12569_v46, %v3469_v23  ;;  %v3472_v7 = vunpack.c.l.bf16 %v10893_v56 }
 0x2dd   :  { %8641 = vpow2.f32 %v3344_v6  ;;  %v3746_v60 = vadd.f32 %v3698_v27, %v10817_v0  ;;  %v3348_v50 = vmul.f32 1.442695, %v3295_v58  ;;  %v10904_v11 = vadd.f32 %v12605_v22, %v3521_v9  ;;  %v10908_v0 = vpop.f32.mrb[107].mxu1 }
 0x2de   :  { %8643 = vpow2.f32 %v3346_v51  ;;  %v8632_v31 = vpop.eup %8631  ;;  %v10910_v17 = vmul.f32 %v3665_v49, %v3633_v36  ;;  %v3524_v59 = vmul.f32 %v12572_v8, %v3470_v13  ;;  %v3297_v6 = vsub.f32 0.0, %v10576_v54 }
 0x2df   :  { %8645 = vrcp.f32 %v3386_v37  ;;  %v3747_v38 = vrot.slane %v3746_v60, 4  ;;  %v3388_v45 = vadd.f32 1.0, %v8632_v31  ;;  %v3298_v52 = vsub.f32 0.0, %v10592_v62  ;;  %v10923_v37 = vld [vmem:[%s12413_s0 + $0x190] sm:$0xff]  ;;  %v8315_v62 = vld [vmem:[%s12418_s6 + $0x40] sm:$0xff]  }
 0x2e0   :  { %8647 = vpow2.f32 %v3350_v34  ;;  %v8634_v14 = vpop.eup %8633  ;;  %v10917_v58 = vadd.f32 %v12577_v63, %v3523_v41  ;;  %v3526_v36 = vmul.f32 %v12578_v2, %v3472_v7  ;;  %v3352_v49 = vmul.f32 1.442695, %v3297_v6  ;;  %v12606_v41 = vld [vmem:[#allocation48_spill] sm:$0xff]  ;;  %8010 = vmatprep.subr.bf16.mxu0 %v8315_v62 }
 0x2e1   :  { %8649 = vpow2.f32 %v3348_v50  ;;  %v8636_v23 = vpop.eup %8635  ;;  %v3748_v51 = vadd.f32 %v3747_v38, %v3746_v60  ;;  %v3604_v55 = vmul.f32 %v8634_v14, %v10788_v15  ;;  %v3354_v60 = vmul.f32 1.442695, %v3298_v52  ;;  %v8316_v50 = vld [vmem:[%s12418_s6 + $0xc0] sm:$0xff]   ;;  %v10942_v52 = vpop.f32.mrb[108].mxu1 }
 0x2e2   :  { %8651 = vrcp.f32 %v3388_v45  ;;  %v8638_v27 = vpop.eup %8637  ;;  %v3387_v9 = vadd.f32 1.0, %v8636_v23  ;;  %v10930_v34 = vadd.f32 %v12581_v18, %v3524_v59  ;;  %v3471_v31 = vunpack.c.h.bf16 %v10879_v19  ;;  %8032 = vmatprep.subr.bf16.mxu1 %v8316_v50 }
 0x2e3   :  { %v3749_v54 = vrot.slane %v3748_v51, 2  ;;  %v3636_v13 = vmax.f32 %v3604_v55, 1e-06  ;;  %v3603_v15 = vmul.f32 %v8638_v27, %v10863_v30  ;;  %v3300_v7 = vsub.f32 0.0, %v12606_v41  ;;  %v10940_v55 = vpop.f32.mrb[108].mxu0 }
 0x2e4   :  { %8653 = vrcp.f32 %v3387_v9  ;;  %v3473_v14 = vunpack.c.h.bf16 %v10893_v56  ;;  %v3474_v59 = vunpack.c.l.bf16 %v10923_v37  ;;  %v3525_v3 = vmul.f32 %v12603_v39, %v3471_v31 }
 0x2e5   :  { %v3668_v45 = vmul.f32 %v3636_v13, %v3636_v13  ;;  %v3635_v30 = vmax.f32 %v3603_v15, 1e-06  ;;  %8655 = vpow2.f32 %v3352_v49  ;;  %v3358_v19 = vmul.f32 1.442695, %v3300_v7 }
 0x2e6   :  { %v8640_v38 = vpop.eup %8639  ;;  %8657 = vpow2.f32 %v3354_v60  ;;  %v3750_v9 = vadd.f32 %v3749_v54, %v3748_v51  ;;  %v3527_v51 = vmul.f32 %v12569_v46, %v3473_v14  ;;  %v8318_v54 = vld [vmem:[%s12418_s6 + $0x80] sm:$0xff]   ;;  %v10959_v14 = vpop.f32.mrb[109].mxu0 }
 0x2e7   :  { %v8642_v6 = vpop.eup %8641  ;;  %v3605_v23 = vmul.f32 %v8640_v38, %v10872_v28  ;;  %v3700_v41 = vmul.f32 %v3668_v45, %v3636_v13  ;;  %v3667_v15 = vmul.f32 %v3635_v30, %v3635_v30  ;;  %8659 = vpow2.f32 %v3358_v19  ;;  %v8317_v28 = vld [vmem:[%s12418_s6] sm:$0xff]   ;;  %8033 = vmatpush3.bf16.msra.mxu1 %v8318_v54 }
 0x2e8   :  { %v8644_v27 = vpop.eup %8643  ;;  %v3389_v49 = vadd.f32 1.0, %v8642_v6  ;;  %v10950_v38 = vadd.f32 %v12584_v61, %v3526_v36  ;;  %8011 = vmatpush3.bf16.msra.mxu0 %v8317_v28  ;;  %v3751_v19 = vrot.slane %v3750_v9, 1  ;;  %v3528_v36 = vmul.f32 %v12572_v8, %v3474_v59 }
 0x2e9   :  { %v8646_v47 = vpop.eup %8645  ;;  %v3637_v56 = vmax.f32 %v3605_v23, 1e-06  ;;  %v3390_v62 = vadd.f32 1.0, %v8644_v27  ;;  %v3760_v7 = vadd.f32 %v3700_v41, %v10822_v53  ;;  %v3699_v50 = vmul.f32 %v3667_v15, %v3635_v30 }
 0x2ea   :  { %v8648_v60 = vpop.eup %8647  ;;  %v3606_v45 = vmul.f32 %v8646_v47, %v10882_v57  ;;  %8661 = vrcp.f32 %v3389_v49  ;;  %v3579_v15 = vadd.f32 %v12605_v22, %v3525_v3  ;;  %v10966_v49 = vld [vmem:[%s12413_s0 + $0x198] sm:$0xff]  ;;  %v3752_v3 = vadd.f32 %v3751_v19, %v3750_v9 }
 0x2eb   :  { %v8650_v13 = vpop.eup %8649  ;;  %v3669_v31 = vmul.f32 %v3637_v56, %v3637_v56  ;;  %v3392_v6 = vadd.f32 1.0, %v8648_v60  ;;  %v3761_v53 = vrot.slane %v3760_v7, 4  ;;  %v3753_v30 = vadd.f32 %v3699_v50, %v10848_v4  ;;  %v12607_v9 = vld [vmem:[#allocation50_spill] sm:$0xff] }
 0x2ec   :  { %v8652_v23 = vpop.eup %8651  ;;  %8663 = vrcp.f32 %v3390_v62  ;;  %v3391_v41 = vadd.f32 1.0, %v8650_v13  ;;  %v3638_v28 = vmax.f32 %v3606_v45, 1e-06  ;;  %v3299_v19 = vsub.f32 0.0, %v12607_v9 }
 0x2ed   :  { %v3701_v27 = vmul.f32 %v3669_v31, %v3637_v56  ;;  %v3762_v43 = vadd.f32 %v3761_v53, %v3760_v7  ;;  %v3754_v47 = vrot.slane %v3753_v30, 4  ;;  %v3608_v57 = vmul.f32 %v8652_v23, %v10899_v26 }
 0x2ee   :  { %8665 = vrcp.f32 %v3392_v6  ;;  %v8654_v4 = vpop.eup %8653  ;;  %v10970_v56 = vadd.f32 %v12577_v63, %v3527_v51  ;;  %v10973_v26 = vadd.f32 %v12581_v18, %v3528_v36  ;;  %v3476_v6 = vunpack.c.l.bf16 %v10966_v49 }
 0x2ef   :  { %v3767_v59 = vadd.f32 %v3701_v27, %v10910_v17  ;;  %8667 = vrcp.f32 %v3391_v41  ;;  %v8656_v62 = vpop.eup %8655  ;;  %v3763_v60 = vrot.slane %v3762_v43, 2  ;;  %v3755_v7 = vadd.f32 %v3754_v47, %v3753_v30 }
 0x2f0   :  { %v8658_v50 = vpop.eup %8657  ;;  %v3607_v13 = vmul.f32 %v8654_v4, %v10904_v11  ;;  %v3393_v31 = vadd.f32 1.0, %v8656_v62  ;;  %v3640_v23 = vmax.f32 %v3608_v57, 1e-06  ;;  %v3670_v41 = vmul.f32 %v3638_v28, %v3638_v28 }
 0x2f1   :  { %v3768_v54 = vrot.slane %v3767_v59, 4  ;;  %v3764_v17 = vadd.f32 %v3763_v60, %v3762_v43  ;;  %v3756_v45 = vrot.slane %v3755_v7, 2  ;;  %v3394_v53 = vadd.f32 1.0, %v8658_v50  ;;  %v8660_v51 = vpop.eup %8659 }
 0x2f2   :  { %8669 = vrcp.f32 %v3393_v31  ;;  %v10978_v30 = vmul.f32 0.0625, %v3752_v3  ;;  %v3639_v4 = vmax.f32 %v3607_v13, 1e-06  ;;  %v3396_v62 = vadd.f32 1.0, %v8660_v51  ;;  %v12608_v3 = vld [vmem:[#allocation52_spill] sm:$0xff] }
 0x2f3   :  { %v3769_v27 = vadd.f32 %v3768_v54, %v3767_v59  ;;  %v3765_v36 = vrot.slane %v3764_v17, 1  ;;  %v3757_v47 = vadd.f32 %v3756_v45, %v3755_v7  ;;  %8671 = vrcp.f32 %v3394_v53 }
 0x2f4   :  { %v8662_v25 = vpop.eup %8661  ;;  %v3356_v48 = vmul.f32 1.442695, %v3299_v19  ;;  %v3530_v59 = vmul.f32 %v12578_v2, %v3476_v6  ;;  %v3702_v31 = vmul.f32 %v3670_v41, %v3638_v28  ;;  %8673 = vrcp.f32 %v3396_v62 }
 0x2f5   :  { %v3770_v11 = vrot.slane %v3769_v27, 2  ;;  %v3766_v43 = vadd.f32 %v3765_v36, %v3764_v17  ;;  %v3758_v60 = vrot.slane %v3757_v47, 1  ;;  %v3609_v57 = vmul.f32 %v8662_v25, %v10917_v58  ;;  %v10985_v25 = vpop.f32.mrb[109].mxu1 }
 0x2f6   :  { %v8664_v50 = vpop.eup %8663  ;;  %v3301_v9 = vsub.f32 0.0, %v12608_v3  ;;  %v3672_v45 = vmul.f32 %v3640_v23, %v3640_v23  ;;  %v3671_v17 = vmul.f32 %v3639_v4, %v3639_v4  ;;  %8675 = vpow2.f32 %v3356_v48 }
 0x2f7   :  { %v3771_v54 = vadd.f32 %v3770_v11, %v3769_v27  ;;  %v3759_v7 = vadd.f32 %v3758_v60, %v3757_v47  ;;  %v3641_v53 = vmax.f32 %v3609_v57, 1e-06  ;;  %v3610_v13 = vmul.f32 %v8664_v50, %v10930_v34 }
 0x2f8   :  { %v8666_v20 = vpop.eup %8665  ;;  %v10987_v58 = vmul.f32 0.0625, %v3766_v43  ;;  %v3584_v47 = vadd.f32 %v12584_v61, %v3530_v59  ;;  %v3360_v62 = vmul.f32 1.442695, %v3301_v9  ;;  %v3704_v60 = vmul.f32 %v3672_v45, %v3640_v23 }
 0x2f9   :  { %v8668_v51 = vpop.eup %8667  ;;  %v3772_v19 = vrot.slane %v3771_v54, 1  ;;  %v3612_v36 = vmul.f32 %v8666_v20, %v10950_v38  ;;  %v3835_v28 = vmul.f32 0.0625, %v3759_v7  ;;  %v3642_v6 = vmax.f32 %v3610_v13, 1e-06 }
 0x2fa   :  { %v3611_v27 = vmul.f32 %v8668_v51, %v3579_v15  ;;  %v3475_v38 = vunpack.c.h.bf16 %v10923_v37  ;;  %8677 = vpow2.f32 %v3360_v62  ;;  %v3703_v7 = vmul.f32 %v3671_v17, %v3639_v4  ;;  %v10999_v37 = vpop.f32.mrb[110].mxu0 }
 0x2fb   :  { %v3773_v41 = vadd.f32 %v3772_v19, %v3771_v54  ;;  %v3644_v11 = vmax.f32 %v3612_v36, 1e-06  ;;  %v3864_v34 = vcombine.low %v10978_v30, %v3835_v28  ;;  %v3674_v57 = vmul.f32 %v3642_v6, %v3642_v6  ;;  %v12609_v36 = vld [vmem:[#allocation53_spill] sm:$0xff] }
 0x2fc   :  { %v3643_v50 = vmax.f32 %v3611_v27, 1e-06  ;;  %v8670_v3 = vpop.eup %8669  ;;  %v3673_v30 = vmul.f32 %v3641_v53, %v3641_v53  ;;  %v3302_v28 = vsub.f32 0.0, %v12609_v36 }
 0x2fd   :  { %v10991_v20 = vmul.f32 0.0625, %v3773_v41  ;;  %v3676_v48 = vmul.f32 %v3644_v11, %v3644_v11  ;;  %v8672_v43 = vpop.eup %8671  ;;  %v3706_v15 = vmul.f32 %v3674_v57, %v3642_v6  ;;  %v3613_v13 = vmul.f32 %v8670_v3, %v10970_v56 }
 0x2fe   :  { %v3675_v54 = vmul.f32 %v3643_v50, %v3643_v50  ;;  %v3614_v9 = vmul.f32 %v8672_v43, %v10973_v26  ;;  %v8674_v27 = vpop.eup %8673  ;;  %v3529_v6 = vmul.f32 %v12603_v39, %v3475_v38  ;;  %v3477_v56 = vunpack.c.h.bf16 %v10966_v49 }
 0x2ff   :  { %v3865_v59 = vcombine.low %v10987_v58, %v10991_v20  ;;  %v3708_v23 = vmul.f32 %v3676_v48, %v3644_v11  ;;  %v3774_v45 = vadd.f32 %v3706_v15, %v3702_v31  ;;  %v3645_v19 = vmax.f32 %v3613_v13, 1e-06 }
 0x300   :  { %v3707_v51 = vmul.f32 %v3675_v54, %v3643_v50  ;;  %v3646_v17 = vmax.f32 %v3614_v9, 1e-06  ;;  %v3616_v11 = vmul.f32 %v8674_v27, %v3584_v47  ;;  %v8676_v57 = vpop.eup %8675  ;;  %v11004_v26 = vmul.f32 0.0625, %v10829_v33  ;;  %v11014_v47 = vld [vmem:[%s12413_s0 + $0x1d0] sm:$0xff]  ;;  %v12612_v9 = vld [vmem:[#allocation54_spill] sm:$0xff] }
 0x301   :  { %v3788_v4 = vadd.f32 %v3708_v23, %v3704_v60  ;;  %v3775_v41 = vrot.slane %v3774_v45, 4  ;;  %v3677_v62 = vmul.f32 %v3645_v19, %v3645_v19  ;;  %v3705_v31 = vmul.f32 %v3673_v30, %v3641_v53 }
 0x302   :  { %v3781_v58 = vadd.f32 %v3707_v51, %v3703_v7  ;;  %12610 = vst [vmem:[#allocation27_spill] sm:$0xff] %v11004_v26  ;;  %v3362_v3 = vmul.f32 1.442695, %v3302_v28  ;;  %v11006_v60 = vmax.f32 %v3616_v11, 1e-06  ;;  %v3395_v38 = vadd.f32 1.0, %v8676_v57 }
 0x303   :  { %v3789_v50 = vrot.slane %v3788_v4, 4  ;;  %v3776_v20 = vadd.f32 %v3775_v41, %v3774_v45  ;;  %v3709_v43 = vmul.f32 %v3677_v62, %v3645_v19  ;;  %v11009_v49 = vadd.f32 %v12605_v22, %v3529_v6  ;;  %v11020_v51 = vpop.f32.mrb[110].mxu1  ;;  %v12613_v57 = vld [vmem:[#allocation55_spill] sm:$0xff] }
 0x304   :  { %v3782_v48 = vrot.slane %v3781_v58, 4  ;;  %8679 = vpow2.f32 %v3362_v3  ;;  %v3531_v54 = vmul.f32 %v12569_v46, %v3477_v56  ;;  %v8678_v13 = vpop.eup %8677  ;;  %v11017_v30 = vrot.slane %v3864_v34, 7  ;;  %v3449_v34 = vld [vmem:[%s12413_s0 + $0x1d8] sm:$0xff] }
 0x305   :  { %v3790_v15 = vadd.f32 %v3789_v50, %v3788_v4  ;;  %v3777_v33 = vrot.slane %v3776_v20, 2  ;;  %v3795_v7 = vadd.f32 %v3709_v43, %v3705_v31  ;;  %8681 = vrcp.f32 %v3395_v38  ;;  %v11033_v38 = vld [vmem:[%s12416_s1 + $0x8] sm:$0xf] }
 0x306   :  { %v3783_v53 = vadd.f32 %v3782_v48, %v3781_v58  ;;  %12611 = vst [vmem:[#allocation28_spill] sm:$0xff] %v11017_v30  ;;  %v3304_v45 = vsub.f32 0.0, %v12612_v9  ;;  %v3478_v27 = vunpack.c.l.bf16 %v11014_v47  ;;  %v3678_v6 = vmul.f32 %v3646_v17, %v3646_v17  ;;  %v12616_v9 = vld [vmem:[#allocation7_spill] sm:$0xff] }
 0x307   :  { %v3791_v23 = vrot.slane %v3790_v15, 2  ;;  %v3778_v19 = vadd.f32 %v3777_v33, %v3776_v20  ;;  %v3796_v28 = vrot.slane %v3795_v7, 4  ;;  %v3397_v41 = vadd.f32 1.0, %v8678_v13 }
 0x308   :  { %v3784_v36 = vrot.slane %v3783_v53, 2  ;;  %v3366_v58 = vmul.f32 1.442695, %v3304_v45  ;;  %v3303_v31 = vsub.f32 0.0, %v12613_v57  ;;  %v11027_v50 = vrot.slane %v3865_v59, 7 }
 0x309   :  { %v3792_v4 = vadd.f32 %v3791_v23, %v3790_v15  ;;  %v3779_v62 = vrot.slane %v3778_v19, 1  ;;  %v3797_v11 = vadd.f32 %v3796_v28, %v3795_v7  ;;  %8683 = vrcp.f32 %v3397_v41 }
 0x30a   :  { %v3785_v56 = vadd.f32 %v3784_v36, %v3783_v53  ;;  %12614 = vst [vmem:[#allocation23_spill] sm:$0xff] %v11027_v50  ;;  %v3585_v20 = vadd.f32 %v12577_v63, %v3531_v54  ;;  %8685 = vpow2.f32 %v3366_v58  ;;  %v11035_v53 = vmul.f32 %v3678_v6, %v3646_v17  ;;  %v11048_v36 = vpop.f32.mrb[111].mxu0 }
 0x30b   :  { %v3793_v3 = vrot.slane %v3792_v4, 1  ;;  %v3780_v48 = vadd.f32 %v3779_v62, %v3778_v19  ;;  %v3798_v15 = vrot.slane %v3797_v11, 2  ;;  %v11038_v7 = vmul.f32 %v12572_v8, %v3478_v27  ;;  %v11046_v19 = vld [vmem:[%s12413_s0 + $0x20] sm:$0xff]  ;;  %v11053_v27 = vpop.f32.mrb[111].mxu1 }
 0x30c   :  { %v3786_v43 = vrot.slane %v3785_v56, 1  ;;  %v3364_v59 = vmul.f32 1.442695, %v3303_v31  ;;  %v3305_v45 = vsub.f32 0.0, %v12616_v9  ;;  %v3479_v8 = vunpack.c.h.bf16 %v11014_v47  ;;  %12618 = vst [vmem:[#allocation24_spill] sm:$0xff] %v11053_v27  ;;  %v12623_v9 = vld [vmem:[#allocation9_spill] sm:$0xff] }
 0x30d   :  { %v3794_v33 = vadd.f32 %v3793_v3, %v3792_v4  ;;  %v11040_v13 = vmul.f32 0.0625, %v3780_v48  ;;  %v3799_v54 = vadd.f32 %v3798_v15, %v3797_v11  ;;  %v3480_v4 = vunpack.c.l.bf16 %v3449_v34  ;;  %v8319_v11 = vld [vmem:[%s12418_s6 + $0x48] sm:$0xff]  }
 0x30e   :  { %v3787_v23 = vadd.f32 %v3786_v43, %v3785_v56  ;;  %v8680_v28 = vpop.eup %8679  ;;  %8687 = vpow2.f32 %v3364_v59  ;;  %v3368_v62 = vmul.f32 1.442695, %v3305_v45  ;;  %v11060_v56 = vld [vmem:[%s12413_s0 + $0x28] sm:$0xff]  ;;  %v3481_v31 = vunpack.c.h.bf16 %v3449_v34  ;;  %v12621_v43 = vld [vmem:[#allocation3_spill] sm:$0xff]  ;;  %8012 = vmatprep.subr.bf16.mxu0 %v8319_v11 }
 0x30f   :  { %12615 = vst [vmem:[#allocation30_spill] sm:$0xff] %v11040_v13  ;;  %v11050_v17 = vmul.f32 0.0625, %v3794_v33  ;;  %v3800_v41 = vrot.slane %v3799_v54, 1  ;;  %v3398_v58 = vadd.f32 1.0, %v8680_v28  ;;  %v8682_v57 = vpop.eup %8681  ;;  %v12620_v3 = vld [vmem:[#allocation8_spill] sm:$0xff]  ;;  %v4406_v48 = vunpack.c.l.bf16 %v11046_v19 }
 0x310   :  { %v11055_v6 = vmul.f32 0.0625, %v3787_v23  ;;  %v4230_v47 = vsub.f32 0.0, %v12620_v3  ;;  %v11069_v15 = vrot.slane %v11033_v38, %v12621_v43  ;;  %v11074_v33 = vld [vmem:[%s12417_s2 + $0x8] sm:$0xf]  ;;  %v3615_v28 = vmul.f32 %v8682_v57, %v11009_v49  ;;  %v8323_v49 = vld [vmem:[%s12418_s6 + $0x50] sm:$0xff]  }
 0x311   :  { %12617 = vst [vmem:[#allocation31_spill] sm:$0xff] %v11050_v17  ;;  %v8320_v59 = vld [vmem:[%s12418_s6 + $0xc8] sm:$0xff]   ;;  %v3801_v45 = vadd.f32 %v3800_v41, %v3799_v54  ;;  %8689 = vrcp.f32 %v3398_v58  ;;  %v3680_v3 = vmul.f32 %v11006_v60, %v11006_v60  ;;  %v3534_v50 = vmul.f32 %v12578_v2, %v3480_v4  ;;  %v8324_v2 = vld [vmem:[%s12418_s6 + $0xd0] sm:$0xff]   ;;  %v12635_v17 = vld [vmem:[#allocation6_spill] sm:$0xff] }
 0x312   :  { %12619 = vst [vmem:[#allocation45_spill] sm:$0xff] %v11055_v6  ;;  %v8321_v34 = vld [vmem:[%s12418_s6 + $0x8] sm:$0xff]   ;;  %8691 = vpow2.f32 %v3368_v62  ;;  %v4262_v30 = vmul.f32 1.442695, %v4230_v47  ;;  %8034 = vmatprep.subr.bf16.mxu1 %v8320_v59  ;;  %v3647_v26 = vmax.f32 %v3615_v28, 1e-06  ;;  %v3533_v42 = vmul.f32 %v12603_v39, %v3479_v8 }
 0x313   :  { %v8322_v23 = vld [vmem:[%s12418_s6 + $0x88] sm:$0xff]   ;;  %8013 = vmatpush3.bf16.msra.mxu0 %v8321_v34  ;;  %v11091_v29 = vmul.f32 0.0625, %v3801_v45  ;;  %v4232_v54 = vsub.f32 0.0, %v12623_v9  ;;  %v8684_v4 = vpop.eup %8683  ;;  %v3535_v41 = vmul.f32 %v12569_v46, %v3481_v31  ;;  %v4408_v58 = vunpack.c.l.bf16 %v11060_v56  ;;  %v8325_v46 = vld [vmem:[%s12418_s6 + $0x10] sm:$0xff]   ;;  %v12625_v9 = vld [vmem:[#allocation39_spill] sm:$0xff]  ;;  %v11123_v45 = vpop.f32.mrb[112].mxu1 }
 0x314   :  { %8035 = vmatpush3.bf16.msra.mxu1 %v8322_v23  ;;  %8693 = vpow2.f32 %v4262_v30  ;;  %v12624_v62 = vld [vmem:[#allocation4_spill] sm:$0xff]  ;;  %v8686_v8 = vpop.eup %8685  ;;  %v3617_v57 = vmul.f32 %v8684_v4, %v3585_v20  ;;  %v4460_v47 = vmul.f32 %v11069_v15, %v4406_v48  ;;  %v11112_v59 = vrot.slane %v11074_v33, %v12621_v43  ;;  %8014 = vmatprep.subr.bf16.mxu0 %v8323_v49  ;;  %v8326_v30 = vld [vmem:[%s12418_s6 + $0x90] sm:$0xff]   ;;  %v11121_v48 = vpop.f32.mrb[112].mxu0 }
 0x315   :  { %12622 = vst [vmem:[#allocation32_spill] sm:$0xff] %v11091_v29  ;;  %v11105_v39 = vrot.slane %v11033_v38, %v12624_v62  ;;  %v3679_v31 = vmul.f32 %v3647_v26, %v3647_v26  ;;  %v3400_v34 = vadd.f32 1.0, %v8686_v8  ;;  %v4266_v23 = vmul.f32 1.442695, %v4232_v54  ;;  %8036 = vmatprep.subr.bf16.mxu1 %v8324_v2  ;;  %12626 = vst [vmem:[#allocation33_spill] sm:$0xff] %v11121_v48 }
 0x316   :  { %v4231_v20 = vsub.f32 0.0, %v12625_v9  ;;  %12627 = vst [vmem:[#allocation34_spill] sm:$0xff] %v11123_v45  ;;  %v3649_v28 = vmax.f32 %v3617_v57, 1e-06  ;;  %v3586_v49 = vadd.f32 %v12581_v18, %v11038_v7  ;;  %v11130_v11 = vrot.slane %v11074_v33, %v12624_v62  ;;  %v11136_v57 = vpop.f32.mrb[113].mxu0 }
 0x317   :  { %v4462_v4 = vmul.f32 %v11105_v39, %v4408_v58  ;;  %8015 = vmatpush3.bf16.msra.mxu0 %v8325_v46  ;;  %v11133_v8 = vmul.f32 %v3680_v3, %v11006_v60  ;;  %8695 = vrcp.f32 %v3400_v34  ;;  %v3588_v2 = vadd.f32 %v12584_v61, %v3534_v50  ;;  %12628 = vst [vmem:[#allocation35_spill] sm:$0xff] %v11136_v57  ;;  %v11144_v58 = vpop.f32.mrb[113].mxu1  ;;  %v12630_v61 = vld [vmem:[#allocation15_spill] sm:$0xff]  ;;  %v12632_v34 = vld [vmem:[#allocation17_spill] sm:$0xff] }
 0x318   :  { %8037 = vmatpush3.bf16.msra.mxu1 %v8326_v30  ;;  %v8688_v54 = vpop.eup %8687  ;;  %v4264_v9 = vmul.f32 1.442695, %v4231_v20  ;;  %v11139_v18 = vadd.f32 %v12605_v22, %v3533_v42  ;;  %v11142_v7 = vadd.f32 %v12577_v63, %v3535_v41  ;;  %8697 = vpow2.f32 %v4266_v23  ;;  %12629 = vst [vmem:[#allocation36_spill] sm:$0xff] %v11144_v58  ;;  %v12631_v63 = vld [vmem:[#allocation5_spill] sm:$0xff] }
 0x319   :  { %v3399_v29 = vadd.f32 1.0, %v8688_v54  ;;  %v11146_v46 = vmul.f32 %v3679_v31, %v3647_v26  ;;  %v11149_v60 = vadd.f32 %v11112_v59, %v4460_v47  ;;  %v4233_v50 = vsub.f32 0.0, %v12630_v61  ;;  %v12633_v54 = vld [vmem:[#allocation40_spill] sm:$0xff]  ;;  %v11172_v61 = vpop.f32.mrb[114].mxu0 }
 0x31a   :  { %8699 = vpow2.f32 %v4264_v9  ;;  %v11153_v30 = vadd.f32 %v11130_v11, %v4462_v4  ;;  %v4407_v42 = vunpack.c.h.bf16 %v11046_v19  ;;  %v11158_v22 = vrot.slane %v11033_v38, %v12631_v63  ;;  %12634 = vst [vmem:[#allocation37_spill] sm:$0xff] %v11172_v61  ;;  %v11186_v61 = vpop.f32.mrb[114].mxu1 }
 0x31b   :  { %v8690_v3 = vpop.eup %8689  ;;  %8701 = vrcp.f32 %v3399_v29  ;;  %v11162_v47 = vrot.slane %v11074_v33, %v12631_v63  ;;  %v4268_v31 = vmul.f32 1.442695, %v4233_v50  ;;  %v4234_v23 = vsub.f32 0.0, %v12632_v34  ;;  %v11168_v29 = vld [vmem:[%s12413_s0 + $0x60] sm:$0xff]  ;;  %12637 = vst [vmem:[#allocation38_spill] sm:$0xff] %v11186_v61 }
 0x31c   :  { %v8692_v41 = vpop.eup %8691  ;;  %v3618_v26 = vmul.f32 %v8690_v3, %v3586_v49  ;;  %v3681_v20 = vmul.f32 %v3649_v28, %v3649_v28  ;;  %v4409_v4 = vunpack.c.h.bf16 %v11060_v56  ;;  %v4236_v9 = vsub.f32 0.0, %v12633_v54  ;;  %v11182_v56 = vld [vmem:[%s12413_s0 + $0x68] sm:$0xff] }
 0x31d   :  { %v3401_v19 = vadd.f32 1.0, %v8692_v41  ;;  %8703 = vpow2.f32 %v4268_v31  ;;  %v11176_v50 = vrot.slane %v11033_v38, %v12635_v17  ;;  %v4270_v34 = vmul.f32 1.442695, %v4234_v23 }
 0x31e   :  { %v8694_v49 = vpop.eup %8693  ;;  %v3650_v3 = vmax.f32 %v3618_v26, 1e-06  ;;  %v4410_v13 = vunpack.c.l.bf16 %v11168_v29  ;;  %v4274_v5 = vmul.f32 1.442695, %v4236_v9  ;;  %v4461_v54 = vmul.f32 %v11158_v22, %v4407_v42  ;;  %v12636_v26 = vld [vmem:[#allocation41_spill] sm:$0xff] }
 0x31f   :  { %8705 = vrcp.f32 %v3401_v19  ;;  %v4326_v6 = vadd.f32 1.0, %v8694_v49  ;;  %v4235_v31 = vsub.f32 0.0, %v12636_v26  ;;  %v11188_v38 = vmul.f32 %v3681_v20, %v3649_v28  ;;  %v12638_v19 = vld [vmem:[#allocation57_spill] sm:$0xff] }
 0x320   :  { %v3682_v41 = vmul.f32 %v3650_v3, %v3650_v3  ;;  %8707 = vpow2.f32 %v4270_v34  ;;  %v11192_v23 = vrot.slane %v11074_v33, %v12635_v17  ;;  %v4237_v9 = vsub.f32 0.0, %v12638_v19  ;;  %v8328_v33 = vld [vmem:[%s12418_s6 + $0xd8] sm:$0xff]  }
 0x321   :  { %8709 = vrcp.f32 %v4326_v6  ;;  %v8696_v49 = vpop.eup %8695  ;;  %v4463_v58 = vmul.f32 %v11176_v50, %v4409_v4  ;;  %v4272_v42 = vmul.f32 1.442695, %v4235_v31  ;;  %v4464_v26 = vmul.f32 %v11069_v15, %v4410_v13  ;;  %v8327_v6 = vld [vmem:[%s12418_s6 + $0x58] sm:$0xff]   ;;  %v11206_v31 = vpop.f32.mrb[115].mxu0  ;;  %8038 = vmatprep.subr.bf16.mxu1 %v8328_v33 }
 0x322   :  { %v3714_v63 = vmul.f32 %v3682_v41, %v3650_v3  ;;  %8711 = vpow2.f32 %v4274_v5  ;;  %v8698_v34 = vpop.eup %8697  ;;  %v3620_v62 = vmul.f32 %v8696_v49, %v3588_v2  ;;  %v4412_v28 = vunpack.c.l.bf16 %v11182_v56  ;;  %v12639_v41 = vld [vmem:[#allocation19_spill] sm:$0xff]  ;;  %12640 = vst [vmem:[#allocation13_spill] sm:$0xff] %v11206_v31  ;;  %v11208_v13 = vpop.f32.mrb[115].mxu1  ;;  %v8329_v19 = vld [vmem:[%s12418_s6 + $0x18] sm:$0xff]   ;;  %8016 = vmatprep.subr.bf16.mxu0 %v8327_v6 }
 0x323   :  { %v4276_v20 = vmul.f32 1.442695, %v4237_v9  ;;  %v4328_v5 = vadd.f32 1.0, %v8698_v34  ;;  %8713 = vpow2.f32 %v4272_v42  ;;  %v4238_v2 = vsub.f32 0.0, %v12639_v41  ;;  %12641 = vst [vmem:[#allocation25_spill] sm:$0xff] %v11208_v13  ;;  %v8330_v9 = vld [vmem:[%s12418_s6 + $0x98] sm:$0xff]   ;;  %8017 = vmatpush3.bf16.msra.mxu0 %v8329_v19 }
 0x324   :  { %v8700_v3 = vpop.eup %8699  ;;  %v3802_v4 = vadd.f32 %v3714_v63, %v11035_v53  ;;  %v3652_v17 = vmax.f32 %v3620_v62, 1e-06  ;;  %v11217_v53 = vadd.f32 %v11162_v47, %v4461_v54  ;;  %v11221_v34 = vadd.f32 %v11192_v23, %v4463_v58  ;;  %8039 = vmatpush3.bf16.msra.mxu1 %v8330_v9  ;;  %v8331_v54 = vld [vmem:[%s12418_s6 + $0x60] sm:$0xff]  }
 0x325   :  { %v8702_v49 = vpop.eup %8701  ;;  %v4327_v61 = vadd.f32 1.0, %v8700_v3  ;;  %8715 = vpow2.f32 %v4276_v20  ;;  %v4466_v62 = vmul.f32 %v11105_v39, %v4412_v28  ;;  %v4278_v3 = vmul.f32 1.442695, %v4238_v2  ;;  %v8332_v20 = vld [vmem:[%s12418_s6 + $0xe0] sm:$0xff]   ;;  %8018 = vmatprep.subr.bf16.mxu0 %v8331_v54 }
 0x326   :  { %v3803_v63 = vrot.slane %v3802_v4, 4  ;;  %v3619_v42 = vmul.f32 %v8702_v49, %v11139_v18  ;;  %8717 = vrcp.f32 %v4328_v5  ;;  %v3684_v41 = vmul.f32 %v3652_v17, %v3652_v17  ;;  %v12642_v5 = vld [vmem:[#allocation20_spill] sm:$0xff]  ;;  %v11238_v49 = vld [vmem:[%s12413_s0 + $0xa0] sm:$0xff]  ;;  %8040 = vmatprep.subr.bf16.mxu1 %v8332_v20 }
 0x327   :  { %8719 = vrcp.f32 %v4327_v61  ;;  %v8704_v18 = vpop.eup %8703  ;;  %v11231_v58 = vadd.f32 %v11112_v59, %v4464_v26  ;;  %v4240_v19 = vsub.f32 0.0, %v12642_v5  ;;  %v4411_v2 = vunpack.c.h.bf16 %v11168_v29  ;;  %v11241_v5 = vpop.f32.mrb[116].mxu0  ;;  %v8333_v29 = vld [vmem:[%s12418_s6 + $0x20] sm:$0xff]  }
 0x328   :  { %v3804_v6 = vadd.f32 %v3803_v63, %v3802_v4  ;;  %v3651_v33 = vmax.f32 %v3619_v42, 1e-06  ;;  %v3716_v9 = vmul.f32 %v3684_v41, %v3652_v17  ;;  %v4329_v28 = vadd.f32 1.0, %v8704_v18  ;;  %12643 = vst [vmem:[#allocation48_spill] sm:$0xff] %v11241_v5  ;;  %v11243_v17 = vpop.f32.mrb[116].mxu1  ;;  %8019 = vmatpush3.bf16.msra.mxu0 %v8333_v29 }
 0x329   :  { %v8706_v61 = vpop.eup %8705  ;;  %8721 = vpow2.f32 %v4278_v3  ;;  %v4282_v13 = vmul.f32 1.442695, %v4240_v19  ;;  %12644 = vst [vmem:[#allocation50_spill] sm:$0xff] %v11243_v17  ;;  %v4413_v20 = vunpack.c.h.bf16 %v11182_v56 }
 0x32a   :  { %v8708_v4 = vpop.eup %8707  ;;  %v3805_v63 = vrot.slane %v3804_v6, 2  ;;  %v3683_v42 = vmul.f32 %v3651_v33, %v3651_v33  ;;  %v3621_v26 = vmul.f32 %v8706_v61, %v11142_v7  ;;  %v3816_v3 = vadd.f32 %v3716_v9, %v11133_v8  ;;  %v8334_v7 = vld [vmem:[%s12418_s6 + $0xa0] sm:$0xff]   ;;  %v11255_v9 = vpop.f32.mrb[117].mxu0 }
 0x32b   :  { %v8710_v41 = vpop.eup %8709  ;;  %8723 = vrcp.f32 %v4329_v28  ;;  %v4330_v54 = vadd.f32 1.0, %v8708_v4  ;;  %v4414_v8 = vunpack.c.l.bf16 %v11238_v49  ;;  %8041 = vmatpush3.bf16.msra.mxu1 %v8334_v7  ;;  %12645 = vst [vmem:[#allocation52_spill] sm:$0xff] %v11255_v9 }
 0x32c   :  { %v8712_v18 = vpop.eup %8711  ;;  %v3806_v19 = vadd.f32 %v3805_v63, %v3804_v6  ;;  %v3715_v61 = vmul.f32 %v3683_v42, %v3651_v33  ;;  %v3653_v5 = vmax.f32 %v3621_v26, 1e-06  ;;  %v4546_v17 = vmul.f32 %v8710_v41, %v11149_v60 }
 0x32d   :  { %v3817_v31 = vrot.slane %v3816_v3, 4  ;;  %8725 = vrcp.f32 %v4330_v54  ;;  %v4332_v57 = vadd.f32 1.0, %v8712_v18  ;;  %v8714_v56 = vpop.eup %8713  ;;  %v4520_v60 = vadd.f32 %v11130_v11, %v4466_v62 }
 0x32e   :  { %v3807_v28 = vrot.slane %v3806_v19, 1  ;;  %v3809_v4 = vadd.f32 %v3715_v61, %v11146_v46  ;;  %v3685_v45 = vmul.f32 %v3653_v5, %v3653_v5  ;;  %v4578_v43 = vmax.f32 %v4546_v17, 1e-06 }
 0x32f   :  { %v8716_v6 = vpop.eup %8715  ;;  %v3818_v33 = vadd.f32 %v3817_v31, %v3816_v3  ;;  %8727 = vrcp.f32 %v4332_v57  ;;  %v4331_v63 = vadd.f32 1.0, %v8714_v56  ;;  %v4465_v41 = vmul.f32 %v11158_v22, %v4411_v2 }
 0x330   :  { %v8718_v42 = vpop.eup %8717  ;;  %v3810_v26 = vrot.slane %v3809_v4, 4  ;;  %v3717_v29 = vmul.f32 %v3685_v45, %v3653_v5  ;;  %v4467_v54 = vmul.f32 %v11176_v50, %v4413_v20  ;;  %v4333_v46 = vadd.f32 1.0, %v8716_v6  ;;  %v11267_v45 = vld [vmem:[%s12413_s0 + $0xa8] sm:$0xff] }
 0x331   :  { %v8720_v7 = vpop.eup %8719  ;;  %v3819_v18 = vrot.slane %v3818_v33, 2  ;;  %v4548_v9 = vmul.f32 %v8718_v42, %v11153_v30  ;;  %8729 = vrcp.f32 %v4331_v63  ;;  %v3808_v17 = vadd.f32 %v3807_v28, %v3806_v19 }
 0x332   :  { %v3811_v61 = vadd.f32 %v3810_v26, %v3809_v4  ;;  %v3823_v57 = vadd.f32 %v3717_v29, %v11188_v38  ;;  %v4468_v31 = vmul.f32 %v11069_v15, %v4414_v8  ;;  %v4547_v3 = vmul.f32 %v8720_v7, %v11217_v53  ;;  %v12647_v29 = vld [vmem:[#allocation29_spill] sm:$0xff] }
 0x333   :  { %v8722_v62 = vpop.eup %8721  ;;  %v3820_v2 = vadd.f32 %v3819_v18, %v3818_v33  ;;  %v4580_v5 = vmax.f32 %v4548_v9, 1e-06  ;;  %8731 = vrcp.f32 %v4333_v46  ;;  %v4610_v38 = vmul.f32 %v4578_v43, %v4578_v43 }
 0x334   :  { %v3812_v30 = vrot.slane %v3811_v61, 2  ;;  %v3824_v20 = vrot.slane %v3823_v57, 4  ;;  %v4334_v56 = vadd.f32 1.0, %v8722_v62  ;;  %8733 = vpow2.f32 %v4282_v13 }
 0x335   :  { %v8724_v19 = vpop.eup %8723  ;;  %v3821_v28 = vrot.slane %v3820_v2, 1  ;;  %v4579_v4 = vmax.f32 %v4547_v3, 1e-06  ;;  %v4416_v8 = vunpack.c.l.bf16 %v11267_v45  ;;  %v11272_v9 = vmul.f32 0.0625, %v3808_v17 }
 0x336   :  { %v3813_v6 = vadd.f32 %v3812_v30, %v3811_v61  ;;  %v3825_v63 = vadd.f32 %v3824_v20, %v3823_v57  ;;  %v4549_v42 = vmul.f32 %v8724_v19, %v11221_v34  ;;  %8735 = vrcp.f32 %v4334_v56 }
 0x337   :  { %v8726_v33 = vpop.eup %8725  ;;  %12646 = vst [vmem:[#allocation53_spill] sm:$0xff] %v11272_v9  ;;  %v4612_v53 = vmul.f32 %v4580_v5, %v4580_v5  ;;  %v4519_v26 = vadd.f32 %v11162_v47, %v4465_v41  ;;  %v4239_v7 = vsub.f32 0.0, %v12647_v29  ;;  %v3822_v13 = vadd.f32 %v3821_v28, %v3820_v2  ;;  %v12648_v2 = vld [vmem:[#allocation16_spill] sm:$0xff] }
 0x338   :  { %v3814_v18 = vrot.slane %v3813_v6, 1  ;;  %v3826_v46 = vrot.slane %v3825_v63, 2  ;;  %v4550_v62 = vmul.f32 %v8726_v33, %v11231_v58  ;;  %v4611_v48 = vmul.f32 %v4579_v4, %v4579_v4 }
 0x339   :  { %v8728_v3 = vpop.eup %8727  ;;  %v4581_v61 = vmax.f32 %v4549_v42, 1e-06  ;;  %v4521_v57 = vadd.f32 %v11192_v23, %v4467_v54  ;;  %v4280_v34 = vmul.f32 1.442695, %v4239_v7  ;;  %v4642_v30 = vmul.f32 %v4610_v38, %v4578_v43  ;;  %v11284_v54 = vpop.f32.mrb[117].mxu1 }
 0x33a   :  { %v4582_v20 = vmax.f32 %v4550_v62, 1e-06  ;;  %v4522_v17 = vadd.f32 %v11112_v59, %v4468_v31  ;;  %v4470_v56 = vmul.f32 %v11105_v39, %v4416_v8  ;;  %v4644_v19 = vmul.f32 %v4612_v53, %v4580_v5 }
 0x33b   :  { %v8730_v41 = vpop.eup %8729  ;;  %v4552_v29 = vmul.f32 %v8728_v3, %v4520_v60  ;;  %8737 = vpow2.f32 %v4280_v34  ;;  %v4241_v28 = vsub.f32 0.0, %v12648_v2  ;;  %v11281_v9 = vmul.f32 0.0625, %v3822_v13 }
 0x33c   :  { %v3815_v58 = vadd.f32 %v3814_v18, %v3813_v6  ;;  %v4614_v33 = vmul.f32 %v4582_v20, %v4582_v20  ;;  %v4415_v42 = vunpack.c.h.bf16 %v11238_v49  ;;  %v4643_v38 = vmul.f32 %v4611_v48, %v4579_v4 }
 0x33d   :  { %12649 = vst [vmem:[#allocation54_spill] sm:$0xff] %v11281_v9  ;;  %v8732_v43 = vpop.eup %8731  ;;  %v4584_v7 = vmax.f32 %v4552_v29, 1e-06  ;;  %v4551_v31 = vmul.f32 %v8730_v41, %v4519_v26  ;;  %v4284_v62 = vmul.f32 1.442695, %v4241_v28  ;;  %v11286_v27 = vadd.f32 %v3826_v46, %v3825_v63  ;;  %v11291_v63 = vpop.f32.mrb[118].mxu0 }
 0x33e   :  { %v8734_v8 = vpop.eup %8733  ;;  %v4613_v60 = vmul.f32 %v4581_v61, %v4581_v61  ;;  %v4646_v5 = vmul.f32 %v4614_v33, %v4582_v20  ;;  %v4553_v53 = vmul.f32 %v8732_v43, %v4521_v57  ;;  %v11288_v18 = vmul.f32 0.0625, %v3815_v58  ;;  %v12651_v29 = vld [vmem:[#allocation42_spill] sm:$0xff] }
 0x33f   :  { %v4616_v3 = vmul.f32 %v4584_v7, %v4584_v7  ;;  %v4583_v13 = vmax.f32 %v4551_v31, 1e-06  ;;  %v4336_v34 = vadd.f32 1.0, %v8734_v8  ;;  %8739 = vpow2.f32 %v4284_v62 }
 0x340   :  { %v8736_v6 = vpop.eup %8735  ;;  %12650 = vst [vmem:[#allocation55_spill] sm:$0xff] %v11288_v18  ;;  %v4674_v49 = vadd.f32 %v4646_v5, %v4642_v30  ;;  %v4585_v2 = vmax.f32 %v4553_v53, 1e-06  ;;  %v4469_v48 = vmul.f32 %v11158_v22, %v4415_v42  ;;  %v4645_v46 = vmul.f32 %v4613_v60, %v4581_v61  ;;  %v11295_v30 = vpop.f32.mrb[118].mxu1 }
 0x341   :  { %v4648_v4 = vmul.f32 %v4616_v3, %v4584_v7  ;;  %v4615_v26 = vmul.f32 %v4583_v13, %v4583_v13  ;;  %v4554_v41 = vmul.f32 %v8736_v6, %v4522_v17  ;;  %8741 = vrcp.f32 %v4336_v34  ;;  %v11300_v17 = vld [vmem:[%s12413_s0 + $0xe0] sm:$0xff] }
 0x342   :  { %v4675_v20 = vrot.slane %v4674_v49, 4  ;;  %v4617_v57 = vmul.f32 %v4585_v2, %v4585_v2  ;;  %v4242_v28 = vsub.f32 0.0, %v12651_v29  ;;  %v4417_v58 = vunpack.c.h.bf16 %v11267_v45  ;;  %v11314_v29 = vpop.f32.mrb[119].mxu0 }
 0x343   :  { %v4688_v33 = vadd.f32 %v4648_v4, %v4644_v19  ;;  %v4647_v43 = vmul.f32 %v4615_v26, %v4583_v13  ;;  %v4586_v31 = vmax.f32 %v4554_v41, 1e-06  ;;  %v4244_v61 = vsub.f32 0.0, %v10805_v24 }
 0x344   :  { %v4676_v62 = vadd.f32 %v4675_v20, %v4674_v49  ;;  %v4649_v42 = vmul.f32 %v4617_v57, %v4585_v2  ;;  %v4286_v7 = vmul.f32 1.442695, %v4242_v28  ;;  %v3828_v60 = vrot.slane %v11286_v27, 1 }
 0x345   :  { %v8738_v8 = vpop.eup %8737  ;;  %v4689_v19 = vrot.slane %v4688_v33, 4  ;;  %v4681_v5 = vadd.f32 %v4647_v43, %v4643_v38  ;;  %v4524_v53 = vadd.f32 %v11130_v11, %v4470_v56  ;;  %v4523_v49 = vadd.f32 %v11162_v47, %v4469_v48  ;;  %v11311_v56 = vld [vmem:[%s12413_s0 + $0xe8] sm:$0xff] }
 0x346   :  { %v4677_v45 = vrot.slane %v4676_v62, 2  ;;  %v4695_v3 = vadd.f32 %v4649_v42, %v4645_v46  ;;  %v4335_v13 = vadd.f32 1.0, %v8738_v8  ;;  %8743 = vpow2.f32 %v4286_v7 }
 0x347   :  { %v4690_v34 = vadd.f32 %v4689_v19, %v4688_v33  ;;  %v4682_v6 = vrot.slane %v4681_v5, 4  ;;  %v4471_v2 = vmul.f32 %v11176_v50, %v4417_v58  ;;  %v4290_v24 = vmul.f32 1.442695, %v4244_v61 }
 0x348   :  { %v4678_v4 = vadd.f32 %v4677_v45, %v4676_v62  ;;  %v4696_v26 = vrot.slane %v4695_v3, 4  ;;  %8745 = vrcp.f32 %v4335_v13  ;;  %v4418_v38 = vunpack.c.l.bf16 %v11300_v17 }
 0x349   :  { %v8740_v41 = vpop.eup %8739  ;;  %v4691_v20 = vrot.slane %v4690_v34, 2  ;;  %v4683_v57 = vadd.f32 %v4682_v6, %v4681_v5  ;;  %v4243_v46 = vsub.f32 0.0, %v10812_v21  ;;  %8747 = vpow2.f32 %v4290_v24 }
 0x34a   :  { %v4679_v48 = vrot.slane %v4678_v4, 1  ;;  %v4697_v28 = vadd.f32 %v4696_v26, %v4695_v3  ;;  %v4337_v33 = vadd.f32 1.0, %v8740_v41  ;;  %v4618_v42 = vmul.f32 %v4586_v31, %v4586_v31  ;;  %v11323_v26 = vpop.f32.mrb[119].mxu1 }
 0x34b   :  { %v8742_v43 = vpop.eup %8741  ;;  %v4692_v58 = vadd.f32 %v4691_v20, %v4690_v34  ;;  %v4684_v62 = vrot.slane %v4683_v57, 2  ;;  %v4288_v7 = vmul.f32 1.442695, %v4243_v46  ;;  %v4420_v19 = vunpack.c.l.bf16 %v11311_v56 }
 0x34c   :  { %v4698_v61 = vrot.slane %v4697_v28, 2  ;;  %v4556_v8 = vmul.f32 %v8742_v43, %v4524_v53  ;;  %8749 = vrcp.f32 %v4337_v33  ;;  %v4680_v5 = vadd.f32 %v4679_v48, %v4678_v4  ;;  %v11330_v4 = vld [vmem:[%s12413_s0 + $0x120] sm:$0xff]  ;;  %v8336_v43 = vld [vmem:[%s12418_s6 + $0xe8] sm:$0xff]  }
 0x34d   :  { %v4693_v45 = vrot.slane %v4692_v58, 1  ;;  %v4685_v13 = vadd.f32 %v4684_v62, %v4683_v57  ;;  %8751 = vpow2.f32 %v4288_v7  ;;  %v11318_v21 = vadd.f32 %v3828_v60, %v11286_v27  ;;  %v8337_v7 = vld [vmem:[%s12418_s6 + $0x28] sm:$0xff]   ;;  %8042 = vmatprep.subr.bf16.mxu1 %v8336_v43  ;;  %v8342_v43 = vld [vmem:[%s12418_s6 + $0xb0] sm:$0xff]  }
 0x34e   :  { %v4699_v3 = vadd.f32 %v4698_v61, %v4697_v28  ;;  %v11320_v6 = vmax.f32 %v4556_v8, 1e-06  ;;  %v4525_v34 = vadd.f32 %v11192_v23, %v4471_v2  ;;  %v4472_v53 = vmul.f32 %v11069_v15, %v4418_v38  ;;  %v8338_v61 = vld [vmem:[%s12418_s6 + $0xa8] sm:$0xff]  }
 0x34f   :  { %v4694_v24 = vadd.f32 %v4693_v45, %v4692_v58  ;;  %v4686_v41 = vrot.slane %v4685_v13, 1  ;;  %v4245_v20 = vsub.f32 0.0, %v10814_v32  ;;  %v11332_v57 = vmul.f32 %v4618_v42, %v4586_v31  ;;  %v8335_v32 = vld [vmem:[%s12418_s6 + $0x68] sm:$0xff]   ;;  %8043 = vmatpush3.bf16.msra.mxu1 %v8338_v61 }
 0x350   :  { %v8744_v27 = vpop.eup %8743  ;;  %v4700_v60 = vrot.slane %v4699_v3, 1  ;;  %v4474_v46 = vmul.f32 %v11105_v39, %v4420_v19  ;;  %v4246_v2 = vsub.f32 0.0, %v10855_v16  ;;  %v11336_v48 = vmul.f32 0.0625, %v4680_v5  ;;  %8020 = vmatprep.subr.bf16.mxu0 %v8335_v32  ;;  %v8341_v32 = vld [vmem:[%s12418_s6 + $0x30] sm:$0xff]  }
 0x351   :  { %v4687_v28 = vadd.f32 %v4686_v41, %v4685_v13  ;;  %v4338_v33 = vadd.f32 1.0, %v8744_v27  ;;  %v4292_v38 = vmul.f32 1.442695, %v4245_v20  ;;  %v11344_v31 = vmul.f32 0.0625, %v4694_v24  ;;  %8021 = vmatpush3.bf16.msra.mxu0 %v8337_v7  ;;  %v11366_v41 = vld [vmem:[%s12413_s0 + $0x128] sm:$0xff]  ;;  %v8339_v20 = vld [vmem:[%s12418_s6 + $0x70] sm:$0xff]  }
 0x352   :  { %12652 = vst [vmem:[#allocation7_spill] sm:$0xff] %v11336_v48  ;;  %v8746_v58 = vpop.eup %8745  ;;  %v4701_v62 = vadd.f32 %v4700_v60, %v4699_v3  ;;  %v4419_v42 = vunpack.c.h.bf16 %v11300_v17  ;;  %v4421_v16 = vunpack.c.h.bf16 %v11311_v56  ;;  %v4294_v5 = vmul.f32 1.442695, %v4246_v2  ;;  %v8340_v27 = vld [vmem:[%s12418_s6 + $0xf0] sm:$0xff]   ;;  %8022 = vmatprep.subr.bf16.mxu0 %v8339_v20 }
 0x353   :  { %12653 = vst [vmem:[#allocation8_spill] sm:$0xff] %v11344_v31  ;;  %v11354_v8 = vmul.f32 0.0625, %v4687_v28  ;;  %v4555_v19 = vmul.f32 %v8746_v58, %v4523_v49  ;;  %8753 = vrcp.f32 %v4338_v33  ;;  %v8748_v45 = vpop.eup %8747  ;;  %v4620_v17 = vmul.f32 %v11320_v6, %v11320_v6  ;;  %8044 = vmatprep.subr.bf16.mxu1 %v8340_v27 }
 0x354   :  { %v11356_v13 = vmul.f32 0.0625, %v4701_v62  ;;  %8755 = vpow2.f32 %v4292_v38  ;;  %v4422_v56 = vunpack.c.l.bf16 %v11330_v4  ;;  %v4340_v49 = vadd.f32 1.0, %v8748_v45  ;;  %v11391_v45 = vpop.f32.mrb[120].mxu1  ;;  %8045 = vmatpush3.bf16.msra.mxu1 %v8342_v43 }
 0x355   :  { %12654 = vst [vmem:[#allocation9_spill] sm:$0xff] %v11354_v8  ;;  %v4587_v24 = vmax.f32 %v4555_v19, 1e-06  ;;  %8757 = vpow2.f32 %v4294_v5  ;;  %v4526_v28 = vadd.f32 %v11112_v59, %v4472_v53  ;;  %v4473_v33 = vmul.f32 %v11158_v22, %v4419_v42  ;;  %v11389_v5 = vpop.f32.mrb[120].mxu0  ;;  %8023 = vmatpush3.bf16.msra.mxu0 %v8341_v32 }
 0x356   :  { %12655 = vst [vmem:[#allocation39_spill] sm:$0xff] %v11356_v13  ;;  %v8750_v60 = vpop.eup %8749  ;;  %v4248_v38 = vsub.f32 0.0, %v10857_v10  ;;  %8759 = vrcp.f32 %v4340_v49  ;;  %v4475_v7 = vmul.f32 %v11176_v50, %v4421_v16  ;;  %v4247_v61 = vsub.f32 0.0, %v10867_v35  ;;  %v11397_v20 = vpop.f32.mrb[121].mxu0 }
 0x357   :  { %v8752_v58 = vpop.eup %8751  ;;  %v4557_v62 = vmul.f32 %v8750_v60, %v4525_v34  ;;  %v4476_v10 = vmul.f32 %v11069_v15, %v4422_v56  ;;  %v4424_v19 = vunpack.c.l.bf16 %v11366_v41  ;;  %v11394_v34 = vmul.f32 %v4620_v17, %v11320_v6 }
 0x358   :  { %v4339_v53 = vadd.f32 1.0, %v8752_v58  ;;  %v4298_v42 = vmul.f32 1.442695, %v4248_v38  ;;  %v4528_v35 = vadd.f32 %v11130_v11, %v4474_v46  ;;  %v4296_v49 = vmul.f32 1.442695, %v4247_v61  ;;  %v11401_v38 = vpop.f32.mrb[121].mxu1 }
 0x359   :  { %v4589_v16 = vmax.f32 %v4557_v62, 1e-06  ;;  %v4619_v27 = vmul.f32 %v4587_v24, %v4587_v24  ;;  %v4423_v56 = vunpack.c.h.bf16 %v11330_v4  ;;  %v4249_v60 = vsub.f32 0.0, %v10869_v12  ;;  %v11411_v46 = vld [vmem:[%s12413_s0 + $0x160] sm:$0xff] }
 0x35a   :  { %8761 = vrcp.f32 %v4339_v53  ;;  %v4527_v32 = vadd.f32 %v11162_v47, %v4473_v33  ;;  %v11405_v43 = vadd.f32 %v11192_v23, %v4475_v7  ;;  %v4250_v6 = vsub.f32 0.0, %v10885_v44  ;;  %v11419_v44 = vpop.f32.mrb[122].mxu0 }
 0x35b   :  { %8763 = vpow2.f32 %v4298_v42  ;;  %v11414_v17 = vadd.f32 %v11112_v59, %v4476_v10  ;;  %v4478_v12 = vmul.f32 %v11105_v39, %v4424_v19  ;;  %v4300_v4 = vmul.f32 1.442695, %v4249_v60 }
 0x35c   :  { %8765 = vpow2.f32 %v4296_v49  ;;  %v4621_v33 = vmul.f32 %v4589_v16, %v4589_v16  ;;  %v4425_v62 = vunpack.c.h.bf16 %v11366_v41  ;;  %v4302_v7 = vmul.f32 1.442695, %v4250_v6 }
 0x35d   :  { %v8754_v58 = vpop.eup %8753  ;;  %v4252_v61 = vsub.f32 0.0, %v10887_v1  ;;  %v11421_v42 = vmul.f32 %v4619_v27, %v4587_v24  ;;  %v4477_v10 = vmul.f32 %v11158_v22, %v4423_v56  ;;  %8767 = vpow2.f32 %v4300_v4  ;;  %v11435_v27 = vld [vmem:[%s12413_s0 + $0x168] sm:$0xff]  ;;  %v11438_v4 = vpop.f32.mrb[122].mxu1 }
 0x35e   :  { %v8756_v53 = vpop.eup %8755  ;;  %v4558_v2 = vmul.f32 %v8754_v58, %v4526_v28  ;;  %8769 = vpow2.f32 %v4302_v7  ;;  %v4426_v49 = vunpack.c.l.bf16 %v11411_v46  ;;  %v11426_v6 = vadd.f32 %v11130_v11, %v4478_v12 }
 0x35f   :  { %v8758_v3 = vpop.eup %8757  ;;  %v4341_v19 = vadd.f32 1.0, %v8756_v53  ;;  %v4306_v60 = vmul.f32 1.442695, %v4252_v61  ;;  %v4251_v1 = vsub.f32 0.0, %v10906_v40  ;;  %v11429_v24 = vmul.f32 %v4621_v33, %v4589_v16 }
 0x360   :  { %v4590_v13 = vmax.f32 %v4558_v2, 1e-06  ;;  %v4342_v41 = vadd.f32 1.0, %v8758_v3  ;;  %v8760_v31 = vpop.eup %8759  ;;  %v4479_v28 = vmul.f32 %v11176_v50, %v4425_v62  ;;  %v4253_v56 = vsub.f32 0.0, %v10908_v0  ;;  %v11445_v0 = vpop.f32.mrb[123].mxu0 }
 0x361   :  { %8771 = vrcp.f32 %v4341_v19  ;;  %v4560_v3 = vmul.f32 %v8760_v31, %v4528_v35  ;;  %v4304_v12 = vmul.f32 1.442695, %v4251_v1  ;;  %v11441_v40 = vadd.f32 %v11162_v47, %v4477_v10  ;;  %v11453_v1 = vpop.f32.mrb[123].mxu1 }
 0x362   :  { %v4622_v2 = vmul.f32 %v4590_v13, %v4590_v13  ;;  %8773 = vrcp.f32 %v4342_v41  ;;  %v4480_v16 = vmul.f32 %v11069_v15, %v4426_v49  ;;  %v4308_v58 = vmul.f32 1.442695, %v4253_v56  ;;  %v8343_v56 = vld [vmem:[%s12418_s6 + $0x78] sm:$0xff]  }
 0x363   :  { %8775 = vpow2.f32 %v4306_v60  ;;  %v4592_v7 = vmax.f32 %v4560_v3, 1e-06  ;;  %v4428_v61 = vunpack.c.l.bf16 %v11435_v27  ;;  %v4427_v53 = vunpack.c.h.bf16 %v11411_v46  ;;  %8024 = vmatprep.subr.bf16.mxu0 %v8343_v56 }
 0x364   :  { %v8762_v33 = vpop.eup %8761  ;;  %v4654_v62 = vmul.f32 %v4622_v2, %v4590_v13  ;;  %8777 = vpow2.f32 %v4304_v12  ;;  %v4254_v10 = vsub.f32 0.0, %v10940_v55  ;;  %v11451_v13 = vadd.f32 %v11192_v23, %v4479_v28  ;;  %v8345_v28 = vld [vmem:[%s12418_s6 + $0x38] sm:$0xff]  }
 0x365   :  { %v8764_v31 = vpop.eup %8763  ;;  %v4559_v35 = vmul.f32 %v8762_v33, %v4527_v32  ;;  %8779 = vpow2.f32 %v4308_v58  ;;  %v4624_v60 = vmul.f32 %v4592_v7, %v4592_v7  ;;  %v8344_v32 = vld [vmem:[%s12418_s6 + $0xf8] sm:$0xff]   ;;  %v11462_v2 = vadd.f32 %v11112_v59, %v4480_v16  ;;  %8025 = vmatpush3.bf16.msra.mxu0 %v8345_v28 }
 0x366   :  { %v8766_v19 = vpop.eup %8765  ;;  %v4702_v49 = vadd.f32 %v4654_v62, %v11332_v57  ;;  %v4344_v41 = vadd.f32 1.0, %v8764_v31  ;;  %v4310_v57 = vmul.f32 1.442695, %v4254_v10  ;;  %v4482_v33 = vmul.f32 %v11105_v39, %v4428_v61  ;;  %8046 = vmatprep.subr.bf16.mxu1 %v8344_v32  ;;  %v8346_v62 = vld [vmem:[%s12418_s6 + $0xb8] sm:$0xff]   ;;  %v11476_v61 = vld [vmem:[%s12413_s0 + $0x1a0] sm:$0xff] }
 0x367   :  { %v4591_v46 = vmax.f32 %v4559_v35, 1e-06  ;;  %v4343_v55 = vadd.f32 1.0, %v8766_v19  ;;  %v8768_v3 = vpop.eup %8767  ;;  %v4656_v58 = vmul.f32 %v4624_v60, %v4592_v7  ;;  %v4481_v10 = vmul.f32 %v11158_v22, %v4427_v53  ;;  %8047 = vmatpush3.bf16.msra.mxu1 %v8346_v62 }
 0x368   :  { %v4703_v12 = vrot.slane %v4702_v49, 4  ;;  %8781 = vrcp.f32 %v4344_v41  ;;  %v8770_v31 = vpop.eup %8769  ;;  %v4345_v35 = vadd.f32 1.0, %v8768_v3  ;;  %v4429_v56 = vunpack.c.h.bf16 %v11435_v27 }
 0x369   :  { %v4623_v16 = vmul.f32 %v4591_v46, %v4591_v46  ;;  %8783 = vrcp.f32 %v4343_v55  ;;  %v4716_v8 = vadd.f32 %v4656_v58, %v11394_v34  ;;  %v4346_v7 = vadd.f32 1.0, %v8770_v31 }
 0x36a   :  { %v4704_v19 = vadd.f32 %v4703_v12, %v4702_v49  ;;  %8785 = vpow2.f32 %v4310_v57  ;;  %v4256_v32 = vsub.f32 0.0, %v10942_v52  ;;  %v4430_v12 = vunpack.c.l.bf16 %v11476_v61 }
 0x36b   :  { %v8772_v60 = vpop.eup %8771  ;;  %v4655_v41 = vmul.f32 %v4623_v16, %v4591_v46  ;;  %8787 = vrcp.f32 %v4345_v35  ;;  %v4717_v49 = vrot.slane %v4716_v8, 4 }
 0x36c   :  { %v8774_v53 = vpop.eup %8773  ;;  %v4705_v55 = vrot.slane %v4704_v19, 2  ;;  %v4561_v34 = vmul.f32 %v8772_v60, %v11405_v43  ;;  %8789 = vrcp.f32 %v4346_v7  ;;  %v4314_v58 = vmul.f32 1.442695, %v4256_v32 }
 0x36d   :  { %v8776_v57 = vpop.eup %8775  ;;  %v4709_v28 = vadd.f32 %v4655_v41, %v11421_v42  ;;  %v4562_v3 = vmul.f32 %v8774_v53, %v11414_v17  ;;  %v4718_v31 = vadd.f32 %v4717_v49, %v4716_v8  ;;  %v4483_v41 = vmul.f32 %v11176_v50, %v4429_v56 }
 0x36e   :  { %v8778_v46 = vpop.eup %8777  ;;  %v4706_v62 = vadd.f32 %v4705_v55, %v4704_v19  ;;  %v4593_v27 = vmax.f32 %v4561_v34, 1e-06  ;;  %v4348_v16 = vadd.f32 1.0, %v8776_v57  ;;  %8791 = vpow2.f32 %v4314_v58 }
 0x36f   :  { %v8780_v52 = vpop.eup %8779  ;;  %v4710_v35 = vrot.slane %v4709_v28, 4  ;;  %v4594_v48 = vmax.f32 %v4562_v3, 1e-06  ;;  %v4347_v9 = vadd.f32 1.0, %v8778_v46  ;;  %v4719_v7 = vrot.slane %v4718_v31, 2 }
 0x370   :  { %v4707_v43 = vrot.slane %v4706_v62, 1  ;;  %v4625_v60 = vmul.f32 %v4593_v27, %v4593_v27  ;;  %8793 = vrcp.f32 %v4348_v16  ;;  %v4349_v17 = vadd.f32 1.0, %v8780_v52 }
 0x371   :  { %v4711_v42 = vadd.f32 %v4710_v35, %v4709_v28  ;;  %8795 = vrcp.f32 %v4347_v9  ;;  %v4720_v53 = vadd.f32 %v4719_v7, %v4718_v31  ;;  %v4536_v8 = vadd.f32 %v11130_v11, %v4482_v33 }
 0x372   :  { %v8782_v32 = vpop.eup %8781  ;;  %v4657_v19 = vmul.f32 %v4625_v60, %v4593_v27  ;;  %v4484_v55 = vmul.f32 %v11069_v15, %v4430_v12  ;;  %v4708_v34 = vadd.f32 %v4707_v43, %v4706_v62  ;;  %8797 = vrcp.f32 %v4349_v17 }
 0x373   :  { %v8784_v49 = vpop.eup %8783  ;;  %v4712_v57 = vrot.slane %v4711_v42, 2  ;;  %v4564_v3 = vmul.f32 %v8782_v32, %v11426_v6  ;;  %v4721_v46 = vrot.slane %v4720_v53, 1  ;;  %v4535_v56 = vadd.f32 %v11162_v47, %v4481_v10 }
 0x374   :  { %v8786_v58 = vpop.eup %8785  ;;  %v4723_v9 = vadd.f32 %v4657_v19, %v11429_v24  ;;  %v4563_v28 = vmul.f32 %v8784_v49, %v11441_v40  ;;  %v4626_v16 = vmul.f32 %v4594_v48, %v4594_v48  ;;  %v4537_v33 = vadd.f32 %v11192_v23, %v4483_v41  ;;  %v11496_v24 = vld [vmem:[%s12413_s0 + $0x1a8] sm:$0xff] }
 0x375   :  { %v8788_v31 = vpop.eup %8787  ;;  %v4713_v27 = vadd.f32 %v4712_v57, %v4711_v42  ;;  %v4350_v12 = vadd.f32 1.0, %v8786_v58  ;;  %v4722_v62 = vadd.f32 %v4721_v46, %v4720_v53  ;;  %v4596_v43 = vmax.f32 %v4564_v3, 1e-06 }
 0x376   :  { %v8790_v52 = vpop.eup %8789  ;;  %v4724_v35 = vrot.slane %v4723_v9, 4  ;;  %v4565_v6 = vmul.f32 %v8788_v31, %v11451_v13  ;;  %v11498_v40 = vmul.f32 0.0625, %v4708_v34  ;;  %v4538_v60 = vadd.f32 %v11112_v59, %v4484_v55 }
 0x377   :  { %v4714_v10 = vrot.slane %v4713_v27, 1  ;;  %v4566_v7 = vmul.f32 %v8790_v52, %v11462_v2  ;;  %v4595_v17 = vmax.f32 %v4563_v28, 1e-06  ;;  %8799 = vrcp.f32 %v4350_v12 }
 0x378   :  { %v4725_v42 = vadd.f32 %v4724_v35, %v4723_v9  ;;  %v4597_v41 = vmax.f32 %v4565_v6, 1e-06  ;;  %v8792_v32 = vpop.eup %8791  ;;  %v11502_v53 = vmul.f32 0.0625, %v4722_v62  ;;  %v4255_v49 = vsub.f32 0.0, %v10959_v14 }
 0x379   :  { %v4715_v13 = vadd.f32 %v4714_v10, %v4713_v27  ;;  %v4598_v19 = vmax.f32 %v4566_v7, 1e-06  ;;  %v4658_v34 = vmul.f32 %v4626_v16, %v4594_v48  ;;  %v4352_v58 = vadd.f32 1.0, %v8792_v32 }
 0x37a   :  { %v8794_v57 = vpop.eup %8793  ;;  %v4726_v3 = vrot.slane %v4725_v42, 2  ;;  %v4432_v46 = vunpack.c.l.bf16 %v11496_v24  ;;  %v4312_v28 = vmul.f32 1.442695, %v4255_v49  ;;  %v4628_v52 = vmul.f32 %v4596_v43, %v4596_v43 }
 0x37b   :  { %v8796_v2 = vpop.eup %8795  ;;  %v11506_v31 = vmul.f32 0.0625, %v4715_v13  ;;  %v4630_v55 = vmul.f32 %v4598_v19, %v4598_v19  ;;  %v4568_v9 = vmul.f32 %v8794_v57, %v4536_v8  ;;  %v4627_v62 = vmul.f32 %v4595_v17, %v4595_v17 }
 0x37c   :  { %v4727_v12 = vadd.f32 %v4726_v3, %v4725_v42  ;;  %v4567_v35 = vmul.f32 %v8796_v2, %v4535_v56  ;;  %v8798_v27 = vpop.eup %8797  ;;  %8801 = vpow2.f32 %v4312_v28  ;;  %v4629_v32 = vmul.f32 %v4597_v41, %v4597_v41 }
 0x37d   :  { %v4662_v6 = vmul.f32 %v4630_v55, %v4598_v19  ;;  %v4600_v10 = vmax.f32 %v4568_v9, 1e-06  ;;  %v4569_v7 = vmul.f32 %v8798_v27, %v4537_v33  ;;  %8803 = vrcp.f32 %v4352_v58 }
 0x37e   :  { %v4728_v48 = vrot.slane %v4727_v12, 1  ;;  %v4599_v16 = vmax.f32 %v4567_v35, 1e-06  ;;  %v4257_v8 = vsub.f32 0.0, %v10985_v25  ;;  %v4486_v56 = vmul.f32 %v11105_v39, %v4432_v46 }
 0x37f   :  { %v4730_v13 = vadd.f32 %v4662_v6, %v4658_v34  ;;  %v4632_v18 = vmul.f32 %v4600_v10, %v4600_v10  ;;  %v4601_v57 = vmax.f32 %v4569_v7, 1e-06  ;;  %v4660_v3 = vmul.f32 %v4628_v52, %v4596_v43 }
 0x380   :  { %v4729_v42 = vadd.f32 %v4728_v48, %v4727_v12  ;;  %v4631_v49 = vmul.f32 %v4599_v16, %v4599_v16  ;;  %v4316_v19 = vmul.f32 1.442695, %v4257_v8  ;;  %v4659_v28 = vmul.f32 %v4627_v62, %v4595_v17 }
 0x381   :  { %v4731_v2 = vrot.slane %v4730_v13, 4  ;;  %v4664_v14 = vmul.f32 %v4632_v18, %v4600_v10  ;;  %v8800_v55 = vpop.eup %8799  ;;  %v4633_v58 = vmul.f32 %v4601_v57, %v4601_v57  ;;  %v4661_v35 = vmul.f32 %v4629_v32, %v4597_v41 }
 0x382   :  { %v11512_v9 = vmul.f32 0.0625, %v4729_v42  ;;  %v4663_v33 = vmul.f32 %v4631_v49, %v4599_v16  ;;  %8805 = vpow2.f32 %v4316_v19  ;;  %v4431_v43 = vunpack.c.h.bf16 %v11476_v61 }
 0x383   :  { %v4732_v34 = vadd.f32 %v4731_v2, %v4730_v13  ;;  %v4744_v27 = vadd.f32 %v4664_v14, %v4660_v3  ;;  %v4665_v6 = vmul.f32 %v4633_v58, %v4601_v57  ;;  %v4570_v52 = vmul.f32 %v8800_v55, %v4538_v60 }
 0x384   :  { %v4821_v25 = vcombine.low %v11502_v53, %v11512_v9  ;;  %v4737_v12 = vadd.f32 %v4663_v33, %v4659_v28  ;;  %v4258_v10 = vsub.f32 0.0, %v10999_v37  ;;  %v11519_v17 = vmul.f32 0.0625, %v11318_v21  ;;  %v11594_v53 = vld [vmem:[%s12413_s0 + $0x38] sm:$0xff]  ;;  %v12668_v9 = vld [vmem:[#allocation35_spill] sm:$0xff] }
 0x385   :  { %v4733_v46 = vrot.slane %v4732_v34, 2  ;;  %v4745_v18 = vrot.slane %v4744_v27, 4  ;;  %v4751_v41 = vadd.f32 %v4665_v6, %v4661_v35  ;;  %v4540_v7 = vadd.f32 %v11130_v11, %v4486_v56 }
 0x386   :  { %12656 = vst [vmem:[#allocation15_spill] sm:$0xff] %v11519_v17  ;;  %v4738_v62 = vrot.slane %v4737_v12, 4  ;;  %v8802_v48 = vpop.eup %8801  ;;  %v4485_v61 = vmul.f32 %v11158_v22, %v4431_v43  ;;  %v11523_v57 = vmax.f32 %v4570_v52, 1e-06  ;;  %v4318_v37 = vmul.f32 1.442695, %v4258_v10 }
 0x387   :  { %v4734_v14 = vadd.f32 %v4733_v46, %v4732_v34  ;;  %v4746_v16 = vadd.f32 %v4745_v18, %v4744_v27  ;;  %v8804_v32 = vpop.eup %8803  ;;  %v4752_v8 = vrot.slane %v4751_v41, 4  ;;  %v4351_v42 = vadd.f32 1.0, %v8802_v48  ;;  %v4404_v52 = vld [vmem:[%s12413_s0 + $0x1e0] sm:$0xff] }
 0x388   :  { %v4739_v13 = vadd.f32 %v4738_v62, %v4737_v12  ;;  %v4433_v2 = vunpack.c.h.bf16 %v11496_v24  ;;  %v4572_v55 = vmul.f32 %v8804_v32, %v4540_v7  ;;  %v4260_v58 = vsub.f32 0.0, %v11020_v51  ;;  %v4405_v51 = vld [vmem:[%s12413_s0 + $0x1e8] sm:$0xff] }
 0x389   :  { %v4735_v49 = vrot.slane %v4734_v14, 1  ;;  %v4747_v60 = vrot.slane %v4746_v16, 2  ;;  %v4753_v3 = vadd.f32 %v4752_v8, %v4751_v41  ;;  %8807 = vrcp.f32 %v4351_v42 }
 0x38a   :  { %v4740_v21 = vrot.slane %v4739_v13, 2  ;;  %8809 = vpow2.f32 %v4318_v37  ;;  %v12657_v34 = vcombine.low %v11498_v40, %v11506_v31  ;;  %v4539_v6 = vadd.f32 %v11162_v47, %v4485_v61  ;;  %v12662_v61 = vld [vmem:[#allocation24_spill] sm:$0xff]  ;;  %v12663_v37 = vld [vmem:[#allocation33_spill] sm:$0xff] }
 0x38b   :  { %v4748_v19 = vadd.f32 %v4747_v60, %v4746_v16  ;;  %v4736_v56 = vadd.f32 %v4735_v49, %v4734_v14  ;;  %v4754_v33 = vrot.slane %v4753_v3, 2  ;;  %v4487_v18 = vmul.f32 %v11176_v50, %v4433_v2 }
 0x38c   :  { %v4741_v28 = vadd.f32 %v4740_v21, %v4739_v13  ;;  %v8806_v35 = vpop.eup %8805  ;;  %v11530_v27 = vrot.slane %v12657_v34, 7  ;;  %v4604_v40 = vmax.f32 %v4572_v55, 1e-06  ;;  %v4322_v31 = vmul.f32 1.442695, %v4260_v58 }
 0x38d   :  { %v4749_v12 = vrot.slane %v4748_v19, 1  ;;  %v4755_v46 = vadd.f32 %v4754_v33, %v4753_v3  ;;  %v4353_v24 = vadd.f32 1.0, %v8806_v35  ;;  %v4259_v62 = vsub.f32 0.0, %v11048_v36  ;;  %v11563_v33 = vld [vmem:[%s12416_s1 + $0xc] sm:$0xf] }
 0x38e   :  { %12658 = vst [vmem:[#allocation17_spill] sm:$0xff] %v11530_v27  ;;  %v4742_v43 = vrot.slane %v4741_v28, 1  ;;  %v11541_v41 = vmul.f32 0.0625, %v4736_v56  ;;  %v4434_v16 = vunpack.c.l.bf16 %v4404_v52  ;;  %v4436_v7 = vunpack.c.l.bf16 %v4405_v51 }
 0x38f   :  { %v4750_v10 = vadd.f32 %v4749_v12, %v4748_v19  ;;  %v4756_v14 = vrot.slane %v4755_v46, 1  ;;  %8811 = vrcp.f32 %v4353_v24  ;;  %v4320_v32 = vmul.f32 1.442695, %v4259_v62  ;;  %v12665_v62 = vld [vmem:[#allocation3_spill] sm:$0xff] }
 0x390   :  { %12659 = vst [vmem:[#allocation40_spill] sm:$0xff] %v11541_v41  ;;  %v4743_v48 = vadd.f32 %v4742_v43, %v4741_v28  ;;  %8813 = vpow2.f32 %v4322_v31  ;;  %v4261_v49 = vsub.f32 0.0, %v12662_v61  ;;  %v4634_v60 = vmul.f32 %v11523_v57, %v11523_v57  ;;  %v11558_v28 = vld [vmem:[%s12413_s0 + $0x30] sm:$0xff] }
 0x391   :  { %v11543_v13 = vmul.f32 0.0625, %v4750_v10  ;;  %v4757_v42 = vadd.f32 %v4756_v14, %v4755_v46  ;;  %8815 = vpow2.f32 %v4320_v32  ;;  %v4435_v36 = vunpack.c.h.bf16 %v4404_v52 }
 0x392   :  { %v11545_v8 = vmul.f32 0.0625, %v4743_v48  ;;  %v5186_v21 = vsub.f32 0.0, %v12663_v37  ;;  %v4636_v55 = vmul.f32 %v4604_v40, %v4604_v40  ;;  %v4324_v56 = vmul.f32 1.442695, %v4261_v49 }
 0x393   :  { %12660 = vst [vmem:[#allocation41_spill] sm:$0xff] %v11543_v13  ;;  %v8808_v3 = vpop.eup %8807  ;;  %v11553_v19 = vmul.f32 0.0625, %v4757_v42  ;;  %v4488_v34 = vmul.f32 %v11069_v15, %v4434_v16  ;;  %v4437_v12 = vunpack.c.h.bf16 %v4405_v51  ;;  %v4490_v52 = vmul.f32 %v11105_v39, %v4436_v7  ;;  %v11584_v39 = vld [vmem:[%s12417_s2 + $0xc] sm:$0xf] }
 0x394   :  { %12661 = vst [vmem:[#allocation57_spill] sm:$0xff] %v11545_v8  ;;  %v8810_v58 = vpop.eup %8809  ;;  %v4571_v35 = vmul.f32 %v8808_v3, %v4539_v6  ;;  %v5218_v43 = vmul.f32 1.442695, %v5186_v21  ;;  %8817 = vpow2.f32 %v4324_v56  ;;  %v4489_v10 = vmul.f32 %v11158_v22, %v4435_v36  ;;  %v12667_v22 = vld [vmem:[#allocation34_spill] sm:$0xff]  ;;  %v12670_v56 = vld [vmem:[#allocation36_spill] sm:$0xff] }
 0x395   :  { %12664 = vst [vmem:[#allocation19_spill] sm:$0xff] %v11553_v19  ;;  %v4354_v24 = vadd.f32 1.0, %v8810_v58  ;;  %v5362_v31 = vunpack.c.l.bf16 %v11558_v28  ;;  %v11573_v48 = vrot.slane %v11563_v33, %v12665_v62  ;;  %v11578_v15 = vrot.slane %v4821_v25, 7 }
 0x396   :  { %8819 = vpow2.f32 %v5218_v43  ;;  %v4541_v6 = vadd.f32 %v11192_v23, %v4487_v18  ;;  %v5188_v51 = vsub.f32 0.0, %v12667_v22  ;;  %v11588_v14 = vmul.f32 %v4634_v60, %v11523_v57 }
 0x397   :  { %12666 = vst [vmem:[#allocation20_spill] sm:$0xff] %v11578_v15  ;;  %8821 = vrcp.f32 %v4354_v24  ;;  %v4603_v16 = vmax.f32 %v4571_v35, 1e-06  ;;  %v4491_v7 = vmul.f32 %v11176_v50, %v4437_v12  ;;  %v5187_v25 = vsub.f32 0.0, %v12668_v9  ;;  %v12671_v12 = vld [vmem:[#allocation5_spill] sm:$0xff] }
 0x398   :  { %v11597_v32 = vmul.f32 %v4636_v55, %v4604_v40  ;;  %v4542_v42 = vadd.f32 %v11112_v59, %v4488_v34  ;;  %v11601_v61 = vadd.f32 %v11130_v11, %v4490_v52  ;;  %v5222_v57 = vmul.f32 1.442695, %v5188_v51  ;;  %v12669_v59 = vld [vmem:[#allocation4_spill] sm:$0xff] }
 0x399   :  { %v8812_v18 = vpop.eup %8811  ;;  %v11604_v60 = vadd.f32 %v11162_v47, %v4489_v10  ;;  %v5416_v50 = vmul.f32 %v11573_v48, %v5362_v31  ;;  %v11609_v36 = vrot.slane %v11584_v39, %v12665_v62  ;;  %v5220_v37 = vmul.f32 1.442695, %v5187_v25  ;;  %v12672_v31 = vld [vmem:[#allocation37_spill] sm:$0xff] }
 0x39a   :  { %v8814_v49 = vpop.eup %8813  ;;  %8823 = vpow2.f32 %v5222_v57  ;;  %v5364_v40 = vunpack.c.l.bf16 %v11594_v53  ;;  %v11614_v11 = vrot.slane %v11563_v33, %v12669_v59  ;;  %v4635_v55 = vmul.f32 %v4603_v16, %v4603_v16 }
 0x39b   :  { %v4356_v21 = vadd.f32 1.0, %v8814_v49  ;;  %v8816_v3 = vpop.eup %8815  ;;  %v11617_v47 = vadd.f32 %v11192_v23, %v4491_v7  ;;  %8825 = vpow2.f32 %v5220_v37  ;;  %v5189_v58 = vsub.f32 0.0, %v12670_v56 }
 0x39c   :  { %v4355_v35 = vadd.f32 1.0, %v8816_v3  ;;  %v5363_v34 = vunpack.c.h.bf16 %v11558_v28  ;;  %v11623_v43 = vrot.slane %v11563_v33, %v12671_v12  ;;  %v4573_v24 = vmul.f32 %v8812_v18, %v4541_v6  ;;  %v12673_v28 = vld [vmem:[#allocation38_spill] sm:$0xff]  ;;  %v12674_v3 = vld [vmem:[#allocation13_spill] sm:$0xff] }
 0x39d   :  { %8827 = vrcp.f32 %v4356_v21  ;;  %v11626_v52 = vadd.f32 %v11609_v36, %v5416_v50  ;;  %v5224_v10 = vmul.f32 1.442695, %v5189_v58  ;;  %v5190_v62 = vsub.f32 0.0, %v12672_v31  ;;  %v12675_v58 = vld [vmem:[#allocation6_spill] sm:$0xff] }
 0x39e   :  { %v8818_v23 = vpop.eup %8817  ;;  %8829 = vrcp.f32 %v4355_v35  ;;  %v5418_v22 = vmul.f32 %v11614_v11, %v5364_v40  ;;  %v11632_v51 = vrot.slane %v11584_v39, %v12669_v59  ;;  %v5192_v7 = vsub.f32 0.0, %v12673_v28  ;;  %v8348_v28 = vld [vmem:[%s12418_s6 + $0x1c0] sm:$0xff]  }
 0x39f   :  { %v11635_v25 = vmul.f32 %v4635_v55, %v4603_v16  ;;  %v4357_v6 = vadd.f32 1.0, %v8818_v23  ;;  %8831 = vpow2.f32 %v5224_v10  ;;  %v5226_v18 = vmul.f32 1.442695, %v5190_v62  ;;  %v11645_v16 = vld [vmem:[%s12413_s0 + $0x70] sm:$0xff]  ;;  %8076 = vmatprep.subr.bf16.mxu1 %v8348_v28 }
 0x3a0   :  { %v8820_v9 = vpop.eup %8819  ;;  %v5417_v50 = vmul.f32 %v11623_v43, %v5363_v34  ;;  %v11640_v37 = vrot.slane %v11584_v39, %v12671_v12  ;;  %v5230_v21 = vmul.f32 1.442695, %v5192_v7  ;;  %v4605_v40 = vmax.f32 %v4573_v24, 1e-06  ;;  %v12676_v34 = vld [vmem:[#allocation25_spill] sm:$0xff] }
 0x3a1   :  { %v8822_v57 = vpop.eup %8821  ;;  %v5282_v49 = vadd.f32 1.0, %v8820_v9  ;;  %8833 = vrcp.f32 %v4357_v6  ;;  %v5191_v55 = vsub.f32 0.0, %v12674_v3  ;;  %v5365_v56 = vunpack.c.h.bf16 %v11594_v53 }
 0x3a2   :  { %v4574_v59 = vmul.f32 %v8822_v57, %v4542_v42  ;;  %v11651_v35 = vrot.slane %v11563_v33, %v12675_v58  ;;  %v5193_v12 = vsub.f32 0.0, %v12676_v34  ;;  %v11655_v42 = vadd.f32 %v11632_v51, %v5418_v22  ;;  %v8347_v33 = vld [vmem:[%s12418_s6 + $0x140] sm:$0xff]   ;;  %v11667_v22 = vpop.f32.mrb[124].mxu0  ;;  %v11672_v57 = vld [vmem:[%s12413_s0 + $0x78] sm:$0xff] }
 0x3a3   :  { %8835 = vrcp.f32 %v5282_v49  ;;  %v5228_v24 = vmul.f32 1.442695, %v5191_v55  ;;  %v11658_v62 = vadd.f32 %v11640_v37, %v5417_v50  ;;  %v5366_v23 = vunpack.c.l.bf16 %v11645_v16  ;;  %v11674_v49 = vpop.f32.mrb[124].mxu1  ;;  %8054 = vmatprep.subr.bf16.mxu0 %v8347_v33  ;;  %v11686_v19 = vpop.f32.mrb[125].mxu0 }
 0x3a4   :  { %v4606_v10 = vmax.f32 %v4574_v59, 1e-06  ;;  %8837 = vpow2.f32 %v5226_v18  ;;  %v8824_v31 = vpop.eup %8823  ;;  %v5232_v53 = vmul.f32 1.442695, %v5193_v12  ;;  %v4637_v9 = vmul.f32 %v4605_v40, %v4605_v40  ;;  %v12677_v12 = vld [vmem:[#allocation48_spill] sm:$0xff] }
 0x3a5   :  { %8839 = vpow2.f32 %v5230_v21  ;;  %v8826_v7 = vpop.eup %8825  ;;  %v5284_v18 = vadd.f32 1.0, %v8824_v31  ;;  %v5419_v59 = vmul.f32 %v11651_v35, %v5365_v56  ;;  %v11679_v3 = vrot.slane %v11584_v39, %v12675_v58  ;;  %v12678_v56 = vld [vmem:[#allocation50_spill] sm:$0xff] }
 0x3a6   :  { %v4638_v6 = vmul.f32 %v4606_v10, %v4606_v10  ;;  %8841 = vpow2.f32 %v5228_v24  ;;  %v5283_v21 = vadd.f32 1.0, %v8826_v7  ;;  %v5194_v31 = vsub.f32 0.0, %v12677_v12 }
 0x3a7   :  { %v8828_v50 = vpop.eup %8827  ;;  %8843 = vpow2.f32 %v5232_v53  ;;  %v5420_v46 = vmul.f32 %v11573_v48, %v5366_v23  ;;  %v5368_v7 = vunpack.c.l.bf16 %v11672_v57  ;;  %v5196_v2 = vsub.f32 0.0, %v12678_v56 }
 0x3a8   :  { %v4670_v55 = vmul.f32 %v4638_v6, %v4606_v10  ;;  %v4576_v34 = vmul.f32 %v8828_v50, %v11601_v61  ;;  %8845 = vrcp.f32 %v5284_v18  ;;  %v8830_v24 = vpop.eup %8829  ;;  %v5234_v61 = vmul.f32 1.442695, %v5194_v31 }
 0x3a9   :  { %8847 = vrcp.f32 %v5283_v21  ;;  %v8832_v39 = vpop.eup %8831  ;;  %v4575_v10 = vmul.f32 %v8830_v24, %v11604_v60  ;;  %v4669_v33 = vmul.f32 %v4637_v9, %v4605_v40  ;;  %v5367_v6 = vunpack.c.h.bf16 %v11645_v16  ;;  %v11698_v40 = vpop.f32.mrb[125].mxu1 }
 0x3aa   :  { %v4758_v58 = vadd.f32 %v4670_v55, %v11588_v14  ;;  %v4608_v53 = vmax.f32 %v4576_v34, 1e-06  ;;  %v5285_v28 = vadd.f32 1.0, %v8832_v39  ;;  %v5238_v18 = vmul.f32 1.442695, %v5196_v2 }
 0x3ab   :  { %v8834_v50 = vpop.eup %8833  ;;  %v4607_v12 = vmax.f32 %v4575_v10, 1e-06  ;;  %8849 = vpow2.f32 %v5234_v61  ;;  %v11693_v14 = vadd.f32 %v11679_v3, %v5419_v59  ;;  %v11696_v60 = vadd.f32 %v11609_v36, %v5420_v46 }
 0x3ac   :  { %v4759_v23 = vrot.slane %v4758_v58, 4  ;;  %v4640_v21 = vmul.f32 %v4608_v53, %v4608_v53  ;;  %v4577_v13 = vmul.f32 %v8834_v50, %v11617_v47  ;;  %8851 = vrcp.f32 %v5285_v28 }
 0x3ad   :  { %v8836_v56 = vpop.eup %8835  ;;  %v4639_v55 = vmul.f32 %v4607_v12, %v4607_v12  ;;  %v5422_v34 = vmul.f32 %v11614_v11, %v5368_v7  ;;  %v5421_v47 = vmul.f32 %v11623_v43, %v5367_v6  ;;  %8853 = vpow2.f32 %v5238_v18  ;;  %v11712_v7 = vld [vmem:[%s12413_s0 + $0xb8] sm:$0xff]  ;;  %v11714_v6 = vpop.f32.mrb[126].mxu0 }
 0x3ae   :  { %v8838_v9 = vpop.eup %8837  ;;  %v4760_v16 = vadd.f32 %v4759_v23, %v4758_v58  ;;  %v4672_v2 = vmul.f32 %v4640_v21, %v4608_v53  ;;  %v4609_v24 = vmax.f32 %v4577_v13, 1e-06  ;;  %v5502_v28 = vmul.f32 %v8836_v56, %v11626_v52  ;;  %v11707_v13 = vld [vmem:[%s12413_s0 + $0xb0] sm:$0xff] }
 0x3af   :  { %v8840_v31 = vpop.eup %8839  ;;  %v5286_v39 = vadd.f32 1.0, %v8838_v9  ;;  %v4671_v46 = vmul.f32 %v4639_v55, %v4607_v12  ;;  %v5369_v21 = vunpack.c.h.bf16 %v11672_v57  ;;  %v11719_v55 = vpop.f32.mrb[126].mxu1  ;;  %v5372_v8 = vunpack.c.l.bf16 %v11712_v7 }
 0x3b0   :  { %v8842_v10 = vpop.eup %8841  ;;  %v4761_v59 = vrot.slane %v4760_v16, 2  ;;  %v4772_v61 = vadd.f32 %v4672_v2, %v11597_v32  ;;  %v4641_v15 = vmul.f32 %v4609_v24, %v4609_v24  ;;  %v5288_v58 = vadd.f32 1.0, %v8840_v31  ;;  %12679 = vst [vmem:[#allocation29_spill] sm:$0xff] %v11719_v55 }
 0x3b1   :  { %v8844_v50 = vpop.eup %8843  ;;  %8855 = vrcp.f32 %v5286_v39  ;;  %v5287_v53 = vadd.f32 1.0, %v8842_v10  ;;  %v4765_v23 = vadd.f32 %v4671_v46, %v11635_v25  ;;  %v5370_v10 = vunpack.c.l.bf16 %v11707_v13 }
 0x3b2   :  { %v8846_v32 = vpop.eup %8845  ;;  %v4762_v18 = vadd.f32 %v4761_v59, %v4760_v16  ;;  %v4773_v52 = vrot.slane %v4772_v61, 4  ;;  %v4673_v56 = vmul.f32 %v4641_v15, %v4609_v24  ;;  %8857 = vrcp.f32 %v5288_v58  ;;  %v11723_v16 = vpop.f32.mrb[127].mxu0 }
 0x3b3   :  { %v8848_v12 = vpop.eup %8847  ;;  %v5504_v9 = vmul.f32 %v8846_v32, %v11655_v42  ;;  %v5289_v2 = vadd.f32 1.0, %v8844_v50  ;;  %v4766_v39 = vrot.slane %v4765_v23, 4  ;;  %12680 = vst [vmem:[#allocation16_spill] sm:$0xff] %v11723_v16  ;;  %v11725_v59 = vpop.f32.mrb[127].mxu1  ;;  %v5534_v57 = vmax.f32 %v5502_v28, 1e-06 }
 0x3b4   :  { %v4774_v31 = vadd.f32 %v4773_v52, %v4772_v61  ;;  %12681 = vst [vmem:[#allocation42_spill] sm:$0xff] %v11725_v59  ;;  %v4779_v25 = vadd.f32 %v4673_v56, %v4669_v33  ;;  %v5503_v15 = vmul.f32 %v8848_v12, %v11658_v62  ;;  %8859 = vrcp.f32 %v5287_v53 }
 0x3b5   :  { %v8850_v42 = vpop.eup %8849  ;;  %v4763_v24 = vrot.slane %v4762_v18, 1  ;;  %v5536_v50 = vmax.f32 %v5504_v9, 1e-06  ;;  %8861 = vrcp.f32 %v5289_v2  ;;  %v4767_v58 = vadd.f32 %v4766_v39, %v4765_v23 }
 0x3b6   :  { %v4775_v46 = vrot.slane %v4774_v31, 2  ;;  %v8852_v61 = vpop.eup %8851  ;;  %v4780_v32 = vrot.slane %v4779_v25, 4  ;;  %v5423_v52 = vmul.f32 %v11651_v35, %v5369_v21  ;;  %v5290_v41 = vadd.f32 1.0, %v8850_v42 }
 0x3b7   :  { %v5535_v27 = vmax.f32 %v5503_v15, 1e-06  ;;  %v5476_v17 = vadd.f32 %v11632_v51, %v5422_v34  ;;  %v5424_v33 = vmul.f32 %v11573_v48, %v5370_v10  ;;  %v5426_v28 = vmul.f32 %v11614_v11, %v5372_v8  ;;  %v8854_v62 = vpop.eup %8853  ;;  %v12682_v10 = vld [vmem:[#allocation52_spill] sm:$0xff] }
 0x3b8   :  { %v5566_v53 = vmul.f32 %v5534_v57, %v5534_v57  ;;  %v5505_v12 = vmul.f32 %v8852_v61, %v11693_v14  ;;  %v5475_v56 = vadd.f32 %v11640_v37, %v5421_v47  ;;  %8863 = vrcp.f32 %v5290_v41 }
 0x3b9   :  { %v4764_v9 = vadd.f32 %v4763_v24, %v4762_v18  ;;  %v11734_v23 = vadd.f32 %v4775_v46, %v4774_v31  ;;  %v5568_v2 = vmul.f32 %v5536_v50, %v5536_v50  ;;  %v5292_v21 = vadd.f32 1.0, %v8854_v62 }
 0x3ba   :  { %v4768_v15 = vrot.slane %v4767_v58, 2  ;;  %v4781_v42 = vadd.f32 %v4780_v32, %v4779_v25  ;;  %v5477_v34 = vadd.f32 %v11679_v3, %v5423_v52  ;;  %v5195_v59 = vsub.f32 0.0, %v12682_v10 }
 0x3bb   :  { %v8856_v39 = vpop.eup %8855  ;;  %v5567_v8 = vmul.f32 %v5535_v27, %v5535_v27  ;;  %v5478_v14 = vadd.f32 %v11609_v36, %v5424_v33  ;;  %v5480_v47 = vadd.f32 %v11632_v51, %v5426_v28  ;;  %v5598_v18 = vmul.f32 %v5566_v53, %v5534_v57 }
 0x3bc   :  { %v5506_v16 = vmul.f32 %v8856_v39, %v11696_v60  ;;  %v8858_v41 = vpop.eup %8857  ;;  %v5537_v31 = vmax.f32 %v5505_v12, 1e-06  ;;  %8865 = vrcp.f32 %v5292_v21  ;;  %v5236_v24 = vmul.f32 1.442695, %v5195_v59 }
 0x3bd   :  { %v11741_v46 = vmul.f32 0.0625, %v4764_v9  ;;  %v4777_v25 = vrot.slane %v11734_v23, 1  ;;  %v5600_v61 = vmul.f32 %v5568_v2, %v5536_v50  ;;  %v11744_v62 = vadd.f32 %v4768_v15, %v4767_v58 }
 0x3be   :  { %v5538_v32 = vmax.f32 %v5506_v16, 1e-06  ;;  %v8860_v52 = vpop.eup %8859  ;;  %v4782_v10 = vrot.slane %v4781_v42, 2  ;;  %v5508_v60 = vmul.f32 %v8858_v41, %v5476_v17  ;;  %8867 = vpow2.f32 %v5236_v24 }
 0x3bf   :  { %v8862_v33 = vpop.eup %8861  ;;  %v5599_v39 = vmul.f32 %v5567_v8, %v5535_v27  ;;  %v5507_v55 = vmul.f32 %v8860_v52, %v5475_v56  ;;  %v5197_v57 = vsub.f32 0.0, %v11284_v54  ;;  %v5569_v53 = vmul.f32 %v5537_v31, %v5537_v31 }
 0x3c0   :  { %v5570_v28 = vmul.f32 %v5538_v32, %v5538_v32  ;;  %v5540_v59 = vmax.f32 %v5508_v60, 1e-06  ;;  %v5509_v12 = vmul.f32 %v8862_v33, %v5477_v34  ;;  %v5371_v9 = vunpack.c.h.bf16 %v11707_v13 }
 0x3c1   :  { %v5539_v50 = vmax.f32 %v5507_v55, 1e-06  ;;  %v5240_v16 = vmul.f32 1.442695, %v5197_v57  ;;  %v5198_v58 = vsub.f32 0.0, %v11291_v63  ;;  %v4770_v17 = vrot.slane %v11744_v62, 1 }
 0x3c2   :  { %v5602_v21 = vmul.f32 %v5570_v28, %v5538_v32  ;;  %v8864_v2 = vpop.eup %8863  ;;  %v11750_v15 = vadd.f32 %v4782_v10, %v4781_v42  ;;  %v5572_v27 = vmul.f32 %v5540_v59, %v5540_v59  ;;  %v5541_v8 = vmax.f32 %v5509_v12, 1e-06  ;;  %v11757_v42 = vld [vmem:[%s12413_s0 + $0xf0] sm:$0xff] }
 0x3c3   :  { %v5571_v41 = vmul.f32 %v5539_v50, %v5539_v50  ;;  %v5510_v54 = vmul.f32 %v8864_v2, %v5478_v14  ;;  %8869 = vpow2.f32 %v5240_v16  ;;  %v5425_v13 = vmul.f32 %v11623_v43, %v5371_v9 }
 0x3c4   :  { %v5630_v56 = vadd.f32 %v5602_v21, %v5598_v18  ;;  %v5604_v24 = vmul.f32 %v5572_v27, %v5540_v59  ;;  %v5573_v34 = vmul.f32 %v5541_v8, %v5541_v8  ;;  %v5242_v32 = vmul.f32 1.442695, %v5198_v58 }
 0x3c5   :  { %v5601_v55 = vmul.f32 %v5569_v53, %v5537_v31  ;;  %v5603_v60 = vmul.f32 %v5571_v41, %v5539_v50  ;;  %v5373_v63 = vunpack.c.h.bf16 %v11712_v7  ;;  %v5200_v14 = vsub.f32 0.0, %v11295_v30 }
 0x3c6   :  { %v5631_v52 = vrot.slane %v5630_v56, 4  ;;  %v8866_v10 = vpop.eup %8865  ;;  %v5644_v18 = vadd.f32 %v5604_v24, %v5600_v61  ;;  %v5605_v33 = vmul.f32 %v5573_v34, %v5541_v8  ;;  %8871 = vpow2.f32 %v5242_v32 }
 0x3c7   :  { %v5637_v57 = vadd.f32 %v5603_v60, %v5599_v39  ;;  %v5542_v59 = vmax.f32 %v5510_v54, 1e-06  ;;  %v5512_v12 = vmul.f32 %v8866_v10, %v5480_v47  ;;  %v5374_v7 = vunpack.c.l.bf16 %v11757_v42 }
 0x3c8   :  { %v5632_v28 = vadd.f32 %v5631_v52, %v5630_v56  ;;  %v8868_v31 = vpop.eup %8867  ;;  %v5645_v53 = vrot.slane %v5644_v18, 4  ;;  %v5651_v9 = vadd.f32 %v5605_v33, %v5601_v55  ;;  %v5246_v21 = vmul.f32 1.442695, %v5200_v14  ;;  %v5353_v33 = vld [vmem:[%s12413_s0 + $0xf8] sm:$0xff] }
 0x3c9   :  { %v5638_v16 = vrot.slane %v5637_v57, 4  ;;  %v5479_v58 = vadd.f32 %v11640_v37, %v5425_v13  ;;  %v5427_v61 = vmul.f32 %v11651_v35, %v5373_v63  ;;  %v5544_v8 = vmax.f32 %v5512_v12, 1e-06 }
 0x3ca   :  { %v5633_v50 = vrot.slane %v5632_v28, 2  ;;  %v5646_v2 = vadd.f32 %v5645_v53, %v5644_v18  ;;  %v5652_v27 = vrot.slane %v5651_v9, 4  ;;  %v5291_v30 = vadd.f32 1.0, %v8868_v31 }
 0x3cb   :  { %v5639_v39 = vadd.f32 %v5638_v16, %v5637_v57  ;;  %v5574_v41 = vmul.f32 %v5542_v59, %v5542_v59  ;;  %8873 = vpow2.f32 %v5246_v21  ;;  %v5428_v24 = vmul.f32 %v11573_v48, %v5374_v7 }
 0x3cc   :  { %v5634_v56 = vadd.f32 %v5633_v50, %v5632_v28  ;;  %v5647_v47 = vrot.slane %v5646_v2, 2  ;;  %v5653_v54 = vadd.f32 %v5652_v27, %v5651_v9  ;;  %8875 = vrcp.f32 %v5291_v30 }
 0x3cd   :  { %v8870_v34 = vpop.eup %8869  ;;  %v5640_v55 = vrot.slane %v5639_v39, 2  ;;  %v11765_v13 = vadd.f32 %v11679_v3, %v5427_v61  ;;  %v5199_v52 = vsub.f32 0.0, %v11314_v29  ;;  %v5576_v10 = vmul.f32 %v5544_v8, %v5544_v8 }
 0x3ce   :  { %v5635_v32 = vrot.slane %v5634_v56, 1  ;;  %v5648_v60 = vadd.f32 %v5647_v47, %v5646_v2  ;;  %v5654_v63 = vrot.slane %v5653_v54, 2  ;;  %v5293_v18 = vadd.f32 1.0, %v8870_v34 }
 0x3cf   :  { %v5641_v28 = vadd.f32 %v5640_v55, %v5639_v39  ;;  %v11771_v57 = vmul.f32 %v5574_v41, %v5542_v59  ;;  %v5244_v12 = vmul.f32 1.442695, %v5199_v52  ;;  %v5482_v7 = vadd.f32 %v11609_v36, %v5428_v24  ;;  %v5354_v59 = vld [vmem:[%s12413_s0 + $0x130] sm:$0xff] }
 0x3d0   :  { %v5636_v14 = vadd.f32 %v5635_v32, %v5634_v56  ;;  %v8872_v31 = vpop.eup %8871  ;;  %v5649_v53 = vrot.slane %v5648_v60, 1  ;;  %v5655_v9 = vadd.f32 %v5654_v63, %v5653_v54  ;;  %8877 = vrcp.f32 %v5293_v18 }
 0x3d1   :  { %v5642_v29 = vrot.slane %v5641_v28, 1  ;;  %v5294_v21 = vadd.f32 1.0, %v8872_v31  ;;  %v5376_v50 = vunpack.c.l.bf16 %v5353_v33  ;;  %8879 = vpow2.f32 %v5244_v12 }
 0x3d2   :  { %v5650_v16 = vadd.f32 %v5649_v53, %v5648_v60  ;;  %v5656_v61 = vrot.slane %v5655_v9, 1  ;;  %v11774_v2 = vmul.f32 %v5576_v10, %v5544_v8  ;;  %v5201_v27 = vsub.f32 0.0, %v11323_v26 }
 0x3d3   :  { %v11780_v30 = vmul.f32 0.0625, %v5636_v14  ;;  %v5643_v56 = vadd.f32 %v5642_v29, %v5641_v28  ;;  %8881 = vrcp.f32 %v5294_v21  ;;  %v5202_v39 = vsub.f32 0.0, %v11389_v5  ;;  %v5355_v5 = vld [vmem:[%s12413_s0 + $0x138] sm:$0xff] }
 0x3d4   :  { %v11783_v41 = vmul.f32 0.0625, %v5650_v16  ;;  %v5657_v47 = vadd.f32 %v5656_v61, %v5655_v9  ;;  %v5375_v54 = vunpack.c.h.bf16 %v11757_v42  ;;  %v5248_v24 = vmul.f32 1.442695, %v5201_v27 }
 0x3d5   :  { %v8874_v8 = vpop.eup %8873  ;;  %v11786_v34 = vmul.f32 0.0625, %v5643_v56  ;;  %v5377_v26 = vunpack.c.h.bf16 %v5353_v33  ;;  %v5250_v32 = vmul.f32 1.442695, %v5202_v39  ;;  %v5378_v55 = vunpack.c.l.bf16 %v5354_v59 }
 0x3d6   :  { %v8876_v52 = vpop.eup %8875  ;;  %v11788_v60 = vmul.f32 0.0625, %v5657_v47  ;;  %v5296_v63 = vadd.f32 1.0, %v8874_v8  ;;  %8883 = vpow2.f32 %v5248_v24  ;;  %v5204_v10 = vsub.f32 0.0, %v11391_v45 }
 0x3d7   :  { %v5774_v42 = vcombine.low %v11780_v30, %v11786_v34  ;;  %v5511_v18 = vmul.f32 %v8876_v52, %v5479_v58  ;;  %v5430_v14 = vmul.f32 %v11614_v11, %v5376_v50  ;;  %8885 = vpow2.f32 %v5250_v32  ;;  %v8369_v30 = vld [vmem:[%s12418_s6 + $0x128] sm:$0xff]  }
 0x3d8   :  { %v5775_v33 = vcombine.low %v11783_v41, %v11788_v60  ;;  %8887 = vrcp.f32 %v5296_v63  ;;  %v5429_v28 = vmul.f32 %v11623_v43, %v5375_v54  ;;  %v5254_v12 = vmul.f32 1.442695, %v5204_v10  ;;  %v8366_v41 = vld [vmem:[%s12418_s6 + $0x1a0] sm:$0xff]  }
 0x3d9   :  { %v5543_v31 = vmax.f32 %v5511_v18, 1e-06  ;;  %v5431_v45 = vmul.f32 %v11651_v35, %v5377_v26  ;;  %v5380_v53 = vunpack.c.l.bf16 %v5355_v5  ;;  %v5203_v9 = vsub.f32 0.0, %v11397_v20  ;;  %v11827_v18 = vld [vmem:[%s12413_s0 + $0x178] sm:$0xff] }
 0x3da   :  { %v8878_v29 = vpop.eup %8877  ;;  %v5432_v21 = vmul.f32 %v11573_v48, %v5378_v55  ;;  %8889 = vpow2.f32 %v5254_v12  ;;  %v5379_v58 = vunpack.c.h.bf16 %v5354_v59  ;;  %v5205_v50 = vsub.f32 0.0, %v11401_v38  ;;  %v11814_v38 = vld [vmem:[%s12413_s0 + $0x170] sm:$0xff] }
 0x3db   :  { %v8880_v16 = vpop.eup %8879  ;;  %v5575_v61 = vmul.f32 %v5543_v31, %v5543_v31  ;;  %v5513_v27 = vmul.f32 %v8878_v29, %v11765_v13  ;;  %v5252_v56 = vmul.f32 1.442695, %v5203_v9  ;;  %v5381_v39 = vunpack.c.h.bf16 %v5355_v5 }
 0x3dc   :  { %v5484_v47 = vadd.f32 %v11632_v51, %v5430_v14  ;;  %v5295_v54 = vadd.f32 1.0, %v8880_v16  ;;  %v5483_v24 = vadd.f32 %v11640_v37, %v5429_v28  ;;  %v5256_v8 = vmul.f32 1.442695, %v5205_v50 }
 0x3dd   :  { %v8882_v20 = vpop.eup %8881  ;;  %v5545_v26 = vmax.f32 %v5513_v27, 1e-06  ;;  %v11808_v32 = vadd.f32 %v11679_v3, %v5431_v45  ;;  %v5434_v59 = vmul.f32 %v11614_v11, %v5380_v53  ;;  %8891 = vpow2.f32 %v5252_v56 }
 0x3de   :  { %v5514_v13 = vmul.f32 %v8882_v20, %v5482_v7  ;;  %8893 = vrcp.f32 %v5295_v54  ;;  %v11817_v55 = vadd.f32 %v11609_v36, %v5432_v21  ;;  %v5433_v52 = vmul.f32 %v11623_v43, %v5379_v58 }
 0x3df   :  { %v11820_v63 = vmul.f32 %v5575_v61, %v5543_v31  ;;  %8895 = vpow2.f32 %v5256_v8  ;;  %v5435_v10 = vmul.f32 %v11651_v35, %v5381_v39  ;;  %v5206_v5 = vsub.f32 0.0, %v11419_v44 }
 0x3e0   :  { %v8884_v14 = vpop.eup %8883  ;;  %v5546_v7 = vmax.f32 %v5514_v13, 1e-06  ;;  %v5382_v28 = vunpack.c.l.bf16 %v11814_v38  ;;  %v5208_v12 = vsub.f32 0.0, %v11438_v4  ;;  %v5207_v45 = vsub.f32 0.0, %v11445_v0 }
 0x3e1   :  { %v8886_v31 = vpop.eup %8885  ;;  %v5577_v53 = vmul.f32 %v5545_v26, %v5545_v26  ;;  %v5297_v9 = vadd.f32 1.0, %v8884_v14  ;;  %v11833_v29 = vadd.f32 %v11632_v51, %v5434_v59  ;;  %v5258_v44 = vmul.f32 1.442695, %v5206_v5 }
 0x3e2   :  { %v8888_v21 = vpop.eup %8887  ;;  %v5578_v58 = vmul.f32 %v5546_v7, %v5546_v7  ;;  %v5298_v50 = vadd.f32 1.0, %v8886_v31  ;;  %v5262_v16 = vmul.f32 1.442695, %v5208_v12  ;;  %v5384_v61 = vunpack.c.l.bf16 %v11827_v18  ;;  %v12683_v12 = vld [vmem:[#allocation44_spill] sm:$0xff]  ;;  %v12684_v31 = vld [vmem:[#allocation43_spill] sm:$0xff] }
 0x3e3   :  { %v5516_v27 = vmul.f32 %v8888_v21, %v5484_v47  ;;  %8897 = vrcp.f32 %v5297_v9  ;;  %v11837_v56 = vadd.f32 %v11640_v37, %v5433_v52  ;;  %v11840_v4 = vadd.f32 %v11679_v3, %v5435_v10 }
 0x3e4   :  { %v8890_v0 = vpop.eup %8889  ;;  %v5610_v39 = vmul.f32 %v5578_v58, %v5546_v7  ;;  %8899 = vrcp.f32 %v5298_v50  ;;  %v5436_v54 = vmul.f32 %v11573_v48, %v5382_v28  ;;  %v5260_v8 = vmul.f32 1.442695, %v5207_v45 }
 0x3e5   :  { %v5548_v20 = vmax.f32 %v5516_v27, 1e-06  ;;  %v5300_v59 = vadd.f32 1.0, %v8890_v0  ;;  %8901 = vpow2.f32 %v5258_v44  ;;  %v5209_v13 = vsub.f32 0.0, %v11453_v1  ;;  %v12685_v0 = vld [vmem:[#allocation46_spill] sm:$0xff] }
 0x3e6   :  { %v11844_v5 = vmul.f32 %v5577_v53, %v5545_v26  ;;  %v5658_v47 = vadd.f32 %v5610_v39, %v11771_v57  ;;  %8903 = vpow2.f32 %v5262_v16  ;;  %v5438_v52 = vmul.f32 %v11614_v11, %v5384_v61  ;;  %v12686_v39 = vld [vmem:[#allocation49_spill] sm:$0xff] }
 0x3e7   :  { %v8892_v10 = vpop.eup %8891  ;;  %v5580_v14 = vmul.f32 %v5548_v20, %v5548_v20  ;;  %8905 = vrcp.f32 %v5300_v59  ;;  %v5264_v7 = vmul.f32 1.442695, %v5209_v13  ;;  %v2906_v28 = vcombine.low %v12684_v31, %v12683_v12  ;;  %v12688_v59 = vld [vmem:[#allocation10_spill] sm:$0xff]  ;;  %v12692_v12 = vld [vmem:[#allocation27_spill] sm:$0xff] }
 0x3e8   :  { %v8894_v45 = vpop.eup %8893  ;;  %v5659_v9 = vrot.slane %v5658_v47, 4  ;;  %v5299_v21 = vadd.f32 1.0, %v8892_v10  ;;  %v11851_v44 = vadd.f32 %v11609_v36, %v5436_v54  ;;  %8907 = vpow2.f32 %v5260_v8  ;;  %v12693_v31 = vld [vmem:[#allocation11_spill] sm:$0xff] }
 0x3e9   :  { %v8896_v1 = vpop.eup %8895  ;;  %v5612_v26 = vmul.f32 %v5580_v14, %v5548_v20  ;;  %v5515_v57 = vmul.f32 %v8894_v45, %v5483_v24  ;;  %v5383_v53 = vunpack.c.h.bf16 %v11814_v38  ;;  %8909 = vpow2.f32 %v5264_v7  ;;  %v12689_v24 = vld [vmem:[#allocation18_spill] sm:$0xff] }
 0x3ea   :  { %v5660_v58 = vadd.f32 %v5659_v9, %v5658_v47  ;;  %8911 = vrcp.f32 %v5299_v21  ;;  %v5301_v50 = vadd.f32 1.0, %v8896_v1  ;;  %v5385_v27 = vunpack.c.h.bf16 %v11827_v18  ;;  %v12690_v38 = vld [vmem:[#allocation58_spill] sm:$0xff] }
 0x3eb   :  { %v5672_v16 = vadd.f32 %v5612_v26, %v11774_v2  ;;  %v5547_v61 = vmax.f32 %v5515_v57, 1e-06  ;;  %v12687_v54 = vcombine.low %v12685_v0, %v12686_v39  ;;  %v12691_v13 = vcombine.low %v12689_v24, %v12690_v38 }
 0x3ec   :  { %v5661_v20 = vrot.slane %v5660_v58, 2  ;;  %8913 = vrcp.f32 %v5301_v50 }
 0x3ed   :  { %v2910_v8 = vsel %vm2909_vm0, %v12688_v59, %v12687_v54  ;;  %v2913_v47 = vrot.slane %v12691_v13, 6  ;;  %v8898_v10 = vpop.eup %8897  ;;  %v5673_v14 = vrot.slane %v5672_v16, 4  ;;  %v5579_v7 = vmul.f32 %v5547_v61, %v5547_v61 }
 0x3ee   :  { %v2912_v2 = vsel %vm2911_vm1, %v12688_v59, %v2910_v8  ;;  %v8900_v18 = vpop.eup %8899  ;;  %v5662_v45 = vadd.f32 %v5661_v20, %v5660_v58  ;;  %v5517_v9 = vmul.f32 %v8898_v10, %v11808_v32  ;;  %v5492_v59 = vadd.f32 %v11632_v51, %v5438_v52 }
 0x3ef   :  { %v2915_v21 = vsel %vm2914_vm2, %v2913_v47, %v2912_v2  ;;  %v8902_v1 = vpop.eup %8901  ;;  %v5674_v26 = vadd.f32 %v5673_v14, %v5672_v16  ;;  %v5611_v57 = vmul.f32 %v5579_v7, %v5547_v61  ;;  %v5518_v50 = vmul.f32 %v8900_v18, %v11817_v55 }
 0x3f0   :  { %v2917_v0 = vsel %vm2916_vm3, %v2913_v47, %v2915_v21  ;;  %v8904_v39 = vpop.eup %8903  ;;  %v5663_v54 = vrot.slane %v5662_v45, 1  ;;  %v5549_v24 = vmax.f32 %v5517_v9, 1e-06  ;;  %v5302_v38 = vadd.f32 1.0, %v8902_v1 }
 0x3f1   :  { %v8906_v8 = vpop.eup %8905  ;;  %v5675_v58 = vrot.slane %v5674_v26, 2  ;;  %v5665_v32 = vadd.f32 %v5611_v57, %v11820_v63  ;;  %v5550_v20 = vmax.f32 %v5518_v50, 1e-06  ;;  %v5304_v13 = vadd.f32 1.0, %v8904_v39 }
 0x3f2   :  { %v8908_v10 = vpop.eup %8907  ;;  %v5581_v2 = vmul.f32 %v5549_v24, %v5549_v24  ;;  %v5520_v16 = vmul.f32 %v8906_v8, %v11833_v29  ;;  %8915 = vrcp.f32 %v5302_v38  ;;  %v5437_v55 = vmul.f32 %v11623_v43, %v5383_v53 }
 0x3f3   :  { %v8910_v61 = vpop.eup %8909  ;;  %v5676_v47 = vadd.f32 %v5675_v58, %v5674_v26  ;;  %v5666_v14 = vrot.slane %v5665_v32, 4  ;;  %8917 = vrcp.f32 %v5304_v13  ;;  %v5439_v7 = vmul.f32 %v11651_v35, %v5385_v27 }
 0x3f4   :  { %v8912_v52 = vpop.eup %8911  ;;  %v5664_v18 = vadd.f32 %v5663_v54, %v5662_v45  ;;  %v5613_v9 = vmul.f32 %v5581_v2, %v5549_v24  ;;  %v5582_v21 = vmul.f32 %v5550_v20, %v5550_v20  ;;  %v5303_v63 = vadd.f32 1.0, %v8908_v10 }
 0x3f5   :  { %v5677_v1 = vrot.slane %v5676_v47, 1  ;;  %v5667_v57 = vadd.f32 %v5666_v14, %v5665_v32  ;;  %v5552_v50 = vmax.f32 %v5520_v16, 1e-06  ;;  %v5519_v39 = vmul.f32 %v8912_v52, %v11837_v56  ;;  %v12695_v52 = vld [vmem:[#allocation51_spill] sm:$0xff] }
 0x3f6   :  { %v8914_v29 = vpop.eup %8913  ;;  %v5679_v38 = vadd.f32 %v5613_v9, %v11844_v5  ;;  %8919 = vrcp.f32 %v5303_v63  ;;  %v5305_v53 = vadd.f32 1.0, %v8910_v61  ;;  %v2918_v26 = vrot.slane %v2906_v28, 5  ;;  %v12697_v9 = vld [vmem:[#allocation14_spill] sm:$0xff]  ;;  %v12699_v63 = vld [vmem:[#allocation59_spill] sm:$0xff] }
 0x3f7   :  { %v5678_v27 = vadd.f32 %v5677_v1, %v5676_v47  ;;  %v5668_v8 = vrot.slane %v5667_v57, 2  ;;  %v5491_v45 = vadd.f32 %v11640_v37, %v5437_v55  ;;  %v5493_v54 = vadd.f32 %v11679_v3, %v5439_v7 }
 0x3f8   :  { %v11882_v24 = vmul.f32 0.0625, %v5664_v18  ;;  %v5680_v58 = vrot.slane %v5679_v38, 4  ;;  %8921 = vrcp.f32 %v5305_v53  ;;  %v5614_v32 = vmul.f32 %v5582_v21, %v5550_v20  ;;  %v12694_v20 = vld [vmem:[#allocation47_spill] sm:$0xff]  ;;  %v12698_v21 = vld [vmem:[#allocation56_spill] sm:$0xff] }
 0x3f9   :  { %v5669_v56 = vadd.f32 %v5668_v8, %v5667_v57  ;;  %v5584_v5 = vmul.f32 %v5552_v50, %v5552_v50  ;;  %v5551_v13 = vmax.f32 %v5519_v39, 1e-06  ;;  %v2920_v2 = vsel %vm2919_vm4, %v2918_v26, %v2917_v0 }
 0x3fa   :  { %v5681_v10 = vadd.f32 %v5680_v58, %v5679_v38  ;;  %v2907_v28 = vcombine.low %v12693_v31, %v12692_v12  ;;  %v11887_v16 = vmul.f32 0.0625, %v5678_v27  ;;  %v5521_v61 = vmul.f32 %v8914_v29, %v11840_v4 }
 0x3fb   :  { %v5670_v55 = vrot.slane %v5669_v56, 1  ;;  %v2922_v47 = vsel %vm2921_vm5, %v2918_v26, %v2920_v2  ;;  %v12696_v18 = vcombine.low %v12694_v20, %v12695_v52  ;;  %v12700_v1 = vcombine.low %v12698_v21, %v12699_v63 }
 0x3fc   :  { %v8916_v14 = vpop.eup %8915  ;;  %v5682_v7 = vrot.slane %v5681_v10, 2  ;;  %8923 = vlog2.f32 %v2922_v47  ;;  %v5583_v53 = vmul.f32 %v5551_v13, %v5551_v13  ;;  %v2929_v58 = vrot.slane %v2907_v28, 5 }
 0x3fd   :  { %v2924_v0 = vsel %vm2909_vm0, %v12697_v9, %v12696_v18  ;;  %v2926_v57 = vrot.slane %v12700_v1, 6  ;;  %v8918_v39 = vpop.eup %8917  ;;  %v5671_v38 = vadd.f32 %v5670_v55, %v5669_v56  ;;  %v5522_v4 = vmul.f32 %v8916_v14, %v11851_v44 }
 0x3fe   :  { %v2925_v29 = vsel %vm2911_vm1, %v12697_v9, %v2924_v0  ;;  %v5683_v26 = vadd.f32 %v5682_v7, %v5681_v10  ;;  %v5524_v27 = vmul.f32 %v8918_v39, %v5492_v59  ;;  %v5210_v47 = vsub.f32 0.0, %v11667_v22 }
 0x3ff   :  { %v2927_v8 = vsel %vm2914_vm2, %v2926_v57, %v2925_v29  ;;  %v11903_v2 = vmul.f32 0.0625, %v5671_v38  ;;  %v5554_v12 = vmax.f32 %v5522_v4, 1e-06  ;;  %v5553_v55 = vmax.f32 %v5521_v61, 1e-06 }
 0x400   :  { %v2928_v31 = vsel %vm2916_vm3, %v2926_v57, %v2927_v8  ;;  %v8920_v20 = vpop.eup %8919  ;;  %v5684_v56 = vrot.slane %v5683_v26, 1  ;;  %v5556_v52 = vmax.f32 %v5524_v27, 1e-06  ;;  %v5266_v0 = vmul.f32 1.442695, %v5210_v47 }
 0x401   :  { %v2930_v44 = vsel %vm2919_vm4, %v2929_v58, %v2928_v31  ;;  %v5776_v10 = vcombine.low %v11882_v24, %v11903_v2  ;;  %v5586_v59 = vmul.f32 %v5554_v12, %v5554_v12  ;;  %v5523_v14 = vmul.f32 %v8920_v20, %v5491_v45 }
 0x402   :  { %v2931_v28 = vsel %vm2921_vm5, %v2929_v58, %v2930_v44  ;;  %v8922_v7 = vpop.eup %8921  ;;  %v5685_v18 = vadd.f32 %v5684_v56, %v5683_v26  ;;  %v5588_v9 = vmul.f32 %v5556_v52, %v5556_v52  ;;  %v5616_v21 = vmul.f32 %v5584_v5, %v5552_v50 }
 0x403   :  { %8925 = vlog2.f32 %v2931_v28  ;;  %v5618_v22 = vmul.f32 %v5586_v59, %v5554_v12  ;;  %v5555_v63 = vmax.f32 %v5523_v14, 1e-06  ;;  %v5525_v1 = vmul.f32 %v8922_v7, %v5493_v54 }
 0x404   :  { %v11911_v61 = vmul.f32 0.0625, %v5685_v18  ;;  %v5585_v57 = vmul.f32 %v5553_v55, %v5553_v55  ;;  %v5620_v39 = vmul.f32 %v5588_v9, %v5556_v52  ;;  %8927 = vpow2.f32 %v5266_v0 }
 0x405   :  { %v5686_v38 = vadd.f32 %v5618_v22, %v5614_v32  ;;  %v5587_v4 = vmul.f32 %v5555_v63, %v5555_v63  ;;  %v5557_v29 = vmax.f32 %v5525_v1, 1e-06  ;;  %v5212_v45 = vsub.f32 0.0, %v11674_v49 }
 0x406   :  { %v8924_v27 = vpop.eup %8923  ;;  %v4784_v26 = vrot.slane %v11750_v15, 1  ;;  %v5777_v8 = vcombine.low %v11887_v16, %v11911_v61  ;;  %v5615_v50 = vmul.f32 %v5583_v53, %v5551_v13  ;;  %v5700_v5 = vadd.f32 %v5620_v39, %v5616_v21  ;;  %v12704_v61 = vld [vmem:[#allocation55_spill] sm:$0xff] }
 0x407   :  { %v5687_v58 = vrot.slane %v5686_v38, 4  ;;  %v5619_v54 = vmul.f32 %v5587_v4, %v5555_v63  ;;  %v5589_v12 = vmul.f32 %v5557_v29, %v5557_v29  ;;  %v5813_v31 = vmul.f32 0.6931472, %v8924_v27 }
 0x408   :  { %v4778_v32 = vadd.f32 %v4777_v25, %v11734_v23  ;;  %v5617_v47 = vmul.f32 %v5585_v57, %v5553_v55  ;;  %v5701_v20 = vrot.slane %v5700_v5, 4  ;;  %v5270_v56 = vmul.f32 1.442695, %v5212_v45 }
 0x409   :  { %v5688_v49 = vadd.f32 %v5687_v58, %v5686_v38  ;;  %v5693_v52 = vadd.f32 %v5619_v54, %v5615_v50  ;;  %v5621_v44 = vmul.f32 %v5589_v12, %v5557_v29  ;;  %v5828_v59 = vmul.f32 0.33333334, %v5813_v31 }
 0x40a   :  { %v4771_v13 = vadd.f32 %v4770_v17, %v11744_v62  ;;  %v4785_v53 = vadd.f32 %v4784_v26, %v11750_v15  ;;  %v5702_v14 = vadd.f32 %v5701_v20, %v5700_v5  ;;  %v5211_v28 = vsub.f32 0.0, %v11686_v19  ;;  %v5358_v62 = vld [vmem:[%s12413_s0 + $0x1b0] sm:$0xff] }
 0x40b   :  { %v5689_v7 = vrot.slane %v5688_v49, 2  ;;  %v5694_v18 = vrot.slane %v5693_v52, 4  ;;  %v5707_v9 = vadd.f32 %v5621_v44, %v5617_v47  ;;  %v5836_v23 = vmul.f32 1.442695, %v5828_v59  ;;  %v11942_v44 = vld [vmem:[%s12413_s0 + $0x1f0] sm:$0xff] }
 0x40c   :  { %v5703_v55 = vrot.slane %v5702_v14, 2  ;;  %8929 = vpow2.f32 %v5270_v56  ;;  %v5268_v0 = vmul.f32 1.442695, %v5211_v28  ;;  %v5213_v21 = vsub.f32 0.0, %v11698_v40  ;;  %v5359_v40 = vld [vmem:[%s12413_s0 + $0x1b8] sm:$0xff] }
 0x40d   :  { %v8926_v25 = vpop.eup %8925  ;;  %v5690_v22 = vadd.f32 %v5689_v7, %v5688_v49  ;;  %v5695_v63 = vadd.f32 %v5694_v18, %v5693_v52  ;;  %v5708_v1 = vrot.slane %v5707_v9, 4  ;;  %8931 = vpow2.f32 %v5836_v23 }
 0x40e   :  { %v8928_v17 = vpop.eup %8927  ;;  %v11929_v19 = vmul.f32 0.0625, %v4778_v32  ;;  %v5704_v15 = vadd.f32 %v5703_v55, %v5702_v14  ;;  %v5815_v57 = vmul.f32 0.6931472, %v8926_v25  ;;  %8933 = vpow2.f32 %v5268_v0  ;;  %v12701_v25 = vld [vmem:[#allocation29_spill] sm:$0xff] }
 0x40f   :  { %v11931_v39 = vmul.f32 0.0625, %v4771_v13  ;;  %v5691_v38 = vrot.slane %v5690_v22, 1  ;;  %v5696_v4 = vrot.slane %v5695_v63, 2  ;;  %v5709_v29 = vadd.f32 %v5708_v1, %v5707_v9  ;;  %v11957_v1 = vld [vmem:[%s12413_s0 + $0x1f8] sm:$0xff] }
 0x410   :  { %v5705_v45 = vrot.slane %v5704_v15, 1  ;;  %v5829_v27 = vmul.f32 0.33333334, %v5815_v57  ;;  %v5386_v26 = vunpack.c.l.bf16 %v5358_v62  ;;  %v5272_v50 = vmul.f32 1.442695, %v5213_v21 }
 0x411   :  { %v11936_v5 = vmul.f32 0.0625, %v4785_v53  ;;  %v5692_v58 = vadd.f32 %v5691_v38, %v5690_v22  ;;  %v5697_v54 = vadd.f32 %v5696_v4, %v5695_v63  ;;  %v5710_v12 = vrot.slane %v5709_v29, 2 }
 0x412   :  { %v5706_v31 = vadd.f32 %v5705_v45, %v5704_v15  ;;  %v5838_v32 = vmul.f32 1.442695, %v5829_v27  ;;  %v5306_v47 = vadd.f32 1.0, %v8928_v17  ;;  %v5388_v20 = vunpack.c.l.bf16 %v5359_v40 }
 0x413   :  { %v5698_v56 = vrot.slane %v5697_v54, 1  ;;  %v5711_v49 = vadd.f32 %v5710_v12, %v5709_v29  ;;  %8935 = vpow2.f32 %v5272_v50  ;;  %v5214_v52 = vsub.f32 0.0, %v11714_v6  ;;  %v8349_v50 = vld [vmem:[%s12418_s6 + $0x100] sm:$0xff]  }
 0x414   :  { %8937 = vpow2.f32 %v5838_v32  ;;  %v5440_v59 = vmul.f32 %v11573_v48, %v5386_v26  ;;  %v5387_v13 = vunpack.c.h.bf16 %v5358_v62  ;;  %v5389_v53 = vunpack.c.h.bf16 %v5359_v40  ;;  %v12702_v62 = vld [vmem:[#allocation16_spill] sm:$0xff] }
 0x415   :  { %v11945_v14 = vmul.f32 0.0625, %v5692_v58  ;;  %v5699_v28 = vadd.f32 %v5698_v56, %v5697_v54  ;;  %v5712_v7 = vrot.slane %v5711_v49, 1  ;;  %v5274_v18 = vmul.f32 1.442695, %v5214_v52 }
 0x416   :  { %v8930_v9 = vpop.eup %8929  ;;  %8939 = vrcp.f32 %v5306_v47  ;;  %v5442_v23 = vmul.f32 %v11614_v11, %v5388_v20  ;;  %v5390_v6 = vunpack.c.l.bf16 %v11942_v44  ;;  %v5216_v55 = vsub.f32 0.0, %v12701_v25  ;;  %v12703_v20 = vld [vmem:[#allocation42_spill] sm:$0xff] }
 0x417   :  { %v8932_v0 = vpop.eup %8931  ;;  %v11950_v21 = vmul.f32 0.0625, %v5706_v31  ;;  %v11952_v22 = vmul.f32 0.0625, %v5699_v28  ;;  %v5713_v63 = vadd.f32 %v5712_v7, %v5711_v49  ;;  %v5215_v17 = vsub.f32 0.0, %v12702_v62  ;;  %v8351_v49 = vld [vmem:[%s12418_s6 + $0x148] sm:$0xff]   ;;  %v8355_v62 = vld [vmem:[%s12418_s6 + $0x150] sm:$0xff]  }
 0x418   :  { %v8934_v15 = vpop.eup %8933  ;;  %v5860_v57 = vcombine.high %v8932_v0, %v8932_v0  ;;  %v5441_v38 = vmul.f32 %v11623_v43, %v5387_v13  ;;  %v5443_v4 = vmul.f32 %v11651_v35, %v5389_v53  ;;  %8941 = vpow2.f32 %v5274_v18  ;;  %v12706_v18 = vld [vmem:[#allocation21_spill] sm:$0xff] }
 0x419   :  { %v5778_v29 = vcombine.low %v11945_v14, %v11952_v22  ;;  %v11964_v40 = vmul.f32 0.0625, %v5713_v63  ;;  %v5308_v45 = vadd.f32 1.0, %v8930_v9  ;;  %v5278_v27 = vmul.f32 1.442695, %v5216_v55  ;;  %v12707_v9 = vld [vmem:[#allocation26_spill] sm:$0xff]  ;;  %v8371_v22 = vld [vmem:[%s12418_s6 + $0x170] sm:$0xff]  }
 0x41a   :  { %v5877_v26 = vpack.c.bf16 %v5860_v57, %v5860_v57  ;;  %v5444_v58 = vmul.f32 %v11573_v48, %v5390_v6  ;;  %v5392_v54 = vunpack.c.l.bf16 %v11957_v1  ;;  %v5276_v12 = vmul.f32 1.442695, %v5215_v17  ;;  %v12709_v6 = vld [vmem:[#allocation28_spill] sm:$0xff] }
 0x41b   :  { %v5779_v31 = vcombine.low %v11950_v21, %v11964_v40  ;;  %v5876_v32 = vpack.c.bf16 %v8932_v0, %v8932_v0  ;;  %v5307_v47 = vadd.f32 1.0, %v8934_v15  ;;  %v5217_v56 = vsub.f32 0.0, %v12703_v20  ;;  %v12718_v20 = vld [vmem:[#allocation23_spill] sm:$0xff] }
 0x41c   :  { %v11980_v52 = vrot.slane %v5776_v10, 7  ;;  %v11985_v48 = vrot.slane %v5777_v8, 7  ;;  %6948 = vmatprep.mubr.bf16.mxu0 %v5877_v26  ;;  %v5494_v13 = vadd.f32 %v11609_v36, %v5440_v59  ;;  %8943 = vpow2.f32 %v5278_v27  ;;  %v8353_v10 = vld [vmem:[%s12418_s6 + $0x108] sm:$0xff]   ;;  %v12705_v8 = vld [vmem:[#allocation53_spill] sm:$0xff] }
 0x41d   :  { %v8936_v53 = vpop.eup %8935  ;;  %6949 = vmatmul.mubr.bf16.vlgmr.msra.gmra.mrb[128].mxu0 %v5876_v32  ;;  %v11989_v28 = vadd.f32 %v11632_v51, %v5442_v23  ;;  %v11992_v7 = vadd.f32 %v11640_v37, %v5441_v38  ;;  %8945 = vpow2.f32 %v5276_v12  ;;  %v5280_v24 = vmul.f32 1.442695, %v5217_v56  ;;  %v12710_v38 = vld [vmem:[#allocation30_spill] sm:$0xff]  ;;  %v12716_v32 = vld [vmem:[#allocation12_spill] sm:$0xff] }
 0x41e   :  { %v8938_v2 = vpop.eup %8937  ;;  %8947 = vrcp.f32 %v5308_v45  ;;  %8055 = vmatpush3.bf16.msra.mxu0 %v8349_v50  ;;  %v11995_v16 = vadd.f32 %v11679_v3, %v5443_v4  ;;  %v3868_v59 = vcombine.low %v12705_v8, %v12704_v61  ;;  %v12708_v23 = vcombine.low %v12706_v18, %v12707_v9  ;;  %v12711_v4 = vld [vmem:[#allocation45_spill] sm:$0xff]  ;;  %v12713_v50 = vld [vmem:[#allocation15_spill] sm:$0xff]  ;;  %v12715_v12 = vld [vmem:[#allocation22_spill] sm:$0xff] }
 0x41f   :  { %v5861_v55 = vcombine.high %v8938_v2, %v8938_v2  ;;  %8949 = vrcp.f32 %v5307_v47  ;;  %v12008_v0 = vadd.f32 %v11609_v36, %v5444_v58  ;;  %v5446_v63 = vmul.f32 %v11614_v11, %v5392_v54  ;;  %8056 = vmatprep.subr.bf16.mxu0 %v8351_v49  ;;  %v8350_v36 = vld [vmem:[%s12418_s6 + $0x180] sm:$0xff]   ;;  %v12714_v58 = vld [vmem:[#allocation54_spill] sm:$0xff]  ;;  %v8352_v61 = vld [vmem:[%s12418_s6 + $0x1c8] sm:$0xff]  }
 0x420   :  { %v3871_v25 = vsel %vm2909_vm0, %v12709_v6, %v12708_v23  ;;  %v8940_v17 = vpop.eup %8939  ;;  %v5309_v15 = vadd.f32 1.0, %v8936_v53  ;;  %8951 = vpow2.f32 %v5280_v24  ;;  %v12712_v45 = vcombine.low %v12710_v38, %v12711_v4  ;;  %v8357_v8 = vld [vmem:[%s12418_s6 + $0x110] sm:$0xff]   ;;  %v12719_v23 = vld [vmem:[#allocation31_spill] sm:$0xff] }
 0x421   :  { %v3872_v57 = vsel %vm2911_vm1, %v12709_v6, %v3871_v25  ;;  %v5879_v26 = vpack.c.bf16 %v5861_v55, %v5861_v55  ;;  %v3876_v11 = vrot.slane %v3868_v59, 5  ;;  %v3869_v54 = vcombine.low %v12714_v58, %v12713_v50  ;;  %v12722_v4 = vld [vmem:[#allocation7_spill] sm:$0xff] }
 0x422   :  { %v3873_v27 = vrot.slane %v12712_v45, 6  ;;  %v12717_v47 = vcombine.low %v12715_v12, %v12716_v32  ;;  %v8942_v49 = vpop.eup %8941  ;;  %v5878_v53 = vpack.c.bf16 %v8938_v2, %v8938_v2  ;;  %v5391_v24 = vunpack.c.h.bf16 %v11942_v44  ;;  %8057 = vmatpush3.bf16.msra.mxu0 %v8353_v10  ;;  %v8359_v44 = vld [vmem:[%s12418_s6 + $0x158] sm:$0xff]   ;;  %v12720_v10 = vld [vmem:[#allocation32_spill] sm:$0xff] }
 0x423   :  { %6988 = vmatprep.mubr.bf16.mxu1 %v5879_v26  ;;  %v5310_v9 = vadd.f32 1.0, %v8942_v49  ;;  %8058 = vmatprep.subr.bf16.mxu0 %v8355_v62  ;;  %v12721_v6 = vcombine.low %v12719_v23, %v12720_v10  ;;  %v3885_v55 = vrot.slane %v3869_v54, 5  ;;  %8953 = vrcp.f32 %v5309_v15  ;;  %v12723_v62 = vld [vmem:[#allocation9_spill] sm:$0xff]  ;;  %v8361_v32 = vld [vmem:[%s12418_s6 + $0x118] sm:$0xff]  }
 0x424   :  { %v3880_v56 = vsel %vm2909_vm0, %v12718_v20, %v12717_v47  ;;  %v3874_v59 = vsel %vm2914_vm2, %v3873_v27, %v3872_v57  ;;  %6989 = vmatmul.mubr.bf16.vlgmr.msra.gmra.mrb[128].mxu1 %v5878_v53  ;;  %v4824_v38 = vcombine.low %v11741_v46, %v11931_v39  ;;  %v12724_v45 = vcombine.low %v12722_v4, %v12723_v62  ;;  %v12725_v26 = vld [vmem:[#allocation17_spill] sm:$0xff]  ;;  %v8360_v4 = vld [vmem:[%s12418_s6 + $0x1d8] sm:$0xff]  }
 0x425   :  { %v3881_v18 = vsel %vm2911_vm1, %v12718_v20, %v3880_v56  ;;  %v3875_v2 = vsel %vm2916_vm3, %v3873_v27, %v3874_v59  ;;  %v3882_v25 = vrot.slane %v12721_v6, 6  ;;  %8077 = vmatpush3.bf16.msra.mxu1 %v8350_v36  ;;  %8955 = vrcp.f32 %v5310_v9  ;;  %v8354_v27 = vld [vmem:[%s12418_s6 + $0x188] sm:$0xff]   ;;  %v8356_v36 = vld [vmem:[%s12418_s6 + $0x1d0] sm:$0xff]  }
 0x426   :  { %v3877_v57 = vsel %vm2919_vm4, %v3876_v11, %v3875_v2  ;;  %v4827_v50 = vsel %vm2909_vm0, %v12725_v26, %v12724_v45  ;;  %v8944_v46 = vpop.eup %8943  ;;  %v5526_v39 = vmul.f32 %v8940_v17, %v5494_v13  ;;  %v5393_v12 = vunpack.c.h.bf16 %v11957_v1  ;;  %8078 = vmatprep.subr.bf16.mxu1 %v8352_v61  ;;  %8059 = vmatpush3.bf16.msra.mxu0 %v8357_v8  ;;  %v8363_v1 = vld [vmem:[%s12418_s6 + $0x160] sm:$0xff]   ;;  %v12726_v17 = vld [vmem:[#allocation40_spill] sm:$0xff]  ;;  %v12727_v56 = vld [vmem:[#allocation57_spill] sm:$0xff] }
 0x427   :  { %v3878_v58 = vsel %vm2921_vm5, %v3876_v11, %v3877_v57  ;;  %v3883_v15 = vsel %vm2914_vm2, %v3882_v25, %v3881_v18  ;;  %v4828_v54 = vsel %vm2911_vm1, %v12725_v26, %v4827_v50  ;;  %v8946_v47 = vpop.eup %8945  ;;  %v5312_v20 = vadd.f32 1.0, %v8944_v46  ;;  %8060 = vmatprep.subr.bf16.mxu0 %v8359_v44  ;;  %v8358_v23 = vld [vmem:[%s12418_s6 + $0x190] sm:$0xff]   ;;  %v12732_v57 = vld [vmem:[#allocation20_spill] sm:$0xff] }
 0x428   :  { %8957 = vlog2.f32 %v3878_v58  ;;  %v3884_v11 = vsel %vm2916_vm3, %v3882_v25, %v3883_v15  ;;  %v12728_v49 = vcombine.low %v12726_v17, %v12727_v56  ;;  %v4832_v61 = vrot.slane %v4824_v38, 5  ;;  %v8948_v8 = vpop.eup %8947  ;;  %v12729_v25 = vld [vmem:[#allocation8_spill] sm:$0xff]  ;;  %v12733_v15 = vld [vmem:[#allocation41_spill] sm:$0xff] }
 0x429   :  { %v3886_v13 = vsel %vm2919_vm4, %v3885_v55, %v3884_v11  ;;  %v12077_v59 = vadd.f32 %v11632_v51, %v5446_v63  ;;  %v5311_v18 = vadd.f32 1.0, %v8946_v47  ;;  %v5445_v9 = vmul.f32 %v11623_v43, %v5391_v24  ;;  %v8950_v2 = vpop.eup %8949  ;;  %8079 = vmatpush3.bf16.msra.mxu1 %v8354_v27  ;;  %v12730_v51 = vld [vmem:[#allocation39_spill] sm:$0xff]  ;;  %v8367_v45 = vld [vmem:[%s12418_s6 + $0x168] sm:$0xff]  }
 0x42a   :  { %v4829_v53 = vrot.slane %v12728_v49, 6  ;;  %v3887_v44 = vsel %vm2921_vm5, %v3885_v55, %v3886_v13  ;;  %8959 = vrcp.f32 %v5312_v20  ;;  %v4825_v6 = vcombine.low %v11929_v19, %v11936_v5  ;;  %v8952_v24 = vpop.eup %8951  ;;  %8080 = vmatprep.subr.bf16.mxu1 %v8356_v36  ;;  %8061 = vmatpush3.bf16.msra.mxu0 %v8361_v32  ;;  %v8365_v19 = vld [vmem:[%s12418_s6 + $0x120] sm:$0xff]  }
 0x42b   :  { %v12731_v63 = vcombine.low %v12729_v25, %v12730_v51  ;;  %v12092_v55 = vmax.f32 %v5526_v39, 1e-06  ;;  %8961 = vrcp.f32 %v5311_v18  ;;  %v12095_v38 = vmul.f32 %v11651_v35, %v5393_v12  ;;  %8062 = vmatprep.subr.bf16.mxu0 %v8363_v1  ;;  %v8362_v12 = vld [vmem:[%s12418_s6 + $0x198] sm:$0xff]   ;;  %v8364_v47 = vld [vmem:[%s12418_s6 + $0x1e0] sm:$0xff]  }
 0x42c   :  { %v4830_v10 = vsel %vm2914_vm2, %v4829_v53, %v4828_v54  ;;  %v5313_v62 = vadd.f32 1.0, %v8952_v24  ;;  %8963 = vlog2.f32 %v3887_v44  ;;  %v5528_v50 = vmul.f32 %v8948_v8, %v11989_v28  ;;  %v12734_v54 = vld [vmem:[#allocation19_spill] sm:$0xff] }
 0x42d   :  { %v4836_v43 = vsel %vm2909_vm0, %v12732_v57, %v12731_v63  ;;  %v4831_v5 = vsel %vm2916_vm3, %v4829_v53, %v4830_v10  ;;  %v5499_v27 = vadd.f32 %v11640_v37, %v5445_v9  ;;  %v12735_v46 = vcombine.low %v12733_v15, %v12734_v54  ;;  %8081 = vmatpush3.bf16.msra.mxu1 %v8358_v23  ;;  %v8954_v32 = vpop.eup %8953 }
 0x42e   :  { %v4833_v35 = vsel %vm2919_vm4, %v4832_v61, %v4831_v5  ;;  %v4837_v26 = vsel %vm2911_vm1, %v12732_v57, %v4836_v43  ;;  %8965 = vrcp.f32 %v5313_v62  ;;  %v4841_v36 = vrot.slane %v4825_v6, 5  ;;  %8082 = vmatprep.subr.bf16.mxu1 %v8360_v4  ;;  %8063 = vmatpush3.bf16.msra.mxu0 %v8365_v19  ;;  %v8370_v43 = vld [vmem:[%s12418_s6 + $0x1a8] sm:$0xff]  }
 0x42f   :  { %v4834_v58 = vsel %vm2921_vm5, %v4832_v61, %v4833_v35  ;;  %v4838_v39 = vrot.slane %v12735_v46, 6  ;;  %v5783_v28 = vsel %vm2909_vm0, %v11980_v52, %v5774_v42  ;;  %v5785_v37 = vrot.slane %v5778_v29, 6  ;;  %v8956_v14 = vpop.eup %8955  ;;  %8064 = vmatprep.subr.bf16.mxu0 %v8367_v45 }
 0x430   :  { %v5527_v11 = vmul.f32 %v8950_v2, %v11992_v7  ;;  %8967 = vlog2.f32 %v4834_v58  ;;  %v5784_v42 = vsel %vm2911_vm1, %v11980_v52, %v5783_v28  ;;  %v5792_v20 = vsel %vm2909_vm0, %v11985_v48, %v5775_v33 }
 0x431   :  { %v4839_v34 = vsel %vm2914_vm2, %v4838_v39, %v4837_v26  ;;  %v5786_v7 = vsel %vm2914_vm2, %v5785_v37, %v5784_v42  ;;  %v5794_v52 = vrot.slane %v5779_v31, 6  ;;  %v5560_v13 = vmax.f32 %v5528_v50, 1e-06  ;;  %8083 = vmatpush3.bf16.msra.mxu1 %v8362_v12  ;;  %v8374_v12 = vld [vmem:[%s12418_s6 + $0x1b0] sm:$0xff]  }
 0x432   :  { %v4840_v29 = vsel %vm2916_vm3, %v4838_v39, %v4839_v34  ;;  %v8958_v1 = vpop.eup %8957  ;;  %v5530_v17 = vmul.f32 %v8956_v14, %v12008_v0  ;;  %v12153_v49 = vsel %vm2916_vm3, %v5785_v37, %v5786_v7  ;;  %v5529_v53 = vmul.f32 %v8954_v32, %v11995_v16  ;;  %8084 = vmatprep.subr.bf16.mxu1 %v8364_v47  ;;  %v8368_v16 = vld [vmem:[%s12418_s6 + $0x1e8] sm:$0xff]   ;;  %v8373_v0 = vld [vmem:[%s12418_s6 + $0x130] sm:$0xff]  }
 0x433   :  { %v4842_v56 = vsel %vm2919_vm4, %v4841_v36, %v4840_v29  ;;  %v5817_v60 = vmul.f32 0.6931472, %v8958_v1  ;;  %v5793_v21 = vsel %vm2911_vm1, %v11985_v48, %v5792_v20  ;;  %v5590_v40 = vmul.f32 %v12092_v55, %v12092_v55  ;;  %8065 = vmatpush3.bf16.msra.mxu0 %v8369_v30  ;;  %v8375_v48 = vld [vmem:[%s12418_s6 + $0x178] sm:$0xff]  }
 0x434   :  { %v4843_v33 = vsel %vm2921_vm5, %v4841_v36, %v4842_v56  ;;  %v5562_v31 = vmax.f32 %v5530_v17, 1e-06  ;;  %v5795_v61 = vsel %vm2914_vm2, %v5794_v52, %v5793_v21  ;;  %v8960_v8 = vpop.eup %8959  ;;  %v5559_v18 = vmax.f32 %v5527_v11, 1e-06  ;;  %8066 = vmatprep.subr.bf16.mxu0 %v8371_v22  ;;  %v8376_v11 = vld [vmem:[%s12418_s6 + $0x1f8] sm:$0xff]  }
 0x435   :  { %8969 = vlog2.f32 %v4843_v33  ;;  %v5830_v9 = vmul.f32 0.33333334, %v5817_v60  ;;  %v12175_v44 = vsel %vm2916_vm3, %v5794_v52, %v5795_v61  ;;  %v8962_v2 = vpop.eup %8961  ;;  %v5532_v10 = vmul.f32 %v8960_v8, %v12077_v59  ;;  %8085 = vmatpush3.bf16.msra.mxu1 %v8366_v41  ;;  %v8372_v59 = vld [vmem:[%s12418_s6 + $0x1f0] sm:$0xff]   ;;  %v8378_v52 = vld [vmem:[%s12418_s6 + $0x1b8] sm:$0xff]   ;;  %v8380_v60 = vld [vmem:[%s12418_s6 + $0x2c0] sm:$0xff]  }
 0x436   :  { %v5594_v23 = vmul.f32 %v5562_v31, %v5562_v31  ;;  %v5501_v6 = vadd.f32 %v11679_v3, %v12095_v38  ;;  %v8964_v25 = vpop.eup %8963  ;;  %v5592_v51 = vmul.f32 %v5560_v13, %v5560_v13  ;;  %v5561_v63 = vmax.f32 %v5529_v53, 1e-06  ;;  %8086 = vmatprep.subr.bf16.mxu1 %v8368_v16  ;;  %v8377_v3 = vld [vmem:[%s12418_s6 + $0x138] sm:$0xff]  }
 0x437   :  { %v5531_v57 = vmul.f32 %v8962_v2, %v5499_v27  ;;  %v5840_v24 = vmul.f32 1.442695, %v5830_v9  ;;  %v5622_v4 = vmul.f32 %v5590_v40, %v12092_v55  ;;  %v5564_v5 = vmax.f32 %v5532_v10, 1e-06  ;;  %8067 = vmatpush3.bf16.msra.mxu0 %v8373_v0  ;;  %v8379_v55 = vld [vmem:[%s12418_s6 + $0x240] sm:$0xff]  }
 0x438   :  { %v5626_v19 = vmul.f32 %v5594_v23, %v5562_v31  ;;  %v5819_v38 = vmul.f32 0.6931472, %v8964_v25  ;;  %v8966_v62 = vpop.eup %8965  ;;  %v5591_v45 = vmul.f32 %v5559_v18, %v5559_v18  ;;  %8068 = vmatprep.subr.bf16.mxu0 %v8375_v48  ;;  %v5624_v54 = vmul.f32 %v5592_v51, %v5560_v13  ;;  %v8381_v51 = vld [vmem:[%s12418_s6 + $0x200] sm:$0xff]  }
 0x439   :  { %v5563_v35 = vmax.f32 %v5531_v57, 1e-06  ;;  %8971 = vpow2.f32 %v5840_v24  ;;  %v5596_v27 = vmul.f32 %v5564_v5, %v5564_v5  ;;  %v5533_v58 = vmul.f32 %v8966_v62, %v5501_v6  ;;  %8087 = vmatpush3.bf16.msra.mxu1 %v8370_v43  ;;  %v8383_v24 = vld [vmem:[%s12418_s6 + $0x248] sm:$0xff]  }
 0x43a   :  { %v8968_v26 = vpop.eup %8967  ;;  %v5714_v50 = vadd.f32 %v5626_v19, %v5622_v4  ;;  %v5831_v15 = vmul.f32 0.33333334, %v5819_v38  ;;  %v5593_v46 = vmul.f32 %v5561_v63, %v5561_v63  ;;  %8088 = vmatprep.subr.bf16.mxu1 %v8372_v59  ;;  %v5623_v30 = vmul.f32 %v5591_v45, %v5559_v18  ;;  %v8385_v45 = vld [vmem:[%s12418_s6 + $0x208] sm:$0xff]  }
 0x43b   :  { %v5595_v39 = vmul.f32 %v5563_v35, %v5563_v35  ;;  %v5821_v36 = vmul.f32 0.6931472, %v8968_v26  ;;  %v5628_v37 = vmul.f32 %v5596_v27, %v5564_v5  ;;  %v5565_v32 = vmax.f32 %v5533_v58, 1e-06  ;;  %8069 = vmatpush3.bf16.msra.mxu0 %v8377_v3  ;;  %v8382_v27 = vld [vmem:[%s12418_s6 + $0x280] sm:$0xff]   ;;  %v8387_v58 = vld [vmem:[%s12418_s6 + $0x250] sm:$0xff]  }
 0x43c   :  { %v5715_v28 = vrot.slane %v5714_v50, 4  ;;  %v5842_v47 = vmul.f32 1.442695, %v5831_v15  ;;  %8098 = vmatprep.subr.bf16.mxu0 %v8379_v55  ;;  %v5625_v17 = vmul.f32 %v5593_v46, %v5561_v63  ;;  %v8384_v46 = vld [vmem:[%s12418_s6 + $0x2c8] sm:$0xff]  }
 0x43d   :  { %v5627_v34 = vmul.f32 %v5595_v39, %v5563_v35  ;;  %v5832_v42 = vmul.f32 0.33333334, %v5821_v36  ;;  %v5728_v29 = vadd.f32 %v5628_v37, %v5624_v54  ;;  %v5597_v7 = vmul.f32 %v5565_v32, %v5565_v32  ;;  %8089 = vmatpush3.bf16.msra.mxu1 %v8374_v12  ;;  %v8389_v37 = vld [vmem:[%s12418_s6 + $0x210] sm:$0xff]  }
 0x43e   :  { %v5716_v22 = vadd.f32 %v5715_v28, %v5714_v50  ;;  %8973 = vpow2.f32 %v5842_v47  ;;  %8090 = vmatprep.subr.bf16.mxu1 %v8376_v11  ;;  %v8386_v47 = vld [vmem:[%s12418_s6 + $0x288] sm:$0xff]  }
 0x43f   :  { %v8970_v14 = vpop.eup %8969  ;;  %v5721_v20 = vadd.f32 %v5627_v34, %v5623_v30  ;;  %v5844_v1 = vmul.f32 1.442695, %v5832_v42  ;;  %v5729_v53 = vrot.slane %v5728_v29, 4  ;;  %v5629_v41 = vmul.f32 %v5597_v7, %v5565_v32  ;;  %v8391_v30 = vld [vmem:[%s12418_s6 + $0x258] sm:$0xff]  }
 0x440   :  { %v5823_v13 = vmul.f32 0.6931472, %v8970_v14  ;;  %v5717_v56 = vrot.slane %v5716_v22, 2  ;;  %v8388_v14 = vld [vmem:[%s12418_s6 + $0x2d0] sm:$0xff]   ;;  %v8393_v7 = vld [vmem:[%s12418_s6 + $0x218] sm:$0xff]  }
 0x441   :  { %v5722_v33 = vrot.slane %v5721_v20, 4  ;;  %8975 = vpow2.f32 %v5844_v1  ;;  %v5730_v31 = vadd.f32 %v5729_v53, %v5728_v29  ;;  %v5735_v16 = vadd.f32 %v5629_v41, %v5625_v17  ;;  %8091 = vmatpush3.bf16.msra.mxu1 %v8378_v52  ;;  %v8390_v1 = vld [vmem:[%s12418_s6 + $0x290] sm:$0xff]  }
 0x442   :  { %v5833_v21 = vmul.f32 0.33333334, %v5823_v13  ;;  %v5718_v40 = vadd.f32 %v5717_v56, %v5716_v22  ;;  %8120 = vmatprep.subr.bf16.mxu1 %v8380_v60  ;;  %v8395_v13 = vld [vmem:[%s12418_s6 + $0x260] sm:$0xff]   ;;  %v8392_v56 = vld [vmem:[%s12418_s6 + $0x2d8] sm:$0xff]  }
 0x443   :  { %v8972_v0 = vpop.eup %8971  ;;  %v5723_v61 = vadd.f32 %v5722_v33, %v5721_v20  ;;  %v5731_v48 = vrot.slane %v5730_v31, 2  ;;  %v5736_v9 = vrot.slane %v5735_v16, 4  ;;  %v8397_v60 = vld [vmem:[%s12418_s6 + $0x220] sm:$0xff]  }
 0x444   :  { %v5846_v8 = vmul.f32 1.442695, %v5833_v21  ;;  %v5719_v18 = vrot.slane %v5718_v40, 1  ;;  %v5862_v2 = vcombine.high %v8972_v0, %v8972_v0  ;;  %v5880_v43 = vpack.c.bf16 %v8972_v0, %v8972_v0  ;;  %v8399_v21 = vld [vmem:[%s12418_s6 + $0x268] sm:$0xff]   ;;  %v8403_v0 = vld [vmem:[%s12418_s6 + $0x270] sm:$0xff]  }
 0x445   :  { %v5724_v23 = vrot.slane %v5723_v61, 2  ;;  %v5732_v10 = vadd.f32 %v5731_v48, %v5730_v31  ;;  %v5737_v6 = vadd.f32 %v5736_v9, %v5735_v16  ;;  %v8396_v31 = vld [vmem:[%s12418_s6 + $0x2e0] sm:$0xff]   ;;  %v8402_v48 = vld [vmem:[%s12418_s6 + $0x2a8] sm:$0xff]   ;;  %v8407_v9 = vld [vmem:[%s12418_s6 + $0x278] sm:$0xff]  }
 0x446   :  { %8977 = vpow2.f32 %v5846_v8  ;;  %v5881_v25 = vpack.c.bf16 %v5862_v2, %v5862_v2  ;;  %v5720_v63 = vadd.f32 %v5719_v18, %v5718_v40  ;;  %v8398_v16 = vld [vmem:[%s12418_s6 + $0x2a0] sm:$0xff]   ;;  %v8405_v8 = vld [vmem:[%s12418_s6 + $0x230] sm:$0xff]  }
 0x447   :  { %v5725_v57 = vadd.f32 %v5724_v23, %v5723_v61  ;;  %v5733_v19 = vrot.slane %v5732_v10, 1  ;;  %v5738_v5 = vrot.slane %v5737_v6, 2  ;;  %v8400_v61 = vld [vmem:[%s12418_s6 + $0x2e8] sm:$0xff]   ;;  %v8404_v2 = vld [vmem:[%s12418_s6 + $0x2f0] sm:$0xff]  }
 0x448   :  { %v8974_v4 = vpop.eup %8973  ;;  %7028 = vmatprep.mubr.bf16.mxu0 %v5881_v25  ;;  %v5754_v55 = vmul.f32 0.0625, %v5720_v63  ;;  %v8411_v63 = vld [vmem:[%s12418_s6 + $0x340] sm:$0xff]  }
 0x449   :  { %v5726_v59 = vrot.slane %v5725_v57, 1  ;;  %v5863_v3 = vcombine.high %v8974_v4, %v8974_v4  ;;  %7029 = vmatmul.mubr.bf16.vlgmr.msra.gmra.mrb[132].mxu0 %v5880_v43  ;;  %v5734_v38 = vadd.f32 %v5733_v19, %v5732_v10  ;;  %v5739_v62 = vadd.f32 %v5738_v5, %v5737_v6  ;;  %v8409_v6 = vld [vmem:[%s12418_s6 + $0x238] sm:$0xff]   ;;  %v8413_v19 = vld [vmem:[%s12418_s6 + $0x300] sm:$0xff]  }
 0x44a   :  { %8099 = vmatpush3.bf16.msra.mxu0 %v8381_v51  ;;  %v5882_v54 = vpack.c.bf16 %v8974_v4, %v8974_v4  ;;  %v8406_v51 = vld [vmem:[%s12418_s6 + $0x2b0] sm:$0xff]   ;;  %v8408_v43 = vld [vmem:[%s12418_s6 + $0x2f8] sm:$0xff]  }
 0x44b   :  { %v12214_v35 = vpop.eup %8975  ;;  %v5727_v26 = vadd.f32 %v5726_v59, %v5725_v57  ;;  %v5883_v50 = vpack.c.bf16 %v5863_v3, %v5863_v3  ;;  %8100 = vmatprep.subr.bf16.mxu0 %v8383_v24  ;;  %v5740_v15 = vrot.slane %v5739_v62, 1  ;;  %v5756_v36 = vmul.f32 0.0625, %v5734_v38  ;;  %v8410_v5 = vld [vmem:[%s12418_s6 + $0x2b8] sm:$0xff]   ;;  %v8415_v3 = vld [vmem:[%s12418_s6 + $0x348] sm:$0xff]  }
 0x44c   :  { %v5864_v39 = vcombine.high %v12214_v35, %v12214_v35  ;;  %v5884_v59 = vpack.c.bf16 %v12214_v35, %v12214_v35  ;;  %v8414_v35 = vld [vmem:[%s12418_s6 + $0x380] sm:$0xff]  }
 0x44d   :  { %v5755_v12 = vmul.f32 0.0625, %v5727_v26  ;;  %7068 = vmatprep.mubr.bf16.mxu1 %v5883_v50  ;;  %v5741_v28 = vadd.f32 %v5740_v15, %v5739_v62  ;;  %v8412_v62 = vld [vmem:[%s12418_s6 + $0x3c0] sm:$0xff]   ;;  %v8416_v50 = vld [vmem:[%s12418_s6 + $0x3c8] sm:$0xff]   ;;  %v8423_v15 = vld [vmem:[%s12418_s6 + $0x358] sm:$0xff]  }
 0x44e   :  { %7069 = vmatmul.mubr.bf16.vlgmr.msra.gmra.mrb[132].mxu1 %v5882_v54  ;;  %8101 = vmatpush3.bf16.msra.mxu0 %v8385_v45  ;;  %v5885_v32 = vpack.c.bf16 %v5864_v39, %v5864_v39  ;;  %v8417_v45 = vld [vmem:[%s12418_s6 + $0x308] sm:$0xff]  }
 0x44f   :  { %8121 = vmatpush3.bf16.msra.mxu1 %v8382_v27  ;;  %8102 = vmatprep.subr.bf16.mxu0 %v8387_v58  ;;  %v5780_v34 = vcombine.low %v5754_v55, %v5755_v12  ;;  %v5757_v42 = vmul.f32 0.0625, %v5741_v28  ;;  %v8419_v55 = vld [vmem:[%s12418_s6 + $0x350] sm:$0xff]   ;;  %v8418_v58 = vld [vmem:[%s12418_s6 + $0x388] sm:$0xff]   ;;  %v8425_v12 = vld [vmem:[%s12418_s6 + $0x318] sm:$0xff]  }
 0x450   :  { %v12230_v11 = vpop.eup %8977  ;;  %8122 = vmatprep.subr.bf16.mxu1 %v8384_v46  ;;  %7108 = vmatprep.mubr.bf16.mxu0 %v5885_v32  ;;  %v8421_v27 = vld [vmem:[%s12418_s6 + $0x310] sm:$0xff]  }
 0x451   :  { %v5865_v22 = vcombine.high %v12230_v11, %v12230_v11  ;;  %v5788_v29 = vrot.slane %v5780_v34, 5  ;;  %v5781_v52 = vcombine.low %v5756_v36, %v5757_v42  ;;  %v5886_v26 = vpack.c.bf16 %v12230_v11, %v12230_v11  ;;  %v8420_v46 = vld [vmem:[%s12418_s6 + $0x3d0] sm:$0xff]   ;;  %v8424_v11 = vld [vmem:[%s12418_s6 + $0x3d8] sm:$0xff]  }
 0x452   :  { %8103 = vmatpush3.bf16.msra.mxu0 %v8389_v37  ;;  %v8422_v28 = vld [vmem:[%s12418_s6 + $0x390] sm:$0xff]   ;;  %v8427_v37 = vld [vmem:[%s12418_s6 + $0x360] sm:$0xff]   ;;  %v8426_v42 = vld [vmem:[%s12418_s6 + $0x398] sm:$0xff]  }
 0x453   :  { %v5887_v20 = vpack.c.bf16 %v5865_v22, %v5865_v22  ;;  %8123 = vmatpush3.bf16.msra.mxu1 %v8386_v47  ;;  %8104 = vmatprep.subr.bf16.mxu0 %v8391_v30  ;;  %v5789_v17 = vsel %vm2919_vm4, %v5788_v29, %v12153_v49  ;;  %v5797_v41 = vrot.slane %v5781_v52, 5  ;;  %v8394_v49 = vld [vmem:[%s12418_s6 + $0x298] sm:$0xff]   ;;  %v8429_v30 = vld [vmem:[%s12418_s6 + $0x320] sm:$0xff]   ;;  %v8432_v52 = vld [vmem:[%s12418_s6 + $0x3e8] sm:$0xff]  }
 0x454   :  { %8124 = vmatprep.subr.bf16.mxu1 %v8388_v14  ;;  %v5790_v53 = vsel %vm2921_vm5, %v5788_v29, %v5789_v17  ;;  %v8431_v14 = vld [vmem:[%s12418_s6 + $0x368] sm:$0xff]   ;;  %v8428_v22 = vld [vmem:[%s12418_s6 + $0x3e0] sm:$0xff]   ;;  %v8439_v17 = vld [vmem:[%s12418_s6 + $0x378] sm:$0xff]  }
 0x455   :  { %7148 = vmatprep.mubr.bf16.mxu1 %v5887_v20  ;;  %8979 = vlog2.f32 %v5790_v53  ;;  %v5798_v33 = vsel %vm2919_vm4, %v5797_v41, %v12175_v44  ;;  %v8401_v44 = vld [vmem:[%s12418_s6 + $0x228] sm:$0xff]   ;;  %v8435_v20 = vld [vmem:[%s12418_s6 + $0x370] sm:$0xff]   ;;  %v8441_v53 = vld [vmem:[%s12418_s6 + $0x338] sm:$0xff]  }
 0x456   :  { %8105 = vmatpush3.bf16.msra.mxu0 %v8393_v7  ;;  %v5799_v40 = vsel %vm2921_vm5, %v5797_v41, %v5798_v33  ;;  %v8433_v29 = vld [vmem:[%s12418_s6 + $0x328] sm:$0xff]   ;;  %v8430_v7 = vld [vmem:[%s12418_s6 + $0x3a0] sm:$0xff]   ;;  %v8438_v41 = vld [vmem:[%s12418_s6 + $0x3b0] sm:$0xff]  }
 0x457   :  { %8125 = vmatpush3.bf16.msra.mxu1 %v8390_v1  ;;  %8106 = vmatprep.subr.bf16.mxu0 %v8395_v13  ;;  %8981 = vlog2.f32 %v5799_v40  ;;  %v8437_v1 = vld [vmem:[%s12418_s6 + $0x330] sm:$0xff]   ;;  %v8434_v13 = vld [vmem:[%s12418_s6 + $0x3a8] sm:$0xff]   ;;  %v8442_v33 = vld [vmem:[%s12418_s6 + $0x3b8] sm:$0xff]  }
 0x458   :  { %8126 = vmatprep.subr.bf16.mxu1 %v8392_v56  ;;  %v8436_v56 = vld [vmem:[%s12418_s6 + $0x3f0] sm:$0xff]  }
 0x45a   :  { %8107 = vmatpush3.bf16.msra.mxu0 %v8397_v60  ;;  %v8440_v60 = vld [vmem:[%s12418_s6 + $0x3f8] sm:$0xff]  }
 0x45b   :  { %8127 = vmatpush3.bf16.msra.mxu1 %v8394_v49  ;;  %8108 = vmatprep.subr.bf16.mxu0 %v8399_v21 }
 0x45c   :  { %8128 = vmatprep.subr.bf16.mxu1 %v8396_v31 }
 0x45e   :  { %8109 = vmatpush3.bf16.msra.mxu0 %v8401_v44 }
 0x45f   :  { %v8980_v18 = vpop.eup %8979  ;;  %8129 = vmatpush3.bf16.msra.mxu1 %v8398_v16  ;;  %8110 = vmatprep.subr.bf16.mxu0 %v8403_v0 }
 0x460   :  { %8130 = vmatprep.subr.bf16.mxu1 %v8400_v61  ;;  %v5825_v23 = vmul.f32 0.6931472, %v8980_v18 }
 0x461   :  { %v8982_v10 = vpop.eup %8981 }
 0x462   :  { %8111 = vmatpush3.bf16.msra.mxu0 %v8405_v8  ;;  %v5834_v25 = vmul.f32 0.33333334, %v5825_v23  ;;  %v5827_v57 = vmul.f32 0.6931472, %v8982_v10 }
 0x463   :  { %8131 = vmatpush3.bf16.msra.mxu1 %v8402_v48  ;;  %8112 = vmatprep.subr.bf16.mxu0 %v8407_v9 }
 0x464   :  { %8132 = vmatprep.subr.bf16.mxu1 %v8404_v2  ;;  %v5848_v24 = vmul.f32 1.442695, %v5834_v25  ;;  %v5835_v4 = vmul.f32 0.33333334, %v5827_v57 }
 0x466   :  { %8113 = vmatpush3.bf16.msra.mxu0 %v8409_v6  ;;  %8983 = vpow2.f32 %v5848_v24  ;;  %v5850_v38 = vmul.f32 1.442695, %v5835_v4 }
 0x467   :  { %8133 = vmatpush3.bf16.msra.mxu1 %v8406_v51  ;;  %8142 = vmatprep.subr.bf16.mxu0 %v8411_v63 }
 0x468   :  { %8134 = vmatprep.subr.bf16.mxu1 %v8408_v43  ;;  %8985 = vpow2.f32 %v5850_v38 }
 0x469   :  { %7109 = vmatmul.mubr.bf16.vlgmr.msra.gmra.mrb[136].mxu0 %v5884_v59 }
 0x46a   :  { %8143 = vmatpush3.bf16.msra.mxu0 %v8413_v19 }
 0x46b   :  { %8135 = vmatpush3.bf16.msra.mxu1 %v8410_v5  ;;  %8144 = vmatprep.subr.bf16.mxu0 %v8415_v3 }
 0x46c   :  { %8164 = vmatprep.subr.bf16.mxu1 %v8412_v62 }
 0x46e   :  { %7149 = vmatmul.mubr.bf16.vlgmr.msra.gmra.mrb[136].mxu1 %v5886_v26  ;;  %8145 = vmatpush3.bf16.msra.mxu0 %v8417_v45 }
 0x46f   :  { %8165 = vmatpush3.bf16.msra.mxu1 %v8414_v35  ;;  %8146 = vmatprep.subr.bf16.mxu0 %v8419_v55 }
 0x470   :  { %v8984_v54 = vpop.eup %8983  ;;  %8166 = vmatprep.subr.bf16.mxu1 %v8416_v50 }
 0x471   :  { %v5866_v39 = vcombine.high %v8984_v54, %v8984_v54  ;;  %v5888_v49 = vpack.c.bf16 %v8984_v54, %v8984_v54 }
 0x472   :  { %8147 = vmatpush3.bf16.msra.mxu0 %v8421_v27  ;;  %v8986_v36 = vpop.eup %8985 }
 0x473   :  { %8167 = vmatpush3.bf16.msra.mxu1 %v8418_v58  ;;  %8148 = vmatprep.subr.bf16.mxu0 %v8423_v15  ;;  %v5889_v32 = vpack.c.bf16 %v5866_v39, %v5866_v39  ;;  %v5867_v47 = vcombine.high %v8986_v36, %v8986_v36  ;;  %v5890_v21 = vpack.c.bf16 %v8986_v36, %v8986_v36 }
 0x474   :  { %8168 = vmatprep.subr.bf16.mxu1 %v8420_v46 }
 0x475   :  { %7188 = vmatprep.mubr.bf16.mxu0 %v5889_v32  ;;  %v5891_v34 = vpack.c.bf16 %v5867_v47, %v5867_v47 }
 0x476   :  { %8149 = vmatpush3.bf16.msra.mxu0 %v8425_v12 }
 0x477   :  { %8169 = vmatpush3.bf16.msra.mxu1 %v8422_v28  ;;  %8150 = vmatprep.subr.bf16.mxu0 %v8427_v37 }
 0x478   :  { %8170 = vmatprep.subr.bf16.mxu1 %v8424_v11  ;;  %7228 = vmatprep.mubr.bf16.mxu1 %v5891_v34 }
 0x47a   :  { %8151 = vmatpush3.bf16.msra.mxu0 %v8429_v30 }
 0x47b   :  { %8171 = vmatpush3.bf16.msra.mxu1 %v8426_v42  ;;  %8152 = vmatprep.subr.bf16.mxu0 %v8431_v14 }
 0x47c   :  { %8172 = vmatprep.subr.bf16.mxu1 %v8428_v22 }
 0x47e   :  { %8153 = vmatpush3.bf16.msra.mxu0 %v8433_v29 }
 0x47f   :  { %8173 = vmatpush3.bf16.msra.mxu1 %v8430_v7  ;;  %8154 = vmatprep.subr.bf16.mxu0 %v8435_v20 }
 0x480   :  { %8174 = vmatprep.subr.bf16.mxu1 %v8432_v52 }
 0x482   :  { %8155 = vmatpush3.bf16.msra.mxu0 %v8437_v1 }
 0x483   :  { %8175 = vmatpush3.bf16.msra.mxu1 %v8434_v13  ;;  %8156 = vmatprep.subr.bf16.mxu0 %v8439_v17 }
 0x484   :  { %8176 = vmatprep.subr.bf16.mxu1 %v8436_v56 }
 0x486   :  { %8157 = vmatpush3.bf16.msra.mxu0 %v8441_v53 }
 0x487   :  { %8177 = vmatpush3.bf16.msra.mxu1 %v8438_v41 }
 0x488   :  { %8178 = vmatprep.subr.bf16.mxu1 %v8440_v60 }
 0x489   :  { %7189 = vmatmul.mubr.bf16.vlgmr.msra.gmra.mrb[140].mxu0 %v5888_v49 }
 0x48b   :  { %8179 = vmatpush3.bf16.msra.mxu1 %v8442_v33 }
 0x48e   :  { %7229 = vmatmul.mubr.bf16.vlgmr.msra.gmra.mrb[140].mxu1 %v5890_v21 }
 0x4f0   :  { %v8026_v40 = vpop.f32.mrb[128].mxu0 }
 0x4f1   :  { %v8027_v31 = vpop.f32.mrb[129].mxu0 }
 0x4f2   :  { %v8028_v44 = vadd.f32 %v8027_v31, %v8026_v40  ;;  %v8029_v16 = vpop.f32.mrb[130].mxu0 }
 0x4f3   :  { %v8030_v0 = vpop.f32.mrb[131].mxu0 }
 0x4f7   :  { %v8048_v61 = vpop.f32.mrb[128].mxu1 }
 0x4f8   :  { %v8049_v8 = vpop.f32.mrb[129].mxu1 }
 0x4f9   :  { %v8050_v18 = vadd.f32 %v8049_v8, %v8048_v61  ;;  %v8051_v48 = vpop.f32.mrb[130].mxu1 }
 0x4fa   :  { %v8052_v9 = vpop.f32.mrb[131].mxu1 }
 0x4fb   :  { %v6991_v2 = vadd.f32 %v8050_v18, %v8028_v44 }
 0x51c   :  { %v8070_v23 = vpop.f32.mrb[132].mxu0 }
 0x51d   :  { %v8071_v10 = vpop.f32.mrb[133].mxu0 }
 0x51e   :  { %v8072_v6 = vadd.f32 %v8071_v10, %v8070_v23  ;;  %v8073_v25 = vpop.f32.mrb[134].mxu0 }
 0x51f   :  { %v8074_v51 = vpop.f32.mrb[135].mxu0 }
 0x520   :  { %v7031_v63 = vadd.f32 %v8072_v6, %v6991_v2 }
 0x521   :  { %v8092_v57 = vpop.f32.mrb[132].mxu1 }
 0x522   :  { %v8093_v43 = vpop.f32.mrb[133].mxu1 }
 0x523   :  { %v8094_v24 = vadd.f32 %v8093_v43, %v8092_v57  ;;  %v8095_v4 = vpop.f32.mrb[134].mxu1 }
 0x524   :  { %v8096_v19 = vpop.f32.mrb[135].mxu1 }
 0x525   :  { %v7071_v5 = vadd.f32 %v8094_v24, %v7031_v63 }
 0x53c   :  { %v8114_v59 = vpop.f32.mrb[136].mxu0 }
 0x53d   :  { %v8115_v3 = vpop.f32.mrb[137].mxu0 }
 0x53e   :  { %v8116_v38 = vadd.f32 %v8115_v3, %v8114_v59  ;;  %v8117_v62 = vpop.f32.mrb[138].mxu0 }
 0x53f   :  { %v8118_v45 = vpop.f32.mrb[139].mxu0 }
 0x540   :  { %v7111_v35 = vadd.f32 %v8116_v38, %v7071_v5 }
 0x541   :  { %v8136_v55 = vpop.f32.mrb[136].mxu1 }
 0x542   :  { %v8137_v26 = vpop.f32.mrb[137].mxu1 }
 0x543   :  { %v8138_v50 = vadd.f32 %v8137_v26, %v8136_v55  ;;  %v8139_v27 = vpop.f32.mrb[138].mxu1 }
 0x544   :  { %v8140_v58 = vpop.f32.mrb[139].mxu1 }
 0x545   :  { %v7151_v15 = vadd.f32 %v8138_v50, %v7111_v35 }
 0x55c   :  { %v8158_v54 = vpop.f32.mrb[140].mxu0 }
 0x55d   :  { %v8159_v46 = vpop.f32.mrb[141].mxu0 }
 0x55e   :  { %v8160_v39 = vadd.f32 %v8159_v46, %v8158_v54  ;;  %v8161_v12 = vpop.f32.mrb[142].mxu0 }
 0x55f   :  { %v8162_v36 = vpop.f32.mrb[143].mxu0 }
 0x560   :  { %v7191_v28 = vadd.f32 %v8160_v39, %v7151_v15 }
 0x561   :  { %v8180_v37 = vpop.f32.mrb[140].mxu1 }
 0x562   :  { %v8181_v32 = vpop.f32.mrb[141].mxu1 }
 0x563   :  { %v8182_v11 = vadd.f32 %v8181_v32, %v8180_v37  ;;  %v8183_v47 = vpop.f32.mrb[142].mxu1 }
 0x564   :  { %v8184_v30 = vpop.f32.mrb[143].mxu1 }
 0x565   :  { %v7231_v34 = vadd.f32 %v8182_v11, %v7191_v28 }
 0x567   :  { %7236 = vst [vmem:[%s12419_s7] sm:$0xf] %v7231_v34 }

</bundles_post_ra>
